<compile_context>
chip_gen: v7x
topology: tpu7x:2x2x1
jax: 0.10.0
libtpu: 0.0.40
codegen_flags: <defaults>
</compile_context>

<pallas_src>
import functools
import math

import jax
import jax.numpy as jnp
from jax import lax
from jax.experimental import pallas as pl
from jax.experimental.pallas import tpu as pltpu


def _round_up(x, m):
    return (x + m - 1) // m * m


def _nbytes(a):
    return int(a.size) * a.dtype.itemsize


def _clamp_vmem(nbytes, floor=16 << 20, cap=100 << 20):
    return int(min(max(int(nbytes), floor), cap))


def _const_spec(shape, grid_rank):
    """Full-array block with a constant index map (resident weights/masks)."""
    zeros = (0,) * len(shape)
    if grid_rank == 1:
        return pl.BlockSpec(shape, lambda i, _z=zeros: _z)
    return pl.BlockSpec(shape, lambda i, j, _z=zeros: _z)


# --------------------------------------------------------------------------
# Fused residual attention block (one pallas_call per block, grid over batch)
# --------------------------------------------------------------------------
def _res_block_kernel(*refs, n_head, has_mask):
    if has_mask:
        (x_ref, mask_ref, ln1_g_ref, ln1_b_ref, ln2_g_ref, ln2_b_ref,
         in_w_ref, in_b_ref, out_w_ref, out_b_ref,
         fc_w_ref, fc_b_ref, proj_w_ref, proj_b_ref,
         o_ref, qkv_sc, attn_sc) = refs
    else:
        (x_ref, ln1_g_ref, ln1_b_ref, ln2_g_ref, ln2_b_ref,
         in_w_ref, in_b_ref, out_w_ref, out_b_ref,
         fc_w_ref, fc_b_ref, proj_w_ref, proj_b_ref,
         o_ref, qkv_sc, attn_sc) = refs
        mask_ref = None

    f32, bf16 = jnp.float32, jnp.bfloat16
    x = x_ref[0].astype(f32)                          # (T, d) residual stream
    T, d = x.shape
    hd = d // n_head
    inv_sqrt_hd = 1.0 / math.sqrt(hd)

    def ln(v, g, b):                                  # LayerNorm in f32 (v5e safe)
        mu = jnp.mean(v, axis=-1, keepdims=True)
        var = jnp.mean((v - mu) ** 2, axis=-1, keepdims=True)
        return (v - mu) * lax.rsqrt(var + 1e-5) * g + b

    T_W = (((1,), (1,)), ((), ()))                    # x @ W^T (torch Linear (out,in))

    def mm(a, w):                                     # bf16 MXU operands, f32 accumulate
        return lax.dot_general(a.astype(bf16), w.astype(bf16), T_W,
                               preferred_element_type=f32)

    # ---- multi-head self attention (pre-LN), fused qkv projection ----
    h1 = ln(x, ln1_g_ref[...], ln1_b_ref[...])
    qkv = (mm(h1, in_w_ref[...]) + in_b_ref[...]).astype(bf16)     # (T, 3d), ONE matmul
    for hh in range(n_head):                          # data staging only (no compute)
        c0 = hh * hd
        qkv_sc[0, hh] = qkv[:, c0:c0 + hd]
        qkv_sc[1, hh] = qkv[:, d + c0:d + c0 + hd]
        qkv_sc[2, hh] = qkv[:, 2 * d + c0:2 * d + c0 + hd]
    q3 = qkv_sc[0]                                    # (H, T, hd) bf16
    k3 = qkv_sc[1]
    v3 = qkv_sc[2]

    # head-batched attention (leading batch dim, like the flash-attention pattern)
    s = jnp.einsum('hqc,hkc->hqk', q3, k3,
                   preferred_element_type=f32) * inv_sqrt_hd       # (H, T, T)
    if has_mask:
        s = s + mask_ref[...][None, :, :]             # additive causal mask
    s = s - jnp.max(s, axis=-1, keepdims=True)
    p = jnp.exp(s)
    p = p * pl.reciprocal(jnp.sum(p, axis=-1, keepdims=True), approx=True)
    ctx = jnp.einsum('hqk,hkc->hqc', p.astype(bf16), v3,
                     preferred_element_type=f32)                   # (H, T, hd)
    for hh in range(n_head):                          # write heads into a (T, d) slab
        attn_sc[:, hh * hd:(hh + 1) * hd] = ctx[hh].astype(bf16)
    x = x + mm(attn_sc[...], out_w_ref[...]) + out_b_ref[...]

    # ---- MLP (pre-LN), QuickGELU on bf16 (bf16 EUP on v6e/v7x) ----
    h2 = ln(x, ln2_g_ref[...], ln2_b_ref[...])
    hfc = mm(h2, fc_w_ref[...]) + fc_b_ref[...]                    # (T, 4d) f32
    hb = hfc.astype(bf16)
    act = hb * jax.nn.sigmoid(1.702 * hb)                          # QuickGELU
    x = x + mm(act, proj_w_ref[...]) + proj_b_ref[...]
    o_ref[0] = x.astype(o_ref.dtype)


def res_block(x, p, n_head, mask=None):
    """x: (B, T, d) residual stream; mask: (T, T) additive attention mask or None."""
    B, T, d = x.shape
    hd = d // n_head
    has_mask = mask is not None
    kernel = functools.partial(_res_block_kernel, n_head=n_head, has_mask=has_mask)
    w_args = (p["ln1_g"], p["ln1_b"], p["ln2_g"], p["ln2_b"],
              p["attn"]["in_w"], p["attn"]["in_b"],
              p["attn"]["out_w"], p["attn"]["out_b"],
              p["fc_w"], p["fc_b"], p["proj_w"], p["proj_b"])
    args = (x,) + ((mask,) if has_mask else ()) + w_args

    in_specs = [pl.BlockSpec((1, T, d), lambda b: (b, 0, 0))]      # per-sequence block
    if has_mask:
        in_specs.append(_const_spec(mask.shape, 1))
    in_specs += [_const_spec(a.shape, 1) for a in w_args]          # weights stay resident

    # Explicit scoped-VMEM budget: resident (double-buffered) bf16 weights + pipelined
    # activation tiles + scratch slabs + in-kernel f32 temporaries.
    wbytes = sum(_nbytes(a) for a in w_args) + (T * T * 4 if has_mask else 0)
    need = (2 * wbytes
            + 2 * (T * d * 4 + T * d * 2)                          # x in/out tiles
            + 3 * n_head * T * hd * 2 + T * d * 2                  # scratch slabs
            + 4 * (3 * T * d + 2 * n_head * T * T + 12 * T * d))   # f32 temporaries
    vmem_limit = _clamp_vmem(int(need * 1.25) + (2 << 20))

    return pl.pallas_call(
        kernel,
        out_shape=jax.ShapeDtypeStruct((B, T, d), jnp.bfloat16),   # bf16 residual carry
        grid=(B,),
        in_specs=in_specs,
        out_specs=pl.BlockSpec((1, T, d), lambda b: (b, 0, 0)),
        scratch_shapes=[pltpu.VMEM((3, n_head, T, hd), jnp.bfloat16),
                        pltpu.VMEM((T, d), jnp.bfloat16)],
        compiler_params=pltpu.CompilerParams(
            dimension_semantics=("parallel",),                     # batch -> megacore split
            vmem_limit_bytes=vmem_limit),
    )(*args)


# --------------------------------------------------------------------------
# Fused (optional LayerNorm) + matmul (+ bias), tiled over rows
# --------------------------------------------------------------------------
def _linear_kernel_factory(transpose_w, has_bias, has_ln):
    def kernel(*refs):
        i = 0
        x_ref = refs[i]; i += 1
        if has_ln:
            g_ref, b_ref = refs[i], refs[i + 1]; i += 2
        w_ref = refs[i]; i += 1
        bias_ref = refs[i] if has_bias else None
        o_ref = refs[-1]
        x = x_ref[...].astype(jnp.float32)
        if has_ln:
            mu = jnp.mean(x, axis=-1, keepdims=True)
            var = jnp.mean((x - mu) ** 2, axis=-1, keepdims=True)
            x = (x - mu) * lax.rsqrt(var + 1e-5) * g_ref[...] + b_ref[...]
        dn = (((1,), (1,)), ((), ())) if transpose_w else (((1,), (0,)), ((), ()))
        y = lax.dot_general(x.astype(jnp.bfloat16), w_ref[...].astype(jnp.bfloat16),
                            dn, preferred_element_type=jnp.float32)
        if has_bias:
            y = y + bias_ref[...]
        o_ref[...] = y.astype(o_ref.dtype)
    return kernel


def pallas_linear(x, w, bias=None, *, transpose_w, ln=None, max_rows=256):
    """y = [LN](x) @ (W^T if transpose_w else W) + bias; rows tiled, weights resident."""
    M, K = x.shape
    N = w.shape[0] if transpose_w else w.shape[1]
    TM = min(_round_up(M, 8), max_rows)
    M_pad = _round_up(M, TM)
    if M_pad != M:
        x = jnp.pad(x, ((0, M_pad - M), (0, 0)))
    const_args = []
    if ln is not None:
        const_args += [ln[0], ln[1]]
    const_args.append(w)
    if bias is not None:
        const_args.append(bias)
    in_specs = [pl.BlockSpec((TM, K), lambda i: (i, 0))]
    in_specs += [_const_spec(a.shape, 1) for a in const_args]
    need = (2 * sum(_nbytes(a) for a in const_args)
            + 2 * TM * K * 4 + 2 * TM * N * 4 + TM * (K + N) * 4)
    y = pl.pallas_call(
        _linear_kernel_factory(transpose_w, bias is not None, ln is not None),
        out_shape=jax.ShapeDtypeStruct((M_pad, N), jnp.float32),
        grid=(M_pad // TM,),
        in_specs=in_specs,
        out_specs=pl.BlockSpec((TM, N), lambda i: (i, 0)),
        compiler_params=pltpu.CompilerParams(
            dimension_semantics=("parallel",),
            vmem_limit_bytes=_clamp_vmem(int(need * 1.25) + (2 << 20))),
    )(x, *const_args)
    return y[:M] if M_pad != M else y


# --------------------------------------------------------------------------
# Text feature L2 normalization (done once, emitted bf16)
# --------------------------------------------------------------------------
def _l2norm_kernel(x_ref, o_ref):
    x = x_ref[...].astype(jnp.float32)
    o_ref[...] = (x * lax.rsqrt(jnp.sum(x * x, axis=-1, keepdims=True))
                  ).astype(o_ref.dtype)


def l2_normalize_rows(x, tile_rows, out_dtype=jnp.bfloat16):
    R, D = x.shape
    return pl.pallas_call(
        _l2norm_kernel,
        out_shape=jax.ShapeDtypeStruct((R, D), out_dtype),
        grid=(R // tile_rows,),
        in_specs=[pl.BlockSpec((tile_rows, D), lambda i: (i, 0))],
        out_specs=pl.BlockSpec((tile_rows, D), lambda i: (i, 0)),
        compiler_params=pltpu.CompilerParams(dimension_semantics=("parallel",)),
    )(x)


# --------------------------------------------------------------------------
# CLIP head: adapter -> L2 norm -> scaled logits, tiled (B tiles x C tiles)
# --------------------------------------------------------------------------
def _clip_head_kernel(scale_ref, img_ref, txtn_ref, w_ref, probs_ref, imgf_ref,
                      y_scratch):
    j = pl.program_id(1)

    @pl.when(j == 0)                                   # adapter + img norm once per B tile
    def _():
        x = img_ref[...].astype(jnp.bfloat16)          # (TB, D)
        y = lax.dot_general(x, w_ref[...], (((1,), (1,)), ((), ())),
                            preferred_element_type=jnp.float32)
        y = y * lax.rsqrt(jnp.sum(y * y, axis=-1, keepdims=True))
        y_scratch[...] = y
        imgf_ref[...] = y.astype(imgf_ref.dtype)

    logits = lax.dot_general(y_scratch[...].astype(jnp.bfloat16), txtn_ref[...],
                             (((1,), (1,)), ((), ())),
                             preferred_element_type=jnp.float32)
    probs_ref[...] = (scale_ref[0, 0] * logits).astype(probs_ref.dtype)


def clip_head(image_features, text_features, adapter_w, logit_scale):
    B, D = image_features.shape
    C, _ = text_features.shape
    TB = min(_round_up(B, 8), 256)                     # sublane-aligned row tiles
    TC = min(_round_up(C, 128), 512)                   # lane-dense class tiles
    B_pad = _round_up(B, TB)
    C_pad = _round_up(C, TC)
    img = jnp.pad(image_features, ((0, B_pad - B), (0, 0)), constant_values=1.0)
    txt = jnp.pad(text_features, ((0, C_pad - C), (0, 0)), constant_values=1.0)
    txt_n = l2_normalize_rows(txt, TC)                 # normalize text ONCE, bf16 out
    scale = jnp.exp(logit_scale.astype(jnp.float32)).reshape(1, 1)

    need = (2 * TB * D * 4 + 2 * TC * D * 2 + 2 * D * D * 2
            + 2 * TB * TC * 4 + 2 * TB * D * 4 + TB * D * 4)
    vmem_limit = int(min(max(int(need * 1.5) + (2 << 20), 8 << 20), 64 << 20))

    probs_full, imgf_full = pl.pallas_call(
        _clip_head_kernel,
        out_shape=(jax.ShapeDtypeStruct((B_pad, C_pad), jnp.float32),
                   jax.ShapeDtypeStruct((B_pad, D), jnp.float32)),
        grid=(B_pad // TB, C_pad // TC),
        in_specs=[
            pl.BlockSpec((1, 1), lambda i, j: (0, 0),
                         memory_space=pltpu.MemorySpace.SMEM),      # logit scale
            pl.BlockSpec((TB, D), lambda i, j: (i, 0)),             # image feats (f32)
            pl.BlockSpec((TC, D), lambda i, j: (j, 0)),             # norm'd text feats (bf16)
            _const_spec(adapter_w.shape, 2),                        # adapter W (bf16, resident)
        ],
        out_specs=(
            pl.BlockSpec((TB, TC), lambda i, j: (i, j)),            # lane-dense logits
            pl.BlockSpec((TB, D), lambda i, j: (i, 0)),
        ),
        scratch_shapes=[pltpu.VMEM((TB, D), jnp.float32)],
        compiler_params=pltpu.CompilerParams(
            dimension_semantics=("parallel", "arbitrary"),
            vmem_limit_bytes=vmem_limit),
    )(scale, img, txt_n, adapter_w)
    return probs_full[:B, :C], imgf_full[:B]


# --------------------------------------------------------------------------
# Plain-JAX glue (embedding gather, positional add, patch reshape, pooling)
# --------------------------------------------------------------------------
def layer_norm(x, g, b, eps=1e-5):
    mu = jnp.mean(x, axis=-1, keepdims=True)
    var = jnp.mean((x - mu) ** 2, axis=-1, keepdims=True)
    return (x - mu) * lax.rsqrt(var + eps) * g + b


def encode_text(params, text):
    C, T = text.shape
    x = params["token_embedding"][text] + params["positional_embedding"]   # (C,T,d) f32
    # permute(1,0,2) -> transformer -> permute(1,0,2) is a no-op for a batch-first impl.
    row = lax.broadcasted_iota(jnp.int32, (T, T), 0)
    col = lax.broadcasted_iota(jnp.int32, (T, T), 1)
    causal = jnp.where(col <= row, 0.0, -1e9).astype(jnp.float32)          # CLIP causal mask
    for blk in params["text_blocks"]:
        x = res_block(x, blk, params["text_heads"], mask=causal)           # bf16 carry
    # EOT pooling: argmax over token ids matches CLIP only because the EOT token has the
    # highest vocabulary id (standard CLIP tokenizer).
    eot = jnp.argmax(text, axis=-1)
    pooled = x[jnp.arange(C), eot]                                         # (C, d)
    # ln_final + @ text_projection fused into one tiled Pallas call
    return pallas_linear(pooled, params["text_projection"], transpose_w=False,
                         ln=(params["ln_final_g"], params["ln_final_b"]))


def encode_image(params, image):
    B, Cc, H, W = image.shape
    P = params["patch_size"]
    d = params["vis_width"]
    gh, gw = H // P, W // P
    # conv1 (kernel=stride=patch, no bias) == patch extraction + matmul (tiled fused kernel)
    x = image.reshape(B, Cc, gh, P, gw, P)
    x = jnp.transpose(x, (0, 2, 4, 1, 3, 5)).reshape(B * gh * gw, Cc * P * P)
    w = params["conv1_w"].reshape(d, Cc * P * P)
    x = pallas_linear(x, w, transpose_w=True).reshape(B, gh * gw, d)
    cls = jnp.broadcast_to(params["class_embedding"].reshape(1, 1, d), (B, 1, d))
    x = jnp.concatenate([cls, x], axis=1) + params["vis_positional_embedding"]
    x = layer_norm(x, params["ln_pre_g"], params["ln_pre_b"])
    for blk in params["vis_blocks"]:
        x = res_block(x, blk, params["vis_heads"], mask=None)              # no mask at all
    # ln_post(x[:,0,:]) + @ vis_proj fused into one Pallas call
    return pallas_linear(x[:, 0, :], params["vis_proj"], transpose_w=False,
                         ln=(params["ln_post_g"], params["ln_post_b"]))


def class_incremental_clip_forward(params, image, text_tokens):
    """Default forward path: memory_data=None, edge_sample=None, not_ini=False,
    ori_ima_f=False  ->  returns (probs, image_features, None, None)."""
    # TODO(synk): memory_data / edge_sample / not_ini / ori_ima_f optional branches are not
    #             exercised by the default forward call and are not implemented here.
    image = image.astype(jnp.float32)                  # image.type(torch.float16)
    text_features = encode_text(params, text_tokens)   # no_grad (inference)
    image_features = encode_image(params, image)       # no_grad (inference)
    probs, image_features = clip_head(
        image_features, text_features, params["adapter_w"], params["logit_scale"])
    return probs, image_features, None, None


# --------------------------------------------------------------------------
# Deterministic synthetic parameter init (shapes follow the module / tiny CLIP)
# --------------------------------------------------------------------------
def init_params(key, *, vocab=64, ctx=8, d_text=64, text_layers=2, text_heads=4,
                image_size=16, patch_size=8, d_vis=64, vis_layers=2, vis_heads=4,
                embed_dim=512):
    keys = iter(jax.random.split(key, 256))
    bf16, f32 = jnp.bfloat16, jnp.float32

    def nrm(shape, dtype=f32, scale=0.02):
        return (scale * jax.random.normal(next(keys), shape)).astype(dtype)

    def block(d):
        return dict(
            ln1_g=jnp.ones((1, d), f32), ln1_b=jnp.zeros((1, d), f32),
            ln2_g=jnp.ones((1, d), f32), ln2_b=jnp.zeros((1, d), f32),
            attn=dict(in_w=nrm((3 * d, d), bf16),                # torch (3d, d), bf16 resident
                      in_b=jnp.zeros((1, 3 * d), f32),           # torch (3d,)
                      out_w=nrm((d, d), bf16),
                      out_b=jnp.zeros((1, d), f32)),
            fc_w=nrm((4 * d, d), bf16), fc_b=jnp.zeros((1, 4 * d), f32),
            proj_w=nrm((d, 4 * d), bf16), proj_b=jnp.zeros((1, d), f32),
        )

    n_patches = (image_size // patch_size) ** 2
    return dict(
        token_embedding=nrm((vocab, d_text)),
        positional_embedding=nrm((ctx, d_text)),
        text_blocks=[block(d_text) for _ in range(text_layers)],
        text_heads=text_heads,
        ln_final_g=jnp.ones((1, d_text), f32),
        ln_final_b=jnp.zeros((1, d_text), f32),
        text_projection=nrm((d_text, embed_dim), bf16),
        patch_size=patch_size,
        vis_width=d_vis,
        conv1_w=nrm((d_vis, 3, patch_size, patch_size), bf16),
        class_embedding=nrm((d_vis,)),
        vis_positional_embedding=nrm((n_patches + 1, d_vis)),
        ln_pre_g=jnp.ones((1, d_vis), f32),
        ln_pre_b=jnp.zeros((1, d_vis), f32),
        vis_blocks=[block(d_vis) for _ in range(vis_layers)],
        vis_heads=vis_heads,
        ln_post_g=jnp.ones((1, d_vis), f32),
        ln_post_b=jnp.zeros((1, d_vis), f32),
        vis_proj=nrm((d_vis, embed_dim), bf16),
        adapter_w=nrm((embed_dim, embed_dim), bf16),    # nn.Linear(512,512,bias=False)
        logit_scale=jnp.asarray(math.log(1.0 / 0.07), f32),
    )


if __name__ == "__main__":
    key = jax.random.PRNGKey(0)
    k_params, k_img, k_txt = jax.random.split(key, 3)
    params = init_params(k_params)

    B, C, T = 2, 4, 8  # batch, current class count, text context length
    image = jax.random.normal(k_img, (B, 3, 16, 16), jnp.float32)        # NCHW
    text_tokens = jax.random.randint(k_txt, (C, T), 0, 64, dtype=jnp.int32)

    fwd = jax.jit(functools.partial(class_incremental_clip_forward, params))
    probs, image_features, _, _ = fwd(image, text_tokens)
    jax.block_until_ready((probs, image_features))
    assert probs.shape == (B, C)
    assert image_features.shape == (B, 512)
    assert bool(jnp.isfinite(probs).all())
    assert bool(jnp.isfinite(image_features).all())
    print("KERNEL_OK")
</pallas_src>

<mosaic_0001>
module attributes {stable_mosaic.version = 11 : i64} {
  func.func @_res_block_kernel(%arg0: i32, %arg1: memref<1x8x64xf32, #tpu.memory_space<vmem>>, %arg2: memref<8x8xf32, #tpu.memory_space<vmem>>, %arg3: memref<1x64xf32, #tpu.memory_space<vmem>>, %arg4: memref<1x64xf32, #tpu.memory_space<vmem>>, %arg5: memref<1x64xf32, #tpu.memory_space<vmem>>, %arg6: memref<1x64xf32, #tpu.memory_space<vmem>>, %arg7: memref<192x64xbf16, #tpu.memory_space<vmem>>, %arg8: memref<1x192xf32, #tpu.memory_space<vmem>>, %arg9: memref<64x64xbf16, #tpu.memory_space<vmem>>, %arg10: memref<1x64xf32, #tpu.memory_space<vmem>>, %arg11: memref<256x64xbf16, #tpu.memory_space<vmem>>, %arg12: memref<1x256xf32, #tpu.memory_space<vmem>>, %arg13: memref<64x256xbf16, #tpu.memory_space<vmem>>, %arg14: memref<1x64xf32, #tpu.memory_space<vmem>>, %arg15: memref<1x8x64xbf16, #tpu.memory_space<vmem>>, %arg16: memref<3x4x8x16xbf16, #tpu.memory_space<vmem>>, %arg17: memref<8x64xbf16, #tpu.memory_space<vmem>>) attributes {dimension_semantics = [#tpu.dimension_semantics<parallel>], iteration_bounds = array<i64: 4>, scalar_prefetch = 0 : i64, scratch_operands = 2 : i64, tpu.core_type = #tpu.core_type<tc>, window_params = [{transform_indices = @transform_0, window_bounds = array<i64: 1, 8, 64>}, {pipeline_mode = #tpu.pipeline_mode<synchronous>, transform_indices = @transform_1, window_bounds = array<i64: 8, 8>}, {pipeline_mode = #tpu.pipeline_mode<synchronous>, transform_indices = @transform_2, window_bounds = array<i64: 1, 64>}, {pipeline_mode = #tpu.pipeline_mode<synchronous>, transform_indices = @transform_3, window_bounds = array<i64: 1, 64>}, {pipeline_mode = #tpu.pipeline_mode<synchronous>, transform_indices = @transform_4, window_bounds = array<i64: 1, 64>}, {pipeline_mode = #tpu.pipeline_mode<synchronous>, transform_indices = @transform_5, window_bounds = array<i64: 1, 64>}, {pipeline_mode = #tpu.pipeline_mode<synchronous>, transform_indices = @transform_6, window_bounds = array<i64: 192, 64>}, {pipeline_mode = #tpu.pipeline_mode<synchronous>, transform_indices = @transform_7, window_bounds = array<i64: 1, 192>}, {pipeline_mode = #tpu.pipeline_mode<synchronous>, transform_indices = @transform_8, window_bounds = array<i64: 64, 64>}, {pipeline_mode = #tpu.pipeline_mode<synchronous>, transform_indices = @transform_9, window_bounds = array<i64: 1, 64>}, {pipeline_mode = #tpu.pipeline_mode<synchronous>, transform_indices = @transform_10, window_bounds = array<i64: 256, 64>}, {pipeline_mode = #tpu.pipeline_mode<synchronous>, transform_indices = @transform_11, window_bounds = array<i64: 1, 256>}, {pipeline_mode = #tpu.pipeline_mode<synchronous>, transform_indices = @transform_12, window_bounds = array<i64: 64, 256>}, {pipeline_mode = #tpu.pipeline_mode<synchronous>, transform_indices = @transform_13, window_bounds = array<i64: 1, 64>}, {transform_indices = @transform_14, window_bounds = array<i64: 1, 8, 64>}]} {
    %c0 = arith.constant 0 : index
    %c0_0 = arith.constant 0 : index
    %c0_1 = arith.constant 0 : index
    %0 = vector.load %arg1[%c0, %c0_0, %c0_1] : memref<1x8x64xf32, #tpu.memory_space<vmem>>, vector<1x8x64xf32>
    %1 = vector.shape_cast %0 : vector<1x8x64xf32> to vector<8x64xf32>
    %c0_2 = arith.constant 0 : index
    %c0_3 = arith.constant 0 : index
    %2 = vector.load %arg3[%c0_2, %c0_3] : memref<1x64xf32, #tpu.memory_space<vmem>>, vector<1x64xf32>
    %c0_4 = arith.constant 0 : index
    %c0_5 = arith.constant 0 : index
    %3 = vector.load %arg4[%c0_4, %c0_5] : memref<1x64xf32, #tpu.memory_space<vmem>>, vector<1x64xf32>
    %cst = arith.constant dense<0.000000e+00> : vector<8xf32>
    %4 = vector.multi_reduction <add>, %1, %cst [1] : vector<8x64xf32> to vector<8xf32>
    %5 = vector.shape_cast %4 : vector<8xf32> to vector<8x1xf32>
    %cst_6 = arith.constant 6.400000e+01 : f32
    %6 = vector.broadcast %cst_6 : f32 to vector<8x1xf32>
    %7 = arith.divf %5, %6 : vector<8x1xf32>
    %8 = vector.broadcast %7 : vector<8x1xf32> to vector<8x64xf32>
    %9 = arith.subf %1, %8 : vector<8x64xf32>
    %10 = arith.mulf %9, %9 : vector<8x64xf32>
    %cst_7 = arith.constant dense<0.000000e+00> : vector<8xf32>
    %11 = vector.multi_reduction <add>, %10, %cst_7 [1] : vector<8x64xf32> to vector<8xf32>
    %12 = vector.shape_cast %11 : vector<8xf32> to vector<8x1xf32>
    %cst_8 = arith.constant 6.400000e+01 : f32
    %13 = vector.broadcast %cst_8 : f32 to vector<8x1xf32>
    %14 = arith.divf %12, %13 : vector<8x1xf32>
    %15 = vector.broadcast %7 : vector<8x1xf32> to vector<8x64xf32>
    %16 = arith.subf %1, %15 : vector<8x64xf32>
    %cst_9 = arith.constant 9.99999974E-6 : f32
    %17 = vector.broadcast %cst_9 : f32 to vector<8x1xf32>
    %18 = arith.addf %14, %17 : vector<8x1xf32>
    %19 = math.rsqrt %18 : vector<8x1xf32>
    %20 = vector.broadcast %19 : vector<8x1xf32> to vector<8x64xf32>
    %21 = arith.mulf %16, %20 : vector<8x64xf32>
    %22 = vector.broadcast %2 : vector<1x64xf32> to vector<8x64xf32>
    %23 = arith.mulf %21, %22 : vector<8x64xf32>
    %24 = vector.broadcast %3 : vector<1x64xf32> to vector<8x64xf32>
    %25 = arith.addf %23, %24 : vector<8x64xf32>
    %c0_10 = arith.constant 0 : index
    %c0_11 = arith.constant 0 : index
    %26 = vector.load %arg7[%c0_10, %c0_11] : memref<192x64xbf16, #tpu.memory_space<vmem>>, vector<192x64xbf16>
    %27 = arith.truncf %25 : vector<8x64xf32> to vector<8x64xbf16>
    %cst_12 = arith.constant dense<0.000000e+00> : vector<8x192xf32>
    %28 = tpu.matmul %27, %26, %cst_12 {dimension_numbers = #tpu.dot_dimension_numbers<[1], [1], [0], [0], [0, 0, 1, 0], [], []>} : vector<8x64xbf16>, vector<192x64xbf16>, vector<8x192xf32> -> vector<8x192xf32>
    %c0_13 = arith.constant 0 : index
    %c0_14 = arith.constant 0 : index
    %29 = vector.load %arg8[%c0_13, %c0_14] : memref<1x192xf32, #tpu.memory_space<vmem>>, vector<1x192xf32>
    %30 = vector.broadcast %29 : vector<1x192xf32> to vector<8x192xf32>
    %31 = arith.addf %28, %30 : vector<8x192xf32>
    %32 = arith.truncf %31 : vector<8x192xf32> to vector<8x192xbf16>
    %33 = vector.extract_strided_slice %32 {offsets = [0, 0], sizes = [8, 16], strides = [1, 1]} : vector<8x192xbf16> to vector<8x16xbf16>
    %c0_15 = arith.constant 0 : index
    %c0_16 = arith.constant 0 : index
    %c0_17 = arith.constant 0 : index
    %c0_18 = arith.constant 0 : index
    %34 = vector.load %arg16[%c0_15, %c0_16, %c0_17, %c0_18] : memref<3x4x8x16xbf16, #tpu.memory_space<vmem>>, vector<1x1x8x16xbf16>
    %35 = vector.shape_cast %34 : vector<1x1x8x16xbf16> to vector<8x16xbf16>
    %36 = vector.shape_cast %33 : vector<8x16xbf16> to vector<1x1x8x16xbf16>
    tpu.vector_store %arg16[%c0_15, %c0_16, %c0_17, %c0_18], %36 {strides = array<i32>} : memref<3x4x8x16xbf16, #tpu.memory_space<vmem>>, vector<1x1x8x16xbf16>,
    %37 = vector.extract_strided_slice %32 {offsets = [0, 64], sizes = [8, 16], strides = [1, 1]} : vector<8x192xbf16> to vector<8x16xbf16>
    %c1 = arith.constant 1 : index
    %c0_19 = arith.constant 0 : index
    %c0_20 = arith.constant 0 : index
    %c0_21 = arith.constant 0 : index
    %38 = vector.load %arg16[%c1, %c0_19, %c0_20, %c0_21] : memref<3x4x8x16xbf16, #tpu.memory_space<vmem>>, vector<1x1x8x16xbf16>
    %39 = vector.shape_cast %38 : vector<1x1x8x16xbf16> to vector<8x16xbf16>
    %40 = vector.shape_cast %37 : vector<8x16xbf16> to vector<1x1x8x16xbf16>
    tpu.vector_store %arg16[%c1, %c0_19, %c0_20, %c0_21], %40 {strides = array<i32>} : memref<3x4x8x16xbf16, #tpu.memory_space<vmem>>, vector<1x1x8x16xbf16>,
    %41 = vector.extract_strided_slice %32 {offsets = [0, 128], sizes = [8, 16], strides = [1, 1]} : vector<8x192xbf16> to vector<8x16xbf16>
    %c2 = arith.constant 2 : index
    %c0_22 = arith.constant 0 : index
    %c0_23 = arith.constant 0 : index
    %c0_24 = arith.constant 0 : index
    %42 = vector.load %arg16[%c2, %c0_22, %c0_23, %c0_24] : memref<3x4x8x16xbf16, #tpu.memory_space<vmem>>, vector<1x1x8x16xbf16>
    %43 = vector.shape_cast %42 : vector<1x1x8x16xbf16> to vector<8x16xbf16>
    %44 = vector.shape_cast %41 : vector<8x16xbf16> to vector<1x1x8x16xbf16>
    tpu.vector_store %arg16[%c2, %c0_22, %c0_23, %c0_24], %44 {strides = array<i32>} : memref<3x4x8x16xbf16, #tpu.memory_space<vmem>>, vector<1x1x8x16xbf16>,
    %45 = vector.extract_strided_slice %32 {offsets = [0, 16], sizes = [8, 16], strides = [1, 1]} : vector<8x192xbf16> to vector<8x16xbf16>
    %c0_25 = arith.constant 0 : index
    %c1_26 = arith.constant 1 : index
    %c0_27 = arith.constant 0 : index
    %c0_28 = arith.constant 0 : index
    %46 = vector.load %arg16[%c0_25, %c1_26, %c0_27, %c0_28] : memref<3x4x8x16xbf16, #tpu.memory_space<vmem>>, vector<1x1x8x16xbf16>
    %47 = vector.shape_cast %46 : vector<1x1x8x16xbf16> to vector<8x16xbf16>
    %48 = vector.shape_cast %45 : vector<8x16xbf16> to vector<1x1x8x16xbf16>
    tpu.vector_store %arg16[%c0_25, %c1_26, %c0_27, %c0_28], %48 {strides = array<i32>} : memref<3x4x8x16xbf16, #tpu.memory_space<vmem>>, vector<1x1x8x16xbf16>,
    %49 = vector.extract_strided_slice %32 {offsets = [0, 80], sizes = [8, 16], strides = [1, 1]} : vector<8x192xbf16> to vector<8x16xbf16>
    %c1_29 = arith.constant 1 : index
    %c1_30 = arith.constant 1 : index
    %c0_31 = arith.constant 0 : index
    %c0_32 = arith.constant 0 : index
    %50 = vector.load %arg16[%c1_29, %c1_30, %c0_31, %c0_32] : memref<3x4x8x16xbf16, #tpu.memory_space<vmem>>, vector<1x1x8x16xbf16>
    %51 = vector.shape_cast %50 : vector<1x1x8x16xbf16> to vector<8x16xbf16>
    %52 = vector.shape_cast %49 : vector<8x16xbf16> to vector<1x1x8x16xbf16>
    tpu.vector_store %arg16[%c1_29, %c1_30, %c0_31, %c0_32], %52 {strides = array<i32>} : memref<3x4x8x16xbf16, #tpu.memory_space<vmem>>, vector<1x1x8x16xbf16>,
    %53 = vector.extract_strided_slice %32 {offsets = [0, 144], sizes = [8, 16], strides = [1, 1]} : vector<8x192xbf16> to vector<8x16xbf16>
    %c2_33 = arith.constant 2 : index
    %c1_34 = arith.constant 1 : index
    %c0_35 = arith.constant 0 : index
    %c0_36 = arith.constant 0 : index
    %54 = vector.load %arg16[%c2_33, %c1_34, %c0_35, %c0_36] : memref<3x4x8x16xbf16, #tpu.memory_space<vmem>>, vector<1x1x8x16xbf16>
    %55 = vector.shape_cast %54 : vector<1x1x8x16xbf16> to vector<8x16xbf16>
    %56 = vector.shape_cast %53 : vector<8x16xbf16> to vector<1x1x8x16xbf16>
    tpu.vector_store %arg16[%c2_33, %c1_34, %c0_35, %c0_36], %56 {strides = array<i32>} : memref<3x4x8x16xbf16, #tpu.memory_space<vmem>>, vector<1x1x8x16xbf16>,
    %57 = vector.extract_strided_slice %32 {offsets = [0, 32], sizes = [8, 16], strides = [1, 1]} : vector<8x192xbf16> to vector<8x16xbf16>
    %c0_37 = arith.constant 0 : index
    %c2_38 = arith.constant 2 : index
    %c0_39 = arith.constant 0 : index
    %c0_40 = arith.constant 0 : index
    %58 = vector.load %arg16[%c0_37, %c2_38, %c0_39, %c0_40] : memref<3x4x8x16xbf16, #tpu.memory_space<vmem>>, vector<1x1x8x16xbf16>
    %59 = vector.shape_cast %58 : vector<1x1x8x16xbf16> to vector<8x16xbf16>
    %60 = vector.shape_cast %57 : vector<8x16xbf16> to vector<1x1x8x16xbf16>
    tpu.vector_store %arg16[%c0_37, %c2_38, %c0_39, %c0_40], %60 {strides = array<i32>} : memref<3x4x8x16xbf16, #tpu.memory_space<vmem>>, vector<1x1x8x16xbf16>,
    %61 = vector.extract_strided_slice %32 {offsets = [0, 96], sizes = [8, 16], strides = [1, 1]} : vector<8x192xbf16> to vector<8x16xbf16>
    %c1_41 = arith.constant 1 : index
    %c2_42 = arith.constant 2 : index
    %c0_43 = arith.constant 0 : index
    %c0_44 = arith.constant 0 : index
    %62 = vector.load %arg16[%c1_41, %c2_42, %c0_43, %c0_44] : memref<3x4x8x16xbf16, #tpu.memory_space<vmem>>, vector<1x1x8x16xbf16>
    %63 = vector.shape_cast %62 : vector<1x1x8x16xbf16> to vector<8x16xbf16>
    %64 = vector.shape_cast %61 : vector<8x16xbf16> to vector<1x1x8x16xbf16>
    tpu.vector_store %arg16[%c1_41, %c2_42, %c0_43, %c0_44], %64 {strides = array<i32>} : memref<3x4x8x16xbf16, #tpu.memory_space<vmem>>, vector<1x1x8x16xbf16>,
    %65 = vector.extract_strided_slice %32 {offsets = [0, 160], sizes = [8, 16], strides = [1, 1]} : vector<8x192xbf16> to vector<8x16xbf16>
    %c2_45 = arith.constant 2 : index
    %c2_46 = arith.constant 2 : index
    %c0_47 = arith.constant 0 : index
    %c0_48 = arith.constant 0 : index
    %66 = vector.load %arg16[%c2_45, %c2_46, %c0_47, %c0_48] : memref<3x4x8x16xbf16, #tpu.memory_space<vmem>>, vector<1x1x8x16xbf16>
    %67 = vector.shape_cast %66 : vector<1x1x8x16xbf16> to vector<8x16xbf16>
    %68 = vector.shape_cast %65 : vector<8x16xbf16> to vector<1x1x8x16xbf16>
    tpu.vector_store %arg16[%c2_45, %c2_46, %c0_47, %c0_48], %68 {strides = array<i32>} : memref<3x4x8x16xbf16, #tpu.memory_space<vmem>>, vector<1x1x8x16xbf16>,
    %69 = vector.extract_strided_slice %32 {offsets = [0, 48], sizes = [8, 16], strides = [1, 1]} : vector<8x192xbf16> to vector<8x16xbf16>
    %c0_49 = arith.constant 0 : index
    %c3 = arith.constant 3 : index
    %c0_50 = arith.constant 0 : index
    %c0_51 = arith.constant 0 : index
    %70 = vector.load %arg16[%c0_49, %c3, %c0_50, %c0_51] : memref<3x4x8x16xbf16, #tpu.memory_space<vmem>>, vector<1x1x8x16xbf16>
    %71 = vector.shape_cast %70 : vector<1x1x8x16xbf16> to vector<8x16xbf16>
    %72 = vector.shape_cast %69 : vector<8x16xbf16> to vector<1x1x8x16xbf16>
    tpu.vector_store %arg16[%c0_49, %c3, %c0_50, %c0_51], %72 {strides = array<i32>} : memref<3x4x8x16xbf16, #tpu.memory_space<vmem>>, vector<1x1x8x16xbf16>,
    %73 = vector.extract_strided_slice %32 {offsets = [0, 112], sizes = [8, 16], strides = [1, 1]} : vector<8x192xbf16> to vector<8x16xbf16>
    %c1_52 = arith.constant 1 : index
    %c3_53 = arith.constant 3 : index
    %c0_54 = arith.constant 0 : index
    %c0_55 = arith.constant 0 : index
    %74 = vector.load %arg16[%c1_52, %c3_53, %c0_54, %c0_55] : memref<3x4x8x16xbf16, #tpu.memory_space<vmem>>, vector<1x1x8x16xbf16>
    %75 = vector.shape_cast %74 : vector<1x1x8x16xbf16> to vector<8x16xbf16>
    %76 = vector.shape_cast %73 : vector<8x16xbf16> to vector<1x1x8x16xbf16>
    tpu.vector_store %arg16[%c1_52, %c3_53, %c0_54, %c0_55], %76 {strides = array<i32>} : memref<3x4x8x16xbf16, #tpu.memory_space<vmem>>, vector<1x1x8x16xbf16>,
    %77 = vector.extract_strided_slice %32 {offsets = [0, 176], sizes = [8, 16], strides = [1, 1]} : vector<8x192xbf16> to vector<8x16xbf16>
    %c2_56 = arith.constant 2 : index
    %c3_57 = arith.constant 3 : index
    %c0_58 = arith.constant 0 : index
    %c0_59 = arith.constant 0 : index
    %78 = vector.load %arg16[%c2_56, %c3_57, %c0_58, %c0_59] : memref<3x4x8x16xbf16, #tpu.memory_space<vmem>>, vector<1x1x8x16xbf16>
    %79 = vector.shape_cast %78 : vector<1x1x8x16xbf16> to vector<8x16xbf16>
    %80 = vector.shape_cast %77 : vector<8x16xbf16> to vector<1x1x8x16xbf16>
    tpu.vector_store %arg16[%c2_56, %c3_57, %c0_58, %c0_59], %80 {strides = array<i32>} : memref<3x4x8x16xbf16, #tpu.memory_space<vmem>>, vector<1x1x8x16xbf16>,
    %c0_60 = arith.constant 0 : index
    %c0_61 = arith.constant 0 : index
    %c0_62 = arith.constant 0 : index
    %c0_63 = arith.constant 0 : index
    %81 = vector.load %arg16[%c0_60, %c0_61, %c0_62, %c0_63] : memref<3x4x8x16xbf16, #tpu.memory_space<vmem>>, vector<1x4x8x16xbf16>
    %82 = vector.shape_cast %81 : vector<1x4x8x16xbf16> to vector<4x8x16xbf16>
    %c1_64 = arith.constant 1 : index
    %c0_65 = arith.constant 0 : index
    %c0_66 = arith.constant 0 : index
    %c0_67 = arith.constant 0 : index
    %83 = vector.load %arg16[%c1_64, %c0_65, %c0_66, %c0_67] : memref<3x4x8x16xbf16, #tpu.memory_space<vmem>>, vector<1x4x8x16xbf16>
    %84 = vector.shape_cast %83 : vector<1x4x8x16xbf16> to vector<4x8x16xbf16>
    %c2_68 = arith.constant 2 : index
    %c0_69 = arith.constant 0 : index
    %c0_70 = arith.constant 0 : index
    %c0_71 = arith.constant 0 : index
    %85 = vector.load %arg16[%c2_68, %c0_69, %c0_70, %c0_71] : memref<3x4x8x16xbf16, #tpu.memory_space<vmem>>, vector<1x4x8x16xbf16>
    %86 = vector.shape_cast %85 : vector<1x4x8x16xbf16> to vector<4x8x16xbf16>
    "tpu.trace_start"() <{level = 10 : i32, message = "hqc,hkc->hqk"}> : () -> ()
    %cst_72 = arith.constant dense<0.000000e+00> : vector<4x8x8xf32>
    %87 = tpu.matmul %82, %84, %cst_72 {dimension_numbers = #tpu.dot_dimension_numbers<[2], [2], [1], [1], [0, 0, 0, 1, 1, 1], [0], [0]>} : vector<4x8x16xbf16>, vector<4x8x16xbf16>, vector<4x8x8xf32> -> vector<4x8x8xf32>
    "tpu.trace_stop"() : () -> ()
    %cst_73 = arith.constant 2.500000e-01 : f32
    %88 = vector.broadcast %cst_73 : f32 to vector<4x8x8xf32>
    %89 = arith.mulf %87, %88 : vector<4x8x8xf32>
    %c0_74 = arith.constant 0 : index
    %c0_75 = arith.constant 0 : index
    %90 = vector.load %arg2[%c0_74, %c0_75] : memref<8x8xf32, #tpu.memory_space<vmem>>, vector<8x8xf32>
    %91 = vector.shape_cast %90 : vector<8x8xf32> to vector<1x8x8xf32>
    %92 = vector.broadcast %91 : vector<1x8x8xf32> to vector<4x8x8xf32>
    %93 = arith.addf %89, %92 : vector<4x8x8xf32>
    %cst_76 = arith.constant dense<0xFF800000> : vector<4x8xf32>
    %94 = vector.multi_reduction <maximumf>, %93, %cst_76 [2] : vector<4x8x8xf32> to vector<4x8xf32>
    %95 = vector.shape_cast %94 : vector<4x8xf32> to vector<4x8x1xf32>
    %96 = vector.broadcast %95 : vector<4x8x1xf32> to vector<4x8x8xf32>
    %97 = arith.subf %93, %96 : vector<4x8x8xf32>
    %98 = math.exp %97 : vector<4x8x8xf32>
    %cst_77 = arith.constant dense<0.000000e+00> : vector<4x8xf32>
    %99 = vector.multi_reduction <add>, %98, %cst_77 [2] : vector<4x8x8xf32> to vector<4x8xf32>
    %100 = vector.shape_cast %99 : vector<4x8xf32> to vector<4x8x1xf32>
    %101 = tpu.reciprocal %100 {approx = true} : vector<4x8x1xf32> -> vector<4x8x1xf32>
    %102 = vector.broadcast %101 : vector<4x8x1xf32> to vector<4x8x8xf32>
    %103 = arith.mulf %98, %102 : vector<4x8x8xf32>
    %104 = arith.truncf %103 : vector<4x8x8xf32> to vector<4x8x8xbf16>
    "tpu.trace_start"() <{level = 10 : i32, message = "hqk,hkc->hqc"}> : () -> ()
    %cst_78 = arith.constant dense<0.000000e+00> : vector<4x8x16xf32>
    %105 = tpu.matmul %104, %86, %cst_78 {dimension_numbers = #tpu.dot_dimension_numbers<[2], [1], [1], [2], [0, 0, 0, 1, 1, 2], [0], [0]>} : vector<4x8x8xbf16>, vector<4x8x16xbf16>, vector<4x8x16xf32> -> vector<4x8x16xf32>
    "tpu.trace_stop"() : () -> ()
    %106 = vector.extract_strided_slice %105 {offsets = [0, 0, 0], sizes = [1, 8, 16], strides = [1, 1, 1]} : vector<4x8x16xf32> to vector<1x8x16xf32>
    %107 = vector.shape_cast %106 : vector<1x8x16xf32> to vector<8x16xf32>
    %108 = arith.truncf %107 : vector<8x16xf32> to vector<8x16xbf16>
    %c0_79 = arith.constant 0 : index
    %c0_80 = arith.constant 0 : index
    %109 = vector.load %arg17[%c0_79, %c0_80] : memref<8x64xbf16, #tpu.memory_space<vmem>>, vector<8x16xbf16>
    tpu.vector_store %arg17[%c0_79, %c0_80], %108 {strides = array<i32>} : memref<8x64xbf16, #tpu.memory_space<vmem>>, vector<8x16xbf16>,
    %110 = vector.extract_strided_slice %105 {offsets = [1, 0, 0], sizes = [1, 8, 16], strides = [1, 1, 1]} : vector<4x8x16xf32> to vector<1x8x16xf32>
    %111 = vector.shape_cast %110 : vector<1x8x16xf32> to vector<8x16xf32>
    %112 = arith.truncf %111 : vector<8x16xf32> to vector<8x16xbf16>
    %c0_81 = arith.constant 0 : index
    %c16 = arith.constant 16 : index
    %113 = vector.load %arg17[%c0_81, %c16] : memref<8x64xbf16, #tpu.memory_space<vmem>>, vector<8x16xbf16>
    tpu.vector_store %arg17[%c0_81, %c16], %112 {strides = array<i32>} : memref<8x64xbf16, #tpu.memory_space<vmem>>, vector<8x16xbf16>,
    %114 = vector.extract_strided_slice %105 {offsets = [2, 0, 0], sizes = [1, 8, 16], strides = [1, 1, 1]} : vector<4x8x16xf32> to vector<1x8x16xf32>
    %115 = vector.shape_cast %114 : vector<1x8x16xf32> to vector<8x16xf32>
    %116 = arith.truncf %115 : vector<8x16xf32> to vector<8x16xbf16>
    %c0_82 = arith.constant 0 : index
    %c32 = arith.constant 32 : index
    %117 = vector.load %arg17[%c0_82, %c32] : memref<8x64xbf16, #tpu.memory_space<vmem>>, vector<8x16xbf16>
    tpu.vector_store %arg17[%c0_82, %c32], %116 {strides = array<i32>} : memref<8x64xbf16, #tpu.memory_space<vmem>>, vector<8x16xbf16>,
    %118 = vector.extract_strided_slice %105 {offsets = [3, 0, 0], sizes = [1, 8, 16], strides = [1, 1, 1]} : vector<4x8x16xf32> to vector<1x8x16xf32>
    %119 = vector.shape_cast %118 : vector<1x8x16xf32> to vector<8x16xf32>
    %120 = arith.truncf %119 : vector<8x16xf32> to vector<8x16xbf16>
    %c0_83 = arith.constant 0 : index
    %c48 = arith.constant 48 : index
    %121 = vector.load %arg17[%c0_83, %c48] : memref<8x64xbf16, #tpu.memory_space<vmem>>, vector<8x16xbf16>
    tpu.vector_store %arg17[%c0_83, %c48], %120 {strides = array<i32>} : memref<8x64xbf16, #tpu.memory_space<vmem>>, vector<8x16xbf16>,
    %c0_84 = arith.constant 0 : index
    %c0_85 = arith.constant 0 : index
    %122 = vector.load %arg17[%c0_84, %c0_85] : memref<8x64xbf16, #tpu.memory_space<vmem>>, vector<8x64xbf16>
    %c0_86 = arith.constant 0 : index
    %c0_87 = arith.constant 0 : index
    %123 = vector.load %arg9[%c0_86, %c0_87] : memref<64x64xbf16, #tpu.memory_space<vmem>>, vector<64x64xbf16>
    %cst_88 = arith.constant dense<0.000000e+00> : vector<8x64xf32>
    %124 = tpu.matmul %122, %123, %cst_88 {dimension_numbers = #tpu.dot_dimension_numbers<[1], [1], [0], [0], [0, 0, 1, 0], [], []>} : vector<8x64xbf16>, vector<64x64xbf16>, vector<8x64xf32> -> vector<8x64xf32>
    %125 = arith.addf %1, %124 : vector<8x64xf32>
    %c0_89 = arith.constant 0 : index
    %c0_90 = arith.constant 0 : index
    %126 = vector.load %arg10[%c0_89, %c0_90] : memref<1x64xf32, #tpu.memory_space<vmem>>, vector<1x64xf32>
    %127 = vector.broadcast %126 : vector<1x64xf32> to vector<8x64xf32>
    %128 = arith.addf %125, %127 : vector<8x64xf32>
    %c0_91 = arith.constant 0 : index
    %c0_92 = arith.constant 0 : index
    %129 = vector.load %arg5[%c0_91, %c0_92] : memref<1x64xf32, #tpu.memory_space<vmem>>, vector<1x64xf32>
    %c0_93 = arith.constant 0 : index
    %c0_94 = arith.constant 0 : index
    %130 = vector.load %arg6[%c0_93, %c0_94] : memref<1x64xf32, #tpu.memory_space<vmem>>, vector<1x64xf32>
    %cst_95 = arith.constant dense<0.000000e+00> : vector<8xf32>
    %131 = vector.multi_reduction <add>, %128, %cst_95 [1] : vector<8x64xf32> to vector<8xf32>
    %132 = vector.shape_cast %131 : vector<8xf32> to vector<8x1xf32>
    %cst_96 = arith.constant 6.400000e+01 : f32
    %133 = vector.broadcast %cst_96 : f32 to vector<8x1xf32>
    %134 = arith.divf %132, %133 : vector<8x1xf32>
    %135 = vector.broadcast %134 : vector<8x1xf32> to vector<8x64xf32>
    %136 = arith.subf %128, %135 : vector<8x64xf32>
    %137 = arith.mulf %136, %136 : vector<8x64xf32>
    %cst_97 = arith.constant dense<0.000000e+00> : vector<8xf32>
    %138 = vector.multi_reduction <add>, %137, %cst_97 [1] : vector<8x64xf32> to vector<8xf32>
    %139 = vector.shape_cast %138 : vector<8xf32> to vector<8x1xf32>
    %cst_98 = arith.constant 6.400000e+01 : f32
    %140 = vector.broadcast %cst_98 : f32 to vector<8x1xf32>
    %141 = arith.divf %139, %140 : vector<8x1xf32>
    %142 = vector.broadcast %134 : vector<8x1xf32> to vector<8x64xf32>
    %143 = arith.subf %128, %142 : vector<8x64xf32>
    %cst_99 = arith.constant 9.99999974E-6 : f32
    %144 = vector.broadcast %cst_99 : f32 to vector<8x1xf32>
    %145 = arith.addf %141, %144 : vector<8x1xf32>
    %146 = math.rsqrt %145 : vector<8x1xf32>
    %147 = vector.broadcast %146 : vector<8x1xf32> to vector<8x64xf32>
    %148 = arith.mulf %143, %147 : vector<8x64xf32>
    %149 = vector.broadcast %129 : vector<1x64xf32> to vector<8x64xf32>
    %150 = arith.mulf %148, %149 : vector<8x64xf32>
    %151 = vector.broadcast %130 : vector<1x64xf32> to vector<8x64xf32>
    %152 = arith.addf %150, %151 : vector<8x64xf32>
    %c0_100 = arith.constant 0 : index
    %c0_101 = arith.constant 0 : index
    %153 = vector.load %arg11[%c0_100, %c0_101] : memref<256x64xbf16, #tpu.memory_space<vmem>>, vector<256x64xbf16>
    %154 = arith.truncf %152 : vector<8x64xf32> to vector<8x64xbf16>
    %cst_102 = arith.constant dense<0.000000e+00> : vector<8x256xf32>
    %155 = tpu.matmul %154, %153, %cst_102 {dimension_numbers = #tpu.dot_dimension_numbers<[1], [1], [0], [0], [0, 0, 1, 0], [], []>} : vector<8x64xbf16>, vector<256x64xbf16>, vector<8x256xf32> -> vector<8x256xf32>
    %c0_103 = arith.constant 0 : index
    %c0_104 = arith.constant 0 : index
    %156 = vector.load %arg12[%c0_103, %c0_104] : memref<1x256xf32, #tpu.memory_space<vmem>>, vector<1x256xf32>
    %157 = vector.broadcast %156 : vector<1x256xf32> to vector<8x256xf32>
    %158 = arith.addf %155, %157 : vector<8x256xf32>
    %159 = arith.truncf %158 : vector<8x256xf32> to vector<8x256xbf16>
    %cst_105 = arith.constant 1.703130e+00 : bf16
    %160 = vector.broadcast %cst_105 : bf16 to vector<8x256xbf16>
    %161 = arith.mulf %160, %159 : vector<8x256xbf16>
    %162 = arith.negf %161 : vector<8x256xbf16>
    %163 = math.exp %162 : vector<8x256xbf16>
    %cst_106 = arith.constant 1.000000e+00 : bf16
    %164 = vector.broadcast %cst_106 : bf16 to vector<8x256xbf16>
    %165 = arith.addf %164, %163 : vector<8x256xbf16>
    %166 = arith.divf %164, %165 : vector<8x256xbf16>
    %167 = arith.mulf %159, %166 : vector<8x256xbf16>
    %c0_107 = arith.constant 0 : index
    %c0_108 = arith.constant 0 : index
    %168 = vector.load %arg13[%c0_107, %c0_108] : memref<64x256xbf16, #tpu.memory_space<vmem>>, vector<64x256xbf16>
    %cst_109 = arith.constant dense<0.000000e+00> : vector<8x64xf32>
    %169 = tpu.matmul %167, %168, %cst_109 {dimension_numbers = #tpu.dot_dimension_numbers<[1], [1], [0], [0], [0, 0, 1, 0], [], []>} : vector<8x256xbf16>, vector<64x256xbf16>, vector<8x64xf32> -> vector<8x64xf32>
    %170 = arith.addf %128, %169 : vector<8x64xf32>
    %c0_110 = arith.constant 0 : index
    %c0_111 = arith.constant 0 : index
    %171 = vector.load %arg14[%c0_110, %c0_111] : memref<1x64xf32, #tpu.memory_space<vmem>>, vector<1x64xf32>
    %172 = vector.broadcast %171 : vector<1x64xf32> to vector<8x64xf32>
    %173 = arith.addf %170, %172 : vector<8x64xf32>
    %174 = arith.truncf %173 : vector<8x64xf32> to vector<8x64xbf16>
    %c0_112 = arith.constant 0 : index
    %c0_113 = arith.constant 0 : index
    %c0_114 = arith.constant 0 : index
    %175 = vector.load %arg15[%c0_112, %c0_113, %c0_114] : memref<1x8x64xbf16, #tpu.memory_space<vmem>>, vector<1x8x64xbf16>
    %176 = vector.shape_cast %175 : vector<1x8x64xbf16> to vector<8x64xbf16>
    %177 = vector.shape_cast %174 : vector<8x64xbf16> to vector<1x8x64xbf16>
    tpu.vector_store %arg15[%c0_112, %c0_113, %c0_114], %177 {strides = array<i32>} : memref<1x8x64xbf16, #tpu.memory_space<vmem>>, vector<1x8x64xbf16>,
    return
  }
  func.func @transform_0(%arg0: i32) -> (i32, i32, i32) {
    %c0_i32 = arith.constant 0 : i32
    %c0_i32_0 = arith.constant 0 : i32
    %c0_i32_1 = arith.constant 0 : i32
    return %arg0, %c0_i32, %c0_i32_0 : i32, i32, i32
  }
  func.func @transform_1(%arg0: i32) -> (i32, i32) {
    %c0_i32 = arith.constant 0 : i32
    %c0_i32_0 = arith.constant 0 : i32
    %c0_i32_1 = arith.constant 0 : i32
    return %c0_i32, %c0_i32_0 : i32, i32
  }
  func.func @transform_2(%arg0: i32) -> (i32, i32) {
    %c0_i32 = arith.constant 0 : i32
    %c0_i32_0 = arith.constant 0 : i32
    %c0_i32_1 = arith.constant 0 : i32
    return %c0_i32, %c0_i32_0 : i32, i32
  }
  func.func @transform_3(%arg0: i32) -> (i32, i32) {
    %c0_i32 = arith.constant 0 : i32
    %c0_i32_0 = arith.constant 0 : i32
    %c0_i32_1 = arith.constant 0 : i32
    return %c0_i32, %c0_i32_0 : i32, i32
  }
  func.func @transform_4(%arg0: i32) -> (i32, i32) {
    %c0_i32 = arith.constant 0 : i32
    %c0_i32_0 = arith.constant 0 : i32
    %c0_i32_1 = arith.constant 0 : i32
    return %c0_i32, %c0_i32_0 : i32, i32
  }
  func.func @transform_5(%arg0: i32) -> (i32, i32) {
    %c0_i32 = arith.constant 0 : i32
    %c0_i32_0 = arith.constant 0 : i32
    %c0_i32_1 = arith.constant 0 : i32
    return %c0_i32, %c0_i32_0 : i32, i32
  }
  func.func @transform_6(%arg0: i32) -> (i32, i32) {
    %c0_i32 = arith.constant 0 : i32
    %c0_i32_0 = arith.constant 0 : i32
    %c0_i32_1 = arith.constant 0 : i32
    return %c0_i32, %c0_i32_0 : i32, i32
  }
  func.func @transform_7(%arg0: i32) -> (i32, i32) {
    %c0_i32 = arith.constant 0 : i32
    %c0_i32_0 = arith.constant 0 : i32
    %c0_i32_1 = arith.constant 0 : i32
    return %c0_i32, %c0_i32_0 : i32, i32
  }
  func.func @transform_8(%arg0: i32) -> (i32, i32) {
    %c0_i32 = arith.constant 0 : i32
    %c0_i32_0 = arith.constant 0 : i32
    %c0_i32_1 = arith.constant 0 : i32
    return %c0_i32, %c0_i32_0 : i32, i32
  }
  func.func @transform_9(%arg0: i32) -> (i32, i32) {
    %c0_i32 = arith.constant 0 : i32
    %c0_i32_0 = arith.constant 0 : i32
    %c0_i32_1 = arith.constant 0 : i32
    return %c0_i32, %c0_i32_0 : i32, i32
  }
  func.func @transform_10(%arg0: i32) -> (i32, i32) {
    %c0_i32 = arith.constant 0 : i32
    %c0_i32_0 = arith.constant 0 : i32
    %c0_i32_1 = arith.constant 0 : i32
    return %c0_i32, %c0_i32_0 : i32, i32
  }
  func.func @transform_11(%arg0: i32) -> (i32, i32) {
    %c0_i32 = arith.constant 0 : i32
    %c0_i32_0 = arith.constant 0 : i32
    %c0_i32_1 = arith.constant 0 : i32
    return %c0_i32, %c0_i32_0 : i32, i32
  }
  func.func @transform_12(%arg0: i32) -> (i32, i32) {
    %c0_i32 = arith.constant 0 : i32
    %c0_i32_0 = arith.constant 0 : i32
    %c0_i32_1 = arith.constant 0 : i32
    return %c0_i32, %c0_i32_0 : i32, i32
  }
  func.func @transform_13(%arg0: i32) -> (i32, i32) {
    %c0_i32 = arith.constant 0 : i32
    %c0_i32_0 = arith.constant 0 : i32
    %c0_i32_1 = arith.constant 0 : i32
    return %c0_i32, %c0_i32_0 : i32, i32
  }
  func.func @transform_14(%arg0: i32) -> (i32, i32, i32) {
    %c0_i32 = arith.constant 0 : i32
    %c0_i32_0 = arith.constant 0 : i32
    %c0_i32_1 = arith.constant 0 : i32
    return %arg0, %c0_i32, %c0_i32_0 : i32, i32, i32
  }
}

module attributes {stable_mosaic.version = 11 : i64} {
  func.func @_res_block_kernel(%arg0: i32, %arg1: memref<1x8x64xbf16, #tpu.memory_space<vmem>>, %arg2: memref<8x8xf32, #tpu.memory_space<vmem>>, %arg3: memref<1x64xf32, #tpu.memory_space<vmem>>, %arg4: memref<1x64xf32, #tpu.memory_space<vmem>>, %arg5: memref<1x64xf32, #tpu.memory_space<vmem>>, %arg6: memref<1x64xf32, #tpu.memory_space<vmem>>, %arg7: memref<192x64xbf16, #tpu.memory_space<vmem>>, %arg8: memref<1x192xf32, #tpu.memory_space<vmem>>, %arg9: memref<64x64xbf16, #tpu.memory_space<vmem>>, %arg10: memref<1x64xf32, #tpu.memory_space<vmem>>, %arg11: memref<256x64xbf16, #tpu.memory_space<vmem>>, %arg12: memref<1x256xf32, #tpu.memory_space<vmem>>, %arg13: memref<64x256xbf16, #tpu.memory_space<vmem>>, %arg14: memref<1x64xf32, #tpu.memory_space<vmem>>, %arg15: memref<1x8x64xbf16, #tpu.memory_space<vmem>>, %arg16: memref<3x4x8x16xbf16, #tpu.memory_space<vmem>>, %arg17: memref<8x64xbf16, #tpu.memory_space<vmem>>) attributes {dimension_semantics = [#tpu.dimension_semantics<parallel>], iteration_bounds = array<i64: 4>, scalar_prefetch = 0 : i64, scratch_operands = 2 : i64, tpu.core_type = #tpu.core_type<tc>, window_params = [{transform_indices = @transform_0, window_bounds = array<i64: 1, 8, 64>}, {pipeline_mode = #tpu.pipeline_mode<synchronous>, transform_indices = @transform_1, window_bounds = array<i64: 8, 8>}, {pipeline_mode = #tpu.pipeline_mode<synchronous>, transform_indices = @transform_2, window_bounds = array<i64: 1, 64>}, {pipeline_mode = #tpu.pipeline_mode<synchronous>, transform_indices = @transform_3, window_bounds = array<i64: 1, 64>}, {pipeline_mode = #tpu.pipeline_mode<synchronous>, transform_indices = @transform_4, window_bounds = array<i64: 1, 64>}, {pipeline_mode = #tpu.pipeline_mode<synchronous>, transform_indices = @transform_5, window_bounds = array<i64: 1, 64>}, {pipeline_mode = #tpu.pipeline_mode<synchronous>, transform_indices = @transform_6, window_bounds = array<i64: 192, 64>}, {pipeline_mode = #tpu.pipeline_mode<synchronous>, transform_indices = @transform_7, window_bounds = array<i64: 1, 192>}, {pipeline_mode = #tpu.pipeline_mode<synchronous>, transform_indices = @transform_8, window_bounds = array<i64: 64, 64>}, {pipeline_mode = #tpu.pipeline_mode<synchronous>, transform_indices = @transform_9, window_bounds = array<i64: 1, 64>}, {pipeline_mode = #tpu.pipeline_mode<synchronous>, transform_indices = @transform_10, window_bounds = array<i64: 256, 64>}, {pipeline_mode = #tpu.pipeline_mode<synchronous>, transform_indices = @transform_11, window_bounds = array<i64: 1, 256>}, {pipeline_mode = #tpu.pipeline_mode<synchronous>, transform_indices = @transform_12, window_bounds = array<i64: 64, 256>}, {pipeline_mode = #tpu.pipeline_mode<synchronous>, transform_indices = @transform_13, window_bounds = array<i64: 1, 64>}, {transform_indices = @transform_14, window_bounds = array<i64: 1, 8, 64>}]} {
    %c0 = arith.constant 0 : index
    %c0_0 = arith.constant 0 : index
    %c0_1 = arith.constant 0 : index
    %0 = vector.load %arg1[%c0, %c0_0, %c0_1] : memref<1x8x64xbf16, #tpu.memory_space<vmem>>, vector<1x8x64xbf16>
    %1 = vector.shape_cast %0 : vector<1x8x64xbf16> to vector<8x64xbf16>
    %2 = arith.extf %1 : vector<8x64xbf16> to vector<8x64xf32>
    %c0_2 = arith.constant 0 : index
    %c0_3 = arith.constant 0 : index
    %3 = vector.load %arg3[%c0_2, %c0_3] : memref<1x64xf32, #tpu.memory_space<vmem>>, vector<1x64xf32>
    %c0_4 = arith.constant 0 : index
    %c0_5 = arith.constant 0 : index
    %4 = vector.load %arg4[%c0_4, %c0_5] : memref<1x64xf32, #tpu.memory_space<vmem>>, vector<1x64xf32>
    %cst = arith.constant dense<0.000000e+00> : vector<8xf32>
    %5 = vector.multi_reduction <add>, %2, %cst [1] : vector<8x64xf32> to vector<8xf32>
    %6 = vector.shape_cast %5 : vector<8xf32> to vector<8x1xf32>
    %cst_6 = arith.constant 6.400000e+01 : f32
    %7 = vector.broadcast %cst_6 : f32 to vector<8x1xf32>
    %8 = arith.divf %6, %7 : vector<8x1xf32>
    %9 = vector.broadcast %8 : vector<8x1xf32> to vector<8x64xf32>
    %10 = arith.subf %2, %9 : vector<8x64xf32>
    %11 = arith.mulf %10, %10 : vector<8x64xf32>
    %cst_7 = arith.constant dense<0.000000e+00> : vector<8xf32>
    %12 = vector.multi_reduction <add>, %11, %cst_7 [1] : vector<8x64xf32> to vector<8xf32>
    %13 = vector.shape_cast %12 : vector<8xf32> to vector<8x1xf32>
    %cst_8 = arith.constant 6.400000e+01 : f32
    %14 = vector.broadcast %cst_8 : f32 to vector<8x1xf32>
    %15 = arith.divf %13, %14 : vector<8x1xf32>
    %16 = vector.broadcast %8 : vector<8x1xf32> to vector<8x64xf32>
    %17 = arith.subf %2, %16 : vector<8x64xf32>
    %cst_9 = arith.constant 9.99999974E-6 : f32
    %18 = vector.broadcast %cst_9 : f32 to vector<8x1xf32>
    %19 = arith.addf %15, %18 : vector<8x1xf32>
    %20 = math.rsqrt %19 : vector<8x1xf32>
    %21 = vector.broadcast %20 : vector<8x1xf32> to vector<8x64xf32>
    %22 = arith.mulf %17, %21 : vector<8x64xf32>
    %23 = vector.broadcast %3 : vector<1x64xf32> to vector<8x64xf32>
    %24 = arith.mulf %22, %23 : vector<8x64xf32>
    %25 = vector.broadcast %4 : vector<1x64xf32> to vector<8x64xf32>
    %26 = arith.addf %24, %25 : vector<8x64xf32>
    %c0_10 = arith.constant 0 : index
    %c0_11 = arith.constant 0 : index
    %27 = vector.load %arg7[%c0_10, %c0_11] : memref<192x64xbf16, #tpu.memory_space<vmem>>, vector<192x64xbf16>
    %28 = arith.truncf %26 : vector<8x64xf32> to vector<8x64xbf16>
    %cst_12 = arith.constant dense<0.000000e+00> : vector<8x192xf32>
    %29 = tpu.matmul %28, %27, %cst_12 {dimension_numbers = #tpu.dot_dimension_numbers<[1], [1], [0], [0], [0, 0, 1, 0], [], []>} : vector<8x64xbf16>, vector<192x64xbf16>, vector<8x192xf32> -> vector<8x192xf32>
    %c0_13 = arith.constant 0 : index
    %c0_14 = arith.constant 0 : index
    %30 = vector.load %arg8[%c0_13, %c0_14] : memref<1x192xf32, #tpu.memory_space<vmem>>, vector<1x192xf32>
    %31 = vector.broadcast %30 : vector<1x192xf32> to vector<8x192xf32>
    %32 = arith.addf %29, %31 : vector<8x192xf32>
    %33 = arith.truncf %32 : vector<8x192xf32> to vector<8x192xbf16>
    %34 = vector.extract_strided_slice %33 {offsets = [0, 0], sizes = [8, 16], strides = [1, 1]} : vector<8x192xbf16> to vector<8x16xbf16>
    %c0_15 = arith.constant 0 : index
    %c0_16 = arith.constant 0 : index
    %c0_17 = arith.constant 0 : index
    %c0_18 = arith.constant 0 : index
    %35 = vector.load %arg16[%c0_15, %c0_16, %c0_17, %c0_18] : memref<3x4x8x16xbf16, #tpu.memory_space<vmem>>, vector<1x1x8x16xbf16>
    %36 = vector.shape_cast %35 : vector<1x1x8x16xbf16> to vector<8x16xbf16>
    %37 = vector.shape_cast %34 : vector<8x16xbf16> to vector<1x1x8x16xbf16>
    tpu.vector_store %arg16[%c0_15, %c0_16, %c0_17, %c0_18], %37 {strides = array<i32>} : memref<3x4x8x16xbf16, #tpu.memory_space<vmem>>, vector<1x1x8x16xbf16>,
    %38 = vector.extract_strided_slice %33 {offsets = [0, 64], sizes = [8, 16], strides = [1, 1]} : vector<8x192xbf16> to vector<8x16xbf16>
    %c1 = arith.constant 1 : index
    %c0_19 = arith.constant 0 : index
    %c0_20 = arith.constant 0 : index
    %c0_21 = arith.constant 0 : index
    %39 = vector.load %arg16[%c1, %c0_19, %c0_20, %c0_21] : memref<3x4x8x16xbf16, #tpu.memory_space<vmem>>, vector<1x1x8x16xbf16>
    %40 = vector.shape_cast %39 : vector<1x1x8x16xbf16> to vector<8x16xbf16>
    %41 = vector.shape_cast %38 : vector<8x16xbf16> to vector<1x1x8x16xbf16>
    tpu.vector_store %arg16[%c1, %c0_19, %c0_20, %c0_21], %41 {strides = array<i32>} : memref<3x4x8x16xbf16, #tpu.memory_space<vmem>>, vector<1x1x8x16xbf16>,
    %42 = vector.extract_strided_slice %33 {offsets = [0, 128], sizes = [8, 16], strides = [1, 1]} : vector<8x192xbf16> to vector<8x16xbf16>
    %c2 = arith.constant 2 : index
    %c0_22 = arith.constant 0 : index
    %c0_23 = arith.constant 0 : index
    %c0_24 = arith.constant 0 : index
    %43 = vector.load %arg16[%c2, %c0_22, %c0_23, %c0_24] : memref<3x4x8x16xbf16, #tpu.memory_space<vmem>>, vector<1x1x8x16xbf16>
    %44 = vector.shape_cast %43 : vector<1x1x8x16xbf16> to vector<8x16xbf16>
    %45 = vector.shape_cast %42 : vector<8x16xbf16> to vector<1x1x8x16xbf16>
    tpu.vector_store %arg16[%c2, %c0_22, %c0_23, %c0_24], %45 {strides = array<i32>} : memref<3x4x8x16xbf16, #tpu.memory_space<vmem>>, vector<1x1x8x16xbf16>,
    %46 = vector.extract_strided_slice %33 {offsets = [0, 16], sizes = [8, 16], strides = [1, 1]} : vector<8x192xbf16> to vector<8x16xbf16>
    %c0_25 = arith.constant 0 : index
    %c1_26 = arith.constant 1 : index
    %c0_27 = arith.constant 0 : index
    %c0_28 = arith.constant 0 : index
    %47 = vector.load %arg16[%c0_25, %c1_26, %c0_27, %c0_28] : memref<3x4x8x16xbf16, #tpu.memory_space<vmem>>, vector<1x1x8x16xbf16>
    %48 = vector.shape_cast %47 : vector<1x1x8x16xbf16> to vector<8x16xbf16>
    %49 = vector.shape_cast %46 : vector<8x16xbf16> to vector<1x1x8x16xbf16>
    tpu.vector_store %arg16[%c0_25, %c1_26, %c0_27, %c0_28], %49 {strides = array<i32>} : memref<3x4x8x16xbf16, #tpu.memory_space<vmem>>, vector<1x1x8x16xbf16>,
    %50 = vector.extract_strided_slice %33 {offsets = [0, 80], sizes = [8, 16], strides = [1, 1]} : vector<8x192xbf16> to vector<8x16xbf16>
    %c1_29 = arith.constant 1 : index
    %c1_30 = arith.constant 1 : index
    %c0_31 = arith.constant 0 : index
    %c0_32 = arith.constant 0 : index
    %51 = vector.load %arg16[%c1_29, %c1_30, %c0_31, %c0_32] : memref<3x4x8x16xbf16, #tpu.memory_space<vmem>>, vector<1x1x8x16xbf16>
    %52 = vector.shape_cast %51 : vector<1x1x8x16xbf16> to vector<8x16xbf16>
    %53 = vector.shape_cast %50 : vector<8x16xbf16> to vector<1x1x8x16xbf16>
    tpu.vector_store %arg16[%c1_29, %c1_30, %c0_31, %c0_32], %53 {strides = array<i32>} : memref<3x4x8x16xbf16, #tpu.memory_space<vmem>>, vector<1x1x8x16xbf16>,
    %54 = vector.extract_strided_slice %33 {offsets = [0, 144], sizes = [8, 16], strides = [1, 1]} : vector<8x192xbf16> to vector<8x16xbf16>
    %c2_33 = arith.constant 2 : index
    %c1_34 = arith.constant 1 : index
    %c0_35 = arith.constant 0 : index
    %c0_36 = arith.constant 0 : index
    %55 = vector.load %arg16[%c2_33, %c1_34, %c0_35, %c0_36] : memref<3x4x8x16xbf16, #tpu.memory_space<vmem>>, vector<1x1x8x16xbf16>
    %56 = vector.shape_cast %55 : vector<1x1x8x16xbf16> to vector<8x16xbf16>
    %57 = vector.shape_cast %54 : vector<8x16xbf16> to vector<1x1x8x16xbf16>
    tpu.vector_store %arg16[%c2_33, %c1_34, %c0_35, %c0_36], %57 {strides = array<i32>} : memref<3x4x8x16xbf16, #tpu.memory_space<vmem>>, vector<1x1x8x16xbf16>,
    %58 = vector.extract_strided_slice %33 {offsets = [0, 32], sizes = [8, 16], strides = [1, 1]} : vector<8x192xbf16> to vector<8x16xbf16>
    %c0_37 = arith.constant 0 : index
    %c2_38 = arith.constant 2 : index
    %c0_39 = arith.constant 0 : index
    %c0_40 = arith.constant 0 : index
    %59 = vector.load %arg16[%c0_37, %c2_38, %c0_39, %c0_40] : memref<3x4x8x16xbf16, #tpu.memory_space<vmem>>, vector<1x1x8x16xbf16>
    %60 = vector.shape_cast %59 : vector<1x1x8x16xbf16> to vector<8x16xbf16>
    %61 = vector.shape_cast %58 : vector<8x16xbf16> to vector<1x1x8x16xbf16>
    tpu.vector_store %arg16[%c0_37, %c2_38, %c0_39, %c0_40], %61 {strides = array<i32>} : memref<3x4x8x16xbf16, #tpu.memory_space<vmem>>, vector<1x1x8x16xbf16>,
    %62 = vector.extract_strided_slice %33 {offsets = [0, 96], sizes = [8, 16], strides = [1, 1]} : vector<8x192xbf16> to vector<8x16xbf16>
    %c1_41 = arith.constant 1 : index
    %c2_42 = arith.constant 2 : index
    %c0_43 = arith.constant 0 : index
    %c0_44 = arith.constant 0 : index
    %63 = vector.load %arg16[%c1_41, %c2_42, %c0_43, %c0_44] : memref<3x4x8x16xbf16, #tpu.memory_space<vmem>>, vector<1x1x8x16xbf16>
    %64 = vector.shape_cast %63 : vector<1x1x8x16xbf16> to vector<8x16xbf16>
    %65 = vector.shape_cast %62 : vector<8x16xbf16> to vector<1x1x8x16xbf16>
    tpu.vector_store %arg16[%c1_41, %c2_42, %c0_43, %c0_44], %65 {strides = array<i32>} : memref<3x4x8x16xbf16, #tpu.memory_space<vmem>>, vector<1x1x8x16xbf16>,
    %66 = vector.extract_strided_slice %33 {offsets = [0, 160], sizes = [8, 16], strides = [1, 1]} : vector<8x192xbf16> to vector<8x16xbf16>
    %c2_45 = arith.constant 2 : index
    %c2_46 = arith.constant 2 : index
    %c0_47 = arith.constant 0 : index
    %c0_48 = arith.constant 0 : index
    %67 = vector.load %arg16[%c2_45, %c2_46, %c0_47, %c0_48] : memref<3x4x8x16xbf16, #tpu.memory_space<vmem>>, vector<1x1x8x16xbf16>
    %68 = vector.shape_cast %67 : vector<1x1x8x16xbf16> to vector<8x16xbf16>
    %69 = vector.shape_cast %66 : vector<8x16xbf16> to vector<1x1x8x16xbf16>
    tpu.vector_store %arg16[%c2_45, %c2_46, %c0_47, %c0_48], %69 {strides = array<i32>} : memref<3x4x8x16xbf16, #tpu.memory_space<vmem>>, vector<1x1x8x16xbf16>,
    %70 = vector.extract_strided_slice %33 {offsets = [0, 48], sizes = [8, 16], strides = [1, 1]} : vector<8x192xbf16> to vector<8x16xbf16>
    %c0_49 = arith.constant 0 : index
    %c3 = arith.constant 3 : index
    %c0_50 = arith.constant 0 : index
    %c0_51 = arith.constant 0 : index
    %71 = vector.load %arg16[%c0_49, %c3, %c0_50, %c0_51] : memref<3x4x8x16xbf16, #tpu.memory_space<vmem>>, vector<1x1x8x16xbf16>
    %72 = vector.shape_cast %71 : vector<1x1x8x16xbf16> to vector<8x16xbf16>
    %73 = vector.shape_cast %70 : vector<8x16xbf16> to vector<1x1x8x16xbf16>
    tpu.vector_store %arg16[%c0_49, %c3, %c0_50, %c0_51], %73 {strides = array<i32>} : memref<3x4x8x16xbf16, #tpu.memory_space<vmem>>, vector<1x1x8x16xbf16>,
    %74 = vector.extract_strided_slice %33 {offsets = [0, 112], sizes = [8, 16], strides = [1, 1]} : vector<8x192xbf16> to vector<8x16xbf16>
    %c1_52 = arith.constant 1 : index
    %c3_53 = arith.constant 3 : index
    %c0_54 = arith.constant 0 : index
    %c0_55 = arith.constant 0 : index
    %75 = vector.load %arg16[%c1_52, %c3_53, %c0_54, %c0_55] : memref<3x4x8x16xbf16, #tpu.memory_space<vmem>>, vector<1x1x8x16xbf16>
    %76 = vector.shape_cast %75 : vector<1x1x8x16xbf16> to vector<8x16xbf16>
    %77 = vector.shape_cast %74 : vector<8x16xbf16> to vector<1x1x8x16xbf16>
    tpu.vector_store %arg16[%c1_52, %c3_53, %c0_54, %c0_55], %77 {strides = array<i32>} : memref<3x4x8x16xbf16, #tpu.memory_space<vmem>>, vector<1x1x8x16xbf16>,
    %78 = vector.extract_strided_slice %33 {offsets = [0, 176], sizes = [8, 16], strides = [1, 1]} : vector<8x192xbf16> to vector<8x16xbf16>
    %c2_56 = arith.constant 2 : index
    %c3_57 = arith.constant 3 : index
    %c0_58 = arith.constant 0 : index
    %c0_59 = arith.constant 0 : index
    %79 = vector.load %arg16[%c2_56, %c3_57, %c0_58, %c0_59] : memref<3x4x8x16xbf16, #tpu.memory_space<vmem>>, vector<1x1x8x16xbf16>
    %80 = vector.shape_cast %79 : vector<1x1x8x16xbf16> to vector<8x16xbf16>
    %81 = vector.shape_cast %78 : vector<8x16xbf16> to vector<1x1x8x16xbf16>
    tpu.vector_store %arg16[%c2_56, %c3_57, %c0_58, %c0_59], %81 {strides = array<i32>} : memref<3x4x8x16xbf16, #tpu.memory_space<vmem>>, vector<1x1x8x16xbf16>,
    %c0_60 = arith.constant 0 : index
    %c0_61 = arith.constant 0 : index
    %c0_62 = arith.constant 0 : index
    %c0_63 = arith.constant 0 : index
    %82 = vector.load %arg16[%c0_60, %c0_61, %c0_62, %c0_63] : memref<3x4x8x16xbf16, #tpu.memory_space<vmem>>, vector<1x4x8x16xbf16>
    %83 = vector.shape_cast %82 : vector<1x4x8x16xbf16> to vector<4x8x16xbf16>
    %c1_64 = arith.constant 1 : index
    %c0_65 = arith.constant 0 : index
    %c0_66 = arith.constant 0 : index
    %c0_67 = arith.constant 0 : index
    %84 = vector.load %arg16[%c1_64, %c0_65, %c0_66, %c0_67] : memref<3x4x8x16xbf16, #tpu.memory_space<vmem>>, vector<1x4x8x16xbf16>
    %85 = vector.shape_cast %84 : vector<1x4x8x16xbf16> to vector<4x8x16xbf16>
    %c2_68 = arith.constant 2 : index
    %c0_69 = arith.constant 0 : index
    %c0_70 = arith.constant 0 : index
    %c0_71 = arith.constant 0 : index
    %86 = vector.load %arg16[%c2_68, %c0_69, %c0_70, %c0_71] : memref<3x4x8x16xbf16, #tpu.memory_space<vmem>>, vector<1x4x8x16xbf16>
    %87 = vector.shape_cast %86 : vector<1x4x8x16xbf16> to vector<4x8x16xbf16>
    "tpu.trace_start"() <{level = 10 : i32, message = "hqc,hkc->hqk"}> : () -> ()
    %cst_72 = arith.constant dense<0.000000e+00> : vector<4x8x8xf32>
    %88 = tpu.matmul %83, %85, %cst_72 {dimension_numbers = #tpu.dot_dimension_numbers<[2], [2], [1], [1], [0, 0, 0, 1, 1, 1], [0], [0]>} : vector<4x8x16xbf16>, vector<4x8x16xbf16>, vector<4x8x8xf32> -> vector<4x8x8xf32>
    "tpu.trace_stop"() : () -> ()
    %cst_73 = arith.constant 2.500000e-01 : f32
    %89 = vector.broadcast %cst_73 : f32 to vector<4x8x8xf32>
    %90 = arith.mulf %88, %89 : vector<4x8x8xf32>
    %c0_74 = arith.constant 0 : index
    %c0_75 = arith.constant 0 : index
    %91 = vector.load %arg2[%c0_74, %c0_75] : memref<8x8xf32, #tpu.memory_space<vmem>>, vector<8x8xf32>
    %92 = vector.shape_cast %91 : vector<8x8xf32> to vector<1x8x8xf32>
    %93 = vector.broadcast %92 : vector<1x8x8xf32> to vector<4x8x8xf32>
    %94 = arith.addf %90, %93 : vector<4x8x8xf32>
    %cst_76 = arith.constant dense<0xFF800000> : vector<4x8xf32>
    %95 = vector.multi_reduction <maximumf>, %94, %cst_76 [2] : vector<4x8x8xf32> to vector<4x8xf32>
    %96 = vector.shape_cast %95 : vector<4x8xf32> to vector<4x8x1xf32>
    %97 = vector.broadcast %96 : vector<4x8x1xf32> to vector<4x8x8xf32>
    %98 = arith.subf %94, %97 : vector<4x8x8xf32>
    %99 = math.exp %98 : vector<4x8x8xf32>
    %cst_77 = arith.constant dense<0.000000e+00> : vector<4x8xf32>
    %100 = vector.multi_reduction <add>, %99, %cst_77 [2] : vector<4x8x8xf32> to vector<4x8xf32>
    %101 = vector.shape_cast %100 : vector<4x8xf32> to vector<4x8x1xf32>
    %102 = tpu.reciprocal %101 {approx = true} : vector<4x8x1xf32> -> vector<4x8x1xf32>
    %103 = vector.broadcast %102 : vector<4x8x1xf32> to vector<4x8x8xf32>
    %104 = arith.mulf %99, %103 : vector<4x8x8xf32>
    %105 = arith.truncf %104 : vector<4x8x8xf32> to vector<4x8x8xbf16>
    "tpu.trace_start"() <{level = 10 : i32, message = "hqk,hkc->hqc"}> : () -> ()
    %cst_78 = arith.constant dense<0.000000e+00> : vector<4x8x16xf32>
    %106 = tpu.matmul %105, %87, %cst_78 {dimension_numbers = #tpu.dot_dimension_numbers<[2], [1], [1], [2], [0, 0, 0, 1, 1, 2], [0], [0]>} : vector<4x8x8xbf16>, vector<4x8x16xbf16>, vector<4x8x16xf32> -> vector<4x8x16xf32>
    "tpu.trace_stop"() : () -> ()
    %107 = vector.extract_strided_slice %106 {offsets = [0, 0, 0], sizes = [1, 8, 16], strides = [1, 1, 1]} : vector<4x8x16xf32> to vector<1x8x16xf32>
    %108 = vector.shape_cast %107 : vector<1x8x16xf32> to vector<8x16xf32>
    %109 = arith.truncf %108 : vector<8x16xf32> to vector<8x16xbf16>
    %c0_79 = arith.constant 0 : index
    %c0_80 = arith.constant 0 : index
    %110 = vector.load %arg17[%c0_79, %c0_80] : memref<8x64xbf16, #tpu.memory_space<vmem>>, vector<8x16xbf16>
    tpu.vector_store %arg17[%c0_79, %c0_80], %109 {strides = array<i32>} : memref<8x64xbf16, #tpu.memory_space<vmem>>, vector<8x16xbf16>,
    %111 = vector.extract_strided_slice %106 {offsets = [1, 0, 0], sizes = [1, 8, 16], strides = [1, 1, 1]} : vector<4x8x16xf32> to vector<1x8x16xf32>
    %112 = vector.shape_cast %111 : vector<1x8x16xf32> to vector<8x16xf32>
    %113 = arith.truncf %112 : vector<8x16xf32> to vector<8x16xbf16>
    %c0_81 = arith.constant 0 : index
    %c16 = arith.constant 16 : index
    %114 = vector.load %arg17[%c0_81, %c16] : memref<8x64xbf16, #tpu.memory_space<vmem>>, vector<8x16xbf16>
    tpu.vector_store %arg17[%c0_81, %c16], %113 {strides = array<i32>} : memref<8x64xbf16, #tpu.memory_space<vmem>>, vector<8x16xbf16>,
    %115 = vector.extract_strided_slice %106 {offsets = [2, 0, 0], sizes = [1, 8, 16], strides = [1, 1, 1]} : vector<4x8x16xf32> to vector<1x8x16xf32>
    %116 = vector.shape_cast %115 : vector<1x8x16xf32> to vector<8x16xf32>
    %117 = arith.truncf %116 : vector<8x16xf32> to vector<8x16xbf16>
    %c0_82 = arith.constant 0 : index
    %c32 = arith.constant 32 : index
    %118 = vector.load %arg17[%c0_82, %c32] : memref<8x64xbf16, #tpu.memory_space<vmem>>, vector<8x16xbf16>
    tpu.vector_store %arg17[%c0_82, %c32], %117 {strides = array<i32>} : memref<8x64xbf16, #tpu.memory_space<vmem>>, vector<8x16xbf16>,
    %119 = vector.extract_strided_slice %106 {offsets = [3, 0, 0], sizes = [1, 8, 16], strides = [1, 1, 1]} : vector<4x8x16xf32> to vector<1x8x16xf32>
    %120 = vector.shape_cast %119 : vector<1x8x16xf32> to vector<8x16xf32>
    %121 = arith.truncf %120 : vector<8x16xf32> to vector<8x16xbf16>
    %c0_83 = arith.constant 0 : index
    %c48 = arith.constant 48 : index
    %122 = vector.load %arg17[%c0_83, %c48] : memref<8x64xbf16, #tpu.memory_space<vmem>>, vector<8x16xbf16>
    tpu.vector_store %arg17[%c0_83, %c48], %121 {strides = array<i32>} : memref<8x64xbf16, #tpu.memory_space<vmem>>, vector<8x16xbf16>,
    %c0_84 = arith.constant 0 : index
    %c0_85 = arith.constant 0 : index
    %123 = vector.load %arg17[%c0_84, %c0_85] : memref<8x64xbf16, #tpu.memory_space<vmem>>, vector<8x64xbf16>
    %c0_86 = arith.constant 0 : index
    %c0_87 = arith.constant 0 : index
    %124 = vector.load %arg9[%c0_86, %c0_87] : memref<64x64xbf16, #tpu.memory_space<vmem>>, vector<64x64xbf16>
    %cst_88 = arith.constant dense<0.000000e+00> : vector<8x64xf32>
    %125 = tpu.matmul %123, %124, %cst_88 {dimension_numbers = #tpu.dot_dimension_numbers<[1], [1], [0], [0], [0, 0, 1, 0], [], []>} : vector<8x64xbf16>, vector<64x64xbf16>, vector<8x64xf32> -> vector<8x64xf32>
    %126 = arith.addf %2, %125 : vector<8x64xf32>
    %c0_89 = arith.constant 0 : index
    %c0_90 = arith.constant 0 : index
    %127 = vector.load %arg10[%c0_89, %c0_90] : memref<1x64xf32, #tpu.memory_space<vmem>>, vector<1x64xf32>
    %128 = vector.broadcast %127 : vector<1x64xf32> to vector<8x64xf32>
    %129 = arith.addf %126, %128 : vector<8x64xf32>
    %c0_91 = arith.constant 0 : index
    %c0_92 = arith.constant 0 : index
    %130 = vector.load %arg5[%c0_91, %c0_92] : memref<1x64xf32, #tpu.memory_space<vmem>>, vector<1x64xf32>
    %c0_93 = arith.constant 0 : index
    %c0_94 = arith.constant 0 : index
    %131 = vector.load %arg6[%c0_93, %c0_94] : memref<1x64xf32, #tpu.memory_space<vmem>>, vector<1x64xf32>
    %cst_95 = arith.constant dense<0.000000e+00> : vector<8xf32>
    %132 = vector.multi_reduction <add>, %129, %cst_95 [1] : vector<8x64xf32> to vector<8xf32>
    %133 = vector.shape_cast %132 : vector<8xf32> to vector<8x1xf32>
    %cst_96 = arith.constant 6.400000e+01 : f32
    %134 = vector.broadcast %cst_96 : f32 to vector<8x1xf32>
    %135 = arith.divf %133, %134 : vector<8x1xf32>
    %136 = vector.broadcast %135 : vector<8x1xf32> to vector<8x64xf32>
    %137 = arith.subf %129, %136 : vector<8x64xf32>
    %138 = arith.mulf %137, %137 : vector<8x64xf32>
    %cst_97 = arith.constant dense<0.000000e+00> : vector<8xf32>
    %139 = vector.multi_reduction <add>, %138, %cst_97 [1] : vector<8x64xf32> to vector<8xf32>
    %140 = vector.shape_cast %139 : vector<8xf32> to vector<8x1xf32>
    %cst_98 = arith.constant 6.400000e+01 : f32
    %141 = vector.broadcast %cst_98 : f32 to vector<8x1xf32>
    %142 = arith.divf %140, %141 : vector<8x1xf32>
    %143 = vector.broadcast %135 : vector<8x1xf32> to vector<8x64xf32>
    %144 = arith.subf %129, %143 : vector<8x64xf32>
    %cst_99 = arith.constant 9.99999974E-6 : f32
    %145 = vector.broadcast %cst_99 : f32 to vector<8x1xf32>
    %146 = arith.addf %142, %145 : vector<8x1xf32>
    %147 = math.rsqrt %146 : vector<8x1xf32>
    %148 = vector.broadcast %147 : vector<8x1xf32> to vector<8x64xf32>
    %149 = arith.mulf %144, %148 : vector<8x64xf32>
    %150 = vector.broadcast %130 : vector<1x64xf32> to vector<8x64xf32>
    %151 = arith.mulf %149, %150 : vector<8x64xf32>
    %152 = vector.broadcast %131 : vector<1x64xf32> to vector<8x64xf32>
    %153 = arith.addf %151, %152 : vector<8x64xf32>
    %c0_100 = arith.constant 0 : index
    %c0_101 = arith.constant 0 : index
    %154 = vector.load %arg11[%c0_100, %c0_101] : memref<256x64xbf16, #tpu.memory_space<vmem>>, vector<256x64xbf16>
    %155 = arith.truncf %153 : vector<8x64xf32> to vector<8x64xbf16>
    %cst_102 = arith.constant dense<0.000000e+00> : vector<8x256xf32>
    %156 = tpu.matmul %155, %154, %cst_102 {dimension_numbers = #tpu.dot_dimension_numbers<[1], [1], [0], [0], [0, 0, 1, 0], [], []>} : vector<8x64xbf16>, vector<256x64xbf16>, vector<8x256xf32> -> vector<8x256xf32>
    %c0_103 = arith.constant 0 : index
    %c0_104 = arith.constant 0 : index
    %157 = vector.load %arg12[%c0_103, %c0_104] : memref<1x256xf32, #tpu.memory_space<vmem>>, vector<1x256xf32>
    %158 = vector.broadcast %157 : vector<1x256xf32> to vector<8x256xf32>
    %159 = arith.addf %156, %158 : vector<8x256xf32>
    %160 = arith.truncf %159 : vector<8x256xf32> to vector<8x256xbf16>
    %cst_105 = arith.constant 1.703130e+00 : bf16
    %161 = vector.broadcast %cst_105 : bf16 to vector<8x256xbf16>
    %162 = arith.mulf %161, %160 : vector<8x256xbf16>
    %163 = arith.negf %162 : vector<8x256xbf16>
    %164 = math.exp %163 : vector<8x256xbf16>
    %cst_106 = arith.constant 1.000000e+00 : bf16
    %165 = vector.broadcast %cst_106 : bf16 to vector<8x256xbf16>
    %166 = arith.addf %165, %164 : vector<8x256xbf16>
    %167 = arith.divf %165, %166 : vector<8x256xbf16>
    %168 = arith.mulf %160, %167 : vector<8x256xbf16>
    %c0_107 = arith.constant 0 : index
    %c0_108 = arith.constant 0 : index
    %169 = vector.load %arg13[%c0_107, %c0_108] : memref<64x256xbf16, #tpu.memory_space<vmem>>, vector<64x256xbf16>
    %cst_109 = arith.constant dense<0.000000e+00> : vector<8x64xf32>
    %170 = tpu.matmul %168, %169, %cst_109 {dimension_numbers = #tpu.dot_dimension_numbers<[1], [1], [0], [0], [0, 0, 1, 0], [], []>} : vector<8x256xbf16>, vector<64x256xbf16>, vector<8x64xf32> -> vector<8x64xf32>
    %171 = arith.addf %129, %170 : vector<8x64xf32>
    %c0_110 = arith.constant 0 : index
    %c0_111 = arith.constant 0 : index
    %172 = vector.load %arg14[%c0_110, %c0_111] : memref<1x64xf32, #tpu.memory_space<vmem>>, vector<1x64xf32>
    %173 = vector.broadcast %172 : vector<1x64xf32> to vector<8x64xf32>
    %174 = arith.addf %171, %173 : vector<8x64xf32>
    %175 = arith.truncf %174 : vector<8x64xf32> to vector<8x64xbf16>
    %c0_112 = arith.constant 0 : index
    %c0_113 = arith.constant 0 : index
    %c0_114 = arith.constant 0 : index
    %176 = vector.load %arg15[%c0_112, %c0_113, %c0_114] : memref<1x8x64xbf16, #tpu.memory_space<vmem>>, vector<1x8x64xbf16>
    %177 = vector.shape_cast %176 : vector<1x8x64xbf16> to vector<8x64xbf16>
    %178 = vector.shape_cast %175 : vector<8x64xbf16> to vector<1x8x64xbf16>
    tpu.vector_store %arg15[%c0_112, %c0_113, %c0_114], %178 {strides = array<i32>} : memref<1x8x64xbf16, #tpu.memory_space<vmem>>, vector<1x8x64xbf16>,
    return
  }
  func.func @transform_0(%arg0: i32) -> (i32, i32, i32) {
    %c0_i32 = arith.constant 0 : i32
    %c0_i32_0 = arith.constant 0 : i32
    %c0_i32_1 = arith.constant 0 : i32
    return %arg0, %c0_i32, %c0_i32_0 : i32, i32, i32
  }
  func.func @transform_1(%arg0: i32) -> (i32, i32) {
    %c0_i32 = arith.constant 0 : i32
    %c0_i32_0 = arith.constant 0 : i32
    %c0_i32_1 = arith.constant 0 : i32
    return %c0_i32, %c0_i32_0 : i32, i32
  }
  func.func @transform_2(%arg0: i32) -> (i32, i32) {
    %c0_i32 = arith.constant 0 : i32
    %c0_i32_0 = arith.constant 0 : i32
    %c0_i32_1 = arith.constant 0 : i32
    return %c0_i32, %c0_i32_0 : i32, i32
  }
  func.func @transform_3(%arg0: i32) -> (i32, i32) {
    %c0_i32 = arith.constant 0 : i32
    %c0_i32_0 = arith.constant 0 : i32
    %c0_i32_1 = arith.constant 0 : i32
    return %c0_i32, %c0_i32_0 : i32, i32
  }
  func.func @transform_4(%arg0: i32) -> (i32, i32) {
    %c0_i32 = arith.constant 0 : i32
    %c0_i32_0 = arith.constant 0 : i32
    %c0_i32_1 = arith.constant 0 : i32
    return %c0_i32, %c0_i32_0 : i32, i32
  }
  func.func @transform_5(%arg0: i32) -> (i32, i32) {
    %c0_i32 = arith.constant 0 : i32
    %c0_i32_0 = arith.constant 0 : i32
    %c0_i32_1 = arith.constant 0 : i32
    return %c0_i32, %c0_i32_0 : i32, i32
  }
  func.func @transform_6(%arg0: i32) -> (i32, i32) {
    %c0_i32 = arith.constant 0 : i32
    %c0_i32_0 = arith.constant 0 : i32
    %c0_i32_1 = arith.constant 0 : i32
    return %c0_i32, %c0_i32_0 : i32, i32
  }
  func.func @transform_7(%arg0: i32) -> (i32, i32) {
    %c0_i32 = arith.constant 0 : i32
    %c0_i32_0 = arith.constant 0 : i32
    %c0_i32_1 = arith.constant 0 : i32
    return %c0_i32, %c0_i32_0 : i32, i32
  }
  func.func @transform_8(%arg0: i32) -> (i32, i32) {
    %c0_i32 = arith.constant 0 : i32
    %c0_i32_0 = arith.constant 0 : i32
    %c0_i32_1 = arith.constant 0 : i32
    return %c0_i32, %c0_i32_0 : i32, i32
  }
  func.func @transform_9(%arg0: i32) -> (i32, i32) {
    %c0_i32 = arith.constant 0 : i32
    %c0_i32_0 = arith.constant 0 : i32
    %c0_i32_1 = arith.constant 0 : i32
    return %c0_i32, %c0_i32_0 : i32, i32
  }
  func.func @transform_10(%arg0: i32) -> (i32, i32) {
    %c0_i32 = arith.constant 0 : i32
    %c0_i32_0 = arith.constant 0 : i32
    %c0_i32_1 = arith.constant 0 : i32
    return %c0_i32, %c0_i32_0 : i32, i32
  }
  func.func @transform_11(%arg0: i32) -> (i32, i32) {
    %c0_i32 = arith.constant 0 : i32
    %c0_i32_0 = arith.constant 0 : i32
    %c0_i32_1 = arith.constant 0 : i32
    return %c0_i32, %c0_i32_0 : i32, i32
  }
  func.func @transform_12(%arg0: i32) -> (i32, i32) {
    %c0_i32 = arith.constant 0 : i32
    %c0_i32_0 = arith.constant 0 : i32
    %c0_i32_1 = arith.constant 0 : i32
    return %c0_i32, %c0_i32_0 : i32, i32
  }
  func.func @transform_13(%arg0: i32) -> (i32, i32) {
    %c0_i32 = arith.constant 0 : i32
    %c0_i32_0 = arith.constant 0 : i32
    %c0_i32_1 = arith.constant 0 : i32
    return %c0_i32, %c0_i32_0 : i32, i32
  }
  func.func @transform_14(%arg0: i32) -> (i32, i32, i32) {
    %c0_i32 = arith.constant 0 : i32
    %c0_i32_0 = arith.constant 0 : i32
    %c0_i32_1 = arith.constant 0 : i32
    return %arg0, %c0_i32, %c0_i32_0 : i32, i32, i32
  }
}

module attributes {stable_mosaic.version = 11 : i64} {
  func.func @kernel(%arg0: i32, %arg1: memref<8x64xbf16, #tpu.memory_space<vmem>>, %arg2: memref<1x64xf32, #tpu.memory_space<vmem>>, %arg3: memref<1x64xf32, #tpu.memory_space<vmem>>, %arg4: memref<64x512xbf16, #tpu.memory_space<vmem>>, %arg5: memref<8x512xf32, #tpu.memory_space<vmem>>) attributes {dimension_semantics = [#tpu.dimension_semantics<parallel>], iteration_bounds = array<i64: 1>, scalar_prefetch = 0 : i64, scratch_operands = 0 : i64, tpu.core_type = #tpu.core_type<tc>, window_params = [{transform_indices = @transform_0, window_bounds = array<i64: 8, 64>}, {pipeline_mode = #tpu.pipeline_mode<synchronous>, transform_indices = @transform_1, window_bounds = array<i64: 1, 64>}, {pipeline_mode = #tpu.pipeline_mode<synchronous>, transform_indices = @transform_2, window_bounds = array<i64: 1, 64>}, {pipeline_mode = #tpu.pipeline_mode<synchronous>, transform_indices = @transform_3, window_bounds = array<i64: 64, 512>}, {transform_indices = @transform_4, window_bounds = array<i64: 8, 512>}]} {
    %c0 = arith.constant 0 : index
    %c0_0 = arith.constant 0 : index
    %0 = vector.load %arg1[%c0, %c0_0] : memref<8x64xbf16, #tpu.memory_space<vmem>>, vector<8x64xbf16>
    %1 = arith.extf %0 : vector<8x64xbf16> to vector<8x64xf32>
    %cst = arith.constant dense<0.000000e+00> : vector<8xf32>
    %2 = vector.multi_reduction <add>, %1, %cst [1] : vector<8x64xf32> to vector<8xf32>
    %3 = vector.shape_cast %2 : vector<8xf32> to vector<8x1xf32>
    %cst_1 = arith.constant 6.400000e+01 : f32
    %4 = vector.broadcast %cst_1 : f32 to vector<8x1xf32>
    %5 = arith.divf %3, %4 : vector<8x1xf32>
    %6 = vector.broadcast %5 : vector<8x1xf32> to vector<8x64xf32>
    %7 = arith.subf %1, %6 : vector<8x64xf32>
    %8 = arith.mulf %7, %7 : vector<8x64xf32>
    %cst_2 = arith.constant dense<0.000000e+00> : vector<8xf32>
    %9 = vector.multi_reduction <add>, %8, %cst_2 [1] : vector<8x64xf32> to vector<8xf32>
    %10 = vector.shape_cast %9 : vector<8xf32> to vector<8x1xf32>
    %cst_3 = arith.constant 6.400000e+01 : f32
    %11 = vector.broadcast %cst_3 : f32 to vector<8x1xf32>
    %12 = arith.divf %10, %11 : vector<8x1xf32>
    %13 = vector.broadcast %5 : vector<8x1xf32> to vector<8x64xf32>
    %14 = arith.subf %1, %13 : vector<8x64xf32>
    %cst_4 = arith.constant 9.99999974E-6 : f32
    %15 = vector.broadcast %cst_4 : f32 to vector<8x1xf32>
    %16 = arith.addf %12, %15 : vector<8x1xf32>
    %17 = math.rsqrt %16 : vector<8x1xf32>
    %18 = vector.broadcast %17 : vector<8x1xf32> to vector<8x64xf32>
    %19 = arith.mulf %14, %18 : vector<8x64xf32>
    %c0_5 = arith.constant 0 : index
    %c0_6 = arith.constant 0 : index
    %20 = vector.load %arg2[%c0_5, %c0_6] : memref<1x64xf32, #tpu.memory_space<vmem>>, vector<1x64xf32>
    %21 = vector.broadcast %20 : vector<1x64xf32> to vector<8x64xf32>
    %22 = arith.mulf %19, %21 : vector<8x64xf32>
    %c0_7 = arith.constant 0 : index
    %c0_8 = arith.constant 0 : index
    %23 = vector.load %arg3[%c0_7, %c0_8] : memref<1x64xf32, #tpu.memory_space<vmem>>, vector<1x64xf32>
    %24 = vector.broadcast %23 : vector<1x64xf32> to vector<8x64xf32>
    %25 = arith.addf %22, %24 : vector<8x64xf32>
    %26 = arith.truncf %25 : vector<8x64xf32> to vector<8x64xbf16>
    %c0_9 = arith.constant 0 : index
    %c0_10 = arith.constant 0 : index
    %27 = vector.load %arg4[%c0_9, %c0_10] : memref<64x512xbf16, #tpu.memory_space<vmem>>, vector<64x512xbf16>
    %cst_11 = arith.constant dense<0.000000e+00> : vector<8x512xf32>
    %28 = tpu.matmul %26, %27, %cst_11 {dimension_numbers = #tpu.dot_dimension_numbers<[1], [0], [0], [1], [0, 0, 1, 1], [], []>} : vector<8x64xbf16>, vector<64x512xbf16>, vector<8x512xf32> -> vector<8x512xf32>
    %c0_12 = arith.constant 0 : index
    %c0_13 = arith.constant 0 : index
    %29 = vector.load %arg5[%c0_12, %c0_13] : memref<8x512xf32, #tpu.memory_space<vmem>>, vector<8x512xf32>
    tpu.vector_store %arg5[%c0_12, %c0_13], %28 {strides = array<i32>} : memref<8x512xf32, #tpu.memory_space<vmem>>, vector<8x512xf32>,
    return
  }
  func.func @transform_0(%arg0: i32) -> (i32, i32) {
    %c0_i32 = arith.constant 0 : i32
    %c0_i32_0 = arith.constant 0 : i32
    return %arg0, %c0_i32 : i32, i32
  }
  func.func @transform_1(%arg0: i32) -> (i32, i32) {
    %c0_i32 = arith.constant 0 : i32
    %c0_i32_0 = arith.constant 0 : i32
    %c0_i32_1 = arith.constant 0 : i32
    return %c0_i32, %c0_i32_0 : i32, i32
  }
  func.func @transform_2(%arg0: i32) -> (i32, i32) {
    %c0_i32 = arith.constant 0 : i32
    %c0_i32_0 = arith.constant 0 : i32
    %c0_i32_1 = arith.constant 0 : i32
    return %c0_i32, %c0_i32_0 : i32, i32
  }
  func.func @transform_3(%arg0: i32) -> (i32, i32) {
    %c0_i32 = arith.constant 0 : i32
    %c0_i32_0 = arith.constant 0 : i32
    %c0_i32_1 = arith.constant 0 : i32
    return %c0_i32, %c0_i32_0 : i32, i32
  }
  func.func @transform_4(%arg0: i32) -> (i32, i32) {
    %c0_i32 = arith.constant 0 : i32
    %c0_i32_0 = arith.constant 0 : i32
    return %arg0, %c0_i32 : i32, i32
  }
}

module attributes {stable_mosaic.version = 11 : i64} {
  func.func @kernel(%arg0: i32, %arg1: memref<8x192xf32, #tpu.memory_space<vmem>>, %arg2: memref<64x192xbf16, #tpu.memory_space<vmem>>, %arg3: memref<8x64xf32, #tpu.memory_space<vmem>>) attributes {dimension_semantics = [#tpu.dimension_semantics<parallel>], iteration_bounds = array<i64: 1>, scalar_prefetch = 0 : i64, scratch_operands = 0 : i64, tpu.core_type = #tpu.core_type<tc>, window_params = [{transform_indices = @transform_0, window_bounds = array<i64: 8, 192>}, {pipeline_mode = #tpu.pipeline_mode<synchronous>, transform_indices = @transform_1, window_bounds = array<i64: 64, 192>}, {transform_indices = @transform_2, window_bounds = array<i64: 8, 64>}]} {
    %c0 = arith.constant 0 : index
    %c0_0 = arith.constant 0 : index
    %0 = vector.load %arg1[%c0, %c0_0] : memref<8x192xf32, #tpu.memory_space<vmem>>, vector<8x192xf32>
    %1 = arith.truncf %0 : vector<8x192xf32> to vector<8x192xbf16>
    %c0_1 = arith.constant 0 : index
    %c0_2 = arith.constant 0 : index
    %2 = vector.load %arg2[%c0_1, %c0_2] : memref<64x192xbf16, #tpu.memory_space<vmem>>, vector<64x192xbf16>
    %cst = arith.constant dense<0.000000e+00> : vector<8x64xf32>
    %3 = tpu.matmul %1, %2, %cst {dimension_numbers = #tpu.dot_dimension_numbers<[1], [1], [0], [0], [0, 0, 1, 0], [], []>} : vector<8x192xbf16>, vector<64x192xbf16>, vector<8x64xf32> -> vector<8x64xf32>
    %c0_3 = arith.constant 0 : index
    %c0_4 = arith.constant 0 : index
    %4 = vector.load %arg3[%c0_3, %c0_4] : memref<8x64xf32, #tpu.memory_space<vmem>>, vector<8x64xf32>
    tpu.vector_store %arg3[%c0_3, %c0_4], %3 {strides = array<i32>} : memref<8x64xf32, #tpu.memory_space<vmem>>, vector<8x64xf32>,
    return
  }
  func.func @transform_0(%arg0: i32) -> (i32, i32) {
    %c0_i32 = arith.constant 0 : i32
    %c0_i32_0 = arith.constant 0 : i32
    return %arg0, %c0_i32 : i32, i32
  }
  func.func @transform_1(%arg0: i32) -> (i32, i32) {
    %c0_i32 = arith.constant 0 : i32
    %c0_i32_0 = arith.constant 0 : i32
    %c0_i32_1 = arith.constant 0 : i32
    return %c0_i32, %c0_i32_0 : i32, i32
  }
  func.func @transform_2(%arg0: i32) -> (i32, i32) {
    %c0_i32 = arith.constant 0 : i32
    %c0_i32_0 = arith.constant 0 : i32
    return %arg0, %c0_i32 : i32, i32
  }
}

module attributes {stable_mosaic.version = 11 : i64} {
  func.func @_res_block_kernel(%arg0: i32, %arg1: memref<1x5x64xbf16, #tpu.memory_space<vmem>>, %arg2: memref<1x64xf32, #tpu.memory_space<vmem>>, %arg3: memref<1x64xf32, #tpu.memory_space<vmem>>, %arg4: memref<1x64xf32, #tpu.memory_space<vmem>>, %arg5: memref<1x64xf32, #tpu.memory_space<vmem>>, %arg6: memref<192x64xbf16, #tpu.memory_space<vmem>>, %arg7: memref<1x192xf32, #tpu.memory_space<vmem>>, %arg8: memref<64x64xbf16, #tpu.memory_space<vmem>>, %arg9: memref<1x64xf32, #tpu.memory_space<vmem>>, %arg10: memref<256x64xbf16, #tpu.memory_space<vmem>>, %arg11: memref<1x256xf32, #tpu.memory_space<vmem>>, %arg12: memref<64x256xbf16, #tpu.memory_space<vmem>>, %arg13: memref<1x64xf32, #tpu.memory_space<vmem>>, %arg14: memref<1x5x64xbf16, #tpu.memory_space<vmem>>, %arg15: memref<3x4x5x16xbf16, #tpu.memory_space<vmem>>, %arg16: memref<5x64xbf16, #tpu.memory_space<vmem>>) attributes {dimension_semantics = [#tpu.dimension_semantics<parallel>], iteration_bounds = array<i64: 2>, scalar_prefetch = 0 : i64, scratch_operands = 2 : i64, tpu.core_type = #tpu.core_type<tc>, window_params = [{transform_indices = @transform_0, window_bounds = array<i64: 1, 5, 64>}, {pipeline_mode = #tpu.pipeline_mode<synchronous>, transform_indices = @transform_1, window_bounds = array<i64: 1, 64>}, {pipeline_mode = #tpu.pipeline_mode<synchronous>, transform_indices = @transform_2, window_bounds = array<i64: 1, 64>}, {pipeline_mode = #tpu.pipeline_mode<synchronous>, transform_indices = @transform_3, window_bounds = array<i64: 1, 64>}, {pipeline_mode = #tpu.pipeline_mode<synchronous>, transform_indices = @transform_4, window_bounds = array<i64: 1, 64>}, {pipeline_mode = #tpu.pipeline_mode<synchronous>, transform_indices = @transform_5, window_bounds = array<i64: 192, 64>}, {pipeline_mode = #tpu.pipeline_mode<synchronous>, transform_indices = @transform_6, window_bounds = array<i64: 1, 192>}, {pipeline_mode = #tpu.pipeline_mode<synchronous>, transform_indices = @transform_7, window_bounds = array<i64: 64, 64>}, {pipeline_mode = #tpu.pipeline_mode<synchronous>, transform_indices = @transform_8, window_bounds = array<i64: 1, 64>}, {pipeline_mode = #tpu.pipeline_mode<synchronous>, transform_indices = @transform_9, window_bounds = array<i64: 256, 64>}, {pipeline_mode = #tpu.pipeline_mode<synchronous>, transform_indices = @transform_10, window_bounds = array<i64: 1, 256>}, {pipeline_mode = #tpu.pipeline_mode<synchronous>, transform_indices = @transform_11, window_bounds = array<i64: 64, 256>}, {pipeline_mode = #tpu.pipeline_mode<synchronous>, transform_indices = @transform_12, window_bounds = array<i64: 1, 64>}, {transform_indices = @transform_13, window_bounds = array<i64: 1, 5, 64>}]} {
    %c0 = arith.constant 0 : index
    %c0_0 = arith.constant 0 : index
    %c0_1 = arith.constant 0 : index
    %0 = vector.load %arg1[%c0, %c0_0, %c0_1] : memref<1x5x64xbf16, #tpu.memory_space<vmem>>, vector<1x5x64xbf16>
    %1 = vector.shape_cast %0 : vector<1x5x64xbf16> to vector<5x64xbf16>
    %2 = arith.extf %1 : vector<5x64xbf16> to vector<5x64xf32>
    %c0_2 = arith.constant 0 : index
    %c0_3 = arith.constant 0 : index
    %3 = vector.load %arg2[%c0_2, %c0_3] : memref<1x64xf32, #tpu.memory_space<vmem>>, vector<1x64xf32>
    %c0_4 = arith.constant 0 : index
    %c0_5 = arith.constant 0 : index
    %4 = vector.load %arg3[%c0_4, %c0_5] : memref<1x64xf32, #tpu.memory_space<vmem>>, vector<1x64xf32>
    %cst = arith.constant dense<0.000000e+00> : vector<5xf32>
    %5 = vector.multi_reduction <add>, %2, %cst [1] : vector<5x64xf32> to vector<5xf32>
    %6 = vector.shape_cast %5 : vector<5xf32> to vector<5x1xf32>
    %cst_6 = arith.constant 6.400000e+01 : f32
    %7 = vector.broadcast %cst_6 : f32 to vector<5x1xf32>
    %8 = arith.divf %6, %7 : vector<5x1xf32>
    %9 = vector.broadcast %8 : vector<5x1xf32> to vector<5x64xf32>
    %10 = arith.subf %2, %9 : vector<5x64xf32>
    %11 = arith.mulf %10, %10 : vector<5x64xf32>
    %cst_7 = arith.constant dense<0.000000e+00> : vector<5xf32>
    %12 = vector.multi_reduction <add>, %11, %cst_7 [1] : vector<5x64xf32> to vector<5xf32>
    %13 = vector.shape_cast %12 : vector<5xf32> to vector<5x1xf32>
    %cst_8 = arith.constant 6.400000e+01 : f32
    %14 = vector.broadcast %cst_8 : f32 to vector<5x1xf32>
    %15 = arith.divf %13, %14 : vector<5x1xf32>
    %16 = vector.broadcast %8 : vector<5x1xf32> to vector<5x64xf32>
    %17 = arith.subf %2, %16 : vector<5x64xf32>
    %cst_9 = arith.constant 9.99999974E-6 : f32
    %18 = vector.broadcast %cst_9 : f32 to vector<5x1xf32>
    %19 = arith.addf %15, %18 : vector<5x1xf32>
    %20 = math.rsqrt %19 : vector<5x1xf32>
    %21 = vector.broadcast %20 : vector<5x1xf32> to vector<5x64xf32>
    %22 = arith.mulf %17, %21 : vector<5x64xf32>
    %23 = vector.broadcast %3 : vector<1x64xf32> to vector<5x64xf32>
    %24 = arith.mulf %22, %23 : vector<5x64xf32>
    %25 = vector.broadcast %4 : vector<1x64xf32> to vector<5x64xf32>
    %26 = arith.addf %24, %25 : vector<5x64xf32>
    %c0_10 = arith.constant 0 : index
    %c0_11 = arith.constant 0 : index
    %27 = vector.load %arg6[%c0_10, %c0_11] : memref<192x64xbf16, #tpu.memory_space<vmem>>, vector<192x64xbf16>
    %28 = arith.truncf %26 : vector<5x64xf32> to vector<5x64xbf16>
    %cst_12 = arith.constant dense<0.000000e+00> : vector<5x192xf32>
    %29 = tpu.matmul %28, %27, %cst_12 {dimension_numbers = #tpu.dot_dimension_numbers<[1], [1], [0], [0], [0, 0, 1, 0], [], []>} : vector<5x64xbf16>, vector<192x64xbf16>, vector<5x192xf32> -> vector<5x192xf32>
    %c0_13 = arith.constant 0 : index
    %c0_14 = arith.constant 0 : index
    %30 = vector.load %arg7[%c0_13, %c0_14] : memref<1x192xf32, #tpu.memory_space<vmem>>, vector<1x192xf32>
    %31 = vector.broadcast %30 : vector<1x192xf32> to vector<5x192xf32>
    %32 = arith.addf %29, %31 : vector<5x192xf32>
    %33 = arith.truncf %32 : vector<5x192xf32> to vector<5x192xbf16>
    %34 = vector.extract_strided_slice %33 {offsets = [0, 0], sizes = [5, 16], strides = [1, 1]} : vector<5x192xbf16> to vector<5x16xbf16>
    %c0_15 = arith.constant 0 : index
    %c0_16 = arith.constant 0 : index
    %c0_17 = arith.constant 0 : index
    %c0_18 = arith.constant 0 : index
    %35 = vector.load %arg15[%c0_15, %c0_16, %c0_17, %c0_18] : memref<3x4x5x16xbf16, #tpu.memory_space<vmem>>, vector<1x1x5x16xbf16>
    %36 = vector.shape_cast %35 : vector<1x1x5x16xbf16> to vector<5x16xbf16>
    %37 = vector.shape_cast %34 : vector<5x16xbf16> to vector<1x1x5x16xbf16>
    tpu.vector_store %arg15[%c0_15, %c0_16, %c0_17, %c0_18], %37 {strides = array<i32>} : memref<3x4x5x16xbf16, #tpu.memory_space<vmem>>, vector<1x1x5x16xbf16>,
    %38 = vector.extract_strided_slice %33 {offsets = [0, 64], sizes = [5, 16], strides = [1, 1]} : vector<5x192xbf16> to vector<5x16xbf16>
    %c1 = arith.constant 1 : index
    %c0_19 = arith.constant 0 : index
    %c0_20 = arith.constant 0 : index
    %c0_21 = arith.constant 0 : index
    %39 = vector.load %arg15[%c1, %c0_19, %c0_20, %c0_21] : memref<3x4x5x16xbf16, #tpu.memory_space<vmem>>, vector<1x1x5x16xbf16>
    %40 = vector.shape_cast %39 : vector<1x1x5x16xbf16> to vector<5x16xbf16>
    %41 = vector.shape_cast %38 : vector<5x16xbf16> to vector<1x1x5x16xbf16>
    tpu.vector_store %arg15[%c1, %c0_19, %c0_20, %c0_21], %41 {strides = array<i32>} : memref<3x4x5x16xbf16, #tpu.memory_space<vmem>>, vector<1x1x5x16xbf16>,
    %42 = vector.extract_strided_slice %33 {offsets = [0, 128], sizes = [5, 16], strides = [1, 1]} : vector<5x192xbf16> to vector<5x16xbf16>
    %c2 = arith.constant 2 : index
    %c0_22 = arith.constant 0 : index
    %c0_23 = arith.constant 0 : index
    %c0_24 = arith.constant 0 : index
    %43 = vector.load %arg15[%c2, %c0_22, %c0_23, %c0_24] : memref<3x4x5x16xbf16, #tpu.memory_space<vmem>>, vector<1x1x5x16xbf16>
    %44 = vector.shape_cast %43 : vector<1x1x5x16xbf16> to vector<5x16xbf16>
    %45 = vector.shape_cast %42 : vector<5x16xbf16> to vector<1x1x5x16xbf16>
    tpu.vector_store %arg15[%c2, %c0_22, %c0_23, %c0_24], %45 {strides = array<i32>} : memref<3x4x5x16xbf16, #tpu.memory_space<vmem>>, vector<1x1x5x16xbf16>,
    %46 = vector.extract_strided_slice %33 {offsets = [0, 16], sizes = [5, 16], strides = [1, 1]} : vector<5x192xbf16> to vector<5x16xbf16>
    %c0_25 = arith.constant 0 : index
    %c1_26 = arith.constant 1 : index
    %c0_27 = arith.constant 0 : index
    %c0_28 = arith.constant 0 : index
    %47 = vector.load %arg15[%c0_25, %c1_26, %c0_27, %c0_28] : memref<3x4x5x16xbf16, #tpu.memory_space<vmem>>, vector<1x1x5x16xbf16>
    %48 = vector.shape_cast %47 : vector<1x1x5x16xbf16> to vector<5x16xbf16>
    %49 = vector.shape_cast %46 : vector<5x16xbf16> to vector<1x1x5x16xbf16>
    tpu.vector_store %arg15[%c0_25, %c1_26, %c0_27, %c0_28], %49 {strides = array<i32>} : memref<3x4x5x16xbf16, #tpu.memory_space<vmem>>, vector<1x1x5x16xbf16>,
    %50 = vector.extract_strided_slice %33 {offsets = [0, 80], sizes = [5, 16], strides = [1, 1]} : vector<5x192xbf16> to vector<5x16xbf16>
    %c1_29 = arith.constant 1 : index
    %c1_30 = arith.constant 1 : index
    %c0_31 = arith.constant 0 : index
    %c0_32 = arith.constant 0 : index
    %51 = vector.load %arg15[%c1_29, %c1_30, %c0_31, %c0_32] : memref<3x4x5x16xbf16, #tpu.memory_space<vmem>>, vector<1x1x5x16xbf16>
    %52 = vector.shape_cast %51 : vector<1x1x5x16xbf16> to vector<5x16xbf16>
    %53 = vector.shape_cast %50 : vector<5x16xbf16> to vector<1x1x5x16xbf16>
    tpu.vector_store %arg15[%c1_29, %c1_30, %c0_31, %c0_32], %53 {strides = array<i32>} : memref<3x4x5x16xbf16, #tpu.memory_space<vmem>>, vector<1x1x5x16xbf16>,
    %54 = vector.extract_strided_slice %33 {offsets = [0, 144], sizes = [5, 16], strides = [1, 1]} : vector<5x192xbf16> to vector<5x16xbf16>
    %c2_33 = arith.constant 2 : index
    %c1_34 = arith.constant 1 : index
    %c0_35 = arith.constant 0 : index
    %c0_36 = arith.constant 0 : index
    %55 = vector.load %arg15[%c2_33, %c1_34, %c0_35, %c0_36] : memref<3x4x5x16xbf16, #tpu.memory_space<vmem>>, vector<1x1x5x16xbf16>
    %56 = vector.shape_cast %55 : vector<1x1x5x16xbf16> to vector<5x16xbf16>
    %57 = vector.shape_cast %54 : vector<5x16xbf16> to vector<1x1x5x16xbf16>
    tpu.vector_store %arg15[%c2_33, %c1_34, %c0_35, %c0_36], %57 {strides = array<i32>} : memref<3x4x5x16xbf16, #tpu.memory_space<vmem>>, vector<1x1x5x16xbf16>,
    %58 = vector.extract_strided_slice %33 {offsets = [0, 32], sizes = [5, 16], strides = [1, 1]} : vector<5x192xbf16> to vector<5x16xbf16>
    %c0_37 = arith.constant 0 : index
    %c2_38 = arith.constant 2 : index
    %c0_39 = arith.constant 0 : index
    %c0_40 = arith.constant 0 : index
    %59 = vector.load %arg15[%c0_37, %c2_38, %c0_39, %c0_40] : memref<3x4x5x16xbf16, #tpu.memory_space<vmem>>, vector<1x1x5x16xbf16>
    %60 = vector.shape_cast %59 : vector<1x1x5x16xbf16> to vector<5x16xbf16>
    %61 = vector.shape_cast %58 : vector<5x16xbf16> to vector<1x1x5x16xbf16>
    tpu.vector_store %arg15[%c0_37, %c2_38, %c0_39, %c0_40], %61 {strides = array<i32>} : memref<3x4x5x16xbf16, #tpu.memory_space<vmem>>, vector<1x1x5x16xbf16>,
    %62 = vector.extract_strided_slice %33 {offsets = [0, 96], sizes = [5, 16], strides = [1, 1]} : vector<5x192xbf16> to vector<5x16xbf16>
    %c1_41 = arith.constant 1 : index
    %c2_42 = arith.constant 2 : index
    %c0_43 = arith.constant 0 : index
    %c0_44 = arith.constant 0 : index
    %63 = vector.load %arg15[%c1_41, %c2_42, %c0_43, %c0_44] : memref<3x4x5x16xbf16, #tpu.memory_space<vmem>>, vector<1x1x5x16xbf16>
    %64 = vector.shape_cast %63 : vector<1x1x5x16xbf16> to vector<5x16xbf16>
    %65 = vector.shape_cast %62 : vector<5x16xbf16> to vector<1x1x5x16xbf16>
    tpu.vector_store %arg15[%c1_41, %c2_42, %c0_43, %c0_44], %65 {strides = array<i32>} : memref<3x4x5x16xbf16, #tpu.memory_space<vmem>>, vector<1x1x5x16xbf16>,
    %66 = vector.extract_strided_slice %33 {offsets = [0, 160], sizes = [5, 16], strides = [1, 1]} : vector<5x192xbf16> to vector<5x16xbf16>
    %c2_45 = arith.constant 2 : index
    %c2_46 = arith.constant 2 : index
    %c0_47 = arith.constant 0 : index
    %c0_48 = arith.constant 0 : index
    %67 = vector.load %arg15[%c2_45, %c2_46, %c0_47, %c0_48] : memref<3x4x5x16xbf16, #tpu.memory_space<vmem>>, vector<1x1x5x16xbf16>
    %68 = vector.shape_cast %67 : vector<1x1x5x16xbf16> to vector<5x16xbf16>
    %69 = vector.shape_cast %66 : vector<5x16xbf16> to vector<1x1x5x16xbf16>
    tpu.vector_store %arg15[%c2_45, %c2_46, %c0_47, %c0_48], %69 {strides = array<i32>} : memref<3x4x5x16xbf16, #tpu.memory_space<vmem>>, vector<1x1x5x16xbf16>,
    %70 = vector.extract_strided_slice %33 {offsets = [0, 48], sizes = [5, 16], strides = [1, 1]} : vector<5x192xbf16> to vector<5x16xbf16>
    %c0_49 = arith.constant 0 : index
    %c3 = arith.constant 3 : index
    %c0_50 = arith.constant 0 : index
    %c0_51 = arith.constant 0 : index
    %71 = vector.load %arg15[%c0_49, %c3, %c0_50, %c0_51] : memref<3x4x5x16xbf16, #tpu.memory_space<vmem>>, vector<1x1x5x16xbf16>
    %72 = vector.shape_cast %71 : vector<1x1x5x16xbf16> to vector<5x16xbf16>
    %73 = vector.shape_cast %70 : vector<5x16xbf16> to vector<1x1x5x16xbf16>
    tpu.vector_store %arg15[%c0_49, %c3, %c0_50, %c0_51], %73 {strides = array<i32>} : memref<3x4x5x16xbf16, #tpu.memory_space<vmem>>, vector<1x1x5x16xbf16>,
    %74 = vector.extract_strided_slice %33 {offsets = [0, 112], sizes = [5, 16], strides = [1, 1]} : vector<5x192xbf16> to vector<5x16xbf16>
    %c1_52 = arith.constant 1 : index
    %c3_53 = arith.constant 3 : index
    %c0_54 = arith.constant 0 : index
    %c0_55 = arith.constant 0 : index
    %75 = vector.load %arg15[%c1_52, %c3_53, %c0_54, %c0_55] : memref<3x4x5x16xbf16, #tpu.memory_space<vmem>>, vector<1x1x5x16xbf16>
    %76 = vector.shape_cast %75 : vector<1x1x5x16xbf16> to vector<5x16xbf16>
    %77 = vector.shape_cast %74 : vector<5x16xbf16> to vector<1x1x5x16xbf16>
    tpu.vector_store %arg15[%c1_52, %c3_53, %c0_54, %c0_55], %77 {strides = array<i32>} : memref<3x4x5x16xbf16, #tpu.memory_space<vmem>>, vector<1x1x5x16xbf16>,
    %78 = vector.extract_strided_slice %33 {offsets = [0, 176], sizes = [5, 16], strides = [1, 1]} : vector<5x192xbf16> to vector<5x16xbf16>
    %c2_56 = arith.constant 2 : index
    %c3_57 = arith.constant 3 : index
    %c0_58 = arith.constant 0 : index
    %c0_59 = arith.constant 0 : index
    %79 = vector.load %arg15[%c2_56, %c3_57, %c0_58, %c0_59] : memref<3x4x5x16xbf16, #tpu.memory_space<vmem>>, vector<1x1x5x16xbf16>
    %80 = vector.shape_cast %79 : vector<1x1x5x16xbf16> to vector<5x16xbf16>
    %81 = vector.shape_cast %78 : vector<5x16xbf16> to vector<1x1x5x16xbf16>
    tpu.vector_store %arg15[%c2_56, %c3_57, %c0_58, %c0_59], %81 {strides = array<i32>} : memref<3x4x5x16xbf16, #tpu.memory_space<vmem>>, vector<1x1x5x16xbf16>,
    %c0_60 = arith.constant 0 : index
    %c0_61 = arith.constant 0 : index
    %c0_62 = arith.constant 0 : index
    %c0_63 = arith.constant 0 : index
    %82 = vector.load %arg15[%c0_60, %c0_61, %c0_62, %c0_63] : memref<3x4x5x16xbf16, #tpu.memory_space<vmem>>, vector<1x4x5x16xbf16>
    %83 = vector.shape_cast %82 : vector<1x4x5x16xbf16> to vector<4x5x16xbf16>
    %c1_64 = arith.constant 1 : index
    %c0_65 = arith.constant 0 : index
    %c0_66 = arith.constant 0 : index
    %c0_67 = arith.constant 0 : index
    %84 = vector.load %arg15[%c1_64, %c0_65, %c0_66, %c0_67] : memref<3x4x5x16xbf16, #tpu.memory_space<vmem>>, vector<1x4x5x16xbf16>
    %85 = vector.shape_cast %84 : vector<1x4x5x16xbf16> to vector<4x5x16xbf16>
    %c2_68 = arith.constant 2 : index
    %c0_69 = arith.constant 0 : index
    %c0_70 = arith.constant 0 : index
    %c0_71 = arith.constant 0 : index
    %86 = vector.load %arg15[%c2_68, %c0_69, %c0_70, %c0_71] : memref<3x4x5x16xbf16, #tpu.memory_space<vmem>>, vector<1x4x5x16xbf16>
    %87 = vector.shape_cast %86 : vector<1x4x5x16xbf16> to vector<4x5x16xbf16>
    "tpu.trace_start"() <{level = 10 : i32, message = "hqc,hkc->hqk"}> : () -> ()
    %cst_72 = arith.constant dense<0.000000e+00> : vector<4x5x5xf32>
    %88 = tpu.matmul %83, %85, %cst_72 {dimension_numbers = #tpu.dot_dimension_numbers<[2], [2], [1], [1], [0, 0, 0, 1, 1, 1], [0], [0]>} : vector<4x5x16xbf16>, vector<4x5x16xbf16>, vector<4x5x5xf32> -> vector<4x5x5xf32>
    "tpu.trace_stop"() : () -> ()
    %cst_73 = arith.constant 2.500000e-01 : f32
    %89 = vector.broadcast %cst_73 : f32 to vector<4x5x5xf32>
    %90 = arith.mulf %88, %89 : vector<4x5x5xf32>
    %cst_74 = arith.constant dense<0xFF800000> : vector<4x5xf32>
    %91 = vector.multi_reduction <maximumf>, %90, %cst_74 [2] : vector<4x5x5xf32> to vector<4x5xf32>
    %92 = vector.shape_cast %91 : vector<4x5xf32> to vector<4x5x1xf32>
    %93 = vector.broadcast %92 : vector<4x5x1xf32> to vector<4x5x5xf32>
    %94 = arith.subf %90, %93 : vector<4x5x5xf32>
    %95 = math.exp %94 : vector<4x5x5xf32>
    %cst_75 = arith.constant dense<0.000000e+00> : vector<4x5xf32>
    %96 = vector.multi_reduction <add>, %95, %cst_75 [2] : vector<4x5x5xf32> to vector<4x5xf32>
    %97 = vector.shape_cast %96 : vector<4x5xf32> to vector<4x5x1xf32>
    %98 = tpu.reciprocal %97 {approx = true} : vector<4x5x1xf32> -> vector<4x5x1xf32>
    %99 = vector.broadcast %98 : vector<4x5x1xf32> to vector<4x5x5xf32>
    %100 = arith.mulf %95, %99 : vector<4x5x5xf32>
    %101 = arith.truncf %100 : vector<4x5x5xf32> to vector<4x5x5xbf16>
    "tpu.trace_start"() <{level = 10 : i32, message = "hqk,hkc->hqc"}> : () -> ()
    %cst_76 = arith.constant dense<0.000000e+00> : vector<4x5x16xf32>
    %102 = tpu.matmul %101, %87, %cst_76 {dimension_numbers = #tpu.dot_dimension_numbers<[2], [1], [1], [2], [0, 0, 0, 1, 1, 2], [0], [0]>} : vector<4x5x5xbf16>, vector<4x5x16xbf16>, vector<4x5x16xf32> -> vector<4x5x16xf32>
    "tpu.trace_stop"() : () -> ()
    %103 = vector.extract_strided_slice %102 {offsets = [0, 0, 0], sizes = [1, 5, 16], strides = [1, 1, 1]} : vector<4x5x16xf32> to vector<1x5x16xf32>
    %104 = vector.shape_cast %103 : vector<1x5x16xf32> to vector<5x16xf32>
    %105 = arith.truncf %104 : vector<5x16xf32> to vector<5x16xbf16>
    %c0_77 = arith.constant 0 : index
    %c0_78 = arith.constant 0 : index
    %106 = vector.load %arg16[%c0_77, %c0_78] : memref<5x64xbf16, #tpu.memory_space<vmem>>, vector<5x16xbf16>
    tpu.vector_store %arg16[%c0_77, %c0_78], %105 {strides = array<i32>} : memref<5x64xbf16, #tpu.memory_space<vmem>>, vector<5x16xbf16>,
    %107 = vector.extract_strided_slice %102 {offsets = [1, 0, 0], sizes = [1, 5, 16], strides = [1, 1, 1]} : vector<4x5x16xf32> to vector<1x5x16xf32>
    %108 = vector.shape_cast %107 : vector<1x5x16xf32> to vector<5x16xf32>
    %109 = arith.truncf %108 : vector<5x16xf32> to vector<5x16xbf16>
    %c0_79 = arith.constant 0 : index
    %c16 = arith.constant 16 : index
    %110 = vector.load %arg16[%c0_79, %c16] : memref<5x64xbf16, #tpu.memory_space<vmem>>, vector<5x16xbf16>
    tpu.vector_store %arg16[%c0_79, %c16], %109 {strides = array<i32>} : memref<5x64xbf16, #tpu.memory_space<vmem>>, vector<5x16xbf16>,
    %111 = vector.extract_strided_slice %102 {offsets = [2, 0, 0], sizes = [1, 5, 16], strides = [1, 1, 1]} : vector<4x5x16xf32> to vector<1x5x16xf32>
    %112 = vector.shape_cast %111 : vector<1x5x16xf32> to vector<5x16xf32>
    %113 = arith.truncf %112 : vector<5x16xf32> to vector<5x16xbf16>
    %c0_80 = arith.constant 0 : index
    %c32 = arith.constant 32 : index
    %114 = vector.load %arg16[%c0_80, %c32] : memref<5x64xbf16, #tpu.memory_space<vmem>>, vector<5x16xbf16>
    tpu.vector_store %arg16[%c0_80, %c32], %113 {strides = array<i32>} : memref<5x64xbf16, #tpu.memory_space<vmem>>, vector<5x16xbf16>,
    %115 = vector.extract_strided_slice %102 {offsets = [3, 0, 0], sizes = [1, 5, 16], strides = [1, 1, 1]} : vector<4x5x16xf32> to vector<1x5x16xf32>
    %116 = vector.shape_cast %115 : vector<1x5x16xf32> to vector<5x16xf32>
    %117 = arith.truncf %116 : vector<5x16xf32> to vector<5x16xbf16>
    %c0_81 = arith.constant 0 : index
    %c48 = arith.constant 48 : index
    %118 = vector.load %arg16[%c0_81, %c48] : memref<5x64xbf16, #tpu.memory_space<vmem>>, vector<5x16xbf16>
    tpu.vector_store %arg16[%c0_81, %c48], %117 {strides = array<i32>} : memref<5x64xbf16, #tpu.memory_space<vmem>>, vector<5x16xbf16>,
    %c0_82 = arith.constant 0 : index
    %c0_83 = arith.constant 0 : index
    %119 = vector.load %arg16[%c0_82, %c0_83] : memref<5x64xbf16, #tpu.memory_space<vmem>>, vector<5x64xbf16>
    %c0_84 = arith.constant 0 : index
    %c0_85 = arith.constant 0 : index
    %120 = vector.load %arg8[%c0_84, %c0_85] : memref<64x64xbf16, #tpu.memory_space<vmem>>, vector<64x64xbf16>
    %cst_86 = arith.constant dense<0.000000e+00> : vector<5x64xf32>
    %121 = tpu.matmul %119, %120, %cst_86 {dimension_numbers = #tpu.dot_dimension_numbers<[1], [1], [0], [0], [0, 0, 1, 0], [], []>} : vector<5x64xbf16>, vector<64x64xbf16>, vector<5x64xf32> -> vector<5x64xf32>
    %122 = arith.addf %2, %121 : vector<5x64xf32>
    %c0_87 = arith.constant 0 : index
    %c0_88 = arith.constant 0 : index
    %123 = vector.load %arg9[%c0_87, %c0_88] : memref<1x64xf32, #tpu.memory_space<vmem>>, vector<1x64xf32>
    %124 = vector.broadcast %123 : vector<1x64xf32> to vector<5x64xf32>
    %125 = arith.addf %122, %124 : vector<5x64xf32>
    %c0_89 = arith.constant 0 : index
    %c0_90 = arith.constant 0 : index
    %126 = vector.load %arg4[%c0_89, %c0_90] : memref<1x64xf32, #tpu.memory_space<vmem>>, vector<1x64xf32>
    %c0_91 = arith.constant 0 : index
    %c0_92 = arith.constant 0 : index
    %127 = vector.load %arg5[%c0_91, %c0_92] : memref<1x64xf32, #tpu.memory_space<vmem>>, vector<1x64xf32>
    %cst_93 = arith.constant dense<0.000000e+00> : vector<5xf32>
    %128 = vector.multi_reduction <add>, %125, %cst_93 [1] : vector<5x64xf32> to vector<5xf32>
    %129 = vector.shape_cast %128 : vector<5xf32> to vector<5x1xf32>
    %cst_94 = arith.constant 6.400000e+01 : f32
    %130 = vector.broadcast %cst_94 : f32 to vector<5x1xf32>
    %131 = arith.divf %129, %130 : vector<5x1xf32>
    %132 = vector.broadcast %131 : vector<5x1xf32> to vector<5x64xf32>
    %133 = arith.subf %125, %132 : vector<5x64xf32>
    %134 = arith.mulf %133, %133 : vector<5x64xf32>
    %cst_95 = arith.constant dense<0.000000e+00> : vector<5xf32>
    %135 = vector.multi_reduction <add>, %134, %cst_95 [1] : vector<5x64xf32> to vector<5xf32>
    %136 = vector.shape_cast %135 : vector<5xf32> to vector<5x1xf32>
    %cst_96 = arith.constant 6.400000e+01 : f32
    %137 = vector.broadcast %cst_96 : f32 to vector<5x1xf32>
    %138 = arith.divf %136, %137 : vector<5x1xf32>
    %139 = vector.broadcast %131 : vector<5x1xf32> to vector<5x64xf32>
    %140 = arith.subf %125, %139 : vector<5x64xf32>
    %cst_97 = arith.constant 9.99999974E-6 : f32
    %141 = vector.broadcast %cst_97 : f32 to vector<5x1xf32>
    %142 = arith.addf %138, %141 : vector<5x1xf32>
    %143 = math.rsqrt %142 : vector<5x1xf32>
    %144 = vector.broadcast %143 : vector<5x1xf32> to vector<5x64xf32>
    %145 = arith.mulf %140, %144 : vector<5x64xf32>
    %146 = vector.broadcast %126 : vector<1x64xf32> to vector<5x64xf32>
    %147 = arith.mulf %145, %146 : vector<5x64xf32>
    %148 = vector.broadcast %127 : vector<1x64xf32> to vector<5x64xf32>
    %149 = arith.addf %147, %148 : vector<5x64xf32>
    %c0_98 = arith.constant 0 : index
    %c0_99 = arith.constant 0 : index
    %150 = vector.load %arg10[%c0_98, %c0_99] : memref<256x64xbf16, #tpu.memory_space<vmem>>, vector<256x64xbf16>
    %151 = arith.truncf %149 : vector<5x64xf32> to vector<5x64xbf16>
    %cst_100 = arith.constant dense<0.000000e+00> : vector<5x256xf32>
    %152 = tpu.matmul %151, %150, %cst_100 {dimension_numbers = #tpu.dot_dimension_numbers<[1], [1], [0], [0], [0, 0, 1, 0], [], []>} : vector<5x64xbf16>, vector<256x64xbf16>, vector<5x256xf32> -> vector<5x256xf32>
    %c0_101 = arith.constant 0 : index
    %c0_102 = arith.constant 0 : index
    %153 = vector.load %arg11[%c0_101, %c0_102] : memref<1x256xf32, #tpu.memory_space<vmem>>, vector<1x256xf32>
    %154 = vector.broadcast %153 : vector<1x256xf32> to vector<5x256xf32>
    %155 = arith.addf %152, %154 : vector<5x256xf32>
    %156 = arith.truncf %155 : vector<5x256xf32> to vector<5x256xbf16>
    %cst_103 = arith.constant 1.703130e+00 : bf16
    %157 = vector.broadcast %cst_103 : bf16 to vector<5x256xbf16>
    %158 = arith.mulf %157, %156 : vector<5x256xbf16>
    %159 = arith.negf %158 : vector<5x256xbf16>
    %160 = math.exp %159 : vector<5x256xbf16>
    %cst_104 = arith.constant 1.000000e+00 : bf16
    %161 = vector.broadcast %cst_104 : bf16 to vector<5x256xbf16>
    %162 = arith.addf %161, %160 : vector<5x256xbf16>
    %163 = arith.divf %161, %162 : vector<5x256xbf16>
    %164 = arith.mulf %156, %163 : vector<5x256xbf16>
    %c0_105 = arith.constant 0 : index
    %c0_106 = arith.constant 0 : index
    %165 = vector.load %arg12[%c0_105, %c0_106] : memref<64x256xbf16, #tpu.memory_space<vmem>>, vector<64x256xbf16>
    %cst_107 = arith.constant dense<0.000000e+00> : vector<5x64xf32>
    %166 = tpu.matmul %164, %165, %cst_107 {dimension_numbers = #tpu.dot_dimension_numbers<[1], [1], [0], [0], [0, 0, 1, 0], [], []>} : vector<5x256xbf16>, vector<64x256xbf16>, vector<5x64xf32> -> vector<5x64xf32>
    %167 = arith.addf %125, %166 : vector<5x64xf32>
    %c0_108 = arith.constant 0 : index
    %c0_109 = arith.constant 0 : index
    %168 = vector.load %arg13[%c0_108, %c0_109] : memref<1x64xf32, #tpu.memory_space<vmem>>, vector<1x64xf32>
    %169 = vector.broadcast %168 : vector<1x64xf32> to vector<5x64xf32>
    %170 = arith.addf %167, %169 : vector<5x64xf32>
    %171 = arith.truncf %170 : vector<5x64xf32> to vector<5x64xbf16>
    %c0_110 = arith.constant 0 : index
    %c0_111 = arith.constant 0 : index
    %c0_112 = arith.constant 0 : index
    %172 = vector.load %arg14[%c0_110, %c0_111, %c0_112] : memref<1x5x64xbf16, #tpu.memory_space<vmem>>, vector<1x5x64xbf16>
    %173 = vector.shape_cast %172 : vector<1x5x64xbf16> to vector<5x64xbf16>
    %174 = vector.shape_cast %171 : vector<5x64xbf16> to vector<1x5x64xbf16>
    tpu.vector_store %arg14[%c0_110, %c0_111, %c0_112], %174 {strides = array<i32>} : memref<1x5x64xbf16, #tpu.memory_space<vmem>>, vector<1x5x64xbf16>,
    return
  }
  func.func @transform_0(%arg0: i32) -> (i32, i32, i32) {
    %c0_i32 = arith.constant 0 : i32
    %c0_i32_0 = arith.constant 0 : i32
    %c0_i32_1 = arith.constant 0 : i32
    return %arg0, %c0_i32, %c0_i32_0 : i32, i32, i32
  }
  func.func @transform_1(%arg0: i32) -> (i32, i32) {
    %c0_i32 = arith.constant 0 : i32
    %c0_i32_0 = arith.constant 0 : i32
    %c0_i32_1 = arith.constant 0 : i32
    return %c0_i32, %c0_i32_0 : i32, i32
  }
  func.func @transform_2(%arg0: i32) -> (i32, i32) {
    %c0_i32 = arith.constant 0 : i32
    %c0_i32_0 = arith.constant 0 : i32
    %c0_i32_1 = arith.constant 0 : i32
    return %c0_i32, %c0_i32_0 : i32, i32
  }
  func.func @transform_3(%arg0: i32) -> (i32, i32) {
    %c0_i32 = arith.constant 0 : i32
    %c0_i32_0 = arith.constant 0 : i32
    %c0_i32_1 = arith.constant 0 : i32
    return %c0_i32, %c0_i32_0 : i32, i32
  }
  func.func @transform_4(%arg0: i32) -> (i32, i32) {
    %c0_i32 = arith.constant 0 : i32
    %c0_i32_0 = arith.constant 0 : i32
    %c0_i32_1 = arith.constant 0 : i32
    return %c0_i32, %c0_i32_0 : i32, i32
  }
  func.func @transform_5(%arg0: i32) -> (i32, i32) {
    %c0_i32 = arith.constant 0 : i32
    %c0_i32_0 = arith.constant 0 : i32
    %c0_i32_1 = arith.constant 0 : i32
    return %c0_i32, %c0_i32_0 : i32, i32
  }
  func.func @transform_6(%arg0: i32) -> (i32, i32) {
    %c0_i32 = arith.constant 0 : i32
    %c0_i32_0 = arith.constant 0 : i32
    %c0_i32_1 = arith.constant 0 : i32
    return %c0_i32, %c0_i32_0 : i32, i32
  }
  func.func @transform_7(%arg0: i32) -> (i32, i32) {
    %c0_i32 = arith.constant 0 : i32
    %c0_i32_0 = arith.constant 0 : i32
    %c0_i32_1 = arith.constant 0 : i32
    return %c0_i32, %c0_i32_0 : i32, i32
  }
  func.func @transform_8(%arg0: i32) -> (i32, i32) {
    %c0_i32 = arith.constant 0 : i32
    %c0_i32_0 = arith.constant 0 : i32
    %c0_i32_1 = arith.constant 0 : i32
    return %c0_i32, %c0_i32_0 : i32, i32
  }
  func.func @transform_9(%arg0: i32) -> (i32, i32) {
    %c0_i32 = arith.constant 0 : i32
    %c0_i32_0 = arith.constant 0 : i32
    %c0_i32_1 = arith.constant 0 : i32
    return %c0_i32, %c0_i32_0 : i32, i32
  }
  func.func @transform_10(%arg0: i32) -> (i32, i32) {
    %c0_i32 = arith.constant 0 : i32
    %c0_i32_0 = arith.constant 0 : i32
    %c0_i32_1 = arith.constant 0 : i32
    return %c0_i32, %c0_i32_0 : i32, i32
  }
  func.func @transform_11(%arg0: i32) -> (i32, i32) {
    %c0_i32 = arith.constant 0 : i32
    %c0_i32_0 = arith.constant 0 : i32
    %c0_i32_1 = arith.constant 0 : i32
    return %c0_i32, %c0_i32_0 : i32, i32
  }
  func.func @transform_12(%arg0: i32) -> (i32, i32) {
    %c0_i32 = arith.constant 0 : i32
    %c0_i32_0 = arith.constant 0 : i32
    %c0_i32_1 = arith.constant 0 : i32
    return %c0_i32, %c0_i32_0 : i32, i32
  }
  func.func @transform_13(%arg0: i32) -> (i32, i32, i32) {
    %c0_i32 = arith.constant 0 : i32
    %c0_i32_0 = arith.constant 0 : i32
    %c0_i32_1 = arith.constant 0 : i32
    return %arg0, %c0_i32, %c0_i32_0 : i32, i32, i32
  }
}

module attributes {stable_mosaic.version = 11 : i64} {
  func.func @_res_block_kernel(%arg0: i32, %arg1: memref<1x5x64xf32, #tpu.memory_space<vmem>>, %arg2: memref<1x64xf32, #tpu.memory_space<vmem>>, %arg3: memref<1x64xf32, #tpu.memory_space<vmem>>, %arg4: memref<1x64xf32, #tpu.memory_space<vmem>>, %arg5: memref<1x64xf32, #tpu.memory_space<vmem>>, %arg6: memref<192x64xbf16, #tpu.memory_space<vmem>>, %arg7: memref<1x192xf32, #tpu.memory_space<vmem>>, %arg8: memref<64x64xbf16, #tpu.memory_space<vmem>>, %arg9: memref<1x64xf32, #tpu.memory_space<vmem>>, %arg10: memref<256x64xbf16, #tpu.memory_space<vmem>>, %arg11: memref<1x256xf32, #tpu.memory_space<vmem>>, %arg12: memref<64x256xbf16, #tpu.memory_space<vmem>>, %arg13: memref<1x64xf32, #tpu.memory_space<vmem>>, %arg14: memref<1x5x64xbf16, #tpu.memory_space<vmem>>, %arg15: memref<3x4x5x16xbf16, #tpu.memory_space<vmem>>, %arg16: memref<5x64xbf16, #tpu.memory_space<vmem>>) attributes {dimension_semantics = [#tpu.dimension_semantics<parallel>], iteration_bounds = array<i64: 2>, scalar_prefetch = 0 : i64, scratch_operands = 2 : i64, tpu.core_type = #tpu.core_type<tc>, window_params = [{transform_indices = @transform_0, window_bounds = array<i64: 1, 5, 64>}, {pipeline_mode = #tpu.pipeline_mode<synchronous>, transform_indices = @transform_1, window_bounds = array<i64: 1, 64>}, {pipeline_mode = #tpu.pipeline_mode<synchronous>, transform_indices = @transform_2, window_bounds = array<i64: 1, 64>}, {pipeline_mode = #tpu.pipeline_mode<synchronous>, transform_indices = @transform_3, window_bounds = array<i64: 1, 64>}, {pipeline_mode = #tpu.pipeline_mode<synchronous>, transform_indices = @transform_4, window_bounds = array<i64: 1, 64>}, {pipeline_mode = #tpu.pipeline_mode<synchronous>, transform_indices = @transform_5, window_bounds = array<i64: 192, 64>}, {pipeline_mode = #tpu.pipeline_mode<synchronous>, transform_indices = @transform_6, window_bounds = array<i64: 1, 192>}, {pipeline_mode = #tpu.pipeline_mode<synchronous>, transform_indices = @transform_7, window_bounds = array<i64: 64, 64>}, {pipeline_mode = #tpu.pipeline_mode<synchronous>, transform_indices = @transform_8, window_bounds = array<i64: 1, 64>}, {pipeline_mode = #tpu.pipeline_mode<synchronous>, transform_indices = @transform_9, window_bounds = array<i64: 256, 64>}, {pipeline_mode = #tpu.pipeline_mode<synchronous>, transform_indices = @transform_10, window_bounds = array<i64: 1, 256>}, {pipeline_mode = #tpu.pipeline_mode<synchronous>, transform_indices = @transform_11, window_bounds = array<i64: 64, 256>}, {pipeline_mode = #tpu.pipeline_mode<synchronous>, transform_indices = @transform_12, window_bounds = array<i64: 1, 64>}, {transform_indices = @transform_13, window_bounds = array<i64: 1, 5, 64>}]} {
    %c0 = arith.constant 0 : index
    %c0_0 = arith.constant 0 : index
    %c0_1 = arith.constant 0 : index
    %0 = vector.load %arg1[%c0, %c0_0, %c0_1] : memref<1x5x64xf32, #tpu.memory_space<vmem>>, vector<1x5x64xf32>
    %1 = vector.shape_cast %0 : vector<1x5x64xf32> to vector<5x64xf32>
    %c0_2 = arith.constant 0 : index
    %c0_3 = arith.constant 0 : index
    %2 = vector.load %arg2[%c0_2, %c0_3] : memref<1x64xf32, #tpu.memory_space<vmem>>, vector<1x64xf32>
    %c0_4 = arith.constant 0 : index
    %c0_5 = arith.constant 0 : index
    %3 = vector.load %arg3[%c0_4, %c0_5] : memref<1x64xf32, #tpu.memory_space<vmem>>, vector<1x64xf32>
    %cst = arith.constant dense<0.000000e+00> : vector<5xf32>
    %4 = vector.multi_reduction <add>, %1, %cst [1] : vector<5x64xf32> to vector<5xf32>
    %5 = vector.shape_cast %4 : vector<5xf32> to vector<5x1xf32>
    %cst_6 = arith.constant 6.400000e+01 : f32
    %6 = vector.broadcast %cst_6 : f32 to vector<5x1xf32>
    %7 = arith.divf %5, %6 : vector<5x1xf32>
    %8 = vector.broadcast %7 : vector<5x1xf32> to vector<5x64xf32>
    %9 = arith.subf %1, %8 : vector<5x64xf32>
    %10 = arith.mulf %9, %9 : vector<5x64xf32>
    %cst_7 = arith.constant dense<0.000000e+00> : vector<5xf32>
    %11 = vector.multi_reduction <add>, %10, %cst_7 [1] : vector<5x64xf32> to vector<5xf32>
    %12 = vector.shape_cast %11 : vector<5xf32> to vector<5x1xf32>
    %cst_8 = arith.constant 6.400000e+01 : f32
    %13 = vector.broadcast %cst_8 : f32 to vector<5x1xf32>
    %14 = arith.divf %12, %13 : vector<5x1xf32>
    %15 = vector.broadcast %7 : vector<5x1xf32> to vector<5x64xf32>
    %16 = arith.subf %1, %15 : vector<5x64xf32>
    %cst_9 = arith.constant 9.99999974E-6 : f32
    %17 = vector.broadcast %cst_9 : f32 to vector<5x1xf32>
    %18 = arith.addf %14, %17 : vector<5x1xf32>
    %19 = math.rsqrt %18 : vector<5x1xf32>
    %20 = vector.broadcast %19 : vector<5x1xf32> to vector<5x64xf32>
    %21 = arith.mulf %16, %20 : vector<5x64xf32>
    %22 = vector.broadcast %2 : vector<1x64xf32> to vector<5x64xf32>
    %23 = arith.mulf %21, %22 : vector<5x64xf32>
    %24 = vector.broadcast %3 : vector<1x64xf32> to vector<5x64xf32>
    %25 = arith.addf %23, %24 : vector<5x64xf32>
    %c0_10 = arith.constant 0 : index
    %c0_11 = arith.constant 0 : index
    %26 = vector.load %arg6[%c0_10, %c0_11] : memref<192x64xbf16, #tpu.memory_space<vmem>>, vector<192x64xbf16>
    %27 = arith.truncf %25 : vector<5x64xf32> to vector<5x64xbf16>
    %cst_12 = arith.constant dense<0.000000e+00> : vector<5x192xf32>
    %28 = tpu.matmul %27, %26, %cst_12 {dimension_numbers = #tpu.dot_dimension_numbers<[1], [1], [0], [0], [0, 0, 1, 0], [], []>} : vector<5x64xbf16>, vector<192x64xbf16>, vector<5x192xf32> -> vector<5x192xf32>
    %c0_13 = arith.constant 0 : index
    %c0_14 = arith.constant 0 : index
    %29 = vector.load %arg7[%c0_13, %c0_14] : memref<1x192xf32, #tpu.memory_space<vmem>>, vector<1x192xf32>
    %30 = vector.broadcast %29 : vector<1x192xf32> to vector<5x192xf32>
    %31 = arith.addf %28, %30 : vector<5x192xf32>
    %32 = arith.truncf %31 : vector<5x192xf32> to vector<5x192xbf16>
    %33 = vector.extract_strided_slice %32 {offsets = [0, 0], sizes = [5, 16], strides = [1, 1]} : vector<5x192xbf16> to vector<5x16xbf16>
    %c0_15 = arith.constant 0 : index
    %c0_16 = arith.constant 0 : index
    %c0_17 = arith.constant 0 : index
    %c0_18 = arith.constant 0 : index
    %34 = vector.load %arg15[%c0_15, %c0_16, %c0_17, %c0_18] : memref<3x4x5x16xbf16, #tpu.memory_space<vmem>>, vector<1x1x5x16xbf16>
    %35 = vector.shape_cast %34 : vector<1x1x5x16xbf16> to vector<5x16xbf16>
    %36 = vector.shape_cast %33 : vector<5x16xbf16> to vector<1x1x5x16xbf16>
    tpu.vector_store %arg15[%c0_15, %c0_16, %c0_17, %c0_18], %36 {strides = array<i32>} : memref<3x4x5x16xbf16, #tpu.memory_space<vmem>>, vector<1x1x5x16xbf16>,
    %37 = vector.extract_strided_slice %32 {offsets = [0, 64], sizes = [5, 16], strides = [1, 1]} : vector<5x192xbf16> to vector<5x16xbf16>
    %c1 = arith.constant 1 : index
    %c0_19 = arith.constant 0 : index
    %c0_20 = arith.constant 0 : index
    %c0_21 = arith.constant 0 : index
    %38 = vector.load %arg15[%c1, %c0_19, %c0_20, %c0_21] : memref<3x4x5x16xbf16, #tpu.memory_space<vmem>>, vector<1x1x5x16xbf16>
    %39 = vector.shape_cast %38 : vector<1x1x5x16xbf16> to vector<5x16xbf16>
    %40 = vector.shape_cast %37 : vector<5x16xbf16> to vector<1x1x5x16xbf16>
    tpu.vector_store %arg15[%c1, %c0_19, %c0_20, %c0_21], %40 {strides = array<i32>} : memref<3x4x5x16xbf16, #tpu.memory_space<vmem>>, vector<1x1x5x16xbf16>,
    %41 = vector.extract_strided_slice %32 {offsets = [0, 128], sizes = [5, 16], strides = [1, 1]} : vector<5x192xbf16> to vector<5x16xbf16>
    %c2 = arith.constant 2 : index
    %c0_22 = arith.constant 0 : index
    %c0_23 = arith.constant 0 : index
    %c0_24 = arith.constant 0 : index
    %42 = vector.load %arg15[%c2, %c0_22, %c0_23, %c0_24] : memref<3x4x5x16xbf16, #tpu.memory_space<vmem>>, vector<1x1x5x16xbf16>
    %43 = vector.shape_cast %42 : vector<1x1x5x16xbf16> to vector<5x16xbf16>
    %44 = vector.shape_cast %41 : vector<5x16xbf16> to vector<1x1x5x16xbf16>
    tpu.vector_store %arg15[%c2, %c0_22, %c0_23, %c0_24], %44 {strides = array<i32>} : memref<3x4x5x16xbf16, #tpu.memory_space<vmem>>, vector<1x1x5x16xbf16>,
    %45 = vector.extract_strided_slice %32 {offsets = [0, 16], sizes = [5, 16], strides = [1, 1]} : vector<5x192xbf16> to vector<5x16xbf16>
    %c0_25 = arith.constant 0 : index
    %c1_26 = arith.constant 1 : index
    %c0_27 = arith.constant 0 : index
    %c0_28 = arith.constant 0 : index
    %46 = vector.load %arg15[%c0_25, %c1_26, %c0_27, %c0_28] : memref<3x4x5x16xbf16, #tpu.memory_space<vmem>>, vector<1x1x5x16xbf16>
    %47 = vector.shape_cast %46 : vector<1x1x5x16xbf16> to vector<5x16xbf16>
    %48 = vector.shape_cast %45 : vector<5x16xbf16> to vector<1x1x5x16xbf16>
    tpu.vector_store %arg15[%c0_25, %c1_26, %c0_27, %c0_28], %48 {strides = array<i32>} : memref<3x4x5x16xbf16, #tpu.memory_space<vmem>>, vector<1x1x5x16xbf16>,
    %49 = vector.extract_strided_slice %32 {offsets = [0, 80], sizes = [5, 16], strides = [1, 1]} : vector<5x192xbf16> to vector<5x16xbf16>
    %c1_29 = arith.constant 1 : index
    %c1_30 = arith.constant 1 : index
    %c0_31 = arith.constant 0 : index
    %c0_32 = arith.constant 0 : index
    %50 = vector.load %arg15[%c1_29, %c1_30, %c0_31, %c0_32] : memref<3x4x5x16xbf16, #tpu.memory_space<vmem>>, vector<1x1x5x16xbf16>
    %51 = vector.shape_cast %50 : vector<1x1x5x16xbf16> to vector<5x16xbf16>
    %52 = vector.shape_cast %49 : vector<5x16xbf16> to vector<1x1x5x16xbf16>
    tpu.vector_store %arg15[%c1_29, %c1_30, %c0_31, %c0_32], %52 {strides = array<i32>} : memref<3x4x5x16xbf16, #tpu.memory_space<vmem>>, vector<1x1x5x16xbf16>,
    %53 = vector.extract_strided_slice %32 {offsets = [0, 144], sizes = [5, 16], strides = [1, 1]} : vector<5x192xbf16> to vector<5x16xbf16>
    %c2_33 = arith.constant 2 : index
    %c1_34 = arith.constant 1 : index
    %c0_35 = arith.constant 0 : index
    %c0_36 = arith.constant 0 : index
    %54 = vector.load %arg15[%c2_33, %c1_34, %c0_35, %c0_36] : memref<3x4x5x16xbf16, #tpu.memory_space<vmem>>, vector<1x1x5x16xbf16>
    %55 = vector.shape_cast %54 : vector<1x1x5x16xbf16> to vector<5x16xbf16>
    %56 = vector.shape_cast %53 : vector<5x16xbf16> to vector<1x1x5x16xbf16>
    tpu.vector_store %arg15[%c2_33, %c1_34, %c0_35, %c0_36], %56 {strides = array<i32>} : memref<3x4x5x16xbf16, #tpu.memory_space<vmem>>, vector<1x1x5x16xbf16>,
    %57 = vector.extract_strided_slice %32 {offsets = [0, 32], sizes = [5, 16], strides = [1, 1]} : vector<5x192xbf16> to vector<5x16xbf16>
    %c0_37 = arith.constant 0 : index
    %c2_38 = arith.constant 2 : index
    %c0_39 = arith.constant 0 : index
    %c0_40 = arith.constant 0 : index
    %58 = vector.load %arg15[%c0_37, %c2_38, %c0_39, %c0_40] : memref<3x4x5x16xbf16, #tpu.memory_space<vmem>>, vector<1x1x5x16xbf16>
    %59 = vector.shape_cast %58 : vector<1x1x5x16xbf16> to vector<5x16xbf16>
    %60 = vector.shape_cast %57 : vector<5x16xbf16> to vector<1x1x5x16xbf16>
    tpu.vector_store %arg15[%c0_37, %c2_38, %c0_39, %c0_40], %60 {strides = array<i32>} : memref<3x4x5x16xbf16, #tpu.memory_space<vmem>>, vector<1x1x5x16xbf16>,
    %61 = vector.extract_strided_slice %32 {offsets = [0, 96], sizes = [5, 16], strides = [1, 1]} : vector<5x192xbf16> to vector<5x16xbf16>
    %c1_41 = arith.constant 1 : index
    %c2_42 = arith.constant 2 : index
    %c0_43 = arith.constant 0 : index
    %c0_44 = arith.constant 0 : index
    %62 = vector.load %arg15[%c1_41, %c2_42, %c0_43, %c0_44] : memref<3x4x5x16xbf16, #tpu.memory_space<vmem>>, vector<1x1x5x16xbf16>
    %63 = vector.shape_cast %62 : vector<1x1x5x16xbf16> to vector<5x16xbf16>
    %64 = vector.shape_cast %61 : vector<5x16xbf16> to vector<1x1x5x16xbf16>
    tpu.vector_store %arg15[%c1_41, %c2_42, %c0_43, %c0_44], %64 {strides = array<i32>} : memref<3x4x5x16xbf16, #tpu.memory_space<vmem>>, vector<1x1x5x16xbf16>,
    %65 = vector.extract_strided_slice %32 {offsets = [0, 160], sizes = [5, 16], strides = [1, 1]} : vector<5x192xbf16> to vector<5x16xbf16>
    %c2_45 = arith.constant 2 : index
    %c2_46 = arith.constant 2 : index
    %c0_47 = arith.constant 0 : index
    %c0_48 = arith.constant 0 : index
    %66 = vector.load %arg15[%c2_45, %c2_46, %c0_47, %c0_48] : memref<3x4x5x16xbf16, #tpu.memory_space<vmem>>, vector<1x1x5x16xbf16>
    %67 = vector.shape_cast %66 : vector<1x1x5x16xbf16> to vector<5x16xbf16>
    %68 = vector.shape_cast %65 : vector<5x16xbf16> to vector<1x1x5x16xbf16>
    tpu.vector_store %arg15[%c2_45, %c2_46, %c0_47, %c0_48], %68 {strides = array<i32>} : memref<3x4x5x16xbf16, #tpu.memory_space<vmem>>, vector<1x1x5x16xbf16>,
    %69 = vector.extract_strided_slice %32 {offsets = [0, 48], sizes = [5, 16], strides = [1, 1]} : vector<5x192xbf16> to vector<5x16xbf16>
    %c0_49 = arith.constant 0 : index
    %c3 = arith.constant 3 : index
    %c0_50 = arith.constant 0 : index
    %c0_51 = arith.constant 0 : index
    %70 = vector.load %arg15[%c0_49, %c3, %c0_50, %c0_51] : memref<3x4x5x16xbf16, #tpu.memory_space<vmem>>, vector<1x1x5x16xbf16>
    %71 = vector.shape_cast %70 : vector<1x1x5x16xbf16> to vector<5x16xbf16>
    %72 = vector.shape_cast %69 : vector<5x16xbf16> to vector<1x1x5x16xbf16>
    tpu.vector_store %arg15[%c0_49, %c3, %c0_50, %c0_51], %72 {strides = array<i32>} : memref<3x4x5x16xbf16, #tpu.memory_space<vmem>>, vector<1x1x5x16xbf16>,
    %73 = vector.extract_strided_slice %32 {offsets = [0, 112], sizes = [5, 16], strides = [1, 1]} : vector<5x192xbf16> to vector<5x16xbf16>
    %c1_52 = arith.constant 1 : index
    %c3_53 = arith.constant 3 : index
    %c0_54 = arith.constant 0 : index
    %c0_55 = arith.constant 0 : index
    %74 = vector.load %arg15[%c1_52, %c3_53, %c0_54, %c0_55] : memref<3x4x5x16xbf16, #tpu.memory_space<vmem>>, vector<1x1x5x16xbf16>
    %75 = vector.shape_cast %74 : vector<1x1x5x16xbf16> to vector<5x16xbf16>
    %76 = vector.shape_cast %73 : vector<5x16xbf16> to vector<1x1x5x16xbf16>
    tpu.vector_store %arg15[%c1_52, %c3_53, %c0_54, %c0_55], %76 {strides = array<i32>} : memref<3x4x5x16xbf16, #tpu.memory_space<vmem>>, vector<1x1x5x16xbf16>,
    %77 = vector.extract_strided_slice %32 {offsets = [0, 176], sizes = [5, 16], strides = [1, 1]} : vector<5x192xbf16> to vector<5x16xbf16>
    %c2_56 = arith.constant 2 : index
    %c3_57 = arith.constant 3 : index
    %c0_58 = arith.constant 0 : index
    %c0_59 = arith.constant 0 : index
    %78 = vector.load %arg15[%c2_56, %c3_57, %c0_58, %c0_59] : memref<3x4x5x16xbf16, #tpu.memory_space<vmem>>, vector<1x1x5x16xbf16>
    %79 = vector.shape_cast %78 : vector<1x1x5x16xbf16> to vector<5x16xbf16>
    %80 = vector.shape_cast %77 : vector<5x16xbf16> to vector<1x1x5x16xbf16>
    tpu.vector_store %arg15[%c2_56, %c3_57, %c0_58, %c0_59], %80 {strides = array<i32>} : memref<3x4x5x16xbf16, #tpu.memory_space<vmem>>, vector<1x1x5x16xbf16>,
    %c0_60 = arith.constant 0 : index
    %c0_61 = arith.constant 0 : index
    %c0_62 = arith.constant 0 : index
    %c0_63 = arith.constant 0 : index
    %81 = vector.load %arg15[%c0_60, %c0_61, %c0_62, %c0_63] : memref<3x4x5x16xbf16, #tpu.memory_space<vmem>>, vector<1x4x5x16xbf16>
    %82 = vector.shape_cast %81 : vector<1x4x5x16xbf16> to vector<4x5x16xbf16>
    %c1_64 = arith.constant 1 : index
    %c0_65 = arith.constant 0 : index
    %c0_66 = arith.constant 0 : index
    %c0_67 = arith.constant 0 : index
    %83 = vector.load %arg15[%c1_64, %c0_65, %c0_66, %c0_67] : memref<3x4x5x16xbf16, #tpu.memory_space<vmem>>, vector<1x4x5x16xbf16>
    %84 = vector.shape_cast %83 : vector<1x4x5x16xbf16> to vector<4x5x16xbf16>
    %c2_68 = arith.constant 2 : index
    %c0_69 = arith.constant 0 : index
    %c0_70 = arith.constant 0 : index
    %c0_71 = arith.constant 0 : index
    %85 = vector.load %arg15[%c2_68, %c0_69, %c0_70, %c0_71] : memref<3x4x5x16xbf16, #tpu.memory_space<vmem>>, vector<1x4x5x16xbf16>
    %86 = vector.shape_cast %85 : vector<1x4x5x16xbf16> to vector<4x5x16xbf16>
    "tpu.trace_start"() <{level = 10 : i32, message = "hqc,hkc->hqk"}> : () -> ()
    %cst_72 = arith.constant dense<0.000000e+00> : vector<4x5x5xf32>
    %87 = tpu.matmul %82, %84, %cst_72 {dimension_numbers = #tpu.dot_dimension_numbers<[2], [2], [1], [1], [0, 0, 0, 1, 1, 1], [0], [0]>} : vector<4x5x16xbf16>, vector<4x5x16xbf16>, vector<4x5x5xf32> -> vector<4x5x5xf32>
    "tpu.trace_stop"() : () -> ()
    %cst_73 = arith.constant 2.500000e-01 : f32
    %88 = vector.broadcast %cst_73 : f32 to vector<4x5x5xf32>
    %89 = arith.mulf %87, %88 : vector<4x5x5xf32>
    %cst_74 = arith.constant dense<0xFF800000> : vector<4x5xf32>
    %90 = vector.multi_reduction <maximumf>, %89, %cst_74 [2] : vector<4x5x5xf32> to vector<4x5xf32>
    %91 = vector.shape_cast %90 : vector<4x5xf32> to vector<4x5x1xf32>
    %92 = vector.broadcast %91 : vector<4x5x1xf32> to vector<4x5x5xf32>
    %93 = arith.subf %89, %92 : vector<4x5x5xf32>
    %94 = math.exp %93 : vector<4x5x5xf32>
    %cst_75 = arith.constant dense<0.000000e+00> : vector<4x5xf32>
    %95 = vector.multi_reduction <add>, %94, %cst_75 [2] : vector<4x5x5xf32> to vector<4x5xf32>
    %96 = vector.shape_cast %95 : vector<4x5xf32> to vector<4x5x1xf32>
    %97 = tpu.reciprocal %96 {approx = true} : vector<4x5x1xf32> -> vector<4x5x1xf32>
    %98 = vector.broadcast %97 : vector<4x5x1xf32> to vector<4x5x5xf32>
    %99 = arith.mulf %94, %98 : vector<4x5x5xf32>
    %100 = arith.truncf %99 : vector<4x5x5xf32> to vector<4x5x5xbf16>
    "tpu.trace_start"() <{level = 10 : i32, message = "hqk,hkc->hqc"}> : () -> ()
    %cst_76 = arith.constant dense<0.000000e+00> : vector<4x5x16xf32>
    %101 = tpu.matmul %100, %86, %cst_76 {dimension_numbers = #tpu.dot_dimension_numbers<[2], [1], [1], [2], [0, 0, 0, 1, 1, 2], [0], [0]>} : vector<4x5x5xbf16>, vector<4x5x16xbf16>, vector<4x5x16xf32> -> vector<4x5x16xf32>
    "tpu.trace_stop"() : () -> ()
    %102 = vector.extract_strided_slice %101 {offsets = [0, 0, 0], sizes = [1, 5, 16], strides = [1, 1, 1]} : vector<4x5x16xf32> to vector<1x5x16xf32>
    %103 = vector.shape_cast %102 : vector<1x5x16xf32> to vector<5x16xf32>
    %104 = arith.truncf %103 : vector<5x16xf32> to vector<5x16xbf16>
    %c0_77 = arith.constant 0 : index
    %c0_78 = arith.constant 0 : index
    %105 = vector.load %arg16[%c0_77, %c0_78] : memref<5x64xbf16, #tpu.memory_space<vmem>>, vector<5x16xbf16>
    tpu.vector_store %arg16[%c0_77, %c0_78], %104 {strides = array<i32>} : memref<5x64xbf16, #tpu.memory_space<vmem>>, vector<5x16xbf16>,
    %106 = vector.extract_strided_slice %101 {offsets = [1, 0, 0], sizes = [1, 5, 16], strides = [1, 1, 1]} : vector<4x5x16xf32> to vector<1x5x16xf32>
    %107 = vector.shape_cast %106 : vector<1x5x16xf32> to vector<5x16xf32>
    %108 = arith.truncf %107 : vector<5x16xf32> to vector<5x16xbf16>
    %c0_79 = arith.constant 0 : index
    %c16 = arith.constant 16 : index
    %109 = vector.load %arg16[%c0_79, %c16] : memref<5x64xbf16, #tpu.memory_space<vmem>>, vector<5x16xbf16>
    tpu.vector_store %arg16[%c0_79, %c16], %108 {strides = array<i32>} : memref<5x64xbf16, #tpu.memory_space<vmem>>, vector<5x16xbf16>,
    %110 = vector.extract_strided_slice %101 {offsets = [2, 0, 0], sizes = [1, 5, 16], strides = [1, 1, 1]} : vector<4x5x16xf32> to vector<1x5x16xf32>
    %111 = vector.shape_cast %110 : vector<1x5x16xf32> to vector<5x16xf32>
    %112 = arith.truncf %111 : vector<5x16xf32> to vector<5x16xbf16>
    %c0_80 = arith.constant 0 : index
    %c32 = arith.constant 32 : index
    %113 = vector.load %arg16[%c0_80, %c32] : memref<5x64xbf16, #tpu.memory_space<vmem>>, vector<5x16xbf16>
    tpu.vector_store %arg16[%c0_80, %c32], %112 {strides = array<i32>} : memref<5x64xbf16, #tpu.memory_space<vmem>>, vector<5x16xbf16>,
    %114 = vector.extract_strided_slice %101 {offsets = [3, 0, 0], sizes = [1, 5, 16], strides = [1, 1, 1]} : vector<4x5x16xf32> to vector<1x5x16xf32>
    %115 = vector.shape_cast %114 : vector<1x5x16xf32> to vector<5x16xf32>
    %116 = arith.truncf %115 : vector<5x16xf32> to vector<5x16xbf16>
    %c0_81 = arith.constant 0 : index
    %c48 = arith.constant 48 : index
    %117 = vector.load %arg16[%c0_81, %c48] : memref<5x64xbf16, #tpu.memory_space<vmem>>, vector<5x16xbf16>
    tpu.vector_store %arg16[%c0_81, %c48], %116 {strides = array<i32>} : memref<5x64xbf16, #tpu.memory_space<vmem>>, vector<5x16xbf16>,
    %c0_82 = arith.constant 0 : index
    %c0_83 = arith.constant 0 : index
    %118 = vector.load %arg16[%c0_82, %c0_83] : memref<5x64xbf16, #tpu.memory_space<vmem>>, vector<5x64xbf16>
    %c0_84 = arith.constant 0 : index
    %c0_85 = arith.constant 0 : index
    %119 = vector.load %arg8[%c0_84, %c0_85] : memref<64x64xbf16, #tpu.memory_space<vmem>>, vector<64x64xbf16>
    %cst_86 = arith.constant dense<0.000000e+00> : vector<5x64xf32>
    %120 = tpu.matmul %118, %119, %cst_86 {dimension_numbers = #tpu.dot_dimension_numbers<[1], [1], [0], [0], [0, 0, 1, 0], [], []>} : vector<5x64xbf16>, vector<64x64xbf16>, vector<5x64xf32> -> vector<5x64xf32>
    %121 = arith.addf %1, %120 : vector<5x64xf32>
    %c0_87 = arith.constant 0 : index
    %c0_88 = arith.constant 0 : index
    %122 = vector.load %arg9[%c0_87, %c0_88] : memref<1x64xf32, #tpu.memory_space<vmem>>, vector<1x64xf32>
    %123 = vector.broadcast %122 : vector<1x64xf32> to vector<5x64xf32>
    %124 = arith.addf %121, %123 : vector<5x64xf32>
    %c0_89 = arith.constant 0 : index
    %c0_90 = arith.constant 0 : index
    %125 = vector.load %arg4[%c0_89, %c0_90] : memref<1x64xf32, #tpu.memory_space<vmem>>, vector<1x64xf32>
    %c0_91 = arith.constant 0 : index
    %c0_92 = arith.constant 0 : index
    %126 = vector.load %arg5[%c0_91, %c0_92] : memref<1x64xf32, #tpu.memory_space<vmem>>, vector<1x64xf32>
    %cst_93 = arith.constant dense<0.000000e+00> : vector<5xf32>
    %127 = vector.multi_reduction <add>, %124, %cst_93 [1] : vector<5x64xf32> to vector<5xf32>
    %128 = vector.shape_cast %127 : vector<5xf32> to vector<5x1xf32>
    %cst_94 = arith.constant 6.400000e+01 : f32
    %129 = vector.broadcast %cst_94 : f32 to vector<5x1xf32>
    %130 = arith.divf %128, %129 : vector<5x1xf32>
    %131 = vector.broadcast %130 : vector<5x1xf32> to vector<5x64xf32>
    %132 = arith.subf %124, %131 : vector<5x64xf32>
    %133 = arith.mulf %132, %132 : vector<5x64xf32>
    %cst_95 = arith.constant dense<0.000000e+00> : vector<5xf32>
    %134 = vector.multi_reduction <add>, %133, %cst_95 [1] : vector<5x64xf32> to vector<5xf32>
    %135 = vector.shape_cast %134 : vector<5xf32> to vector<5x1xf32>
    %cst_96 = arith.constant 6.400000e+01 : f32
    %136 = vector.broadcast %cst_96 : f32 to vector<5x1xf32>
    %137 = arith.divf %135, %136 : vector<5x1xf32>
    %138 = vector.broadcast %130 : vector<5x1xf32> to vector<5x64xf32>
    %139 = arith.subf %124, %138 : vector<5x64xf32>
    %cst_97 = arith.constant 9.99999974E-6 : f32
    %140 = vector.broadcast %cst_97 : f32 to vector<5x1xf32>
    %141 = arith.addf %137, %140 : vector<5x1xf32>
    %142 = math.rsqrt %141 : vector<5x1xf32>
    %143 = vector.broadcast %142 : vector<5x1xf32> to vector<5x64xf32>
    %144 = arith.mulf %139, %143 : vector<5x64xf32>
    %145 = vector.broadcast %125 : vector<1x64xf32> to vector<5x64xf32>
    %146 = arith.mulf %144, %145 : vector<5x64xf32>
    %147 = vector.broadcast %126 : vector<1x64xf32> to vector<5x64xf32>
    %148 = arith.addf %146, %147 : vector<5x64xf32>
    %c0_98 = arith.constant 0 : index
    %c0_99 = arith.constant 0 : index
    %149 = vector.load %arg10[%c0_98, %c0_99] : memref<256x64xbf16, #tpu.memory_space<vmem>>, vector<256x64xbf16>
    %150 = arith.truncf %148 : vector<5x64xf32> to vector<5x64xbf16>
    %cst_100 = arith.constant dense<0.000000e+00> : vector<5x256xf32>
    %151 = tpu.matmul %150, %149, %cst_100 {dimension_numbers = #tpu.dot_dimension_numbers<[1], [1], [0], [0], [0, 0, 1, 0], [], []>} : vector<5x64xbf16>, vector<256x64xbf16>, vector<5x256xf32> -> vector<5x256xf32>
    %c0_101 = arith.constant 0 : index
    %c0_102 = arith.constant 0 : index
    %152 = vector.load %arg11[%c0_101, %c0_102] : memref<1x256xf32, #tpu.memory_space<vmem>>, vector<1x256xf32>
    %153 = vector.broadcast %152 : vector<1x256xf32> to vector<5x256xf32>
    %154 = arith.addf %151, %153 : vector<5x256xf32>
    %155 = arith.truncf %154 : vector<5x256xf32> to vector<5x256xbf16>
    %cst_103 = arith.constant 1.703130e+00 : bf16
    %156 = vector.broadcast %cst_103 : bf16 to vector<5x256xbf16>
    %157 = arith.mulf %156, %155 : vector<5x256xbf16>
    %158 = arith.negf %157 : vector<5x256xbf16>
    %159 = math.exp %158 : vector<5x256xbf16>
    %cst_104 = arith.constant 1.000000e+00 : bf16
    %160 = vector.broadcast %cst_104 : bf16 to vector<5x256xbf16>
    %161 = arith.addf %160, %159 : vector<5x256xbf16>
    %162 = arith.divf %160, %161 : vector<5x256xbf16>
    %163 = arith.mulf %155, %162 : vector<5x256xbf16>
    %c0_105 = arith.constant 0 : index
    %c0_106 = arith.constant 0 : index
    %164 = vector.load %arg12[%c0_105, %c0_106] : memref<64x256xbf16, #tpu.memory_space<vmem>>, vector<64x256xbf16>
    %cst_107 = arith.constant dense<0.000000e+00> : vector<5x64xf32>
    %165 = tpu.matmul %163, %164, %cst_107 {dimension_numbers = #tpu.dot_dimension_numbers<[1], [1], [0], [0], [0, 0, 1, 0], [], []>} : vector<5x256xbf16>, vector<64x256xbf16>, vector<5x64xf32> -> vector<5x64xf32>
    %166 = arith.addf %124, %165 : vector<5x64xf32>
    %c0_108 = arith.constant 0 : index
    %c0_109 = arith.constant 0 : index
    %167 = vector.load %arg13[%c0_108, %c0_109] : memref<1x64xf32, #tpu.memory_space<vmem>>, vector<1x64xf32>
    %168 = vector.broadcast %167 : vector<1x64xf32> to vector<5x64xf32>
    %169 = arith.addf %166, %168 : vector<5x64xf32>
    %170 = arith.truncf %169 : vector<5x64xf32> to vector<5x64xbf16>
    %c0_110 = arith.constant 0 : index
    %c0_111 = arith.constant 0 : index
    %c0_112 = arith.constant 0 : index
    %171 = vector.load %arg14[%c0_110, %c0_111, %c0_112] : memref<1x5x64xbf16, #tpu.memory_space<vmem>>, vector<1x5x64xbf16>
    %172 = vector.shape_cast %171 : vector<1x5x64xbf16> to vector<5x64xbf16>
    %173 = vector.shape_cast %170 : vector<5x64xbf16> to vector<1x5x64xbf16>
    tpu.vector_store %arg14[%c0_110, %c0_111, %c0_112], %173 {strides = array<i32>} : memref<1x5x64xbf16, #tpu.memory_space<vmem>>, vector<1x5x64xbf16>,
    return
  }
  func.func @transform_0(%arg0: i32) -> (i32, i32, i32) {
    %c0_i32 = arith.constant 0 : i32
    %c0_i32_0 = arith.constant 0 : i32
    %c0_i32_1 = arith.constant 0 : i32
    return %arg0, %c0_i32, %c0_i32_0 : i32, i32, i32
  }
  func.func @transform_1(%arg0: i32) -> (i32, i32) {
    %c0_i32 = arith.constant 0 : i32
    %c0_i32_0 = arith.constant 0 : i32
    %c0_i32_1 = arith.constant 0 : i32
    return %c0_i32, %c0_i32_0 : i32, i32
  }
  func.func @transform_2(%arg0: i32) -> (i32, i32) {
    %c0_i32 = arith.constant 0 : i32
    %c0_i32_0 = arith.constant 0 : i32
    %c0_i32_1 = arith.constant 0 : i32
    return %c0_i32, %c0_i32_0 : i32, i32
  }
  func.func @transform_3(%arg0: i32) -> (i32, i32) {
    %c0_i32 = arith.constant 0 : i32
    %c0_i32_0 = arith.constant 0 : i32
    %c0_i32_1 = arith.constant 0 : i32
    return %c0_i32, %c0_i32_0 : i32, i32
  }
  func.func @transform_4(%arg0: i32) -> (i32, i32) {
    %c0_i32 = arith.constant 0 : i32
    %c0_i32_0 = arith.constant 0 : i32
    %c0_i32_1 = arith.constant 0 : i32
    return %c0_i32, %c0_i32_0 : i32, i32
  }
  func.func @transform_5(%arg0: i32) -> (i32, i32) {
    %c0_i32 = arith.constant 0 : i32
    %c0_i32_0 = arith.constant 0 : i32
    %c0_i32_1 = arith.constant 0 : i32
    return %c0_i32, %c0_i32_0 : i32, i32
  }
  func.func @transform_6(%arg0: i32) -> (i32, i32) {
    %c0_i32 = arith.constant 0 : i32
    %c0_i32_0 = arith.constant 0 : i32
    %c0_i32_1 = arith.constant 0 : i32
    return %c0_i32, %c0_i32_0 : i32, i32
  }
  func.func @transform_7(%arg0: i32) -> (i32, i32) {
    %c0_i32 = arith.constant 0 : i32
    %c0_i32_0 = arith.constant 0 : i32
    %c0_i32_1 = arith.constant 0 : i32
    return %c0_i32, %c0_i32_0 : i32, i32
  }
  func.func @transform_8(%arg0: i32) -> (i32, i32) {
    %c0_i32 = arith.constant 0 : i32
    %c0_i32_0 = arith.constant 0 : i32
    %c0_i32_1 = arith.constant 0 : i32
    return %c0_i32, %c0_i32_0 : i32, i32
  }
  func.func @transform_9(%arg0: i32) -> (i32, i32) {
    %c0_i32 = arith.constant 0 : i32
    %c0_i32_0 = arith.constant 0 : i32
    %c0_i32_1 = arith.constant 0 : i32
    return %c0_i32, %c0_i32_0 : i32, i32
  }
  func.func @transform_10(%arg0: i32) -> (i32, i32) {
    %c0_i32 = arith.constant 0 : i32
    %c0_i32_0 = arith.constant 0 : i32
    %c0_i32_1 = arith.constant 0 : i32
    return %c0_i32, %c0_i32_0 : i32, i32
  }
  func.func @transform_11(%arg0: i32) -> (i32, i32) {
    %c0_i32 = arith.constant 0 : i32
    %c0_i32_0 = arith.constant 0 : i32
    %c0_i32_1 = arith.constant 0 : i32
    return %c0_i32, %c0_i32_0 : i32, i32
  }
  func.func @transform_12(%arg0: i32) -> (i32, i32) {
    %c0_i32 = arith.constant 0 : i32
    %c0_i32_0 = arith.constant 0 : i32
    %c0_i32_1 = arith.constant 0 : i32
    return %c0_i32, %c0_i32_0 : i32, i32
  }
  func.func @transform_13(%arg0: i32) -> (i32, i32, i32) {
    %c0_i32 = arith.constant 0 : i32
    %c0_i32_0 = arith.constant 0 : i32
    %c0_i32_1 = arith.constant 0 : i32
    return %arg0, %c0_i32, %c0_i32_0 : i32, i32, i32
  }
}

module attributes {stable_mosaic.version = 11 : i64} {
  func.func @_l2norm_kernel(%arg0: i32, %arg1: memref<128x512xf32, #tpu.memory_space<vmem>>, %arg2: memref<128x512xbf16, #tpu.memory_space<vmem>>) attributes {dimension_semantics = [#tpu.dimension_semantics<parallel>], iteration_bounds = array<i64: 1>, scalar_prefetch = 0 : i64, scratch_operands = 0 : i64, tpu.core_type = #tpu.core_type<tc>, window_params = [{transform_indices = @transform_0, window_bounds = array<i64: 128, 512>}, {transform_indices = @transform_1, window_bounds = array<i64: 128, 512>}]} {
    %c0 = arith.constant 0 : index
    %c0_0 = arith.constant 0 : index
    %0 = vector.load %arg1[%c0, %c0_0] : memref<128x512xf32, #tpu.memory_space<vmem>>, vector<128x512xf32>
    %1 = arith.mulf %0, %0 : vector<128x512xf32>
    %cst = arith.constant dense<0.000000e+00> : vector<128xf32>
    %2 = vector.multi_reduction <add>, %1, %cst [1] : vector<128x512xf32> to vector<128xf32>
    %3 = vector.shape_cast %2 : vector<128xf32> to vector<128x1xf32>
    %4 = math.rsqrt %3 : vector<128x1xf32>
    %5 = vector.broadcast %4 : vector<128x1xf32> to vector<128x512xf32>
    %6 = arith.mulf %0, %5 : vector<128x512xf32>
    %7 = arith.truncf %6 : vector<128x512xf32> to vector<128x512xbf16>
    %c0_1 = arith.constant 0 : index
    %c0_2 = arith.constant 0 : index
    %8 = vector.load %arg2[%c0_1, %c0_2] : memref<128x512xbf16, #tpu.memory_space<vmem>>, vector<128x512xbf16>
    tpu.vector_store %arg2[%c0_1, %c0_2], %7 {strides = array<i32>} : memref<128x512xbf16, #tpu.memory_space<vmem>>, vector<128x512xbf16>,
    return
  }
  func.func @transform_0(%arg0: i32) -> (i32, i32) {
    %c0_i32 = arith.constant 0 : i32
    %c0_i32_0 = arith.constant 0 : i32
    return %arg0, %c0_i32 : i32, i32
  }
  func.func @transform_1(%arg0: i32) -> (i32, i32) {
    %c0_i32 = arith.constant 0 : i32
    %c0_i32_0 = arith.constant 0 : i32
    return %arg0, %c0_i32 : i32, i32
  }
}

module attributes {stable_mosaic.version = 11 : i64} {
  func.func @_clip_head_kernel(%arg0: i32, %arg1: i32, %arg2: memref<1x1xf32, #tpu.memory_space<smem>>, %arg3: memref<8x512xf32, #tpu.memory_space<vmem>>, %arg4: memref<128x512xbf16, #tpu.memory_space<vmem>>, %arg5: memref<512x512xbf16, #tpu.memory_space<vmem>>, %arg6: memref<8x128xf32, #tpu.memory_space<vmem>>, %arg7: memref<8x512xf32, #tpu.memory_space<vmem>>, %arg8: memref<8x512xf32, #tpu.memory_space<vmem>>) attributes {dimension_semantics = [#tpu.dimension_semantics<parallel>, #tpu.dimension_semantics<arbitrary>], iteration_bounds = array<i64: 1, 1>, scalar_prefetch = 0 : i64, scratch_operands = 1 : i64, tpu.core_type = #tpu.core_type<tc>, window_params = [{transform_indices = @transform_0, window_bounds = array<i64: 1, 1>}, {transform_indices = @transform_1, window_bounds = array<i64: 8, 512>}, {transform_indices = @transform_2, window_bounds = array<i64: 128, 512>}, {pipeline_mode = #tpu.pipeline_mode<synchronous>, transform_indices = @transform_3, window_bounds = array<i64: 512, 512>}, {transform_indices = @transform_4, window_bounds = array<i64: 8, 128>}, {transform_indices = @transform_5, window_bounds = array<i64: 8, 512>}]} {
    %c0_i32 = arith.constant 0 : i32
    %0 = arith.cmpi eq, %arg1, %c0_i32 : i32
    %1 = arith.extui %0 : i1 to i32
    %c0_i32_0 = arith.constant 0 : i32
    %2 = arith.cmpi ne, %1, %c0_i32_0 : i32
    scf.if %2 {
      %c0_8 = arith.constant 0 : index
      %c0_9 = arith.constant 0 : index
      %11 = vector.load %arg3[%c0_8, %c0_9] : memref<8x512xf32, #tpu.memory_space<vmem>>, vector<8x512xf32>
      %12 = arith.truncf %11 : vector<8x512xf32> to vector<8x512xbf16>
      %c0_10 = arith.constant 0 : index
      %c0_11 = arith.constant 0 : index
      %13 = vector.load %arg5[%c0_10, %c0_11] : memref<512x512xbf16, #tpu.memory_space<vmem>>, vector<512x512xbf16>
      %cst_12 = arith.constant dense<0.000000e+00> : vector<8x512xf32>
      %14 = tpu.matmul %12, %13, %cst_12 {dimension_numbers = #tpu.dot_dimension_numbers<[1], [1], [0], [0], [0, 0, 1, 0], [], []>} : vector<8x512xbf16>, vector<512x512xbf16>, vector<8x512xf32> -> vector<8x512xf32>
      %15 = arith.mulf %14, %14 : vector<8x512xf32>
      %cst_13 = arith.constant dense<0.000000e+00> : vector<8xf32>
      %16 = vector.multi_reduction <add>, %15, %cst_13 [1] : vector<8x512xf32> to vector<8xf32>
      %17 = vector.shape_cast %16 : vector<8xf32> to vector<8x1xf32>
      %18 = math.rsqrt %17 : vector<8x1xf32>
      %19 = vector.broadcast %18 : vector<8x1xf32> to vector<8x512xf32>
      %20 = arith.mulf %14, %19 : vector<8x512xf32>
      %c0_14 = arith.constant 0 : index
      %c0_15 = arith.constant 0 : index
      %21 = vector.load %arg8[%c0_14, %c0_15] : memref<8x512xf32, #tpu.memory_space<vmem>>, vector<8x512xf32>
      tpu.vector_store %arg8[%c0_14, %c0_15], %20 {strides = array<i32>} : memref<8x512xf32, #tpu.memory_space<vmem>>, vector<8x512xf32>,
      %c0_16 = arith.constant 0 : index
      %c0_17 = arith.constant 0 : index
      %22 = vector.load %arg7[%c0_16, %c0_17] : memref<8x512xf32, #tpu.memory_space<vmem>>, vector<8x512xf32>
      tpu.vector_store %arg7[%c0_16, %c0_17], %20 {strides = array<i32>} : memref<8x512xf32, #tpu.memory_space<vmem>>, vector<8x512xf32>,
    } else {
    }
    %c0 = arith.constant 0 : index
    %c0_1 = arith.constant 0 : index
    %3 = vector.load %arg8[%c0, %c0_1] : memref<8x512xf32, #tpu.memory_space<vmem>>, vector<8x512xf32>
    %4 = arith.truncf %3 : vector<8x512xf32> to vector<8x512xbf16>
    %c0_2 = arith.constant 0 : index
    %c0_3 = arith.constant 0 : index
    %5 = vector.load %arg4[%c0_2, %c0_3] : memref<128x512xbf16, #tpu.memory_space<vmem>>, vector<128x512xbf16>
    %cst = arith.constant dense<0.000000e+00> : vector<8x128xf32>
    %6 = tpu.matmul %4, %5, %cst {dimension_numbers = #tpu.dot_dimension_numbers<[1], [1], [0], [0], [0, 0, 1, 0], [], []>} : vector<8x512xbf16>, vector<128x512xbf16>, vector<8x128xf32> -> vector<8x128xf32>
    %c0_4 = arith.constant 0 : index
    %c0_5 = arith.constant 0 : index
    %7 = memref.load %arg2[%c0_4, %c0_5] : memref<1x1xf32, #tpu.memory_space<smem>>
    %8 = vector.broadcast %7 : f32 to vector<8x128xf32>
    %9 = arith.mulf %8, %6 : vector<8x128xf32>
    %c0_6 = arith.constant 0 : index
    %c0_7 = arith.constant 0 : index
    %10 = vector.load %arg6[%c0_6, %c0_7] : memref<8x128xf32, #tpu.memory_space<vmem>>, vector<8x128xf32>
    tpu.vector_store %arg6[%c0_6, %c0_7], %9 {strides = array<i32>} : memref<8x128xf32, #tpu.memory_space<vmem>>, vector<8x128xf32>,
    return
  }
  func.func @transform_0(%arg0: i32, %arg1: i32) -> (i32, i32) {
    %c0_i32 = arith.constant 0 : i32
    %c0_i32_0 = arith.constant 0 : i32
    %c0_i32_1 = arith.constant 0 : i32
    return %c0_i32, %c0_i32_0 : i32, i32
  }
  func.func @transform_1(%arg0: i32, %arg1: i32) -> (i32, i32) {
    %c0_i32 = arith.constant 0 : i32
    %c0_i32_0 = arith.constant 0 : i32
    return %arg0, %c0_i32 : i32, i32
  }
  func.func @transform_2(%arg0: i32, %arg1: i32) -> (i32, i32) {
    %c0_i32 = arith.constant 0 : i32
    %c0_i32_0 = arith.constant 0 : i32
    return %arg1, %c0_i32 : i32, i32
  }
  func.func @transform_3(%arg0: i32, %arg1: i32) -> (i32, i32) {
    %c0_i32 = arith.constant 0 : i32
    %c0_i32_0 = arith.constant 0 : i32
    %c0_i32_1 = arith.constant 0 : i32
    return %c0_i32, %c0_i32_0 : i32, i32
  }
  func.func @transform_4(%arg0: i32, %arg1: i32) -> (i32, i32) {
    %c0_i32 = arith.constant 0 : i32
    return %arg0, %arg1 : i32, i32
  }
  func.func @transform_5(%arg0: i32, %arg1: i32) -> (i32, i32) {
    %c0_i32 = arith.constant 0 : i32
    %c0_i32_0 = arith.constant 0 : i32
    return %arg0, %c0_i32 : i32, i32
  }
}

</mosaic_0001>

<bundles_post_ra>
// kernel: class_incremental_clip_forward.11
= control target key start
LH: loop header
LB: loop body
LE: loop exit
PB: predicated region body
PF: predicated region fallthrough
CT: control target
= control target key end

     0   :  { %vm20_vm0 = vcmask 523264   ;;  %v288_v24 = vmov 0   ;;  %s387_s0 = inlined_call_operand.vmem [shape: bf16[8,64], index: 0, kind: input, shape index: {}]   ;;  %s388_s3 = inlined_call_operand.vmem [shape: bf16[64,512], index: 3, kind: input, shape index: {}]   ;;  %s389_s1 = inlined_call_operand.vmem [shape: f32[1,64], index: 1, kind: input, shape index: {}]   ;;  %s390_s2 = inlined_call_operand.vmem [shape: f32[1,64], index: 2, kind: input, shape index: {}]   ;;  %s391_s4 = inlined_call_operand.vmem [shape: f32[8,512], index: 4, kind: output, shape index: {}]  }
   0x1   :  { %v18_v0 = vld [vmem:[%s387_s0] sm:$0xf]  ;;  %v262_v8 = vld [vmem:[%s388_s3 + $0x4] ss:$16 sps:$4 sm:$0xff]   ;;  %v264_v9 = vld [vmem:[%s388_s3 + $0xc] ss:$16 sps:$4 sm:$0xff]   ;;  %183 = vmatprep.mubr.bf16.mxu0 %v288_v24  ;;  %224 = vmatprep.mubr.bf16.mxu1 %v288_v24 }
   0x2   :  { %v19_v1 = vunpack.c.l.bf16 %v18_v0  ;;  %151 = vmatprep.subr.bf16.mxu0 %v262_v8  ;;  %v266_v10 = vld [vmem:[%s388_s3] ss:$16 sps:$4 sm:$0xff]   ;;  %v267_v11 = vld [vmem:[%s388_s3 + $0x8] ss:$16 sps:$4 sm:$0xff]   ;;  %192 = vmatprep.subr.bf16.mxu1 %v264_v9  ;;  %v268_v12 = vld [vmem:[%s388_s3 + $0x24] ss:$16 sps:$4 sm:$0xff]  }
   0x3   :  { %152 = vmatpush1.bf16.msra.mxu0 %v266_v10  ;;  %193 = vmatpush1.bf16.msra.mxu1 %v267_v11  ;;  %v270_v13 = vld [vmem:[%s388_s3 + $0x2c] ss:$16 sps:$4 sm:$0xff]   ;;  %v272_v14 = vld [vmem:[%s388_s3 + $0x20] ss:$16 sps:$4 sm:$0xff]   ;;  %v273_v15 = vld [vmem:[%s388_s3 + $0x28] ss:$16 sps:$4 sm:$0xff]  }
   0x4   :  { %v21_v2 = vsel %vm20_vm0, %v19_v1, 0.0  ;;  %153 = vmatprep.subr.bf16.mxu0 %v268_v12  ;;  %194 = vmatprep.subr.bf16.mxu1 %v270_v13  ;;  %v274_v16 = vld [vmem:[%s388_s3 + $0x44] ss:$16 sps:$4 sm:$0xff]   ;;  %v276_v17 = vld [vmem:[%s388_s3 + $0x4c] ss:$16 sps:$4 sm:$0xff]  }
   0x5   :  { %22 = vadd.xlane.f32.xlu0 %v21_v2  ;;  %v278_v18 = vld [vmem:[%s388_s3 + $0x40] ss:$16 sps:$4 sm:$0xff]   ;;  %v279_v19 = vld [vmem:[%s388_s3 + $0x48] ss:$16 sps:$4 sm:$0xff]   ;;  %v280_v20 = vld [vmem:[%s388_s3 + $0x64] ss:$16 sps:$4 sm:$0xff]  }
   0x6   :  { %v282_v21 = vld [vmem:[%s388_s3 + $0x6c] ss:$16 sps:$4 sm:$0xff]   ;;  %v284_v22 = vld [vmem:[%s388_s3 + $0x60] ss:$16 sps:$4 sm:$0xff]   ;;  %v285_v23 = vld [vmem:[%s388_s3 + $0x68] ss:$16 sps:$4 sm:$0xff]  }
   0x7   :  { %154 = vmatpush1.bf16.msra.mxu0 %v272_v14  ;;  %195 = vmatpush1.bf16.msra.mxu1 %v273_v15  ;;  %v241_v29 = vld [vmem:[%s389_s1] ss:$0 sm:$0xff] }
   0x8   :  { %155 = vmatprep.subr.bf16.mxu0 %v274_v16  ;;  %196 = vmatprep.subr.bf16.mxu1 %v276_v17  ;;  %v242_v31 = vld [vmem:[%s390_s2] ss:$0 sm:$0xff] }
   0xb   :  { %156 = vmatpush1.bf16.msra.mxu0 %v278_v18  ;;  %197 = vmatpush1.bf16.msra.mxu1 %v279_v19 }
   0xc   :  { %157 = vmatprep.subr.bf16.mxu0 %v280_v20  ;;  %198 = vmatprep.subr.bf16.mxu1 %v282_v21 }
   0xf   :  { %158 = vmatpush1.bf16.msra.mxu0 %v284_v22  ;;  %199 = vmatpush1.bf16.msra.mxu1 %v285_v23 }
  0x92   :  { %v23_v3 = vpop.xlane.xlu0 %22 }
  0x93   :  { %v25_v4 = vmul.f32 0.015625, %v23_v3 }
  0x95   :  { %v26_v5 = vsub.f32 %v19_v1, %v25_v4 }
  0x97   :  { %v27_v6 = vmul.f32 %v26_v5, %v26_v5 }
  0x99   :  { %v28_v7 = vsel %vm20_vm0, %v27_v6, 0.0 }
  0x9a   :  { %29 = vadd.xlane.f32.xlu0 %v28_v7 }
 0x127   :  { %v30_v25 = vpop.xlane.xlu0 %29 }
 0x128   :  { %v31_v26 = vmul.f32 0.015625, %v30_v25 }
 0x12a   :  { %v32_v27 = vadd.f32 1e-05, %v31_v26 }
 0x12c   :  { %286 = vrsqrt.f32 %v32_v27 }
 0x136   :  { %v287_v28 = vpop.eup %286 }
 0x137   :  { %v34_v30 = vmul.f32 %v287_v28, %v26_v5 }
 0x139   :  { %v42_v32 = vmul.f32 %v241_v29, %v34_v30 }
 0x13b   :  { %v50_v33 = vadd.f32 %v242_v31, %v42_v32 }
 0x13d   :  { %v51_v34 = vpack.c.bf16 %v50_v33, %v50_v33 }
 0x13f   :  { %259 = vmatmul.mubr.msk.bf16.vlgmr.msra.gmra.mrb[0].mxu0 %vm20_vm0, %v51_v34  ;;  %260 = vmatmul.mubr.msk.bf16.vlgmr.msra.gmra.mrb[0].mxu1 %vm20_vm0, %v51_v34 }
 0x212   :  { %v185_v35 = vpop.f32.mrb[0].mxu0  ;;  %v226_v36 = vpop.f32.mrb[0].mxu1 }
 0x213   :  { %233 = vst [vmem:[%s391_s4] sm:$0xff] %v185_v35  ;;  %235 = vst [vmem:[%s391_s4 + $0x10] sm:$0xff] %v226_v36  ;;  %v187_v37 = vpop.f32.mrb[1].mxu0  ;;  %v228_v38 = vpop.f32.mrb[1].mxu1 }
 0x214   :  { %234 = vst [vmem:[%s391_s4 + $0x8] sm:$0xff] %v187_v37  ;;  %236 = vst [vmem:[%s391_s4 + $0x18] sm:$0xff] %v228_v38  ;;  %v189_v39 = vpop.f32.mrb[2].mxu0  ;;  %v230_v40 = vpop.f32.mrb[2].mxu1 }
 0x215   :  { %v190_v41 = vpop.f32.mrb[3].mxu0  ;;  %v231_v42 = vpop.f32.mrb[3].mxu1 }

// kernel: class_incremental_clip_forward.12
= control target key start
LH: loop header
LB: loop body
LE: loop exit
PB: predicated region body
PF: predicated region fallthrough
CT: control target
= control target key end

     0   :  { %vm60_vm0 = vcmask 523264   ;;  %s200_s1 = inlined_call_operand.vmem [shape: bf16[64,192], index: 1, kind: input, shape index: {}]   ;;  %s201_s0 = inlined_call_operand.vmem [shape: f32[8,192], index: 0, kind: input, shape index: {}]   ;;  %s202_s2 = inlined_call_operand.vmem [shape: f32[8,64], index: 2, kind: output, shape index: {}]  }
   0x1   :  { %v134_v0 = vld [vmem:[%s200_s1 + $0x4] ss:$8 sps:$4 sm:$0xff]   ;;  %v136_v1 = vld [vmem:[%s200_s1] ss:$8 sps:$4 sm:$0xff]   ;;  %v137_v2 = vld [vmem:[%s200_s1 + $0x14] ss:$8 sps:$4 sm:$0xff]  }
   0x2   :  { %129 = vmatprep.subr.msk.bf16.mxu0 %vm60_vm0, %v134_v0  ;;  %v13_v3 = vld [vmem:[%s201_s0 + $0x8] sm:$0xff]  ;;  %v139_v5 = vld [vmem:[%s200_s1 + $0x10] ss:$8 sps:$4 sm:$0xff]   ;;  %v143_v8 = vld [vmem:[%s200_s1 + $0x34] ss:$8 sps:$4 sm:$0xff]  }
   0x3   :  { %77 = vmatpush1.bf16.xpose.msra.mxu0 %v136_v1  ;;  %v15_v4 = vpack.c.bf16 %v13_v3, %v13_v3  ;;  %v140_v6 = vld [vmem:[%s200_s1 + $0x24] ss:$8 sps:$4 sm:$0xff]   ;;  %v142_v7 = vld [vmem:[%s200_s1 + $0x20] ss:$8 sps:$4 sm:$0xff]   ;;  %v145_v9 = vld [vmem:[%s200_s1 + $0x30] ss:$8 sps:$4 sm:$0xff]  }
   0x4   :  { %130 = vmatprep.subr.msk.bf16.mxu0 %vm60_vm0, %v137_v2  ;;  %v12_v10 = vld [vmem:[%s201_s0] sm:$0xff] }
   0x5   :  { %133 = vmatprep.mubr.msk.bf16.mxu0 %vm60_vm0, %v15_v4  ;;  %v14_v11 = vpack.c.bf16 %v12_v10, %v12_v10 }
   0xb   :  { %79 = vmatpush1.bf16.xpose.msra.mxu0 %v139_v5 }
   0xc   :  { %131 = vmatprep.subr.msk.bf16.mxu0 %vm60_vm0, %v140_v6 }
  0x13   :  { %81 = vmatpush1.bf16.xpose.msra.mxu0 %v142_v7 }
  0x14   :  { %132 = vmatprep.subr.msk.bf16.mxu0 %vm60_vm0, %v143_v8 }
  0x1b   :  { %83 = vmatpush1.bf16.xpose.msra.mxu0 %v145_v9 }
  0x22   :  { %109 = vmatmul.mubr.bf16.vlgmr.msra.gmra.mrb[0].mxu0 %v14_v11 }
  0xf5   :  { %v110_v12 = vpop.f32.mrb[0].mxu0 }
  0xf6   :  { %116 = vst.msk [vmem:[%s202_s2] sm:$0xff] %vm60_vm0, %v110_v12  ;;  %v112_v13 = vpop.f32.mrb[1].mxu0 }
  0xf7   :  { %v113_v14 = vpop.f32.mrb[2].mxu0 }
  0xf8   :  { %v114_v15 = vpop.f32.mrb[3].mxu0 }

// kernel: class_incremental_clip_forward.10
= control target key start
LH: loop header
LB: loop body
LE: loop exit
PB: predicated region body
PF: predicated region fallthrough
CT: control target
= control target key end

     0   :  { %s2087_s29 = smov 0   ;;  %s2405_s0 = inlined_call_operand.vmem [shape: bf16[4,8,64], index: 0, kind: input, shape index: {}]   ;;  %s2406_s1 = inlined_call_operand.vmem [shape: f32[8,8], index: 1, kind: input, shape index: {}]   ;;  %s2407_s2 = inlined_call_operand.vmem [shape: f32[1,64], index: 2, kind: input, shape index: {}, may-alias: {2,4}]   ;;  %s2408_s3 = inlined_call_operand.vmem [shape: f32[1,64], index: 3, kind: input, shape index: {}, may-alias: {3,5,9,13}]   ;;  %s2409_s4 = inlined_call_operand.vmem [shape: f32[1,64], index: 4, kind: input, shape index: {}, may-alias: {2,4}]   ;;  %s2410_s5 = inlined_call_operand.vmem [shape: f32[1,64], index: 5, kind: input, shape index: {}, may-alias: {3,5,9,13}]   ;;  %s2411_s6 = inlined_call_operand.vmem [shape: bf16[192,64], index: 6, kind: input, shape index: {}]   ;;  %s2412_s7 = inlined_call_operand.vmem [shape: f32[1,192], index: 7, kind: input, shape index: {}]   ;;  %s2413_s8 = inlined_call_operand.vmem [shape: bf16[64,64], index: 8, kind: input, shape index: {}]   ;;  %s2414_s9 = inlined_call_operand.vmem [shape: f32[1,64], index: 9, kind: input, shape index: {}, may-alias: {3,5,9,13}]   ;;  %s2415_s10 = inlined_call_operand.vmem [shape: bf16[256,64], index: 10, kind: input, shape index: {}]   ;;  %s2416_s11 = inlined_call_operand.vmem [shape: f32[1,256], index: 11, kind: input, shape index: {}]   ;;  %s2417_s12 = inlined_call_operand.vmem [shape: bf16[64,256], index: 12, kind: input, shape index: {}]   ;;  %s2418_s13 = inlined_call_operand.vmem [shape: f32[1,64], index: 13, kind: input, shape index: {}, may-alias: {3,5,9,13}]   ;;  %s2419_s14 = inlined_call_operand.vmem [shape: bf16[4,8,64], index: 14, kind: output, shape index: {}]  }
   0x1 LB: > { %s1719_s30 = sadd.s32 4294967295, %s2000_s29   ;;  %p1723_p0 = scmp.ge.s32.totalorder %s2000_s29, 1  ;;  %s2000_s29 = sphi %s2087_s29, %s24_s29  }
   0x2   : > { %p411_p1 = scmp.lt.s32.totalorder %s2000_s29, 5 }
   0x4   : > { %p412_p2 = pnand %p1723_p0, %p411_p1 }
   0x5   : > { %p455_p3 = scmp.lt.s32.totalorder (!%p412_p2), %s1719_s30, 3  ;;  %vm470_vm0 = vcmask (!%p412_p2), 523264   ;;  %v1922_v3 = vld [vmem:[%s2411_s6] sm:$0xff] (!%p412_p2)   ;;  %v2002_v4 = vmov (!%p412_p2), 0   ;;  %v1923_v6 = vld [vmem:[%s2411_s6 + $0x8] sm:$0xff] (!%p412_p2)   ;;  %v1924_v8 = vld [vmem:[%s2411_s6 + $0x10] sm:$0xff] (!%p412_p2)   ;;  %v526_v43 = vlaneseq (!%p412_p2) }
   0x6   : > { %415 = sbr.rel (%p412_p2) target bundleno = 2614 (0xa36), region = 76  ;;  %635 = vmatprep.subr.bf16.mxu0 (!%p412_p2), %v2002_v4  ;;  %667 = vmatprep.mubr.bf16.mxu0 (!%p412_p2), %v2002_v4  ;;  %v600_v5 = vsel (!%p412_p2), %vm470_vm0, %v1922_v3, 0  ;;  %v603_v7 = vsel (!%p412_p2), %vm470_vm0, %v1923_v6, 0  ;;  %v606_v9 = vsel (!%p412_p2), %vm470_vm0, %v1924_v8, 0  ;;  %v1925_v10 = vld [vmem:[%s2411_s6 + $0x18] sm:$0xff] (!%p412_p2)   ;;  %v1926_v12 = vld [vmem:[%s2411_s6 + $0x20] sm:$0xff] (!%p412_p2)  }
   0x7   : > { %636 = vmatpush1.bf16.xpose.msra.mxu0 (!%p412_p2), %v600_v5  ;;  %v609_v11 = vsel (!%p412_p2), %vm470_vm0, %v1925_v10, 0  ;;  %v612_v13 = vsel (!%p412_p2), %vm470_vm0, %v1926_v12, 0  ;;  %v1927_v14 = vld [vmem:[%s2411_s6 + $0x28] sm:$0xff] (!%p412_p2)   ;;  %v1928_v16 = vld [vmem:[%s2411_s6 + $0x30] sm:$0xff] (!%p412_p2)   ;;  %v1929_v18 = vld [vmem:[%s2411_s6 + $0x38] sm:$0xff] (!%p412_p2)   ;;  %v2164_v44 = vshrl.u32 (!%p412_p2), %v526_v43, 7 }
   0x8   : > { %637 = vmatprep.subr.bf16.mxu0 (!%p412_p2), %v2002_v4  ;;  %v615_v15 = vsel (!%p412_p2), %vm470_vm0, %v1927_v14, 0  ;;  %v618_v17 = vsel (!%p412_p2), %vm470_vm0, %v1928_v16, 0  ;;  %v621_v19 = vsel (!%p412_p2), %vm470_vm0, %v1929_v18, 0  ;;  %v1930_v20 = vld [vmem:[%s2411_s6 + $0x40] sm:$0xff] (!%p412_p2)   ;;  %v1931_v27 = vld [vmem:[%s2411_s6 + $0x48] sm:$0xff] (!%p412_p2)   ;;  %v1932_v29 = vld [vmem:[%s2411_s6 + $0x50] sm:$0xff] (!%p412_p2)  }
   0x9   : > { %v624_v21 = vsel (!%p412_p2), %vm470_vm0, %v1930_v20, 0  ;;  %v627_v28 = vsel (!%p412_p2), %vm470_vm0, %v1931_v27, 0  ;;  %v630_v30 = vsel (!%p412_p2), %vm470_vm0, %v1932_v29, 0  ;;  %v1933_v31 = vld [vmem:[%s2411_s6 + $0x58] sm:$0xff] (!%p412_p2)   ;;  %v1726_v37 = vld [vmem:[%s2407_s2] ss:$0 sm:$0xff] (!%p412_p2) }
   0xa   : > { %v633_v32 = vsel (!%p412_p2), %vm470_vm0, %v1933_v31, 0  ;;  %v1727_v39 = vld [vmem:[%s2408_s3] ss:$0 sm:$0xff] (!%p412_p2)  ;;  %v528_v45 = vsub.s32 (!%p412_p2), 0, %v2164_v44  ;;  %v532_v47 = vsub.s32 (!%p412_p2), 1, %v2164_v44  ;;  %v2003_v51 = vmov (!%p412_p2), 0.0  }
   0xb   : > { %v524_v46 = vld [vmem:[%s2412_s7] sm:$0x3] (!%p412_p2)  ;;  %1836 = vmatprep.subr.bf16.mxu1 (!%p412_p2), %v2003_v51  ;;  %vm678_vm1 = vcmask (!%p412_p2), 125952   ;;  %s2004_s23 = smov (!%p412_p2), 112   ;;  %s2005_s24 = smov (!%p412_p2), 64   ;;  %vm2006_vm2 = vmmov (!%p412_p2), 0  }
   0xc   : > { %v529_v48 = vrot.slane (!%p412_p2), %v524_v46, %v528_v45  ;;  %v533_v49 = vrot.slane (!%p412_p2), %v524_v46, %v532_v47  ;;  %1838 = vmatprep.mubr.msk.bf16.mxu1 (!%p412_p2), %vm2006_vm2, %v2003_v51  ;;  %s2007_s25 = smov (!%p412_p2), 48   ;;  %s2008_s26 = smov (!%p412_p2), 32   ;;  %vm750_vm3 = vcmask (!%p412_p2), 130048   ;;  %vm996_vm4 = vcmask (!%p412_p2), 1043456   ;;  %v939_v18 = vld [vmem:[%s2406_s1] sm:$0xff] (!%p412_p2) }
   0xd   : > { %s2421_s30 = smov (!%p455_p3, %s1719_s30), 3  ;;  %s2009_s27 = smov 96   ;;  %vm944_vm5 = vcmask 64512   ;;  %vm1187_vm6 = vcmask 257152   ;;  %vm1196_vm7 = vcmask 388352   ;;  %vm1205_vm8 = vcmask 519552  }
   0xe   : > { %s1724_s15 = sshll.u32 %s2421_s30, 2  ;;  %s2010_s28 = smov 16   ;;  %vm1664_vm9 = vcmask 519168  }
   0xf   : > { %s458_s18 = scalar_lea.vmem %s2405_s0, %s1724_s15  ;;  %638 = vmatpush1.bf16.xpose.msra.mxu0 %v603_v7  ;;  %s2011_s16 = smov 80  }
  0x10   : > { %v466_v0 = vld [vmem:[%s458_s18] sm:$0xf]  ;;  %639 = vmatprep.subr.bf16.mxu0 %v2002_v4  ;;  %s462_s22 = scalar_lea.vmem %s2419_s14, %s1724_s15 }
  0x11   : > { %v2103_v1 = vunpack.c.l.bf16 %v466_v0 }
  0x13   : > { %v471_v2 = vsel %vm470_vm0, %v2103_v1, 0.0 }
  0x14   : > { %472 = vadd.xlane.f32.xlu0 %v471_v2 }
  0x17   : > { %640 = vmatpush1.bf16.xpose.msra.mxu0 %v606_v9 }
  0x18   : > { %641 = vmatprep.subr.bf16.mxu0 %v2002_v4 }
  0x1f   : > { %642 = vmatpush1.bf16.xpose.msra.mxu0 %v609_v11 }
  0x20   : > { %643 = vmatprep.subr.bf16.mxu0 %v2002_v4 }
  0x27   : > { %644 = vmatpush1.bf16.xpose.msra.mxu0 %v612_v13 }
  0x28   : > { %645 = vmatprep.subr.bf16.mxu0 %v2002_v4 }
  0x2f   : > { %646 = vmatpush1.bf16.xpose.msra.mxu0 %v615_v15 }
  0x30   : > { %647 = vmatprep.subr.bf16.mxu0 %v2002_v4 }
  0x37   : > { %648 = vmatpush1.bf16.xpose.msra.mxu0 %v618_v17 }
  0x38   : > { %649 = vmatprep.subr.bf16.mxu0 %v2002_v4 }
  0x3f   : > { %650 = vmatpush1.bf16.xpose.msra.mxu0 %v621_v19 }
  0x40   : > { %651 = vmatprep.subr.bf16.mxu0 %v2002_v4 }
  0x47   : > { %652 = vmatpush1.bf16.xpose.msra.mxu0 %v624_v21 }
  0x48   : > { %653 = vmatprep.subr.bf16.mxu0 %v2002_v4 }
  0x4f   : > { %654 = vmatpush1.bf16.xpose.msra.mxu0 %v627_v28 }
  0x50   : > { %655 = vmatprep.subr.bf16.mxu0 %v2002_v4 }
  0x57   : > { %656 = vmatpush1.bf16.xpose.msra.mxu0 %v630_v30 }
  0x58   : > { %657 = vmatprep.subr.bf16.mxu0 %v2002_v4 }
  0x5f   : > { %658 = vmatpush1.bf16.xpose.msra.mxu0 %v633_v32 }
  0xa1   : > { %v473_v22 = vpop.xlane.xlu0 %472 }
  0xa2   : > { %v475_v23 = vmul.f32 0.015625, %v473_v22 }
  0xa4   : > { %v476_v24 = vsub.f32 %v2103_v1, %v475_v23 }
  0xa6   : > { %v477_v25 = vmul.f32 %v476_v24, %v476_v24 }
  0xa8   : > { %v478_v26 = vsel %vm470_vm0, %v477_v25, 0.0 }
  0xa9   : > { %479 = vadd.xlane.f32.xlu0 %v478_v26 }
 0x136   : > { %v480_v33 = vpop.xlane.xlu0 %479 }
 0x137   : > { %v481_v34 = vmul.f32 0.015625, %v480_v33 }
 0x139   : > { %v482_v35 = vadd.f32 1e-05, %v481_v34 }
 0x13b   : > { %1966 = vrsqrt.f32 %v482_v35 }
 0x145   : > { %v1967_v36 = vpop.eup %1966 }
 0x146   : > { %v484_v38 = vmul.f32 %v1967_v36, %v476_v24 }
 0x148   : > { %v491_v40 = vmul.f32 %v1726_v37, %v484_v38 }
 0x14a   : > { %v498_v41 = vadd.f32 %v1727_v39, %v491_v40 }
 0x14c   : > { %v523_v42 = vpack.c.bf16 %v498_v41, %v498_v41 }
 0x14e   : > { %1740 = vmatmul.mubr.msk.bf16.vlgmr.msra.gmra.mrb[0].mxu0 %vm470_vm0, %v523_v42 }
 0x221   : > { %v669_v50 = vpop.f32.mrb[0].mxu0 }
 0x222   : > { %v670_v52 = vadd.f32 %v669_v50, %v529_v48  ;;  %v671_v53 = vpop.f32.mrb[1].mxu0 }
 0x223   : > { %v672_v54 = vadd.f32 %v671_v53, %v533_v49  ;;  %v673_v55 = vpop.f32.mrb[2].mxu0 }
 0x224   : > { %v676_v56 = vpack.c.bf16 %v670_v52, %v670_v52  ;;  %v674_v57 = vpop.f32.mrb[3].mxu0 }
 0x225   : > { %v2176_v58 = vpack.c.bf16 %v672_v54, %v672_v54 }
 0x226   : > { %679 = vst.msk [vmem:[#allocation2] sm:$0xf] %vm678_vm1, %v676_v56  ;;  %690 = vrot.lane.b32.xlu0 %v676_v56, %s2004_s23  ;;  %683 = vrot.lane.b32.xlu1 %v676_v56, %s2005_s24 }
 0x227   : > { %689 = vst.msk [vmem:[#allocation2 + $0x20] sm:$0xf] %vm678_vm1, %v2176_v58 }
 0x22a   : > { %695 = vrot.lane.b32.xlu1 %v676_v56, %s2007_s25 }
 0x22d   : > { %v738_v5 = vld [vmem:[#allocation2] sm:$0xf] }
 0x22e   : > { %713 = vrot.lane.b32.xlu1 %v676_v56, %s2008_s26  ;;  %v746_v14 = vld [vmem:[#allocation2 + $0x20] sm:$0xf] }
 0x22f   : > { %v998_v16 = vsel %vm996_vm4, %v746_v14, 0 }
 0x232   : > { %708 = vrot.lane.b32.xlu1 %v676_v56, %s2009_s27 }
 0x236   : > { %728 = vrot.lane.b32.xlu1 %v676_v56, %s2010_s28 }
 0x23a   : > { %723 = vrot.lane.b32.xlu1 %v676_v56, %s2011_s16 }
 0x298   : > { %v691_v59 = vpop.permute.xlu0 %690  ;;  %v684_v60 = vpop.permute.xlu1 %683 }
 0x299   : > { %694 = vst.msk [vmem:[#allocation2 + $0x4] sm:$0xf] %vm678_vm1, %v691_v59  ;;  %687 = vst.msk [vmem:[#allocation2 + $0x10] sm:$0xf] %vm678_vm1, %v684_v60 }
 0x29c   : > { %v696_v61 = vpop.permute.xlu1 %695 }
 0x29d   : > { %699 = vst.msk [vmem:[#allocation2 + $0x14] sm:$0xf] %vm678_vm1, %v696_v61 }
 0x2a0   : > { %v714_v62 = vpop.permute.xlu1 %713  ;;  %v742_v63 = vld [vmem:[#allocation2 + $0x10] sm:$0xf]  ;;  %v739_v9 = vld [vmem:[#allocation2 + $0x4] sm:$0xf] }
 0x2a1   : > { %717 = vst.msk [vmem:[#allocation2 + $0x18] sm:$0xf] %vm678_vm1, %v714_v62  ;;  %v755_v0 = vsel %vm750_vm3, %v742_v63, 0 }
 0x2a2   : > { %1837 = vmatpush3.bf16.xpose.msra.mxu1 %v755_v0 }
 0x2a3   : > { %1842 = vmatprep.subr.bf16.mxu1 %v2003_v51 }
 0x2a4   : > { %v709_v2 = vpop.permute.xlu1 %708  ;;  %v743_v3 = vld [vmem:[#allocation2 + $0x14] sm:$0xf] }
 0x2a5   : > { %712 = vst.msk [vmem:[#allocation2 + $0x8] sm:$0xf] %vm678_vm1, %v709_v2  ;;  %v801_v6 = vsel %vm750_vm3, %v743_v3, 0 }
 0x2a8   : > { %v729_v4 = vpop.permute.xlu1 %728  ;;  %v744_v8 = vld [vmem:[#allocation2 + $0x18] sm:$0xf] }
 0x2a9   : > { %732 = vst.msk [vmem:[#allocation2 + $0x1c] sm:$0xf] %vm678_vm1, %v729_v4  ;;  %1839 = vmatmul.mubr.msk.bf16.vlgmr.msra.gmra.mrb[0].mxu1 %vm750_vm3, %v738_v5  ;;  %v847_v10 = vsel %vm750_vm3, %v744_v8, 0 }
 0x2aa   : > { %1843 = vmatpush3.bf16.xpose.msra.mxu1 %v801_v6  ;;  %1844 = vmatprep.mubr.msk.bf16.mxu1 %vm2006_vm2, %v2003_v51 }
 0x2ab   : > { %1848 = vmatprep.subr.bf16.mxu1 %v2003_v51 }
 0x2ac   : > { %v724_v7 = vpop.permute.xlu1 %723  ;;  %v740_v12 = vld [vmem:[#allocation2 + $0x8] sm:$0xf] }
 0x2ad   : > { %727 = vst.msk [vmem:[#allocation2 + $0xc] sm:$0xf] %vm678_vm1, %v724_v7 }
 0x2b0   : > { %v745_v11 = vld [vmem:[#allocation2 + $0x1c] sm:$0xf] }
 0x2b1   : > { %1845 = vmatmul.mubr.msk.bf16.vlgmr.msra.gmra.mrb[4].mxu1 %vm750_vm3, %v739_v9  ;;  %v893_v13 = vsel %vm750_vm3, %v745_v11, 0 }
 0x2b2   : > { %1849 = vmatpush3.bf16.xpose.msra.mxu1 %v847_v10  ;;  %1850 = vmatprep.mubr.msk.bf16.mxu1 %vm2006_vm2, %v2003_v51 }
 0x2b3   : > { %1854 = vmatprep.subr.bf16.mxu1 %v2003_v51 }
 0x2b4   : > { %v741_v15 = vld [vmem:[#allocation2 + $0xc] sm:$0xf] }
 0x2b9   : > { %1851 = vmatmul.mubr.msk.bf16.vlgmr.msra.gmra.mrb[8].mxu1 %vm750_vm3, %v740_v12 }
 0x2ba   : > { %1855 = vmatpush3.bf16.xpose.msra.mxu1 %v893_v13  ;;  %1856 = vmatprep.mubr.msk.bf16.mxu1 %vm2006_vm2, %v2003_v51 }
 0x2bb   : > { %1860 = vmatprep.subr.bf16.mxu1 %v2003_v51 }
 0x2c1   : > { %1857 = vmatmul.mubr.msk.bf16.vlgmr.msra.gmra.mrb[12].mxu1 %vm750_vm3, %v741_v15 }
 0x2c2   : > { %1861 = vmatpush3.bf16.msra.mxu1 %v998_v16  ;;  %1862 = vmatprep.mubr.msk.bf16.mxu1 %vm2006_vm2, %v2003_v51 }
 0x2c3   : > { %1866 = vmatprep.subr.bf16.mxu1 %v2003_v51 }
 0x37c   : > { %v791_v17 = vpop.f32.mrb[0].mxu1 }
 0x37d   : > { %v935_v19 = vmul.f32 0.25, %v791_v17  ;;  %v1840_v20 = vpop.f32.mrb[1].mxu1 }
 0x37e   : > { %v794_v21 = vpop.f32.mrb[2].mxu1 }
 0x37f   : > { %v1841_v22 = vpop.f32.mrb[3].mxu1  ;;  %v940_v23 = vadd.f32 %v939_v18, %v935_v19 }
 0x381   : > { %v945_v24 = vsel %vm944_vm5, %v940_v23, -inf }
 0x382   : > { %946 = vmax.xlane.f32.xlu1 %v945_v24 }
 0x384   : > { %v837_v25 = vpop.f32.mrb[4].mxu1 }
 0x385   : > { %v936_v26 = vmul.f32 0.25, %v837_v25  ;;  %v1846_v27 = vpop.f32.mrb[5].mxu1 }
 0x386   : > { %v840_v28 = vpop.f32.mrb[6].mxu1 }
 0x387   : > { %v1847_v29 = vpop.f32.mrb[7].mxu1  ;;  %v941_v30 = vadd.f32 %v939_v18, %v936_v26 }
 0x389   : > { %v948_v31 = vsel %vm944_vm5, %v941_v30, -inf }
 0x38a   : > { %949 = vmax.xlane.f32.xlu0 %v948_v31 }
 0x38c   : > { %v883_v32 = vpop.f32.mrb[8].mxu1 }
 0x38d   : > { %v937_v33 = vmul.f32 0.25, %v883_v32  ;;  %v1852_v34 = vpop.f32.mrb[9].mxu1  ;;  %v1934_v32 = vld [vmem:[%s2413_s8] sm:$0xff]  }
 0x38e   : > { %v886_v35 = vpop.f32.mrb[10].mxu1  ;;  %v1240_v34 = vsel %vm470_vm0, %v1934_v32, 0  ;;  %v1949_v32 = vld [vmem:[%s2415_s10 + $0x28] sm:$0xff]  }
 0x38f   : > { %v1853_v36 = vpop.f32.mrb[11].mxu1  ;;  %v942_v37 = vadd.f32 %v939_v18, %v937_v33 }
 0x391   : > { %v951_v38 = vsel %vm944_vm5, %v942_v37, -inf }
 0x392   : > { %952 = vmax.xlane.f32.xlu1 %v951_v38  ;;  %v1935_v38 = vld [vmem:[%s2413_s8 + $0x8] sm:$0xff]  }
 0x394   : > { %v929_v39 = vpop.f32.mrb[12].mxu1 }
 0x395   : > { %v938_v40 = vmul.f32 0.25, %v929_v39  ;;  %v1858_v41 = vpop.f32.mrb[13].mxu1 }
 0x396   : > { %v932_v42 = vpop.f32.mrb[14].mxu1 }
 0x397   : > { %v1859_v43 = vpop.f32.mrb[15].mxu1  ;;  %v943_v46 = vadd.f32 %v939_v18, %v938_v40  ;;  %v1243_v40 = vsel %vm470_vm0, %v1935_v38, 0  ;;  %v1953_v38 = vld [vmem:[%s2415_s10 + $0x38] sm:$0xff]  }
 0x399   : > { %v954_v48 = vsel %vm944_vm5, %v943_v46, -inf }
 0x39a   : > { %955 = vmax.xlane.f32.xlu0 %v954_v48 }
 0x40f   : > { %v947_v49 = vpop.xlane.xlu1 %946 }
 0x410   : > { %v957_v50 = vsub.f32 %v940_v23, %v947_v49  ;;  %v1936_v49 = vld [vmem:[%s2413_s8 + $0x10] sm:$0xff]  }
 0x412   : > { %v961_v52 = vmul.f32 1.442695, %v957_v50  ;;  %v1246_v50 = vsel %vm470_vm0, %v1936_v49, 0  ;;  %v1761_v49 = vld [vmem:[%s2410_s5] ss:$0 sm:$0xff] }
 0x414   : > { %1968 = vpow2.f32 %v961_v52  ;;  %v1937_v52 = vld [vmem:[%s2413_s8 + $0x18] sm:$0xff]  }
 0x417   : > { %v950_v53 = vpop.xlane.xlu0 %949 }
 0x418   : > { %v958_v54 = vsub.f32 %v941_v30, %v950_v53  ;;  %v1249_v53 = vsel %vm470_vm0, %v1937_v52, 0 }
 0x41a   : > { %v963_v55 = vmul.f32 1.442695, %v958_v54 }
 0x41c   : > { %1970 = vpow2.f32 %v963_v55 }
 0x41e   : > { %v1969_v56 = vpop.eup %1968 }
 0x41f   : > { %v969_v57 = vsel %vm944_vm5, %v1969_v56, 0.0  ;;  %v953_v3 = vpop.xlane.xlu1 %952 }
 0x420   : > { %970 = vadd.xlane.f32.xlu1 %v969_v57  ;;  %v959_v4 = vsub.f32 %v942_v37, %v953_v3 }
 0x422   : > { %v965_v5 = vmul.f32 1.442695, %v959_v4 }
 0x426   : > { %v1971_v59 = vpop.eup %1970 }
 0x427   : > { %v956_v60 = vpop.xlane.xlu0 %955  ;;  %v972_v61 = vsel %vm944_vm5, %v1971_v59, 0.0 }
 0x428   : > { %v960_v62 = vsub.f32 %v943_v46, %v956_v60  ;;  %973 = vadd.xlane.f32.xlu0 %v972_v61 }
 0x42a   : > { %v967_v63 = vmul.f32 1.442695, %v960_v62 }
 0x42c   : > { %1972 = vpow2.f32 %v967_v63 }
 0x42d   : > { %1974 = vpow2.f32 %v965_v5 }
 0x431   : > { %703 = vrot.lane.b32.xlu1 %v2176_v58, %s2004_s23 }
 0x436   : > { %v1973_v0 = vpop.eup %1972 }
 0x437   : > { %v978_v2 = vsel %vm944_vm5, %v1973_v0, 0.0  ;;  %v1975_v6 = vpop.eup %1974 }
 0x438   : > { %979 = vadd.xlane.f32.xlu0 %v978_v2  ;;  %v975_v7 = vsel %vm944_vm5, %v1975_v6, 0.0 }
 0x44e   : > { %718 = vrot.lane.b32.xlu0 %v2176_v58, %s2009_s27 }
 0x455   : > { %976 = vadd.xlane.f32.xlu1 %v975_v7 }
 0x466   : > { %733 = vrot.lane.b32.xlu1 %v2176_v58, %s2011_s16 }
 0x4ad   : > { %v971_v8 = vpop.xlane.xlu1 %970 }
 0x4ae   : > { %1976 = vrcp.f32 %v971_v8 }
 0x4b1   : > { %v704_v9 = vpop.permute.xlu1 %703 }
 0x4b2   : > { %707 = vst.msk [vmem:[#allocation2 + $0x24] sm:$0xf] %vm678_vm1, %v704_v9 }
 0x4b5   : > { %v974_v10 = vpop.xlane.xlu0 %973 }
 0x4b6   : > { %1978 = vrcp.f32 %v974_v10 }
 0x4b8   : > { %v1977_v11 = vpop.eup %1976 }
 0x4b9   : > { %v985_v12 = vmul.f32 %v1977_v11, %v1969_v56  ;;  %v747_v13 = vld [vmem:[#allocation2 + $0x24] sm:$0xf] }
 0x4ba   : > { %v1044_v15 = vsel %vm996_vm4, %v747_v13, 0  ;;  %v1938_v13 = vld [vmem:[%s2415_s10 + $0x40] sm:$0xff]  }
 0x4bb   : > { %v989_v14 = vpack.c.bf16 %v985_v12, %v985_v12  ;;  %1896 = vmatprep.subr.msk.bf16.mxu0 %vm470_vm0, %v1938_v13 }
 0x4bd   : > { %1863 = vmatmul.mubr.msk.bf16.vlgmr.msra.gmra.mrb[16].mxu1 %vm944_vm5, %v989_v14  ;;  %v1939_v14 = vld [vmem:[%s2415_s10] sm:$0xff]  }
 0x4be   : > { %1867 = vmatpush3.bf16.msra.mxu1 %v1044_v15  ;;  %1868 = vmatprep.mubr.msk.bf16.mxu1 %vm2006_vm2, %v2003_v51  ;;  %v1458_v15 = vsel %vm470_vm0, %v1939_v14, 0 }
 0x4bf   : > { %1872 = vmatprep.subr.bf16.mxu1 %v2003_v51  ;;  %1819 = vmatpush3.bf16.xpose.msra.mxu0 %v1458_v15 }
 0x4c0   : > { %v1979_v58 = vpop.eup %1978 }
 0x4c1   : > { %v986_v16 = vmul.f32 %v1979_v58, %v1971_v59  ;;  %v1941_v58 = vld [vmem:[%s2415_s10 + $0x8] sm:$0xff]  }
 0x4c3   : > { %v990_v17 = vpack.c.bf16 %v986_v16, %v986_v16  ;;  %v1461_v16 = vsel %vm470_vm0, %v1941_v58, 0 }
 0x4c5   : > { %1869 = vmatmul.mubr.msk.bf16.vlgmr.msra.gmra.mrb[20].mxu1 %vm944_vm5, %v990_v17  ;;  %v980_v18 = vpop.xlane.xlu0 %979  ;;  %v1942_v17 = vld [vmem:[%s2415_s10 + $0x50] sm:$0xff]  }
 0x4c6   : > { %1874 = vmatprep.mubr.msk.bf16.mxu1 %vm2006_vm2, %v2003_v51 }
 0x4c9   : > { %v719_v19 = vpop.permute.xlu0 %718 }
 0x4ca   : > { %722 = vst.msk [vmem:[#allocation2 + $0x28] sm:$0xf] %vm678_vm1, %v719_v19 }
 0x4d1   : > { %v748_v20 = vld [vmem:[#allocation2 + $0x28] sm:$0xf] }
 0x4d2   : > { %v1090_v21 = vsel %vm996_vm4, %v748_v20, 0  ;;  %v1944_v20 = vld [vmem:[%s2415_s10 + $0x58] sm:$0xff]  }
 0x4d3   : > { %1873 = vmatpush3.bf16.msra.mxu1 %v1090_v21  ;;  %v1945_v21 = vld [vmem:[%s2415_s10 + $0x18] sm:$0xff]  }
 0x4d4   : > { %1878 = vmatprep.subr.bf16.mxu1 %v2003_v51 }
 0x4e2   : > { %v977_v22 = vpop.xlane.xlu1 %976 }
 0x4e3   : > { %1980 = vrcp.f32 %v977_v22  ;;  %v1467_v22 = vsel %vm470_vm0, %v1945_v21, 0  ;;  %v1789_v21 = vld [vmem:[%s2418_s13] ss:$0 sm:$0xff] }
 0x4e4   : > { %1982 = vrcp.f32 %v980_v18  ;;  %v1943_v18 = vld [vmem:[%s2415_s10 + $0x10] sm:$0xff]  }
 0x4e5   : > { %v1464_v19 = vsel %vm470_vm0, %v1943_v18, 0 }
 0x4e6   : > { %v734_v23 = vpop.permute.xlu1 %733 }
 0x4e7   : > { %737 = vst.msk [vmem:[#allocation2 + $0x2c] sm:$0xf] %vm678_vm1, %v734_v23  ;;  %v1946_v23 = vld [vmem:[%s2415_s10 + $0x60] sm:$0xff]  }
 0x4ed   : > { %v1981_v24 = vpop.eup %1980 }
 0x4ee   : > { %v987_v25 = vmul.f32 %v1981_v24, %v1975_v6  ;;  %v749_v26 = vld [vmem:[#allocation2 + $0x2c] sm:$0xf]  ;;  %v1983_v28 = vpop.eup %1982  ;;  %v1759_v6 = vld [vmem:[%s2414_s9] ss:$0 sm:$0xff] }
 0x4ef   : > { %v1136_v29 = vsel %vm996_vm4, %v749_v26, 0  ;;  %v988_v30 = vmul.f32 %v1983_v28, %v1973_v0  ;;  %v1947_v24 = vld [vmem:[%s2415_s10 + $0x20] sm:$0xff]  }
 0x4f0   : > { %v991_v27 = vpack.c.bf16 %v987_v25, %v987_v25  ;;  %v1470_v25 = vsel %vm470_vm0, %v1947_v24, 0 }
 0x4f1   : > { %v992_v31 = vpack.c.bf16 %v988_v30, %v988_v30 }
 0x4f2   : > { %1875 = vmatmul.mubr.msk.bf16.vlgmr.msra.gmra.mrb[24].mxu1 %vm944_vm5, %v991_v27 }
 0x4f3   : > { %1879 = vmatpush3.bf16.msra.mxu1 %v1136_v29  ;;  %1880 = vmatprep.mubr.msk.bf16.mxu1 %vm2006_vm2, %v2003_v51 }
 0x4f4   : > { %1884 = vmatprep.subr.bf16.mxu1 %v2003_v51 }
 0x4fa   : > { %1881 = vmatmul.mubr.msk.bf16.vlgmr.msra.gmra.mrb[28].mxu1 %vm944_vm5, %v992_v31  ;;  %v1948_v31 = vld [vmem:[%s2415_s10 + $0x68] sm:$0xff]  }
 0x4fb   : > { %1892 = vmatprep.mubr.msk.bf16.mxu1 %vm2006_vm2, %v2003_v51 }
 0x4fc   : > { %1885 = vmatpush3.bf16.xpose.msra.mxu1 %v1240_v34  ;;  %v1950_v34 = vld [vmem:[%s2415_s10 + $0x70] sm:$0xff]  }
 0x4fd   : > { %1886 = vmatprep.subr.bf16.mxu1 %v2003_v51 }
 0x504   : > { %1887 = vmatpush3.bf16.xpose.msra.mxu1 %v1243_v40 }
 0x505   : > { %1888 = vmatprep.subr.bf16.mxu1 %v2003_v51 }
 0x50c   : > { %1889 = vmatpush3.bf16.xpose.msra.mxu1 %v1246_v50 }
 0x50d   : > { %1890 = vmatprep.subr.bf16.mxu1 %v2003_v51 }
 0x514   : > { %1891 = vmatpush3.bf16.xpose.msra.mxu1 %v1249_v53 }
 0x590   : > { %v1034_v33 = vpop.f32.mrb[16].mxu1 }
 0x591   : > { %v1178_v35 = vpack.c.bf16 %v1034_v33, %v1034_v33  ;;  %v1864_v36 = vpop.f32.mrb[17].mxu1  ;;  %v1473_v33 = vsel %vm470_vm0, %v1949_v32, 0 }
 0x592   : > { %v1037_v37 = vpop.f32.mrb[18].mxu1 }
 0x593   : > { %1179 = vst.msk [vmem:[#allocation3] sm:$0xf] %vm678_vm1, %v1178_v35  ;;  %v1865_v39 = vpop.f32.mrb[19].mxu1  ;;  %v1951_v35 = vld [vmem:[%s2415_s10 + $0x30] sm:$0xff]   ;;  %v1952_v37 = vld [vmem:[%s2415_s10 + $0x78] sm:$0xff]  }
 0x594   : > { %v1476_v36 = vsel %vm470_vm0, %v1951_v35, 0  ;;  %v1479_v39 = vsel %vm470_vm0, %v1953_v38, 0 }
 0x598   : > { %v1080_v41 = vpop.f32.mrb[20].mxu1 }
 0x599   : > { %v1794_v42 = vpack.c.bf16 %v1080_v41, %v1080_v41  ;;  %v1870_v43 = vpop.f32.mrb[21].mxu1 }
 0x59a   : > { %v1083_v46 = vpop.f32.mrb[22].mxu1 }
 0x59b   : > { %1184 = vrot.lane.b32.xlu1 %v1794_v42, %s2010_s28  ;;  %v1871_v48 = vpop.f32.mrb[23].mxu1  ;;  %v1760_v46 = vld [vmem:[%s2409_s4] ss:$0 sm:$0xff] }
 0x5c5   : > { %v1126_v54 = vpop.f32.mrb[24].mxu1 }
 0x5c6   : > { %v1795_v55 = vpack.c.bf16 %v1126_v54, %v1126_v54  ;;  %v1876_v56 = vpop.f32.mrb[25].mxu1  ;;  %v1956_v54 = vld [vmem:[%s2417_s12 + $0x4] ss:$8 sps:$4 sm:$0xff]  }
 0x5c7   : > { %v1129_v57 = vpop.f32.mrb[26].mxu1  ;;  %1614 = vmatprep.subr.bf16.mxu1 %v1956_v54  ;;  %v1959_v56 = vld [vmem:[%s2417_s12 + $0x14] ss:$8 sps:$4 sm:$0xff]  }
 0x5c8   : > { %1193 = vrot.lane.b32.xlu0 %v1795_v55, %s2008_s26  ;;  %v1877_v59 = vpop.f32.mrb[27].mxu1  ;;  %v1954_v55 = vld [vmem:[%s2417_s12] ss:$8 sps:$4 sm:$0xff]   ;;  %v1957_v57 = vld [vmem:[%s2417_s12 + $0x10] ss:$8 sps:$4 sm:$0xff]  }
 0x5c9   : > { %v1962_v59 = vld [vmem:[%s2417_s12 + $0x24] ss:$8 sps:$4 sm:$0xff]  }
 0x5cd   : > { %v1172_v60 = vpop.f32.mrb[28].mxu1 }
 0x5ce   : > { %v1796_v61 = vpack.c.bf16 %v1172_v60, %v1172_v60  ;;  %v1882_v62 = vpop.f32.mrb[29].mxu1  ;;  %v1960_v60 = vld [vmem:[%s2417_s12 + $0x20] ss:$8 sps:$4 sm:$0xff]  }
 0x5cf   : > { %v1175_v63 = vpop.f32.mrb[30].mxu1  ;;  %v1963_v62 = vld [vmem:[%s2417_s12 + $0x30] ss:$8 sps:$4 sm:$0xff]  }
 0x5d0   : > { %1202 = vrot.lane.b32.xlu1 %v1796_v61, %s2007_s25  ;;  %v1883_v51 = vpop.f32.mrb[31].mxu1  ;;  %v1965_v61 = vld [vmem:[%s2417_s12 + $0x34] ss:$8 sps:$4 sm:$0xff]   ;;  %v1362_v63 = vld [vmem:[%s2416_s11] sm:$0x3] }
 0x5d1   : > { %v1367_v51 = vrot.slane %v1362_v63, %v528_v45 }
 0x60d   : > { %v1185_v0 = vpop.permute.xlu1 %1184 }
 0x60e   : > { %1188 = vst.msk [vmem:[#allocation3] sm:$0xf] %vm1187_vm6, %v1185_v0  ;;  %v1371_v0 = vrot.slane %v1362_v63, %v532_v47 }
 0x63a   : > { %v1194_v2 = vpop.permute.xlu0 %1193 }
 0x63b   : > { %1197 = vst.msk [vmem:[#allocation3] sm:$0xf] %vm1196_vm7, %v1194_v2 }
 0x642   : > { %v1203_v3 = vpop.permute.xlu1 %1202 }
 0x643   : > { %1206 = vst.msk [vmem:[#allocation3] sm:$0xf] %vm1205_vm8, %v1203_v3 }
 0x64a   : > { %v1207_v4 = vld [vmem:[#allocation3] sm:$0xf] }
 0x64b   : > { %1893 = vmatmul.mubr.msk.bf16.vlgmr.msra.gmra.mrb[32].mxu1 %vm470_vm0, %v1207_v4 }
 0x64c   : > { %1615 = vmatpush1.bf16.xpose.msra.mxu1 %v1954_v55 }
 0x64d   : > { %1616 = vmatprep.subr.bf16.mxu1 %v1959_v56 }
 0x654   : > { %1617 = vmatpush1.bf16.xpose.msra.mxu1 %v1957_v57 }
 0x655   : > { %1618 = vmatprep.subr.bf16.mxu1 %v1962_v59 }
 0x65c   : > { %1619 = vmatpush1.bf16.xpose.msra.mxu1 %v1960_v60 }
 0x65d   : > { %1620 = vmatprep.subr.bf16.mxu1 %v1965_v61 }
 0x664   : > { %1621 = vmatpush1.bf16.xpose.msra.mxu1 %v1963_v62 }
 0x71e   : > { %v1285_v5 = vpop.f32.mrb[32].mxu1 }
 0x71f   : > { %v1291_v7 = vadd.f32 %v1285_v5, %v2103_v1  ;;  %v1894_v8 = vpop.f32.mrb[33].mxu1  ;;  %v1940_v1 = vld [vmem:[%s2415_s10 + $0x48] sm:$0xff]  }
 0x720   : > { %v1288_v9 = vpop.f32.mrb[34].mxu1  ;;  %1897 = vmatprep.subr.msk.bf16.mxu0 %vm470_vm0, %v1940_v1 }
 0x721   : > { %v2284_v10 = vadd.f32 %v1759_v6, %v1291_v7  ;;  %v1895_v11 = vpop.f32.mrb[35].mxu1  ;;  %1821 = vmatpush3.bf16.xpose.msra.mxu0 %v1461_v16 }
 0x722   : > { %1898 = vmatprep.subr.msk.bf16.mxu0 %vm470_vm0, %v1942_v17 }
 0x723   : > { %v1302_v12 = vsel %vm470_vm0, %v2284_v10, 0.0 }
 0x724   : > { %1303 = vadd.xlane.f32.xlu0 %v1302_v12 }
 0x729   : > { %1823 = vmatpush3.bf16.xpose.msra.mxu0 %v1464_v19 }
 0x72a   : > { %1899 = vmatprep.subr.msk.bf16.mxu0 %vm470_vm0, %v1944_v20 }
 0x731   : > { %1825 = vmatpush3.bf16.xpose.msra.mxu0 %v1467_v22 }
 0x732   : > { %1900 = vmatprep.subr.msk.bf16.mxu0 %vm470_vm0, %v1946_v23 }
 0x739   : > { %1827 = vmatpush3.bf16.xpose.msra.mxu0 %v1470_v25 }
 0x73a   : > { %1901 = vmatprep.subr.msk.bf16.mxu0 %vm470_vm0, %v1948_v31 }
 0x741   : > { %1829 = vmatpush3.bf16.xpose.msra.mxu0 %v1473_v33 }
 0x742   : > { %1902 = vmatprep.subr.msk.bf16.mxu0 %vm470_vm0, %v1950_v34 }
 0x749   : > { %1831 = vmatpush3.bf16.xpose.msra.mxu0 %v1476_v36 }
 0x74a   : > { %1903 = vmatprep.subr.msk.bf16.mxu0 %vm470_vm0, %v1952_v37 }
 0x751   : > { %1833 = vmatpush3.bf16.xpose.msra.mxu0 %v1479_v39 }
 0x7b1   : > { %v1304_v26 = vpop.xlane.xlu0 %1303 }
 0x7b2   : > { %v1305_v27 = vmul.f32 0.015625, %v1304_v26 }
 0x7b4   : > { %v1306_v28 = vsub.f32 %v2284_v10, %v1305_v27 }
 0x7b6   : > { %v1307_v29 = vmul.f32 %v1306_v28, %v1306_v28 }
 0x7b8   : > { %v1308_v30 = vsel %vm470_vm0, %v1307_v29, 0.0 }
 0x7b9   : > { %1309 = vadd.xlane.f32.xlu1 %v1308_v30 }
 0x846   : > { %v1310_v40 = vpop.xlane.xlu1 %1309 }
 0x847   : > { %v1311_v41 = vmul.f32 0.015625, %v1310_v40 }
 0x849   : > { %v1312_v42 = vadd.f32 1e-05, %v1311_v41 }
 0x84b   : > { %1984 = vrsqrt.f32 %v1312_v42 }
 0x855   : > { %v1985_v43 = vpop.eup %1984 }
 0x856   : > { %v1314_v48 = vmul.f32 %v1985_v43, %v1306_v28 }
 0x858   : > { %v1321_v50 = vmul.f32 %v1760_v46, %v1314_v48 }
 0x85a   : > { %v1328_v52 = vadd.f32 %v1761_v49, %v1321_v50 }
 0x85c   : > { %v1361_v53 = vpack.c.bf16 %v1328_v52, %v1328_v52 }
 0x85e   : > { %1834 = vmatprep.mubr.msk.bf16.mxu0 %vm470_vm0, %v1361_v53 }
 0x85f   : > { %1835 = vmatmul.mubr.msk.bf16.vlgmr.msra.gmra.mrb[4].mxu0 %vm470_vm0, %v1361_v53 }
 0x932   : > { %v1539_v2 = vpop.f32.mrb[4].mxu0 }
 0x933   : > { %v1540_v3 = vadd.f32 %v1539_v2, %v1367_v51  ;;  %v1541_v4 = vpop.f32.mrb[5].mxu0 }
 0x934   : > { %v1542_v5 = vadd.f32 %v1541_v4, %v1371_v0  ;;  %v1543_v6 = vpop.f32.mrb[6].mxu0 }
 0x935   : > { %v1546_v7 = vpack.c.bf16 %v1540_v3, %v1540_v3  ;;  %v1544_v8 = vpop.f32.mrb[7].mxu0 }
 0x936   : > { %v1547_v9 = vpack.c.bf16 %v1542_v5, %v1542_v5 }
 0x937   : > { %v1779_v11 = vmul.bf16 3218784218, %v1546_v7 }
 0x938   : > { %v1780_v12 = vmul.bf16 3218784218, %v1547_v9 }
 0x939   : > { %v1553_v13 = vmul.bf16 1069105081, %v1779_v11 }
 0x93a   : > { %v1556_v14 = vmul.bf16 1069105081, %v1780_v12 }
 0x93b   : > { %1986 = vpow.bf16 %v1553_v13 }
 0x93c   : > { %1988 = vpow.bf16 %v1556_v14 }
 0x946   : > { %v1987_v1 = vpop.eup %1986 }
 0x947   : > { %v1989_v15 = vpop.eup %1988  ;;  %v1558_v45 = vadd.bf16 1065369472, %v1987_v1 }
 0x948   : > { %v1559_v58 = vadd.bf16 1065369472, %v1989_v15 }
 0x949   : > { %1990 = vrcp.bf16 %v1558_v45 }
 0x94a   : > { %1992 = vrcp.bf16 %v1559_v58 }
 0x954   : > { %v1991_v44 = vpop.eup %1990 }
 0x955   : > { %v1993_v47 = vpop.eup %1992  ;;  %v1561_v16 = vmul.bf16 1065369472, %v1991_v44 }
 0x956   : > { %v1563_v17 = vmul.bf16 1065369472, %v1993_v47 }
 0x957   : > { %v1564_v19 = vmul.bf16 %v1561_v16, %v1546_v7 }
 0x958   : > { %v1565_v18 = vmul.bf16 %v1563_v17, %v1547_v9 }
 0x95a   : > { %1646 = vmatprep.mubr.bf16.mxu1 %v1565_v18 }
 0x95b   : > { %1647 = vmatmul.mubr.bf16.vlgmr.msra.gmra.mrb[36].mxu1 %v1564_v19 }
 0xa2e   : > { %v1648_v20 = vpop.f32.mrb[36].mxu1 }
 0xa2f   : > { %v1654_v22 = vadd.f32 %v1648_v20, %v2284_v10  ;;  %v1650_v23 = vpop.f32.mrb[37].mxu1 }
 0xa30   : > { %v1651_v24 = vpop.f32.mrb[38].mxu1 }
 0xa31   : > { %v1662_v25 = vadd.f32 %v1789_v21, %v1654_v22  ;;  %v1652_v26 = vpop.f32.mrb[39].mxu1 }
 0xa33   : > { %v1663_v27 = vpack.c.bf16 %v1662_v25, %v1662_v25 }
 0xa35   : > { %1665 = vst.msk [vmem:[%s462_s22] sm:$0xf] %vm1664_vm9, %v1663_v27 }
 0xa36 PF: > { %s24_s29 = sadd.s32 1, %s2000_s29  }
 0xa37   : > { %p21_p4 = scmp.ge.s32.totalorder %s24_s29, 6  }
 0xa39   :  { %23 = sbr.rel (!%p21_p4) target bundleno = 1 (0x1), region = 117 }

// kernel: class_incremental_clip_forward.9
= control target key start
LH: loop header
LB: loop body
LE: loop exit
PB: predicated region body
PF: predicated region fallthrough
CT: control target
= control target key end

     0   :  { %s2086_s29 = smov 0   ;;  %s2401_s0 = inlined_call_operand.vmem [shape: f32[4,8,64], index: 0, kind: input, shape index: {}]   ;;  %s2402_s1 = inlined_call_operand.vmem [shape: f32[8,8], index: 1, kind: input, shape index: {}]   ;;  %s2403_s2 = inlined_call_operand.vmem [shape: f32[1,64], index: 2, kind: input, shape index: {}, may-alias: {2,4}]   ;;  %s2404_s3 = inlined_call_operand.vmem [shape: f32[1,64], index: 3, kind: input, shape index: {}, may-alias: {3,5,9,13}]   ;;  %s2405_s4 = inlined_call_operand.vmem [shape: f32[1,64], index: 4, kind: input, shape index: {}, may-alias: {2,4}]   ;;  %s2406_s5 = inlined_call_operand.vmem [shape: f32[1,64], index: 5, kind: input, shape index: {}, may-alias: {3,5,9,13}]   ;;  %s2407_s6 = inlined_call_operand.vmem [shape: bf16[192,64], index: 6, kind: input, shape index: {}]   ;;  %s2408_s7 = inlined_call_operand.vmem [shape: f32[1,192], index: 7, kind: input, shape index: {}]   ;;  %s2409_s8 = inlined_call_operand.vmem [shape: bf16[64,64], index: 8, kind: input, shape index: {}]   ;;  %s2410_s9 = inlined_call_operand.vmem [shape: f32[1,64], index: 9, kind: input, shape index: {}, may-alias: {3,5,9,13}]   ;;  %s2411_s10 = inlined_call_operand.vmem [shape: bf16[256,64], index: 10, kind: input, shape index: {}]   ;;  %s2412_s11 = inlined_call_operand.vmem [shape: f32[1,256], index: 11, kind: input, shape index: {}]   ;;  %s2413_s12 = inlined_call_operand.vmem [shape: bf16[64,256], index: 12, kind: input, shape index: {}]   ;;  %s2414_s13 = inlined_call_operand.vmem [shape: f32[1,64], index: 13, kind: input, shape index: {}, may-alias: {3,5,9,13}]   ;;  %s2415_s14 = inlined_call_operand.vmem [shape: bf16[4,8,64], index: 14, kind: output, shape index: {}]  }
   0x1 LB: > { %s1718_s30 = sadd.s32 4294967295, %s1999_s29   ;;  %p1722_p0 = scmp.ge.s32.totalorder %s1999_s29, 1  ;;  %s1999_s29 = sphi %s2086_s29, %s24_s29  }
   0x2   : > { %p411_p1 = scmp.lt.s32.totalorder %s1999_s29, 5 }
   0x4   : > { %p412_p2 = pnand %p1722_p0, %p411_p1 }
   0x5   : > { %p455_p3 = scmp.lt.s32.totalorder (!%p412_p2), %s1718_s30, 3  ;;  %vm469_vm0 = vcmask (!%p412_p2), 523264   ;;  %v1921_v2 = vld [vmem:[%s2407_s6] sm:$0xff] (!%p412_p2)   ;;  %v2001_v3 = vmov (!%p412_p2), 0   ;;  %v1922_v5 = vld [vmem:[%s2407_s6 + $0x8] sm:$0xff] (!%p412_p2)   ;;  %v1923_v7 = vld [vmem:[%s2407_s6 + $0x10] sm:$0xff] (!%p412_p2)   ;;  %v525_v42 = vlaneseq (!%p412_p2) }
   0x6   : > { %415 = sbr.rel (%p412_p2) target bundleno = 2612 (0xa34), region = 76  ;;  %634 = vmatprep.subr.bf16.mxu0 (!%p412_p2), %v2001_v3  ;;  %666 = vmatprep.mubr.bf16.mxu0 (!%p412_p2), %v2001_v3  ;;  %v599_v4 = vsel (!%p412_p2), %vm469_vm0, %v1921_v2, 0  ;;  %v602_v6 = vsel (!%p412_p2), %vm469_vm0, %v1922_v5, 0  ;;  %v605_v8 = vsel (!%p412_p2), %vm469_vm0, %v1923_v7, 0  ;;  %v1924_v9 = vld [vmem:[%s2407_s6 + $0x18] sm:$0xff] (!%p412_p2)   ;;  %v1925_v11 = vld [vmem:[%s2407_s6 + $0x20] sm:$0xff] (!%p412_p2)  }
   0x7   : > { %635 = vmatpush1.bf16.xpose.msra.mxu0 (!%p412_p2), %v599_v4  ;;  %v608_v10 = vsel (!%p412_p2), %vm469_vm0, %v1924_v9, 0  ;;  %v611_v12 = vsel (!%p412_p2), %vm469_vm0, %v1925_v11, 0  ;;  %v1926_v13 = vld [vmem:[%s2407_s6 + $0x28] sm:$0xff] (!%p412_p2)   ;;  %v1927_v15 = vld [vmem:[%s2407_s6 + $0x30] sm:$0xff] (!%p412_p2)   ;;  %v1928_v17 = vld [vmem:[%s2407_s6 + $0x38] sm:$0xff] (!%p412_p2)   ;;  %v2161_v43 = vshrl.u32 (!%p412_p2), %v525_v42, 7 }
   0x8   : > { %636 = vmatprep.subr.bf16.mxu0 (!%p412_p2), %v2001_v3  ;;  %v614_v14 = vsel (!%p412_p2), %vm469_vm0, %v1926_v13, 0  ;;  %v617_v16 = vsel (!%p412_p2), %vm469_vm0, %v1927_v15, 0  ;;  %v620_v18 = vsel (!%p412_p2), %vm469_vm0, %v1928_v17, 0  ;;  %v1929_v19 = vld [vmem:[%s2407_s6 + $0x40] sm:$0xff] (!%p412_p2)   ;;  %v1930_v26 = vld [vmem:[%s2407_s6 + $0x48] sm:$0xff] (!%p412_p2)   ;;  %v1931_v28 = vld [vmem:[%s2407_s6 + $0x50] sm:$0xff] (!%p412_p2)  }
   0x9   : > { %v623_v20 = vsel (!%p412_p2), %vm469_vm0, %v1929_v19, 0  ;;  %v626_v27 = vsel (!%p412_p2), %vm469_vm0, %v1930_v26, 0  ;;  %v629_v29 = vsel (!%p412_p2), %vm469_vm0, %v1931_v28, 0  ;;  %v1932_v30 = vld [vmem:[%s2407_s6 + $0x58] sm:$0xff] (!%p412_p2)   ;;  %v1725_v36 = vld [vmem:[%s2403_s2] ss:$0 sm:$0xff] (!%p412_p2) }
   0xa   : > { %v632_v31 = vsel (!%p412_p2), %vm469_vm0, %v1932_v30, 0  ;;  %v1726_v38 = vld [vmem:[%s2404_s3] ss:$0 sm:$0xff] (!%p412_p2)  ;;  %v527_v44 = vsub.s32 (!%p412_p2), 0, %v2161_v43  ;;  %v531_v46 = vsub.s32 (!%p412_p2), 1, %v2161_v43  ;;  %v2002_v50 = vmov (!%p412_p2), 0.0  }
   0xb   : > { %v523_v45 = vld [vmem:[%s2408_s7] sm:$0x3] (!%p412_p2)  ;;  %1835 = vmatprep.subr.bf16.mxu1 (!%p412_p2), %v2002_v50  ;;  %vm677_vm1 = vcmask (!%p412_p2), 125952   ;;  %s2003_s21 = smov (!%p412_p2), 112   ;;  %s2004_s22 = smov (!%p412_p2), 64   ;;  %vm2005_vm2 = vmmov (!%p412_p2), 0  }
   0xc   : > { %v528_v47 = vrot.slane (!%p412_p2), %v523_v45, %v527_v44  ;;  %v532_v48 = vrot.slane (!%p412_p2), %v523_v45, %v531_v46  ;;  %1837 = vmatprep.mubr.msk.bf16.mxu1 (!%p412_p2), %vm2005_vm2, %v2002_v50  ;;  %s2006_s23 = smov (!%p412_p2), 48   ;;  %s2007_s24 = smov (!%p412_p2), 32   ;;  %vm749_vm3 = vcmask (!%p412_p2), 130048   ;;  %vm995_vm4 = vcmask (!%p412_p2), 1043456   ;;  %v938_v17 = vld [vmem:[%s2402_s1] sm:$0xff] (!%p412_p2) }
   0xd   : > { %s2417_s30 = smov (!%p455_p3, %s1718_s30), 3  ;;  %s2008_s25 = smov 96   ;;  %vm943_vm5 = vcmask 64512   ;;  %vm1186_vm6 = vcmask 257152   ;;  %vm1195_vm7 = vcmask 388352   ;;  %vm1204_vm8 = vcmask 519552  }
   0xe   : > { %s1723_s15 = sshll.u32 %s2417_s30, 3  ;;  %s2009_s26 = smov 16   ;;  %vm1663_vm9 = vcmask 519168  }
   0xf   : > { %s458_s18 = scalar_lea.vmem %s2401_s0, %s1723_s15  ;;  %637 = vmatpush1.bf16.xpose.msra.mxu0 %v602_v6  ;;  %s2010_s27 = smov 80  }
  0x10   : > { %v2100_v0 = vld [vmem:[%s458_s18] sm:$0xff]  ;;  %638 = vmatprep.subr.bf16.mxu0 %v2001_v3 }
  0x11   : > { %v470_v1 = vsel %vm469_vm0, %v2100_v0, 0.0 }
  0x12   : > { %471 = vadd.xlane.f32.xlu0 %v470_v1 }
  0x17   : > { %639 = vmatpush1.bf16.xpose.msra.mxu0 %v605_v8 }
  0x18   : > { %640 = vmatprep.subr.bf16.mxu0 %v2001_v3 }
  0x1f   : > { %641 = vmatpush1.bf16.xpose.msra.mxu0 %v608_v10 }
  0x20   : > { %642 = vmatprep.subr.bf16.mxu0 %v2001_v3 }
  0x27   : > { %643 = vmatpush1.bf16.xpose.msra.mxu0 %v611_v12 }
  0x28   : > { %644 = vmatprep.subr.bf16.mxu0 %v2001_v3 }
  0x2f   : > { %645 = vmatpush1.bf16.xpose.msra.mxu0 %v614_v14 }
  0x30   : > { %646 = vmatprep.subr.bf16.mxu0 %v2001_v3 }
  0x37   : > { %647 = vmatpush1.bf16.xpose.msra.mxu0 %v617_v16 }
  0x38   : > { %648 = vmatprep.subr.bf16.mxu0 %v2001_v3 }
  0x3f   : > { %649 = vmatpush1.bf16.xpose.msra.mxu0 %v620_v18 }
  0x40   : > { %650 = vmatprep.subr.bf16.mxu0 %v2001_v3 }
  0x47   : > { %651 = vmatpush1.bf16.xpose.msra.mxu0 %v623_v20 }
  0x48   : > { %652 = vmatprep.subr.bf16.mxu0 %v2001_v3 }
  0x4f   : > { %653 = vmatpush1.bf16.xpose.msra.mxu0 %v626_v27 }
  0x50   : > { %654 = vmatprep.subr.bf16.mxu0 %v2001_v3 }
  0x57   : > { %655 = vmatpush1.bf16.xpose.msra.mxu0 %v629_v29 }
  0x58   : > { %656 = vmatprep.subr.bf16.mxu0 %v2001_v3 }
  0x5f   : > { %657 = vmatpush1.bf16.xpose.msra.mxu0 %v632_v31 }
  0x9f   : > { %v472_v21 = vpop.xlane.xlu0 %471 }
  0xa0   : > { %v474_v22 = vmul.f32 0.015625, %v472_v21 }
  0xa2   : > { %v475_v23 = vsub.f32 %v2100_v0, %v474_v22 }
  0xa4   : > { %v476_v24 = vmul.f32 %v475_v23, %v475_v23 }
  0xa6   : > { %v477_v25 = vsel %vm469_vm0, %v476_v24, 0.0 }
  0xa7   : > { %478 = vadd.xlane.f32.xlu0 %v477_v25 }
 0x134   : > { %v479_v32 = vpop.xlane.xlu0 %478 }
 0x135   : > { %v480_v33 = vmul.f32 0.015625, %v479_v32 }
 0x137   : > { %v481_v34 = vadd.f32 1e-05, %v480_v33 }
 0x139   : > { %1965 = vrsqrt.f32 %v481_v34 }
 0x143   : > { %v1966_v35 = vpop.eup %1965 }
 0x144   : > { %v483_v37 = vmul.f32 %v1966_v35, %v475_v23 }
 0x146   : > { %v490_v39 = vmul.f32 %v1725_v36, %v483_v37 }
 0x148   : > { %v497_v40 = vadd.f32 %v1726_v38, %v490_v39 }
 0x14a   : > { %v522_v41 = vpack.c.bf16 %v497_v40, %v497_v40 }
 0x14c   : > { %1739 = vmatmul.mubr.msk.bf16.vlgmr.msra.gmra.mrb[0].mxu0 %vm469_vm0, %v522_v41 }
 0x21f   : > { %v668_v49 = vpop.f32.mrb[0].mxu0 }
 0x220   : > { %v669_v51 = vadd.f32 %v668_v49, %v528_v47  ;;  %v670_v52 = vpop.f32.mrb[1].mxu0 }
 0x221   : > { %v671_v53 = vadd.f32 %v670_v52, %v532_v48  ;;  %v672_v54 = vpop.f32.mrb[2].mxu0 }
 0x222   : > { %v675_v55 = vpack.c.bf16 %v669_v51, %v669_v51  ;;  %v673_v56 = vpop.f32.mrb[3].mxu0 }
 0x223   : > { %v2173_v57 = vpack.c.bf16 %v671_v53, %v671_v53 }
 0x224   : > { %678 = vst.msk [vmem:[#allocation2] sm:$0xf] %vm677_vm1, %v675_v55  ;;  %689 = vrot.lane.b32.xlu0 %v675_v55, %s2003_s21  ;;  %682 = vrot.lane.b32.xlu1 %v675_v55, %s2004_s22 }
 0x225   : > { %688 = vst.msk [vmem:[#allocation2 + $0x20] sm:$0xf] %vm677_vm1, %v2173_v57 }
 0x228   : > { %694 = vrot.lane.b32.xlu1 %v675_v55, %s2006_s23 }
 0x22b   : > { %v737_v4 = vld [vmem:[#allocation2] sm:$0xf] }
 0x22c   : > { %712 = vrot.lane.b32.xlu1 %v675_v55, %s2007_s24  ;;  %v745_v13 = vld [vmem:[#allocation2 + $0x20] sm:$0xf] }
 0x22d   : > { %v997_v15 = vsel %vm995_vm4, %v745_v13, 0 }
 0x230   : > { %707 = vrot.lane.b32.xlu1 %v675_v55, %s2008_s25 }
 0x234   : > { %727 = vrot.lane.b32.xlu1 %v675_v55, %s2009_s26 }
 0x238   : > { %722 = vrot.lane.b32.xlu1 %v675_v55, %s2010_s27 }
 0x296   : > { %v690_v58 = vpop.permute.xlu0 %689  ;;  %v683_v59 = vpop.permute.xlu1 %682 }
 0x297   : > { %693 = vst.msk [vmem:[#allocation2 + $0x4] sm:$0xf] %vm677_vm1, %v690_v58  ;;  %686 = vst.msk [vmem:[#allocation2 + $0x10] sm:$0xf] %vm677_vm1, %v683_v59 }
 0x29a   : > { %v695_v60 = vpop.permute.xlu1 %694 }
 0x29b   : > { %698 = vst.msk [vmem:[#allocation2 + $0x14] sm:$0xf] %vm677_vm1, %v695_v60 }
 0x29e   : > { %v713_v61 = vpop.permute.xlu1 %712  ;;  %v741_v62 = vld [vmem:[#allocation2 + $0x10] sm:$0xf]  ;;  %v738_v8 = vld [vmem:[#allocation2 + $0x4] sm:$0xf] }
 0x29f   : > { %716 = vst.msk [vmem:[#allocation2 + $0x18] sm:$0xf] %vm677_vm1, %v713_v61  ;;  %v754_v63 = vsel %vm749_vm3, %v741_v62, 0 }
 0x2a0   : > { %1836 = vmatpush3.bf16.xpose.msra.mxu1 %v754_v63 }
 0x2a1   : > { %1841 = vmatprep.subr.bf16.mxu1 %v2002_v50 }
 0x2a2   : > { %v708_v1 = vpop.permute.xlu1 %707  ;;  %v742_v2 = vld [vmem:[#allocation2 + $0x14] sm:$0xf] }
 0x2a3   : > { %711 = vst.msk [vmem:[#allocation2 + $0x8] sm:$0xf] %vm677_vm1, %v708_v1  ;;  %v800_v5 = vsel %vm749_vm3, %v742_v2, 0 }
 0x2a6   : > { %v728_v3 = vpop.permute.xlu1 %727  ;;  %v743_v7 = vld [vmem:[#allocation2 + $0x18] sm:$0xf] }
 0x2a7   : > { %731 = vst.msk [vmem:[#allocation2 + $0x1c] sm:$0xf] %vm677_vm1, %v728_v3  ;;  %1838 = vmatmul.mubr.msk.bf16.vlgmr.msra.gmra.mrb[0].mxu1 %vm749_vm3, %v737_v4  ;;  %v846_v9 = vsel %vm749_vm3, %v743_v7, 0 }
 0x2a8   : > { %1842 = vmatpush3.bf16.xpose.msra.mxu1 %v800_v5  ;;  %1843 = vmatprep.mubr.msk.bf16.mxu1 %vm2005_vm2, %v2002_v50 }
 0x2a9   : > { %1847 = vmatprep.subr.bf16.mxu1 %v2002_v50 }
 0x2aa   : > { %v723_v6 = vpop.permute.xlu1 %722  ;;  %v739_v11 = vld [vmem:[#allocation2 + $0x8] sm:$0xf] }
 0x2ab   : > { %726 = vst.msk [vmem:[#allocation2 + $0xc] sm:$0xf] %vm677_vm1, %v723_v6 }
 0x2ae   : > { %v744_v10 = vld [vmem:[#allocation2 + $0x1c] sm:$0xf] }
 0x2af   : > { %1844 = vmatmul.mubr.msk.bf16.vlgmr.msra.gmra.mrb[4].mxu1 %vm749_vm3, %v738_v8  ;;  %v892_v12 = vsel %vm749_vm3, %v744_v10, 0 }
 0x2b0   : > { %1848 = vmatpush3.bf16.xpose.msra.mxu1 %v846_v9  ;;  %1849 = vmatprep.mubr.msk.bf16.mxu1 %vm2005_vm2, %v2002_v50 }
 0x2b1   : > { %1853 = vmatprep.subr.bf16.mxu1 %v2002_v50 }
 0x2b2   : > { %v740_v14 = vld [vmem:[#allocation2 + $0xc] sm:$0xf] }
 0x2b7   : > { %1850 = vmatmul.mubr.msk.bf16.vlgmr.msra.gmra.mrb[8].mxu1 %vm749_vm3, %v739_v11 }
 0x2b8   : > { %1854 = vmatpush3.bf16.xpose.msra.mxu1 %v892_v12  ;;  %1855 = vmatprep.mubr.msk.bf16.mxu1 %vm2005_vm2, %v2002_v50 }
 0x2b9   : > { %1859 = vmatprep.subr.bf16.mxu1 %v2002_v50 }
 0x2bf   : > { %1856 = vmatmul.mubr.msk.bf16.vlgmr.msra.gmra.mrb[12].mxu1 %vm749_vm3, %v740_v14 }
 0x2c0   : > { %1860 = vmatpush3.bf16.msra.mxu1 %v997_v15  ;;  %1861 = vmatprep.mubr.msk.bf16.mxu1 %vm2005_vm2, %v2002_v50 }
 0x2c1   : > { %1865 = vmatprep.subr.bf16.mxu1 %v2002_v50 }
 0x37a   : > { %v790_v16 = vpop.f32.mrb[0].mxu1 }
 0x37b   : > { %v934_v18 = vmul.f32 0.25, %v790_v16  ;;  %v1839_v19 = vpop.f32.mrb[1].mxu1 }
 0x37c   : > { %v793_v20 = vpop.f32.mrb[2].mxu1 }
 0x37d   : > { %v1840_v21 = vpop.f32.mrb[3].mxu1  ;;  %v939_v22 = vadd.f32 %v938_v17, %v934_v18 }
 0x37f   : > { %v944_v23 = vsel %vm943_vm5, %v939_v22, -inf }
 0x380   : > { %945 = vmax.xlane.f32.xlu1 %v944_v23 }
 0x382   : > { %v836_v24 = vpop.f32.mrb[4].mxu1 }
 0x383   : > { %v935_v25 = vmul.f32 0.25, %v836_v24  ;;  %v1845_v26 = vpop.f32.mrb[5].mxu1 }
 0x384   : > { %v839_v27 = vpop.f32.mrb[6].mxu1 }
 0x385   : > { %v1846_v28 = vpop.f32.mrb[7].mxu1  ;;  %v940_v29 = vadd.f32 %v938_v17, %v935_v25 }
 0x387   : > { %v947_v30 = vsel %vm943_vm5, %v940_v29, -inf }
 0x388   : > { %948 = vmax.xlane.f32.xlu0 %v947_v30 }
 0x38a   : > { %v882_v31 = vpop.f32.mrb[8].mxu1 }
 0x38b   : > { %v936_v32 = vmul.f32 0.25, %v882_v31  ;;  %v1851_v33 = vpop.f32.mrb[9].mxu1  ;;  %v1933_v31 = vld [vmem:[%s2409_s8] sm:$0xff]  }
 0x38c   : > { %v885_v34 = vpop.f32.mrb[10].mxu1  ;;  %v1239_v33 = vsel %vm469_vm0, %v1933_v31, 0  ;;  %v1948_v31 = vld [vmem:[%s2411_s10 + $0x28] sm:$0xff]  }
 0x38d   : > { %v1852_v35 = vpop.f32.mrb[11].mxu1  ;;  %v941_v36 = vadd.f32 %v938_v17, %v936_v32 }
 0x38f   : > { %v950_v37 = vsel %vm943_vm5, %v941_v36, -inf }
 0x390   : > { %951 = vmax.xlane.f32.xlu1 %v950_v37  ;;  %v1934_v37 = vld [vmem:[%s2409_s8 + $0x8] sm:$0xff]  }
 0x392   : > { %v928_v38 = vpop.f32.mrb[12].mxu1 }
 0x393   : > { %v937_v39 = vmul.f32 0.25, %v928_v38  ;;  %v1857_v40 = vpop.f32.mrb[13].mxu1 }
 0x394   : > { %v931_v41 = vpop.f32.mrb[14].mxu1 }
 0x395   : > { %v1858_v42 = vpop.f32.mrb[15].mxu1  ;;  %v942_v45 = vadd.f32 %v938_v17, %v937_v39  ;;  %v1242_v39 = vsel %vm469_vm0, %v1934_v37, 0  ;;  %v1952_v37 = vld [vmem:[%s2411_s10 + $0x38] sm:$0xff]  }
 0x397   : > { %v953_v47 = vsel %vm943_vm5, %v942_v45, -inf }
 0x398   : > { %954 = vmax.xlane.f32.xlu0 %v953_v47 }
 0x40d   : > { %v946_v48 = vpop.xlane.xlu1 %945 }
 0x40e   : > { %v956_v49 = vsub.f32 %v939_v22, %v946_v48  ;;  %v1935_v48 = vld [vmem:[%s2409_s8 + $0x10] sm:$0xff]  }
 0x410   : > { %v960_v51 = vmul.f32 1.442695, %v956_v49  ;;  %v1245_v49 = vsel %vm469_vm0, %v1935_v48, 0  ;;  %v1760_v48 = vld [vmem:[%s2406_s5] ss:$0 sm:$0xff] }
 0x412   : > { %1967 = vpow2.f32 %v960_v51  ;;  %v1936_v51 = vld [vmem:[%s2409_s8 + $0x18] sm:$0xff]  }
 0x415   : > { %v949_v52 = vpop.xlane.xlu0 %948 }
 0x416   : > { %v957_v53 = vsub.f32 %v940_v29, %v949_v52  ;;  %v1248_v52 = vsel %vm469_vm0, %v1936_v51, 0 }
 0x418   : > { %v962_v54 = vmul.f32 1.442695, %v957_v53 }
 0x41a   : > { %1969 = vpow2.f32 %v962_v54 }
 0x41c   : > { %v1968_v55 = vpop.eup %1967 }
 0x41d   : > { %v968_v56 = vsel %vm943_vm5, %v1968_v55, 0.0  ;;  %v952_v2 = vpop.xlane.xlu1 %951 }
 0x41e   : > { %969 = vadd.xlane.f32.xlu1 %v968_v56  ;;  %v958_v3 = vsub.f32 %v941_v36, %v952_v2 }
 0x420   : > { %v964_v4 = vmul.f32 1.442695, %v958_v3 }
 0x424   : > { %v1970_v58 = vpop.eup %1969 }
 0x425   : > { %v955_v59 = vpop.xlane.xlu0 %954  ;;  %v971_v60 = vsel %vm943_vm5, %v1970_v58, 0.0 }
 0x426   : > { %v959_v61 = vsub.f32 %v942_v45, %v955_v59  ;;  %972 = vadd.xlane.f32.xlu0 %v971_v60 }
 0x428   : > { %v966_v62 = vmul.f32 1.442695, %v959_v61 }
 0x42a   : > { %1971 = vpow2.f32 %v966_v62 }
 0x42b   : > { %1973 = vpow2.f32 %v964_v4 }
 0x42f   : > { %702 = vrot.lane.b32.xlu1 %v2173_v57, %s2003_s21 }
 0x434   : > { %v1972_v63 = vpop.eup %1971 }
 0x435   : > { %v977_v1 = vsel %vm943_vm5, %v1972_v63, 0.0  ;;  %v1974_v5 = vpop.eup %1973 }
 0x436   : > { %978 = vadd.xlane.f32.xlu0 %v977_v1  ;;  %v974_v6 = vsel %vm943_vm5, %v1974_v5, 0.0 }
 0x44c   : > { %717 = vrot.lane.b32.xlu0 %v2173_v57, %s2008_s25 }
 0x453   : > { %975 = vadd.xlane.f32.xlu1 %v974_v6 }
 0x464   : > { %732 = vrot.lane.b32.xlu1 %v2173_v57, %s2010_s27 }
 0x4ab   : > { %v970_v7 = vpop.xlane.xlu1 %969 }
 0x4ac   : > { %1975 = vrcp.f32 %v970_v7 }
 0x4af   : > { %v703_v8 = vpop.permute.xlu1 %702 }
 0x4b0   : > { %706 = vst.msk [vmem:[#allocation2 + $0x24] sm:$0xf] %vm677_vm1, %v703_v8 }
 0x4b3   : > { %v973_v9 = vpop.xlane.xlu0 %972 }
 0x4b4   : > { %1977 = vrcp.f32 %v973_v9 }
 0x4b6   : > { %v1976_v10 = vpop.eup %1975 }
 0x4b7   : > { %v984_v11 = vmul.f32 %v1976_v10, %v1968_v55  ;;  %v746_v12 = vld [vmem:[#allocation2 + $0x24] sm:$0xf] }
 0x4b8   : > { %v1043_v14 = vsel %vm995_vm4, %v746_v12, 0  ;;  %v1937_v12 = vld [vmem:[%s2411_s10 + $0x40] sm:$0xff]  }
 0x4b9   : > { %v988_v13 = vpack.c.bf16 %v984_v11, %v984_v11  ;;  %1895 = vmatprep.subr.msk.bf16.mxu0 %vm469_vm0, %v1937_v12 }
 0x4bb   : > { %1862 = vmatmul.mubr.msk.bf16.vlgmr.msra.gmra.mrb[16].mxu1 %vm943_vm5, %v988_v13  ;;  %v1938_v13 = vld [vmem:[%s2411_s10] sm:$0xff]  }
 0x4bc   : > { %1866 = vmatpush3.bf16.msra.mxu1 %v1043_v14  ;;  %1867 = vmatprep.mubr.msk.bf16.mxu1 %vm2005_vm2, %v2002_v50  ;;  %v1457_v14 = vsel %vm469_vm0, %v1938_v13, 0 }
 0x4bd   : > { %1871 = vmatprep.subr.bf16.mxu1 %v2002_v50  ;;  %1818 = vmatpush3.bf16.xpose.msra.mxu0 %v1457_v14 }
 0x4be   : > { %v1978_v57 = vpop.eup %1977 }
 0x4bf   : > { %v985_v15 = vmul.f32 %v1978_v57, %v1970_v58  ;;  %v1940_v57 = vld [vmem:[%s2411_s10 + $0x8] sm:$0xff]  }
 0x4c1   : > { %v989_v16 = vpack.c.bf16 %v985_v15, %v985_v15  ;;  %v1460_v15 = vsel %vm469_vm0, %v1940_v57, 0 }
 0x4c3   : > { %1868 = vmatmul.mubr.msk.bf16.vlgmr.msra.gmra.mrb[20].mxu1 %vm943_vm5, %v989_v16  ;;  %v979_v17 = vpop.xlane.xlu0 %978  ;;  %v1941_v16 = vld [vmem:[%s2411_s10 + $0x50] sm:$0xff]  }
 0x4c4   : > { %1873 = vmatprep.mubr.msk.bf16.mxu1 %vm2005_vm2, %v2002_v50 }
 0x4c7   : > { %v718_v18 = vpop.permute.xlu0 %717 }
 0x4c8   : > { %721 = vst.msk [vmem:[#allocation2 + $0x28] sm:$0xf] %vm677_vm1, %v718_v18 }
 0x4cf   : > { %v747_v19 = vld [vmem:[#allocation2 + $0x28] sm:$0xf] }
 0x4d0   : > { %v1089_v20 = vsel %vm995_vm4, %v747_v19, 0  ;;  %v1943_v19 = vld [vmem:[%s2411_s10 + $0x58] sm:$0xff]  }
 0x4d1   : > { %1872 = vmatpush3.bf16.msra.mxu1 %v1089_v20  ;;  %v1944_v20 = vld [vmem:[%s2411_s10 + $0x18] sm:$0xff]  }
 0x4d2   : > { %1877 = vmatprep.subr.bf16.mxu1 %v2002_v50 }
 0x4e0   : > { %v976_v21 = vpop.xlane.xlu1 %975 }
 0x4e1   : > { %1979 = vrcp.f32 %v976_v21  ;;  %v1466_v21 = vsel %vm469_vm0, %v1944_v20, 0  ;;  %v1788_v20 = vld [vmem:[%s2414_s13] ss:$0 sm:$0xff] }
 0x4e2   : > { %1981 = vrcp.f32 %v979_v17  ;;  %v1942_v17 = vld [vmem:[%s2411_s10 + $0x10] sm:$0xff]  }
 0x4e3   : > { %v1463_v18 = vsel %vm469_vm0, %v1942_v17, 0 }
 0x4e4   : > { %v733_v22 = vpop.permute.xlu1 %732 }
 0x4e5   : > { %736 = vst.msk [vmem:[#allocation2 + $0x2c] sm:$0xf] %vm677_vm1, %v733_v22  ;;  %v1945_v22 = vld [vmem:[%s2411_s10 + $0x60] sm:$0xff]  }
 0x4eb   : > { %v1980_v23 = vpop.eup %1979 }
 0x4ec   : > { %v986_v24 = vmul.f32 %v1980_v23, %v1974_v5  ;;  %v748_v25 = vld [vmem:[#allocation2 + $0x2c] sm:$0xf]  ;;  %v1982_v27 = vpop.eup %1981  ;;  %v1758_v5 = vld [vmem:[%s2410_s9] ss:$0 sm:$0xff] }
 0x4ed   : > { %v1135_v28 = vsel %vm995_vm4, %v748_v25, 0  ;;  %v987_v29 = vmul.f32 %v1982_v27, %v1972_v63  ;;  %v1946_v23 = vld [vmem:[%s2411_s10 + $0x20] sm:$0xff]  }
 0x4ee   : > { %v990_v26 = vpack.c.bf16 %v986_v24, %v986_v24  ;;  %v1469_v24 = vsel %vm469_vm0, %v1946_v23, 0 }
 0x4ef   : > { %v991_v30 = vpack.c.bf16 %v987_v29, %v987_v29 }
 0x4f0   : > { %1874 = vmatmul.mubr.msk.bf16.vlgmr.msra.gmra.mrb[24].mxu1 %vm943_vm5, %v990_v26 }
 0x4f1   : > { %1878 = vmatpush3.bf16.msra.mxu1 %v1135_v28  ;;  %1879 = vmatprep.mubr.msk.bf16.mxu1 %vm2005_vm2, %v2002_v50 }
 0x4f2   : > { %1883 = vmatprep.subr.bf16.mxu1 %v2002_v50 }
 0x4f8   : > { %1880 = vmatmul.mubr.msk.bf16.vlgmr.msra.gmra.mrb[28].mxu1 %vm943_vm5, %v991_v30  ;;  %v1947_v30 = vld [vmem:[%s2411_s10 + $0x68] sm:$0xff]  }
 0x4f9   : > { %1891 = vmatprep.mubr.msk.bf16.mxu1 %vm2005_vm2, %v2002_v50 }
 0x4fa   : > { %1884 = vmatpush3.bf16.xpose.msra.mxu1 %v1239_v33  ;;  %v1949_v33 = vld [vmem:[%s2411_s10 + $0x70] sm:$0xff]  }
 0x4fb   : > { %1885 = vmatprep.subr.bf16.mxu1 %v2002_v50 }
 0x502   : > { %1886 = vmatpush3.bf16.xpose.msra.mxu1 %v1242_v39 }
 0x503   : > { %1887 = vmatprep.subr.bf16.mxu1 %v2002_v50 }
 0x50a   : > { %1888 = vmatpush3.bf16.xpose.msra.mxu1 %v1245_v49 }
 0x50b   : > { %1889 = vmatprep.subr.bf16.mxu1 %v2002_v50 }
 0x512   : > { %1890 = vmatpush3.bf16.xpose.msra.mxu1 %v1248_v52 }
 0x58e   : > { %v1033_v32 = vpop.f32.mrb[16].mxu1 }
 0x58f   : > { %v1177_v34 = vpack.c.bf16 %v1033_v32, %v1033_v32  ;;  %v1863_v35 = vpop.f32.mrb[17].mxu1  ;;  %v1472_v32 = vsel %vm469_vm0, %v1948_v31, 0 }
 0x590   : > { %v1036_v36 = vpop.f32.mrb[18].mxu1 }
 0x591   : > { %1178 = vst.msk [vmem:[#allocation3] sm:$0xf] %vm677_vm1, %v1177_v34  ;;  %v1864_v38 = vpop.f32.mrb[19].mxu1  ;;  %v1950_v34 = vld [vmem:[%s2411_s10 + $0x30] sm:$0xff]   ;;  %v1951_v36 = vld [vmem:[%s2411_s10 + $0x78] sm:$0xff]  }
 0x592   : > { %v1475_v35 = vsel %vm469_vm0, %v1950_v34, 0  ;;  %v1478_v38 = vsel %vm469_vm0, %v1952_v37, 0 }
 0x596   : > { %v1079_v40 = vpop.f32.mrb[20].mxu1 }
 0x597   : > { %v1793_v41 = vpack.c.bf16 %v1079_v40, %v1079_v40  ;;  %v1869_v42 = vpop.f32.mrb[21].mxu1 }
 0x598   : > { %v1082_v45 = vpop.f32.mrb[22].mxu1 }
 0x599   : > { %1183 = vrot.lane.b32.xlu1 %v1793_v41, %s2009_s26  ;;  %v1870_v47 = vpop.f32.mrb[23].mxu1  ;;  %v1759_v45 = vld [vmem:[%s2405_s4] ss:$0 sm:$0xff] }
 0x5c3   : > { %v1125_v53 = vpop.f32.mrb[24].mxu1 }
 0x5c4   : > { %v1794_v54 = vpack.c.bf16 %v1125_v53, %v1125_v53  ;;  %v1875_v55 = vpop.f32.mrb[25].mxu1  ;;  %v1955_v53 = vld [vmem:[%s2413_s12 + $0x4] ss:$8 sps:$4 sm:$0xff]  }
 0x5c5   : > { %v1128_v56 = vpop.f32.mrb[26].mxu1  ;;  %1613 = vmatprep.subr.bf16.mxu1 %v1955_v53  ;;  %v1958_v55 = vld [vmem:[%s2413_s12 + $0x14] ss:$8 sps:$4 sm:$0xff]  }
 0x5c6   : > { %1192 = vrot.lane.b32.xlu0 %v1794_v54, %s2007_s24  ;;  %v1876_v58 = vpop.f32.mrb[27].mxu1  ;;  %v1953_v54 = vld [vmem:[%s2413_s12] ss:$8 sps:$4 sm:$0xff]   ;;  %v1956_v56 = vld [vmem:[%s2413_s12 + $0x10] ss:$8 sps:$4 sm:$0xff]  }
 0x5c7   : > { %v1961_v58 = vld [vmem:[%s2413_s12 + $0x24] ss:$8 sps:$4 sm:$0xff]  }
 0x5cb   : > { %v1171_v59 = vpop.f32.mrb[28].mxu1 }
 0x5cc   : > { %v1795_v60 = vpack.c.bf16 %v1171_v59, %v1171_v59  ;;  %v1881_v61 = vpop.f32.mrb[29].mxu1  ;;  %v1959_v59 = vld [vmem:[%s2413_s12 + $0x20] ss:$8 sps:$4 sm:$0xff]  }
 0x5cd   : > { %v1174_v62 = vpop.f32.mrb[30].mxu1  ;;  %v1962_v61 = vld [vmem:[%s2413_s12 + $0x30] ss:$8 sps:$4 sm:$0xff]  }
 0x5ce   : > { %1201 = vrot.lane.b32.xlu1 %v1795_v60, %s2006_s23  ;;  %v1882_v50 = vpop.f32.mrb[31].mxu1  ;;  %v1964_v60 = vld [vmem:[%s2413_s12 + $0x34] ss:$8 sps:$4 sm:$0xff]   ;;  %v1361_v62 = vld [vmem:[%s2412_s11] sm:$0x3]  ;;  %s1724_s23 = sshll.u32 %s2417_s30, 2 }
 0x5cf   : > { %v1366_v50 = vrot.slane %v1361_v62, %v527_v44  ;;  %s462_s15 = scalar_lea.vmem %s2415_s14, %s1724_s23 }
 0x60b   : > { %v1184_v63 = vpop.permute.xlu1 %1183 }
 0x60c   : > { %1187 = vst.msk [vmem:[#allocation3] sm:$0xf] %vm1186_vm6, %v1184_v63  ;;  %v1370_v63 = vrot.slane %v1361_v62, %v531_v46 }
 0x638   : > { %v1193_v1 = vpop.permute.xlu0 %1192 }
 0x639   : > { %1196 = vst.msk [vmem:[#allocation3] sm:$0xf] %vm1195_vm7, %v1193_v1 }
 0x640   : > { %v1202_v2 = vpop.permute.xlu1 %1201 }
 0x641   : > { %1205 = vst.msk [vmem:[#allocation3] sm:$0xf] %vm1204_vm8, %v1202_v2 }
 0x648   : > { %v1206_v3 = vld [vmem:[#allocation3] sm:$0xf] }
 0x649   : > { %1892 = vmatmul.mubr.msk.bf16.vlgmr.msra.gmra.mrb[32].mxu1 %vm469_vm0, %v1206_v3 }
 0x64a   : > { %1614 = vmatpush1.bf16.xpose.msra.mxu1 %v1953_v54 }
 0x64b   : > { %1615 = vmatprep.subr.bf16.mxu1 %v1958_v55 }
 0x652   : > { %1616 = vmatpush1.bf16.xpose.msra.mxu1 %v1956_v56 }
 0x653   : > { %1617 = vmatprep.subr.bf16.mxu1 %v1961_v58 }
 0x65a   : > { %1618 = vmatpush1.bf16.xpose.msra.mxu1 %v1959_v59 }
 0x65b   : > { %1619 = vmatprep.subr.bf16.mxu1 %v1964_v60 }
 0x662   : > { %1620 = vmatpush1.bf16.xpose.msra.mxu1 %v1962_v61 }
 0x71c   : > { %v1284_v4 = vpop.f32.mrb[32].mxu1 }
 0x71d   : > { %v1290_v6 = vadd.f32 %v1284_v4, %v2100_v0  ;;  %v1893_v7 = vpop.f32.mrb[33].mxu1  ;;  %v1939_v0 = vld [vmem:[%s2411_s10 + $0x48] sm:$0xff]  }
 0x71e   : > { %v1287_v8 = vpop.f32.mrb[34].mxu1  ;;  %1896 = vmatprep.subr.msk.bf16.mxu0 %vm469_vm0, %v1939_v0 }
 0x71f   : > { %v2281_v9 = vadd.f32 %v1758_v5, %v1290_v6  ;;  %v1894_v10 = vpop.f32.mrb[35].mxu1  ;;  %1820 = vmatpush3.bf16.xpose.msra.mxu0 %v1460_v15 }
 0x720   : > { %1897 = vmatprep.subr.msk.bf16.mxu0 %vm469_vm0, %v1941_v16 }
 0x721   : > { %v1301_v11 = vsel %vm469_vm0, %v2281_v9, 0.0 }
 0x722   : > { %1302 = vadd.xlane.f32.xlu0 %v1301_v11 }
 0x727   : > { %1822 = vmatpush3.bf16.xpose.msra.mxu0 %v1463_v18 }
 0x728   : > { %1898 = vmatprep.subr.msk.bf16.mxu0 %vm469_vm0, %v1943_v19 }
 0x72f   : > { %1824 = vmatpush3.bf16.xpose.msra.mxu0 %v1466_v21 }
 0x730   : > { %1899 = vmatprep.subr.msk.bf16.mxu0 %vm469_vm0, %v1945_v22 }
 0x737   : > { %1826 = vmatpush3.bf16.xpose.msra.mxu0 %v1469_v24 }
 0x738   : > { %1900 = vmatprep.subr.msk.bf16.mxu0 %vm469_vm0, %v1947_v30 }
 0x73f   : > { %1828 = vmatpush3.bf16.xpose.msra.mxu0 %v1472_v32 }
 0x740   : > { %1901 = vmatprep.subr.msk.bf16.mxu0 %vm469_vm0, %v1949_v33 }
 0x747   : > { %1830 = vmatpush3.bf16.xpose.msra.mxu0 %v1475_v35 }
 0x748   : > { %1902 = vmatprep.subr.msk.bf16.mxu0 %vm469_vm0, %v1951_v36 }
 0x74f   : > { %1832 = vmatpush3.bf16.xpose.msra.mxu0 %v1478_v38 }
 0x7af   : > { %v1303_v25 = vpop.xlane.xlu0 %1302 }
 0x7b0   : > { %v1304_v26 = vmul.f32 0.015625, %v1303_v25 }
 0x7b2   : > { %v1305_v27 = vsub.f32 %v2281_v9, %v1304_v26 }
 0x7b4   : > { %v1306_v28 = vmul.f32 %v1305_v27, %v1305_v27 }
 0x7b6   : > { %v1307_v29 = vsel %vm469_vm0, %v1306_v28, 0.0 }
 0x7b7   : > { %1308 = vadd.xlane.f32.xlu1 %v1307_v29 }
 0x844   : > { %v1309_v39 = vpop.xlane.xlu1 %1308 }
 0x845   : > { %v1310_v40 = vmul.f32 0.015625, %v1309_v39 }
 0x847   : > { %v1311_v41 = vadd.f32 1e-05, %v1310_v40 }
 0x849   : > { %1983 = vrsqrt.f32 %v1311_v41 }
 0x853   : > { %v1984_v42 = vpop.eup %1983 }
 0x854   : > { %v1313_v47 = vmul.f32 %v1984_v42, %v1305_v27 }
 0x856   : > { %v1320_v49 = vmul.f32 %v1759_v45, %v1313_v47 }
 0x858   : > { %v1327_v51 = vadd.f32 %v1760_v48, %v1320_v49 }
 0x85a   : > { %v1360_v52 = vpack.c.bf16 %v1327_v51, %v1327_v51 }
 0x85c   : > { %1833 = vmatprep.mubr.msk.bf16.mxu0 %vm469_vm0, %v1360_v52 }
 0x85d   : > { %1834 = vmatmul.mubr.msk.bf16.vlgmr.msra.gmra.mrb[4].mxu0 %vm469_vm0, %v1360_v52 }
 0x930   : > { %v1538_v1 = vpop.f32.mrb[4].mxu0 }
 0x931   : > { %v1539_v2 = vadd.f32 %v1538_v1, %v1366_v50  ;;  %v1540_v3 = vpop.f32.mrb[5].mxu0 }
 0x932   : > { %v1541_v4 = vadd.f32 %v1540_v3, %v1370_v63  ;;  %v1542_v5 = vpop.f32.mrb[6].mxu0 }
 0x933   : > { %v1545_v6 = vpack.c.bf16 %v1539_v2, %v1539_v2  ;;  %v1543_v7 = vpop.f32.mrb[7].mxu0 }
 0x934   : > { %v1546_v8 = vpack.c.bf16 %v1541_v4, %v1541_v4 }
 0x935   : > { %v1778_v10 = vmul.bf16 3218784218, %v1545_v6 }
 0x936   : > { %v1779_v11 = vmul.bf16 3218784218, %v1546_v8 }
 0x937   : > { %v1552_v12 = vmul.bf16 1069105081, %v1778_v10 }
 0x938   : > { %v1555_v13 = vmul.bf16 1069105081, %v1779_v11 }
 0x939   : > { %1985 = vpow.bf16 %v1552_v12 }
 0x93a   : > { %1987 = vpow.bf16 %v1555_v13 }
 0x944   : > { %v1986_v0 = vpop.eup %1985 }
 0x945   : > { %v1988_v44 = vpop.eup %1987  ;;  %v1557_v14 = vadd.bf16 1065369472, %v1986_v0 }
 0x946   : > { %v1558_v43 = vadd.bf16 1065369472, %v1988_v44 }
 0x947   : > { %1989 = vrcp.bf16 %v1557_v14 }
 0x948   : > { %1991 = vrcp.bf16 %v1558_v43 }
 0x952   : > { %v1990_v46 = vpop.eup %1989 }
 0x953   : > { %v1992_v57 = vpop.eup %1991  ;;  %v1560_v15 = vmul.bf16 1065369472, %v1990_v46 }
 0x954   : > { %v1562_v16 = vmul.bf16 1065369472, %v1992_v57 }
 0x955   : > { %v1563_v18 = vmul.bf16 %v1560_v15, %v1545_v6 }
 0x956   : > { %v1564_v17 = vmul.bf16 %v1562_v16, %v1546_v8 }
 0x958   : > { %1645 = vmatprep.mubr.bf16.mxu1 %v1564_v17 }
 0x959   : > { %1646 = vmatmul.mubr.bf16.vlgmr.msra.gmra.mrb[36].mxu1 %v1563_v18 }
 0xa2c   : > { %v1647_v19 = vpop.f32.mrb[36].mxu1 }
 0xa2d   : > { %v1653_v21 = vadd.f32 %v1647_v19, %v2281_v9  ;;  %v1649_v22 = vpop.f32.mrb[37].mxu1 }
 0xa2e   : > { %v1650_v23 = vpop.f32.mrb[38].mxu1 }
 0xa2f   : > { %v1661_v24 = vadd.f32 %v1788_v20, %v1653_v21  ;;  %v1651_v25 = vpop.f32.mrb[39].mxu1 }
 0xa31   : > { %v1662_v26 = vpack.c.bf16 %v1661_v24, %v1661_v24 }
 0xa33   : > { %1664 = vst.msk [vmem:[%s462_s15] sm:$0xf] %vm1663_vm9, %v1662_v26 }
 0xa34 PF: > { %s24_s29 = sadd.s32 1, %s1999_s29  }
 0xa35   : > { %p21_p4 = scmp.ge.s32.totalorder %s24_s29, 6  }
 0xa37   :  { %23 = sbr.rel (!%p21_p4) target bundleno = 1 (0x1), region = 117 }

// kernel: class_incremental_clip_forward.16
= control target key start
LH: loop header
LB: loop body
LE: loop exit
PB: predicated region body
PF: predicated region fallthrough
CT: control target
= control target key end

     0   :  { %s1238_s0 = inlined_call_operand.vmem [shape: f32[128,512], index: 0, kind: input, shape index: {}]   ;;  %s1239_s1 = inlined_call_operand.vmem [shape: bf16[128,512], index: 1, kind: output, shape index: {}]  }
   0x1   :  { %v633_v0 = vld [vmem:[%s1238_s0 + $0x40] sm:$0xff]  ;;  %v638_v1 = vld [vmem:[%s1238_s0 + $0x48] sm:$0xff]  ;;  %v643_v2 = vld [vmem:[%s1238_s0 + $0x50] sm:$0xff] }
   0x2   :  { %v648_v3 = vld [vmem:[%s1238_s0 + $0x58] sm:$0xff]  ;;  %v80_v4 = vmul.f32 %v633_v0, %v633_v0  ;;  %v81_v5 = vmul.f32 %v638_v1, %v638_v1  ;;  %v82_v6 = vmul.f32 %v643_v2, %v643_v2  ;;  %v659_v7 = vld [vmem:[%s1238_s0] sm:$0xff]  ;;  %v664_v8 = vld [vmem:[%s1238_s0 + $0x8] sm:$0xff] }
   0x3   :  { %v83_v9 = vmul.f32 %v648_v3, %v648_v3  ;;  %v671_v10 = vld [vmem:[%s1238_s0 + $0x10] sm:$0xff]  ;;  %v676_v11 = vld [vmem:[%s1238_s0 + $0x18] sm:$0xff]  ;;  %v72_v12 = vmul.f32 %v659_v7, %v659_v7  ;;  %v73_v13 = vmul.f32 %v664_v8, %v664_v8  ;;  %v685_v14 = vld [vmem:[%s1238_s0 + $0x60] sm:$0xff] }
   0x4   :  { %v146_v15 = vadd.f32 %v81_v5, %v80_v4  ;;  %v74_v16 = vmul.f32 %v671_v10, %v671_v10  ;;  %v75_v17 = vmul.f32 %v676_v11, %v676_v11  ;;  %v694_v18 = vld [vmem:[%s1238_s0 + $0x68] sm:$0xff]  ;;  %v699_v19 = vld [vmem:[%s1238_s0 + $0x70] sm:$0xff]  ;;  %v704_v20 = vld [vmem:[%s1238_s0 + $0x78] sm:$0xff]  ;;  %v84_v21 = vmul.f32 %v685_v14, %v685_v14 }
   0x5   :  { %v136_v22 = vadd.f32 %v73_v13, %v72_v12  ;;  %v85_v23 = vmul.f32 %v694_v18, %v694_v18  ;;  %v86_v24 = vmul.f32 %v699_v19, %v699_v19  ;;  %v87_v25 = vmul.f32 %v704_v20, %v704_v20  ;;  %v717_v26 = vld [vmem:[%s1238_s0 + $0x20] sm:$0xff]  ;;  %v722_v27 = vld [vmem:[%s1238_s0 + $0x28] sm:$0xff]  ;;  %v727_v28 = vld [vmem:[%s1238_s0 + $0x30] sm:$0xff] }
   0x6   :  { %v147_v29 = vadd.f32 %v146_v15, %v82_v6  ;;  %v732_v30 = vld [vmem:[%s1238_s0 + $0x38] sm:$0xff]  ;;  %v76_v31 = vmul.f32 %v717_v26, %v717_v26  ;;  %v77_v32 = vmul.f32 %v722_v27, %v722_v27  ;;  %v78_v33 = vmul.f32 %v727_v28, %v727_v28  ;;  %v743_v34 = vld [vmem:[%s1238_s0 + $0xa0] sm:$0xff]  ;;  %v748_v35 = vld [vmem:[%s1238_s0 + $0xa8] sm:$0xff] }
   0x7   :  { %v137_v36 = vadd.f32 %v136_v22, %v74_v16  ;;  %v151_v37 = vadd.f32 %v85_v23, %v84_v21  ;;  %v79_v38 = vmul.f32 %v732_v30, %v732_v30  ;;  %v755_v39 = vld [vmem:[%s1238_s0 + $0xb0] sm:$0xff]  ;;  %v760_v40 = vld [vmem:[%s1238_s0 + $0xb8] sm:$0xff]  ;;  %v92_v41 = vmul.f32 %v743_v34, %v743_v34  ;;  %v767_v42 = vld [vmem:[%s1238_s0 + $0x80] sm:$0xff] }
   0x8   :  { %v148_v43 = vadd.f32 %v147_v29, %v83_v9  ;;  %v141_v44 = vadd.f32 %v77_v32, %v76_v31  ;;  %v93_v45 = vmul.f32 %v748_v35, %v748_v35  ;;  %v94_v46 = vmul.f32 %v755_v39, %v755_v39  ;;  %v776_v47 = vld [vmem:[%s1238_s0 + $0x88] sm:$0xff]  ;;  %v781_v48 = vld [vmem:[%s1238_s0 + $0x90] sm:$0xff]  ;;  %v786_v49 = vld [vmem:[%s1238_s0 + $0x98] sm:$0xff] }
   0x9   :  { %v138_v50 = vadd.f32 %v137_v36, %v75_v17  ;;  %v152_v51 = vadd.f32 %v151_v37, %v86_v24  ;;  %v95_v52 = vmul.f32 %v760_v40, %v760_v40  ;;  %v88_v53 = vmul.f32 %v767_v42, %v767_v42  ;;  %v795_v54 = vld [vmem:[%s1238_s0 + $0xe0] sm:$0xff]  ;;  %v800_v55 = vld [vmem:[%s1238_s0 + $0xe8] sm:$0xff]  ;;  %v805_v56 = vld [vmem:[%s1238_s0 + $0xf0] sm:$0xff] }
   0xa   :  { %149 = vadd.xlane.f32.xlu1 %v148_v43  ;;  %v142_v57 = vadd.f32 %v141_v44, %v78_v33  ;;  %v161_v58 = vadd.f32 %v93_v45, %v92_v41  ;;  %v89_v59 = vmul.f32 %v776_v47, %v776_v47  ;;  %v90_v60 = vmul.f32 %v781_v48, %v781_v48  ;;  %v814_v61 = vld [vmem:[%s1238_s0 + $0xf8] sm:$0xff]  ;;  %v819_v62 = vld [vmem:[%s1238_s0 + $0xc0] sm:$0xff]  ;;  %v824_v63 = vld [vmem:[%s1238_s0 + $0xc8] sm:$0xff] }
   0xb   :  { %139 = vadd.xlane.f32.xlu0 %v138_v50  ;;  %v153_v4 = vadd.f32 %v152_v51, %v87_v25  ;;  %v91_v5 = vmul.f32 %v786_v49, %v786_v49  ;;  %v100_v6 = vmul.f32 %v795_v54, %v795_v54  ;;  %v101_v9 = vmul.f32 %v800_v55, %v800_v55  ;;  %v835_v12 = vld [vmem:[%s1238_s0 + $0xd0] sm:$0xff]  ;;  %v840_v13 = vld [vmem:[%s1238_s0 + $0xd8] sm:$0xff]  ;;  %v847_v22 = vld [vmem:[%s1238_s0 + $0x120] sm:$0xff] }
   0xc   :  { %v143_v15 = vadd.f32 %v142_v57, %v79_v38  ;;  %v162_v16 = vadd.f32 %v161_v58, %v94_v46  ;;  %v156_v17 = vadd.f32 %v89_v59, %v88_v53  ;;  %v102_v21 = vmul.f32 %v805_v56, %v805_v56  ;;  %v852_v23 = vld [vmem:[%s1238_s0 + $0x128] sm:$0xff]  ;;  %v863_v32 = vld [vmem:[%s1238_s0 + $0x130] sm:$0xff]  ;;  %v868_v33 = vld [vmem:[%s1238_s0 + $0x138] sm:$0xff] }
   0xd   :  { %v103_v24 = vmul.f32 %v814_v61, %v814_v61  ;;  %v171_v25 = vadd.f32 %v101_v9, %v100_v6  ;;  %v96_v29 = vmul.f32 %v819_v62, %v819_v62  ;;  %v97_v31 = vmul.f32 %v824_v63, %v824_v63  ;;  %v873_v36 = vld [vmem:[%s1238_s0 + $0x100] sm:$0xff]  ;;  %v882_v44 = vld [vmem:[%s1238_s0 + $0x108] sm:$0xff]  ;;  %v887_v45 = vld [vmem:[%s1238_s0 + $0x110] sm:$0xff] }
   0xe   :  { %154 = vadd.xlane.f32.xlu1 %v153_v4  ;;  %v163_v37 = vadd.f32 %v162_v16, %v95_v52  ;;  %v157_v38 = vadd.f32 %v156_v17, %v90_v60  ;;  %v98_v41 = vmul.f32 %v835_v12, %v835_v12  ;;  %v99_v43 = vmul.f32 %v840_v13, %v840_v13  ;;  %v896_v53 = vld [vmem:[%s1238_s0 + $0x118] sm:$0xff]  ;;  %v901_v57 = vld [vmem:[%s1238_s0 + $0x160] sm:$0xff]  ;;  %v906_v58 = vld [vmem:[%s1238_s0 + $0x168] sm:$0xff] }
   0xf   :  { %1261 = vst [vmem:[#allocation2_spill] sm:$0xff] %v887_v45  ;;  %144 = vadd.xlane.f32.xlu0 %v143_v15  ;;  %v172_v46 = vadd.f32 %v171_v25, %v102_v21  ;;  %v166_v50 = vadd.f32 %v97_v31, %v96_v29  ;;  %v108_v51 = vmul.f32 %v847_v22, %v847_v22  ;;  %1262 = vst [vmem:[#allocation3_spill] sm:$0xff] %v896_v53  ;;  %v917_v9 = vld [vmem:[%s1238_s0 + $0x170] sm:$0xff]  ;;  %v924_v21 = vld [vmem:[%s1238_s0 + $0x140] sm:$0xff] }
  0x10   :  { %v109_v52 = vmul.f32 %v852_v23, %v852_v23  ;;  %1263 = vst [vmem:[#allocation4_spill] sm:$0xff] %v901_v57  ;;  %1264 = vst [vmem:[#allocation5_spill] sm:$0xff] %v906_v58  ;;  %v158_v59 = vadd.f32 %v157_v38, %v91_v5  ;;  %v110_v60 = vmul.f32 %v863_v32, %v863_v32  ;;  %v929_v25 = vld [vmem:[%s1238_s0 + $0x148] sm:$0xff]  ;;  %v938_v31 = vld [vmem:[%s1238_s0 + $0x178] sm:$0xff] }
  0x11   :  { %v111_v4 = vmul.f32 %v868_v33, %v868_v33  ;;  %v104_v6 = vmul.f32 %v873_v36, %v873_v36  ;;  %1265 = vst [vmem:[#allocation6_spill] sm:$0xff] %v917_v9  ;;  %v173_v15 = vadd.f32 %v172_v46, %v103_v24  ;;  %v167_v16 = vadd.f32 %v166_v50, %v98_v41 }
  0x12   :  { %v181_v17 = vadd.f32 %v109_v52, %v108_v51  ;;  %v105_v5 = vmul.f32 %v882_v44, %v882_v44  ;;  %1266 = vst [vmem:[#allocation7_spill] sm:$0xff] %v924_v21  ;;  %1267 = vst [vmem:[#allocation8_spill] sm:$0xff] %v929_v25  ;;  %164 = vadd.xlane.f32.xlu1 %v163_v37  ;;  %v106_v29 = vmul.f32 %v887_v45, %v887_v45  ;;  %v947_v37 = vld [vmem:[%s1238_s0 + $0x150] sm:$0xff] }
  0x13   :  { %v107_v24 = vmul.f32 %v896_v53, %v896_v53  ;;  %1268 = vst [vmem:[#allocation9_spill] sm:$0xff] %v938_v31  ;;  %v116_v38 = vmul.f32 %v901_v57, %v901_v57  ;;  %v117_v41 = vmul.f32 %v906_v58, %v906_v58  ;;  %1269 = vst [vmem:[#allocation10_spill] sm:$0xff] %v947_v37  ;;  %159 = vadd.xlane.f32.xlu0 %v158_v59  ;;  %v954_v53 = vld [vmem:[%s1238_s0 + $0x1a0] sm:$0xff]  ;;  %v959_v58 = vld [vmem:[%s1238_s0 + $0x1a8] sm:$0xff] }
  0x14   :  { %v168_v46 = vadd.f32 %v167_v16, %v99_v43  ;;  %v182_v50 = vadd.f32 %v181_v17, %v110_v60  ;;  %v176_v51 = vadd.f32 %v105_v5, %v104_v6  ;;  %v118_v52 = vmul.f32 %v917_v9, %v917_v9  ;;  %1270 = vst [vmem:[#allocation11_spill] sm:$0xff] %v954_v53  ;;  %v964_v43 = vld [vmem:[%s1238_s0 + $0x158] sm:$0xff]  ;;  %v973_v6 = vld [vmem:[%s1238_s0 + $0x1b0] sm:$0xff]  ;;  %v978_v16 = vld [vmem:[%s1238_s0 + $0x180] sm:$0xff] }
  0x15   :  { %1271 = vst [vmem:[#allocation12_spill] sm:$0xff] %v959_v58  ;;  %v191_v57 = vadd.f32 %v117_v41, %v116_v38  ;;  %1272 = vst [vmem:[#allocation13_spill] sm:$0xff] %v964_v43  ;;  %v112_v59 = vmul.f32 %v924_v21, %v924_v21  ;;  %v113_v60 = vmul.f32 %v929_v25, %v929_v25  ;;  %v987_v25 = vld [vmem:[%s1238_s0 + $0x1b8] sm:$0xff]  ;;  %v992_v21 = vld [vmem:[%s1238_s0 + $0x188] sm:$0xff] }
  0x16   :  { %1273 = vst [vmem:[#allocation14_spill] sm:$0xff] %v973_v6  ;;  %1274 = vst [vmem:[#allocation15_spill] sm:$0xff] %v978_v16  ;;  %v183_v17 = vadd.f32 %v182_v50, %v111_v4  ;;  %v177_v5 = vadd.f32 %v176_v51, %v106_v29  ;;  %v119_v38 = vmul.f32 %v938_v31, %v938_v31  ;;  %174 = vadd.xlane.f32.xlu1 %v173_v15  ;;  %v1001_v51 = vld [vmem:[%s1238_s0 + $0x190] sm:$0xff] }
  0x17   :  { %v114_v41 = vmul.f32 %v947_v37, %v947_v37  ;;  %1275 = vst [vmem:[#allocation16_spill] sm:$0xff] %v987_v25  ;;  %1276 = vst [vmem:[#allocation17_spill] sm:$0xff] %v992_v21  ;;  %v192_v9 = vadd.f32 %v191_v57, %v118_v52  ;;  %v186_v4 = vadd.f32 %v113_v60, %v112_v59  ;;  %v1006_v37 = vld [vmem:[%s1238_s0 + $0x1e0] sm:$0xff]  ;;  %v1011_v57 = vld [vmem:[%s1238_s0 + $0x1e8] sm:$0xff]  ;;  %169 = vadd.xlane.f32.xlu0 %v168_v46 }
  0x18   :  { %v124_v29 = vmul.f32 %v954_v53, %v954_v53  ;;  %v125_v50 = vmul.f32 %v959_v58, %v959_v58  ;;  %1277 = vst [vmem:[#allocation18_spill] sm:$0xff] %v1001_v51  ;;  %1278 = vst [vmem:[#allocation19_spill] sm:$0xff] %v1006_v37  ;;  %v178_v15 = vadd.f32 %v177_v5, %v107_v24  ;;  %v1020_v60 = vld [vmem:[%s1238_s0 + $0x198] sm:$0xff]  ;;  %v1027_v53 = vld [vmem:[%s1238_s0 + $0x1f0] sm:$0xff] }
  0x19   :  { %1279 = vst [vmem:[#allocation20_spill] sm:$0xff] %v1011_v57  ;;  %v115_v52 = vmul.f32 %v964_v43, %v964_v43  ;;  %v126_v59 = vmul.f32 %v973_v6, %v973_v6  ;;  %v120_v58 = vmul.f32 %v978_v16, %v978_v16  ;;  %v187_v24 = vadd.f32 %v186_v4, %v114_v41  ;;  %v1036_v43 = vld [vmem:[%s1238_s0 + $0x1c0] sm:$0xff]  ;;  %v1041_v16 = vld [vmem:[%s1238_s0 + $0x1c8] sm:$0xff] }
  0x1a   :  { %v127_v46 = vmul.f32 %v987_v25, %v987_v25  ;;  %v201_v5 = vadd.f32 %v125_v50, %v124_v29  ;;  %v121_v6 = vmul.f32 %v992_v21, %v992_v21  ;;  %1280 = vst [vmem:[#allocation21_spill] sm:$0xff] %v1041_v16  ;;  %v193_v31 = vadd.f32 %v192_v9, %v119_v38  ;;  %v1052_v50 = vld [vmem:[%s1238_s0 + $0x1d0] sm:$0xff] }
  0x1b   :  { %v122_v41 = vmul.f32 %v1001_v51, %v1001_v51  ;;  %v132_v4 = vmul.f32 %v1006_v37, %v1006_v37  ;;  %v133_v29 = vmul.f32 %v1011_v57, %v1011_v57  ;;  %1281 = vst [vmem:[#allocation22_spill] sm:$0xff] %v1052_v50  ;;  %184 = vadd.xlane.f32.xlu1 %v183_v17  ;;  %v1061_v57 = vld [vmem:[%s1238_s0 + $0x1f8] sm:$0xff] }
  0x1c   :  { %v202_v21 = vadd.f32 %v201_v5, %v126_v59  ;;  %v123_v25 = vmul.f32 %v1020_v60, %v1020_v60  ;;  %v196_v9 = vadd.f32 %v121_v6, %v120_v58  ;;  %v134_v38 = vmul.f32 %v1027_v53, %v1027_v53  ;;  %179 = vadd.xlane.f32.xlu0 %v178_v15  ;;  %v1070_v58 = vld [vmem:[%s1238_s0 + $0x1d8] sm:$0xff] }
  0x1d   :  { %v188_v51 = vadd.f32 %v187_v24, %v115_v52  ;;  %v211_v37 = vadd.f32 %v133_v29, %v132_v4  ;;  %v128_v45 = vmul.f32 %v1036_v43, %v1036_v43  ;;  %v129_v17 = vmul.f32 %v1041_v16, %v1041_v16 }
  0x1e   :  { %v197_v59 = vadd.f32 %v196_v9, %v122_v41  ;;  %v130_v6 = vmul.f32 %v1052_v50, %v1052_v50  ;;  %v203_v52 = vadd.f32 %v202_v21, %v127_v46  ;;  %v135_v24 = vmul.f32 %v1061_v57, %v1061_v57 }
  0x1f   :  { %v206_v15 = vadd.f32 %v129_v17, %v128_v45  ;;  %194 = vadd.xlane.f32.xlu1 %v193_v31  ;;  %v212_v5 = vadd.f32 %v211_v37, %v134_v38  ;;  %v131_v41 = vmul.f32 %v1070_v58, %v1070_v58 }
  0x20   :  { %189 = vadd.xlane.f32.xlu0 %v188_v51  ;;  %v198_v4 = vadd.f32 %v197_v59, %v123_v25 }
  0x21   :  { %v207_v29 = vadd.f32 %v206_v15, %v130_v6  ;;  %v213_v9 = vadd.f32 %v212_v5, %v135_v24 }
  0x23   :  { %204 = vadd.xlane.f32.xlu1 %v203_v52  ;;  %v208_v16 = vadd.f32 %v207_v29, %v131_v41 }
  0x24   :  { %199 = vadd.xlane.f32.xlu0 %v198_v4 }
  0x27   :  { %214 = vadd.xlane.f32.xlu1 %v213_v9 }
  0x28   :  { %209 = vadd.xlane.f32.xlu0 %v208_v16 }
  0x97   :  { %v150_v50 = vpop.xlane.xlu1 %149 }
  0x98   :  { %588 = vrsqrt.f32 %v150_v50  ;;  %v140_v45 = vpop.xlane.xlu0 %139 }
  0x99   :  { %590 = vrsqrt.f32 %v140_v45 }
  0x9b   :  { %v155_v21 = vpop.xlane.xlu1 %154 }
  0x9c   :  { %592 = vrsqrt.f32 %v155_v21  ;;  %v145_v31 = vpop.xlane.xlu0 %144 }
  0x9d   :  { %594 = vrsqrt.f32 %v145_v31 }
  0x9f   :  { %v165_v37 = vpop.xlane.xlu1 %164 }
  0xa0   :  { %596 = vrsqrt.f32 %v165_v37  ;;  %v160_v25 = vpop.xlane.xlu0 %159 }
  0xa1   :  { %598 = vrsqrt.f32 %v160_v25 }
  0xa2   :  { %v589_v51 = vpop.eup %588 }
  0xa3   :  { %v591_v46 = vpop.eup %590  ;;  %v240_v38 = vmul.f32 %v589_v51, %v633_v0  ;;  %v241_v17 = vmul.f32 %v589_v51, %v638_v1  ;;  %v242_v16 = vmul.f32 %v589_v51, %v643_v2  ;;  %v243_v50 = vmul.f32 %v589_v51, %v648_v3  ;;  %v175_v59 = vpop.xlane.xlu1 %174 }
  0xa4   :  { %v232_v6 = vmul.f32 %v591_v46, %v659_v7  ;;  %v233_v15 = vmul.f32 %v591_v46, %v664_v8  ;;  %v234_v52 = vmul.f32 %v591_v46, %v671_v10  ;;  %v235_v24 = vmul.f32 %v591_v46, %v676_v11  ;;  %v170_v5 = vpop.xlane.xlu0 %169 }
  0xa5   :  { %v560_v4 = vpack.c.bf16 %v241_v17, %v240_v38  ;;  %v561_v41 = vpack.c.bf16 %v243_v50, %v242_v16  ;;  %600 = vrsqrt.f32 %v175_v59 }
  0xa6   :  { %v593_v0 = vpop.eup %592  ;;  %v556_v29 = vpack.c.bf16 %v233_v15, %v232_v6  ;;  %v557_v1 = vpack.c.bf16 %v235_v24, %v234_v52  ;;  %602 = vrsqrt.f32 %v170_v5 }
  0xa7   :  { %v595_v2 = vpop.eup %594  ;;  %492 = vst [vmem:[%s1239_s1 + $0x20] sm:$0xff] %v560_v4  ;;  %493 = vst [vmem:[%s1239_s1 + $0x28] sm:$0xff] %v561_v41  ;;  %v244_v3 = vmul.f32 %v593_v0, %v685_v14  ;;  %v245_v7 = vmul.f32 %v593_v0, %v694_v18  ;;  %v246_v8 = vmul.f32 %v593_v0, %v699_v19 }
  0xa8   :  { %v247_v10 = vmul.f32 %v593_v0, %v704_v20  ;;  %v185_v11 = vpop.xlane.xlu1 %184  ;;  %488 = vst [vmem:[%s1239_s1] sm:$0xff] %v556_v29  ;;  %489 = vst [vmem:[%s1239_s1 + $0x8] sm:$0xff] %v557_v1  ;;  %v236_v9 = vmul.f32 %v595_v2, %v717_v26  ;;  %v237_v45 = vmul.f32 %v595_v2, %v722_v27 }
  0xa9   :  { %v238_v14 = vmul.f32 %v595_v2, %v727_v28  ;;  %v239_v18 = vmul.f32 %v595_v2, %v732_v30  ;;  %v180_v19 = vpop.xlane.xlu0 %179  ;;  %v562_v21 = vpack.c.bf16 %v245_v7, %v244_v3  ;;  %604 = vrsqrt.f32 %v185_v11 }
  0xaa   :  { %v563_v20 = vpack.c.bf16 %v247_v10, %v246_v8  ;;  %v597_v31 = vpop.eup %596  ;;  %v558_v37 = vpack.c.bf16 %v237_v45, %v236_v9  ;;  %606 = vrsqrt.f32 %v180_v19  ;;  %v1285_v19 = vld [vmem:[#allocation5_spill] sm:$0xff] }
  0xab   :  { %v559_v25 = vpack.c.bf16 %v239_v18, %v238_v14  ;;  %v599_v51 = vpop.eup %598  ;;  %494 = vst [vmem:[%s1239_s1 + $0x30] sm:$0xff] %v562_v21  ;;  %v252_v26 = vmul.f32 %v597_v31, %v743_v34  ;;  %v253_v27 = vmul.f32 %v597_v31, %v748_v35  ;;  %v254_v28 = vmul.f32 %v597_v31, %v755_v39 }
  0xac   :  { %495 = vst [vmem:[%s1239_s1 + $0x38] sm:$0xff] %v563_v20  ;;  %v255_v30 = vmul.f32 %v597_v31, %v760_v40  ;;  %v195_v46 = vpop.xlane.xlu1 %194  ;;  %490 = vst [vmem:[%s1239_s1 + $0x10] sm:$0xff] %v558_v37  ;;  %v248_v38 = vmul.f32 %v599_v51, %v767_v42  ;;  %v249_v17 = vmul.f32 %v599_v51, %v776_v47  ;;  %v1286_v20 = vld [vmem:[#allocation6_spill] sm:$0xff]  ;;  %v1287_v37 = vld [vmem:[#allocation9_spill] sm:$0xff] }
  0xad   :  { %491 = vst [vmem:[%s1239_s1 + $0x18] sm:$0xff] %v559_v25  ;;  %v250_v34 = vmul.f32 %v599_v51, %v781_v48  ;;  %v251_v35 = vmul.f32 %v599_v51, %v786_v49  ;;  %v190_v39 = vpop.xlane.xlu0 %189  ;;  %v566_v16 = vpack.c.bf16 %v253_v27, %v252_v26  ;;  %608 = vrsqrt.f32 %v195_v46  ;;  %v1288_v51 = vld [vmem:[#allocation7_spill] sm:$0xff]  ;;  %v1289_v27 = vld [vmem:[#allocation8_spill] sm:$0xff] }
  0xae   :  { %v567_v40 = vpack.c.bf16 %v255_v30, %v254_v28  ;;  %v564_v50 = vpack.c.bf16 %v249_v17, %v248_v38  ;;  %610 = vrsqrt.f32 %v190_v39  ;;  %v1290_v30 = vld [vmem:[#allocation10_spill] sm:$0xff]  ;;  %v1291_v38 = vld [vmem:[#allocation13_spill] sm:$0xff] }
  0xaf   :  { %v565_v59 = vpack.c.bf16 %v251_v35, %v250_v34  ;;  %v601_v6 = vpop.eup %600  ;;  %498 = vst [vmem:[%s1239_s1 + $0x50] sm:$0xff] %v566_v16 }
  0xb0   :  { %499 = vst [vmem:[%s1239_s1 + $0x58] sm:$0xff] %v567_v40  ;;  %v205_v42 = vpop.xlane.xlu1 %204  ;;  %v603_v47 = vpop.eup %602  ;;  %496 = vst [vmem:[%s1239_s1 + $0x40] sm:$0xff] %v564_v50  ;;  %v260_v48 = vmul.f32 %v601_v6, %v795_v54  ;;  %v261_v49 = vmul.f32 %v601_v6, %v800_v55  ;;  %v262_v15 = vmul.f32 %v601_v6, %v805_v56 }
  0xb1   :  { %497 = vst [vmem:[%s1239_s1 + $0x48] sm:$0xff] %v565_v59  ;;  %v263_v52 = vmul.f32 %v601_v6, %v814_v61  ;;  %v200_v24 = vpop.xlane.xlu0 %199  ;;  %v256_v5 = vmul.f32 %v603_v47, %v819_v62  ;;  %v257_v4 = vmul.f32 %v603_v47, %v824_v63  ;;  %v258_v41 = vmul.f32 %v603_v47, %v835_v12  ;;  %v1292_v59 = vld [vmem:[#allocation11_spill] sm:$0xff] }
  0xb2   :  { %v259_v0 = vmul.f32 %v603_v47, %v840_v13  ;;  %v570_v29 = vpack.c.bf16 %v261_v49, %v260_v48  ;;  %612 = vrsqrt.f32 %v205_v42  ;;  %v1293_v42 = vld [vmem:[#allocation12_spill] sm:$0xff]  ;;  %v1294_v48 = vld [vmem:[#allocation14_spill] sm:$0xff] }
  0xb3   :  { %v571_v1 = vpack.c.bf16 %v263_v52, %v262_v15  ;;  %v605_v2 = vpop.eup %604  ;;  %v568_v54 = vpack.c.bf16 %v257_v4, %v256_v5  ;;  %614 = vrsqrt.f32 %v200_v24  ;;  %v1295_v15 = vld [vmem:[#allocation16_spill] sm:$0xff]  ;;  %v1296_v24 = vld [vmem:[#allocation15_spill] sm:$0xff]  ;;  %v1297_v4 = vld [vmem:[#allocation17_spill] sm:$0xff] }
  0xb4   :  { %v569_v3 = vpack.c.bf16 %v259_v0, %v258_v41  ;;  %v215_v55 = vpop.xlane.xlu1 %214  ;;  %v607_v56 = vpop.eup %606  ;;  %502 = vst [vmem:[%s1239_s1 + $0x70] sm:$0xff] %v570_v29  ;;  %v268_v61 = vmul.f32 %v605_v2, %v847_v22  ;;  %v269_v62 = vmul.f32 %v605_v2, %v852_v23  ;;  %v270_v63 = vmul.f32 %v605_v2, %v863_v32  ;;  %v1282_v22 = vld [vmem:[#allocation2_spill] sm:$0xff]  ;;  %v1283_v23 = vld [vmem:[#allocation3_spill] sm:$0xff] }
  0xb5   :  { %503 = vst [vmem:[%s1239_s1 + $0x78] sm:$0xff] %v571_v1  ;;  %v271_v12 = vmul.f32 %v605_v2, %v868_v33  ;;  %v210_v13 = vpop.xlane.xlu0 %209  ;;  %500 = vst [vmem:[%s1239_s1 + $0x60] sm:$0xff] %v568_v54  ;;  %v264_v7 = vmul.f32 %v607_v56, %v873_v36  ;;  %v265_v8 = vmul.f32 %v607_v56, %v882_v44  ;;  %616 = vrsqrt.f32 %v215_v55  ;;  %v1284_v36 = vld [vmem:[#allocation4_spill] sm:$0xff]  ;;  %v1298_v0 = vld [vmem:[#allocation18_spill] sm:$0xff] }
  0xb6   :  { %501 = vst [vmem:[%s1239_s1 + $0x68] sm:$0xff] %v569_v3  ;;  %v266_v10 = vmul.f32 %v607_v56, %v1282_v22  ;;  %v267_v11 = vmul.f32 %v607_v56, %v1283_v23  ;;  %v574_v32 = vpack.c.bf16 %v269_v62, %v268_v61  ;;  %618 = vrsqrt.f32 %v210_v13  ;;  %v1299_v62 = vld [vmem:[#allocation19_spill] sm:$0xff]  ;;  %v1301_v22 = vld [vmem:[#allocation21_spill] sm:$0xff]  ;;  %v1302_v23 = vld [vmem:[#allocation22_spill] sm:$0xff] }
  0xb7   :  { %v575_v9 = vpack.c.bf16 %v271_v12, %v270_v63  ;;  %v609_v33 = vpop.eup %608  ;;  %v572_v45 = vpack.c.bf16 %v265_v8, %v264_v7  ;;  %v1300_v12 = vld [vmem:[#allocation20_spill] sm:$0xff] }
  0xb8   :  { %v573_v14 = vpack.c.bf16 %v267_v11, %v266_v10  ;;  %v611_v18 = vpop.eup %610  ;;  %506 = vst [vmem:[%s1239_s1 + $0x90] sm:$0xff] %v574_v32  ;;  %v276_v44 = vmul.f32 %v609_v33, %v1284_v36  ;;  %v277_v21 = vmul.f32 %v609_v33, %v1285_v19  ;;  %v278_v31 = vmul.f32 %v609_v33, %v1286_v20 }
  0xb9   :  { %507 = vst [vmem:[%s1239_s1 + $0x98] sm:$0xff] %v575_v9  ;;  %v279_v25 = vmul.f32 %v609_v33, %v1287_v37  ;;  %504 = vst [vmem:[%s1239_s1 + $0x80] sm:$0xff] %v572_v45  ;;  %v272_v26 = vmul.f32 %v611_v18, %v1288_v51  ;;  %v273_v28 = vmul.f32 %v611_v18, %v1289_v27 }
  0xba   :  { %505 = vst [vmem:[%s1239_s1 + $0x88] sm:$0xff] %v573_v14  ;;  %v274_v46 = vmul.f32 %v611_v18, %v1290_v30  ;;  %v275_v17 = vmul.f32 %v611_v18, %v1291_v38  ;;  %v578_v34 = vpack.c.bf16 %v277_v21, %v276_v44 }
  0xbb   :  { %v579_v35 = vpack.c.bf16 %v279_v25, %v278_v31  ;;  %v576_v39 = vpack.c.bf16 %v273_v28, %v272_v26 }
  0xbc   :  { %v577_v16 = vpack.c.bf16 %v275_v17, %v274_v46  ;;  %v613_v40 = vpop.eup %612  ;;  %510 = vst [vmem:[%s1239_s1 + $0xb0] sm:$0xff] %v578_v34 }
  0xbd   :  { %511 = vst [vmem:[%s1239_s1 + $0xb8] sm:$0xff] %v579_v35  ;;  %v615_v50 = vpop.eup %614  ;;  %508 = vst [vmem:[%s1239_s1 + $0xa0] sm:$0xff] %v576_v39  ;;  %v284_v6 = vmul.f32 %v613_v40, %v1292_v59  ;;  %v285_v47 = vmul.f32 %v613_v40, %v1293_v42  ;;  %v286_v49 = vmul.f32 %v613_v40, %v1294_v48 }
  0xbe   :  { %509 = vst [vmem:[%s1239_s1 + $0xa8] sm:$0xff] %v577_v16  ;;  %v287_v52 = vmul.f32 %v613_v40, %v1295_v15  ;;  %v280_v5 = vmul.f32 %v615_v50, %v1296_v24  ;;  %v281_v41 = vmul.f32 %v615_v50, %v1297_v4  ;;  %v282_v29 = vmul.f32 %v615_v50, %v1298_v0 }
  0xbf   :  { %v283_v1 = vmul.f32 %v615_v50, %v1020_v60  ;;  %v582_v2 = vpack.c.bf16 %v285_v47, %v284_v6  ;;  %v617_v3 = vpop.eup %616 }
  0xc0   :  { %v583_v54 = vpack.c.bf16 %v287_v52, %v286_v49  ;;  %v580_v55 = vpack.c.bf16 %v281_v41, %v280_v5  ;;  %v619_v61 = vpop.eup %618  ;;  %v292_v63 = vmul.f32 %v617_v3, %v1299_v62  ;;  %v293_v13 = vmul.f32 %v617_v3, %v1300_v12 }
  0xc1   :  { %v581_v56 = vpack.c.bf16 %v283_v1, %v282_v29  ;;  %514 = vst [vmem:[%s1239_s1 + $0xd0] sm:$0xff] %v582_v2  ;;  %v294_v60 = vmul.f32 %v617_v3, %v1027_v53  ;;  %v295_v7 = vmul.f32 %v617_v3, %v1061_v57  ;;  %v288_v8 = vmul.f32 %v619_v61, %v1036_v43 }
  0xc2   :  { %515 = vst [vmem:[%s1239_s1 + $0xd8] sm:$0xff] %v583_v54  ;;  %512 = vst [vmem:[%s1239_s1 + $0xc0] sm:$0xff] %v580_v55  ;;  %v289_v10 = vmul.f32 %v619_v61, %v1301_v22  ;;  %v290_v11 = vmul.f32 %v619_v61, %v1302_v23  ;;  %v291_v32 = vmul.f32 %v619_v61, %v1070_v58 }
  0xc3   :  { %513 = vst [vmem:[%s1239_s1 + $0xc8] sm:$0xff] %v581_v56  ;;  %v586_v9 = vpack.c.bf16 %v293_v13, %v292_v63  ;;  %v587_v53 = vpack.c.bf16 %v295_v7, %v294_v60 }
  0xc4   :  { %v584_v33 = vpack.c.bf16 %v289_v10, %v288_v8  ;;  %v585_v57 = vpack.c.bf16 %v291_v32, %v290_v11 }
  0xc5   :  { %518 = vst [vmem:[%s1239_s1 + $0xf0] sm:$0xff] %v586_v9  ;;  %519 = vst [vmem:[%s1239_s1 + $0xf8] sm:$0xff] %v587_v53 }
  0xc6   :  { %516 = vst [vmem:[%s1239_s1 + $0xe0] sm:$0xff] %v584_v33  ;;  %517 = vst [vmem:[%s1239_s1 + $0xe8] sm:$0xff] %v585_v57 }

// kernel: class_incremental_clip_forward.14
= control target key start
LH: loop header
LB: loop body
LE: loop exit
PB: predicated region body
PF: predicated region fallthrough
CT: control target
= control target key end

     0   :  { %s2097_s25 = smov 0   ;;  %s2436_s0 = inlined_call_operand.vmem [shape: bf16[2,5,64], index: 0, kind: input, shape index: {}]   ;;  %s2437_s1 = inlined_call_operand.vmem [shape: f32[1,64], index: 1, kind: input, shape index: {}, may-alias: {1,3}]   ;;  %s2438_s2 = inlined_call_operand.vmem [shape: f32[1,64], index: 2, kind: input, shape index: {}, may-alias: {2,4,8,12}]   ;;  %s2439_s3 = inlined_call_operand.vmem [shape: f32[1,64], index: 3, kind: input, shape index: {}, may-alias: {1,3}]   ;;  %s2440_s4 = inlined_call_operand.vmem [shape: f32[1,64], index: 4, kind: input, shape index: {}, may-alias: {2,4,8,12}]   ;;  %s2441_s5 = inlined_call_operand.vmem [shape: bf16[192,64], index: 5, kind: input, shape index: {}]   ;;  %s2442_s6 = inlined_call_operand.vmem [shape: f32[1,192], index: 6, kind: input, shape index: {}]   ;;  %s2443_s7 = inlined_call_operand.vmem [shape: bf16[64,64], index: 7, kind: input, shape index: {}]   ;;  %s2444_s8 = inlined_call_operand.vmem [shape: f32[1,64], index: 8, kind: input, shape index: {}, may-alias: {2,4,8,12}]   ;;  %s2445_s9 = inlined_call_operand.vmem [shape: bf16[256,64], index: 9, kind: input, shape index: {}]   ;;  %s2446_s10 = inlined_call_operand.vmem [shape: f32[1,256], index: 10, kind: input, shape index: {}]   ;;  %s2447_s11 = inlined_call_operand.vmem [shape: bf16[64,256], index: 11, kind: input, shape index: {}]   ;;  %s2448_s12 = inlined_call_operand.vmem [shape: f32[1,64], index: 12, kind: input, shape index: {}, may-alias: {2,4,8,12}]   ;;  %s2449_s13 = inlined_call_operand.vmem [shape: bf16[2,5,64], index: 13, kind: output, shape index: {}]  }
   0x1 LB: > { %s1732_s26 = sadd.s32 4294967295, %s2014_s25   ;;  %p1736_p0 = scmp.ge.s32.totalorder %s2014_s25, 1  ;;  %s2014_s25 = sphi %s2097_s25, %s23_s25  }
   0x2   : > { %p386_p1 = scmp.lt.s32.totalorder %s2014_s25, 3 }
   0x4   : > { %p387_p2 = pnand %p1736_p0, %p386_p1 }
   0x5   : > { %p428_p3 = scmp.lt.s32.totalorder (!%p387_p2), %s1732_s26, 1  ;;  %vm443_vm0 = vcmask (!%p387_p2), 520192   ;;  %v1936_v3 = vld [vmem:[%s2441_s5] sm:$0xff] (!%p387_p2)   ;;  %vm569_vm1 = vcmask (!%p387_p2), 523264   ;;  %v2016_v4 = vmov (!%p387_p2), 0   ;;  %v1937_v6 = vld [vmem:[%s2441_s5 + $0x8] sm:$0xff] (!%p387_p2)   ;;  %v499_v43 = vlaneseq (!%p387_p2) }
   0x6   : > { %390 = sbr.rel (%p387_p2) target bundleno = 2590 (0xa1e), region = 72  ;;  %609 = vmatprep.subr.bf16.mxu0 (!%p387_p2), %v2016_v4  ;;  %641 = vmatprep.mubr.bf16.mxu0 (!%p387_p2), %v2016_v4  ;;  %v574_v5 = vsel (!%p387_p2), %vm569_vm1, %v1936_v3, 0  ;;  %v577_v7 = vsel (!%p387_p2), %vm569_vm1, %v1937_v6, 0  ;;  %v1938_v8 = vld [vmem:[%s2441_s5 + $0x10] sm:$0xff] (!%p387_p2)   ;;  %v1939_v10 = vld [vmem:[%s2441_s5 + $0x18] sm:$0xff] (!%p387_p2)   ;;  %v1940_v12 = vld [vmem:[%s2441_s5 + $0x20] sm:$0xff] (!%p387_p2)  }
   0x7   : > { %610 = vmatpush1.bf16.xpose.msra.mxu0 (!%p387_p2), %v574_v5  ;;  %v580_v9 = vsel (!%p387_p2), %vm569_vm1, %v1938_v8, 0  ;;  %v583_v11 = vsel (!%p387_p2), %vm569_vm1, %v1939_v10, 0  ;;  %v586_v13 = vsel (!%p387_p2), %vm569_vm1, %v1940_v12, 0  ;;  %v1941_v14 = vld [vmem:[%s2441_s5 + $0x28] sm:$0xff] (!%p387_p2)   ;;  %v1942_v16 = vld [vmem:[%s2441_s5 + $0x30] sm:$0xff] (!%p387_p2)   ;;  %v1943_v18 = vld [vmem:[%s2441_s5 + $0x38] sm:$0xff] (!%p387_p2)  }
   0x8   : > { %611 = vmatprep.subr.bf16.mxu0 (!%p387_p2), %v2016_v4  ;;  %v589_v15 = vsel (!%p387_p2), %vm569_vm1, %v1941_v14, 0  ;;  %v592_v17 = vsel (!%p387_p2), %vm569_vm1, %v1942_v16, 0  ;;  %v595_v19 = vsel (!%p387_p2), %vm569_vm1, %v1943_v18, 0  ;;  %v1944_v20 = vld [vmem:[%s2441_s5 + $0x40] sm:$0xff] (!%p387_p2)   ;;  %v1945_v27 = vld [vmem:[%s2441_s5 + $0x48] sm:$0xff] (!%p387_p2)   ;;  %v1946_v29 = vld [vmem:[%s2441_s5 + $0x50] sm:$0xff] (!%p387_p2)  }
   0x9   : > { %v598_v21 = vsel (!%p387_p2), %vm569_vm1, %v1944_v20, 0  ;;  %v601_v28 = vsel (!%p387_p2), %vm569_vm1, %v1945_v27, 0  ;;  %v604_v30 = vsel (!%p387_p2), %vm569_vm1, %v1946_v29, 0  ;;  %v1947_v31 = vld [vmem:[%s2441_s5 + $0x58] sm:$0xff] (!%p387_p2)   ;;  %v1739_v37 = vld [vmem:[%s2437_s1] ss:$0 sm:$0xff] (!%p387_p2) }
   0xa   : > { %v607_v32 = vsel (!%p387_p2), %vm569_vm1, %v1947_v31, 0  ;;  %v1740_v39 = vld [vmem:[%s2438_s2] ss:$0 sm:$0xff] (!%p387_p2)  ;;  %v2174_v44 = vshrl.u32 (!%p387_p2), %v499_v43, 7  ;;  %vm652_vm2 = vcmask (!%p387_p2), 124928   ;;  %v2017_v53 = vmov (!%p387_p2), 0.0  }
   0xb   : > { %v497_v46 = vld [vmem:[%s2442_s6] sm:$0x3] (!%p387_p2)  ;;  %vm653_vm3 = vsmask.f32 (!%p387_p2), 2304  ;;  %1849 = vmatprep.subr.bf16.mxu1 (!%p387_p2), %v2017_v53  ;;  %s2018_s16 = smov (!%p387_p2), 112   ;;  %s2019_s17 = smov (!%p387_p2), 64  }
   0xc   : > { %v501_v45 = vsub.s32 (!%p387_p2), 0, %v2174_v44  ;;  %v505_v47 = vsub.s32 (!%p387_p2), 1, %v2174_v44  ;;  %vm2187_vm4 = vmand (!%p387_p2), %vm652_vm2, %vm653_vm3  ;;  %v655_v55 = vld [vmem:[#allocation2] sm:$0x7] (!%p387_p2)  ;;  %vm2020_vm5 = vmmov (!%p387_p2), 0   ;;  %s2021_s18 = smov (!%p387_p2), 48  }
   0xd   : > { %s2453_s26 = smov (!%p428_p3, %s1732_s26), 1  ;;  %v669_v59 = vld [vmem:[#allocation2 + $0x20] sm:$0x7]  ;;  %1851 = vmatprep.mubr.msk.bf16.mxu1 %vm2020_vm5, %v2017_v53  ;;  %s2022_s19 = smov 32   ;;  %v707_v10 = vld [vmem:[#allocation2 + $0x18] sm:$0x7] }
   0xe   : > { %s1737_s27 = sshll.u32 %s2453_s26, 2  ;;  %v502_v48 = vrot.slane %v497_v46, %v501_v45  ;;  %v506_v49 = vrot.slane %v497_v46, %v505_v47  ;;  %s2023_s20 = smov 96   ;;  %vm750_vm6 = vcmask 130048   ;;  %v728_v18 = vld [vmem:[#allocation2 + $0x1c] sm:$0x7]  ;;  %vm992_vm7 = vcmask 1041408  }
   0xf   : > { %s431_s30 = scalar_lea.vmem %s2436_s0, %s1737_s27  ;;  %612 = vmatpush1.bf16.xpose.msra.mxu0 %v577_v7  ;;  %s2024_s21 = smov 16   ;;  %v683_v7 = vld [vmem:[#allocation2 + $0x14] sm:$0x7]  ;;  %vm993_vm8 = vcmask 1042432   ;;  %vm939_vm9 = vcmask 36864   ;;  %vm988_vm10 = vcmask 39936  }
  0x10   : > { %v439_v0 = vld [vmem:[%s431_s30] sm:$0x7]  ;;  %613 = vmatprep.subr.bf16.mxu0 %v2016_v4  ;;  %s2025_s22 = smov 80   ;;  %vm1188_vm11 = vcmask 256128   ;;  %vm1200_vm13 = vcmask 387328   ;;  %vm1212_vm15 = vcmask 518528  }
  0x11   : > { %v2113_v1 = vunpack.c.l.bf16 %v439_v0  ;;  %v676_v0 = vld [vmem:[#allocation2 + $0x4] sm:$0x7]  ;;  %vm1189_vm12 = vmand %vm1188_vm11, %vm653_vm3 }
  0x12   : > { %vm1201_vm14 = vmand %vm1200_vm13, %vm653_vm3 }
  0x13   : > { %v444_v2 = vsel %vm443_vm0, %v2113_v1, 0.0  ;;  %vm1213_vm2 = vmand %vm1212_vm15, %vm653_vm3 }
  0x14   : > { %445 = vadd.xlane.f32.xlu0 %v444_v2  ;;  %v665_v2 = vld [vmem:[#allocation2 + $0x10] sm:$0x7] }
  0x17   : > { %614 = vmatpush1.bf16.xpose.msra.mxu0 %v580_v9 }
  0x18   : > { %615 = vmatprep.subr.bf16.mxu0 %v2016_v4 }
  0x1f   : > { %616 = vmatpush1.bf16.xpose.msra.mxu0 %v583_v11 }
  0x20   : > { %617 = vmatprep.subr.bf16.mxu0 %v2016_v4 }
  0x27   : > { %618 = vmatpush1.bf16.xpose.msra.mxu0 %v586_v13 }
  0x28   : > { %619 = vmatprep.subr.bf16.mxu0 %v2016_v4 }
  0x2f   : > { %620 = vmatpush1.bf16.xpose.msra.mxu0 %v589_v15  ;;  %v700_v15 = vld [vmem:[#allocation2 + $0x8] sm:$0x7] }
  0x30   : > { %621 = vmatprep.subr.bf16.mxu0 %v2016_v4 }
  0x37   : > { %622 = vmatpush1.bf16.xpose.msra.mxu0 %v592_v17 }
  0x38   : > { %623 = vmatprep.subr.bf16.mxu0 %v2016_v4 }
  0x3f   : > { %624 = vmatpush1.bf16.xpose.msra.mxu0 %v595_v19 }
  0x40   : > { %625 = vmatprep.subr.bf16.mxu0 %v2016_v4 }
  0x47   : > { %626 = vmatpush1.bf16.xpose.msra.mxu0 %v598_v21 }
  0x48   : > { %627 = vmatprep.subr.bf16.mxu0 %v2016_v4 }
  0x4f   : > { %628 = vmatpush1.bf16.xpose.msra.mxu0 %v601_v28 }
  0x50   : > { %629 = vmatprep.subr.bf16.mxu0 %v2016_v4 }
  0x57   : > { %630 = vmatpush1.bf16.xpose.msra.mxu0 %v604_v30 }
  0x58   : > { %631 = vmatprep.subr.bf16.mxu0 %v2016_v4 }
  0x5f   : > { %632 = vmatpush1.bf16.xpose.msra.mxu0 %v607_v32 }
  0xa1   : > { %v446_v22 = vpop.xlane.xlu0 %445 }
  0xa2   : > { %v448_v23 = vmul.f32 0.015625, %v446_v22 }
  0xa4   : > { %v449_v24 = vsub.f32 %v2113_v1, %v448_v23 }
  0xa6   : > { %v450_v25 = vmul.f32 %v449_v24, %v449_v24 }
  0xa8   : > { %v451_v26 = vsel %vm443_vm0, %v450_v25, 0.0 }
  0xa9   : > { %452 = vadd.xlane.f32.xlu0 %v451_v26 }
 0x136   : > { %v453_v33 = vpop.xlane.xlu0 %452 }
 0x137   : > { %v454_v34 = vmul.f32 0.015625, %v453_v33  ;;  %v2026_v33 = vmov 65535  }
 0x139   : > { %v455_v35 = vadd.f32 1e-05, %v454_v34  ;;  %v994_v34 = vsel %vm992_vm7, 4294967295, %v2026_v33 }
 0x13b   : > { %1980 = vrsqrt.f32 %v455_v35 }
 0x145   : > { %v1981_v36 = vpop.eup %1980 }
 0x146   : > { %v457_v38 = vmul.f32 %v1981_v36, %v449_v24  ;;  %v721_v24 = vld [vmem:[#allocation2 + $0xc] sm:$0x7]  ;;  %v2237_v36 = vsel %vm993_vm8, %v994_v34, 0 }
 0x147   : > { %v735_v34 = vld [vmem:[#allocation2 + $0x2c] sm:$0x7] }
 0x148   : > { %v464_v40 = vmul.f32 %v1739_v37, %v457_v38 }
 0x14a   : > { %v471_v41 = vadd.f32 %v1740_v39, %v464_v40 }
 0x14c   : > { %v496_v42 = vpack.c.bf16 %v471_v41, %v471_v41 }
 0x14e   : > { %1753 = vmatmul.mubr.msk.bf16.vlgmr.msra.gmra.mrb[0].mxu0 %vm569_vm1, %v496_v42 }
 0x221   : > { %v643_v50 = vpop.f32.mrb[0].mxu0 }
 0x222   : > { %v644_v51 = vadd.f32 %v643_v50, %v502_v48  ;;  %v645_v52 = vpop.f32.mrb[1].mxu0 }
 0x223   : > { %v646_v56 = vadd.f32 %v645_v52, %v506_v49  ;;  %v647_v57 = vpop.f32.mrb[2].mxu0 }
 0x224   : > { %v650_v58 = vpack.c.bf16 %v644_v51, %v644_v51  ;;  %v648_v60 = vpop.f32.mrb[3].mxu0 }
 0x225   : > { %v2191_v61 = vpack.c.bf16 %v646_v56, %v646_v56 }
 0x226   : > { %v656_v62 = vsel %vm2187_vm4, %v650_v58, %v655_v55  ;;  %672 = vrot.lane.b32.xlu0 %v650_v58, %s2018_s16  ;;  %661 = vrot.lane.b32.xlu1 %v650_v58, %s2019_s17 }
 0x227   : > { %657 = vst [vmem:[#allocation2] sm:$0x7] %v656_v62  ;;  %v670_v63 = vsel %vm2187_vm4, %v2191_v61, %v669_v59 }
 0x228   : > { %671 = vst [vmem:[#allocation2 + $0x20] sm:$0x7] %v670_v63 }
 0x22a   : > { %679 = vrot.lane.b32.xlu1 %v650_v58, %s2021_s18 }
 0x22e   : > { %703 = vrot.lane.b32.xlu1 %v650_v58, %s2022_s19  ;;  %v738_v22 = vld [vmem:[#allocation2] sm:$0x7] }
 0x22f   : > { %v746_v35 = vld [vmem:[#allocation2 + $0x20] sm:$0x7] }
 0x230   : > { %v997_v38 = vand.u32 %v2237_v36, %v746_v35 }
 0x232   : > { %696 = vrot.lane.b32.xlu1 %v650_v58, %s2023_s20 }
 0x236   : > { %724 = vrot.lane.b32.xlu1 %v650_v58, %s2024_s21 }
 0x23a   : > { %717 = vrot.lane.b32.xlu1 %v650_v58, %s2025_s22 }
 0x298   : > { %v673_v3 = vpop.permute.xlu0 %672  ;;  %v662_v4 = vpop.permute.xlu1 %661 }
 0x299   : > { %v677_v5 = vsel %vm2187_vm4, %v673_v3, %v676_v0  ;;  %v666_v6 = vsel %vm2187_vm4, %v662_v4, %v665_v2 }
 0x29a   : > { %678 = vst [vmem:[#allocation2 + $0x4] sm:$0x7] %v677_v5  ;;  %667 = vst [vmem:[#allocation2 + $0x10] sm:$0x7] %v666_v6 }
 0x29c   : > { %v680_v8 = vpop.permute.xlu1 %679 }
 0x29d   : > { %v684_v9 = vsel %vm2187_vm4, %v680_v8, %v683_v7 }
 0x29e   : > { %685 = vst [vmem:[#allocation2 + $0x14] sm:$0x7] %v684_v9 }
 0x2a0   : > { %v704_v11 = vpop.permute.xlu1 %703 }
 0x2a1   : > { %v708_v12 = vsel %vm2187_vm4, %v704_v11, %v707_v10  ;;  %v742_v13 = vld [vmem:[#allocation2 + $0x10] sm:$0x7]  ;;  %v739_v28 = vld [vmem:[#allocation2 + $0x4] sm:$0x7] }
 0x2a2   : > { %709 = vst [vmem:[#allocation2 + $0x18] sm:$0x7] %v708_v12  ;;  %v755_v14 = vsel %vm750_vm6, %v742_v13, 0 }
 0x2a3   : > { %1850 = vmatpush3.bf16.xpose.msra.mxu1 %v755_v14 }
 0x2a4   : > { %v697_v16 = vpop.permute.xlu1 %696  ;;  %1855 = vmatprep.subr.bf16.mxu1 %v2017_v53 }
 0x2a5   : > { %v701_v17 = vsel %vm2187_vm4, %v697_v16, %v700_v15  ;;  %v743_v19 = vld [vmem:[#allocation2 + $0x14] sm:$0x7] }
 0x2a6   : > { %702 = vst [vmem:[#allocation2 + $0x8] sm:$0x7] %v701_v17  ;;  %v801_v23 = vsel %vm750_vm6, %v743_v19, 0 }
 0x2a8   : > { %v725_v20 = vpop.permute.xlu1 %724 }
 0x2a9   : > { %v729_v21 = vsel %vm2187_vm4, %v725_v20, %v728_v18  ;;  %v744_v27 = vld [vmem:[#allocation2 + $0x18] sm:$0x7] }
 0x2aa   : > { %730 = vst [vmem:[#allocation2 + $0x1c] sm:$0x7] %v729_v21  ;;  %1852 = vmatmul.mubr.msk.bf16.vlgmr.msra.gmra.mrb[0].mxu1 %vm750_vm6, %v738_v22  ;;  %v847_v29 = vsel %vm750_vm6, %v744_v27, 0 }
 0x2ab   : > { %1856 = vmatpush3.bf16.xpose.msra.mxu1 %v801_v23  ;;  %1857 = vmatprep.mubr.msk.bf16.mxu1 %vm2020_vm5, %v2017_v53 }
 0x2ac   : > { %v718_v25 = vpop.permute.xlu1 %717  ;;  %1861 = vmatprep.subr.bf16.mxu1 %v2017_v53 }
 0x2ad   : > { %v722_v26 = vsel %vm2187_vm4, %v718_v25, %v721_v24  ;;  %v740_v31 = vld [vmem:[#allocation2 + $0x8] sm:$0x7] }
 0x2ae   : > { %723 = vst [vmem:[#allocation2 + $0xc] sm:$0x7] %v722_v26 }
 0x2b1   : > { %v745_v30 = vld [vmem:[#allocation2 + $0x1c] sm:$0x7] }
 0x2b2   : > { %1858 = vmatmul.mubr.msk.bf16.vlgmr.msra.gmra.mrb[4].mxu1 %vm750_vm6, %v739_v28  ;;  %v893_v32 = vsel %vm750_vm6, %v745_v30, 0  ;;  %v693_v28 = vld [vmem:[#allocation2 + $0x24] sm:$0x7] }
 0x2b3   : > { %1862 = vmatpush3.bf16.xpose.msra.mxu1 %v847_v29  ;;  %1863 = vmatprep.mubr.msk.bf16.mxu1 %vm2020_vm5, %v2017_v53 }
 0x2b4   : > { %1867 = vmatprep.subr.bf16.mxu1 %v2017_v53 }
 0x2b5   : > { %v741_v37 = vld [vmem:[#allocation2 + $0xc] sm:$0x7] }
 0x2ba   : > { %1864 = vmatmul.mubr.msk.bf16.vlgmr.msra.gmra.mrb[8].mxu1 %vm750_vm6, %v740_v31 }
 0x2bb   : > { %1868 = vmatpush3.bf16.xpose.msra.mxu1 %v893_v32  ;;  %1869 = vmatprep.mubr.msk.bf16.mxu1 %vm2020_vm5, %v2017_v53 }
 0x2bc   : > { %1873 = vmatprep.subr.bf16.mxu1 %v2017_v53 }
 0x2c2   : > { %1870 = vmatmul.mubr.msk.bf16.vlgmr.msra.gmra.mrb[12].mxu1 %vm750_vm6, %v741_v37 }
 0x2c3   : > { %1874 = vmatpush3.bf16.msra.mxu1 %v997_v38  ;;  %1875 = vmatprep.mubr.msk.bf16.mxu1 %vm2020_vm5, %v2017_v53 }
 0x2c4   : > { %1879 = vmatprep.subr.bf16.mxu1 %v2017_v53 }
 0x37d   : > { %v791_v39 = vpop.f32.mrb[0].mxu1 }
 0x37e   : > { %v935_v40 = vmul.f32 0.25, %v791_v39  ;;  %v1853_v41 = vpop.f32.mrb[1].mxu1 }
 0x37f   : > { %v794_v42 = vpop.f32.mrb[2].mxu1 }
 0x380   : > { %v1854_v43 = vpop.f32.mrb[3].mxu1  ;;  %v940_v46 = vsel %vm939_vm9, %v935_v40, -inf }
 0x381   : > { %941 = vmax.xlane.f32.xlu1 %v940_v46  ;;  %v714_v46 = vld [vmem:[#allocation2 + $0x28] sm:$0x7] }
 0x385   : > { %v837_v48 = vpop.f32.mrb[4].mxu1 }
 0x386   : > { %v936_v49 = vmul.f32 0.25, %v837_v48  ;;  %v1859_v50 = vpop.f32.mrb[5].mxu1 }
 0x387   : > { %v840_v51 = vpop.f32.mrb[6].mxu1 }
 0x388   : > { %v1860_v52 = vpop.f32.mrb[7].mxu1  ;;  %v943_v55 = vsel %vm939_vm9, %v936_v49, -inf }
 0x389   : > { %944 = vmax.xlane.f32.xlu0 %v943_v55 }
 0x38d   : > { %v883_v56 = vpop.f32.mrb[8].mxu1 }
 0x38e   : > { %v937_v57 = vmul.f32 0.25, %v883_v56  ;;  %v1865_v58 = vpop.f32.mrb[9].mxu1 }
 0x38f   : > { %v886_v59 = vpop.f32.mrb[10].mxu1 }
 0x390   : > { %v1866_v60 = vpop.f32.mrb[11].mxu1  ;;  %v946_v62 = vsel %vm939_vm9, %v937_v57, -inf }
 0x391   : > { %947 = vmax.xlane.f32.xlu1 %v946_v62 }
 0x395   : > { %v929_v63 = vpop.f32.mrb[12].mxu1 }
 0x396   : > { %v938_v0 = vmul.f32 0.25, %v929_v63  ;;  %v1871_v2 = vpop.f32.mrb[13].mxu1 }
 0x397   : > { %v932_v3 = vpop.f32.mrb[14].mxu1 }
 0x398   : > { %v1872_v4 = vpop.f32.mrb[15].mxu1  ;;  %v949_v5 = vsel %vm939_vm9, %v938_v0, -inf }
 0x399   : > { %950 = vmax.xlane.f32.xlu0 %v949_v5 }
 0x40e   : > { %v942_v6 = vpop.xlane.xlu1 %941 }
 0x40f   : > { %v952_v7 = vsub.f32 %v935_v40, %v942_v6 }
 0x411   : > { %v956_v8 = vmul.f32 1.442695, %v952_v7 }
 0x413   : > { %1982 = vpow2.f32 %v956_v8  ;;  %v1949_v8 = vld [vmem:[%s2443_s7 + $0x8] sm:$0xff]  }
 0x416   : > { %v945_v9 = vpop.xlane.xlu0 %944 }
 0x417   : > { %v953_v10 = vsub.f32 %v936_v49, %v945_v9  ;;  %v1253_v9 = vsel %vm569_vm1, %v1949_v8, 0 }
 0x419   : > { %v958_v11 = vmul.f32 1.442695, %v953_v10 }
 0x41b   : > { %1984 = vpow2.f32 %v958_v11 }
 0x41d   : > { %v1983_v12 = vpop.eup %1982 }
 0x41e   : > { %v948_v13 = vpop.xlane.xlu1 %947  ;;  %v964_v14 = vsel %vm939_vm9, %v1983_v12, 0.0 }
 0x41f   : > { %v954_v15 = vsub.f32 %v937_v57, %v948_v13  ;;  %965 = vadd.xlane.f32.xlu1 %v964_v14  ;;  %v1950_v14 = vld [vmem:[%s2443_s7 + $0x10] sm:$0xff]  }
 0x421   : > { %v960_v16 = vmul.f32 1.442695, %v954_v15  ;;  %v1256_v15 = vsel %vm569_vm1, %v1950_v14, 0 }
 0x423   : > { %1986 = vpow2.f32 %v960_v16  ;;  %v1951_v16 = vld [vmem:[%s2443_s7 + $0x18] sm:$0xff]  }
 0x425   : > { %v1985_v17 = vpop.eup %1984 }
 0x426   : > { %v951_v18 = vpop.xlane.xlu0 %950  ;;  %v967_v19 = vsel %vm939_vm9, %v1985_v17, 0.0 }
 0x427   : > { %v955_v20 = vsub.f32 %v938_v0, %v951_v18  ;;  %968 = vadd.xlane.f32.xlu0 %v967_v19  ;;  %v1178_v0 = vld [vmem:[#allocation3] sm:$0x7]  ;;  %v1259_v18 = vsel %vm569_vm1, %v1951_v16, 0 }
 0x429   : > { %v962_v21 = vmul.f32 1.442695, %v955_v20 }
 0x42b   : > { %1988 = vpow2.f32 %v962_v21 }
 0x42d   : > { %v1987_v22 = vpop.eup %1986 }
 0x42e   : > { %v970_v23 = vsel %vm939_vm9, %v1987_v22, 0.0 }
 0x42f   : > { %971 = vadd.xlane.f32.xlu1 %v970_v23 }
 0x435   : > { %v1989_v24 = vpop.eup %1988 }
 0x436   : > { %v973_v25 = vsel %vm939_vm9, %v1989_v24, 0.0 }
 0x437   : > { %974 = vadd.xlane.f32.xlu1 %v973_v25 }
 0x43d   : > { %689 = vrot.lane.b32.xlu0 %v2191_v61, %s2018_s16 }
 0x441   : > { %731 = vrot.lane.b32.xlu0 %v2191_v61, %s2025_s22 }
 0x448   : > { %710 = vrot.lane.b32.xlu1 %v2191_v61, %s2023_s20 }
 0x4ac   : > { %v966_v26 = vpop.xlane.xlu1 %965 }
 0x4ad   : > { %1990 = vrcp.f32 %v966_v26 }
 0x4b4   : > { %v969_v27 = vpop.xlane.xlu0 %968 }
 0x4b5   : > { %1992 = vrcp.f32 %v969_v27 }
 0x4b7   : > { %v1991_v29 = vpop.eup %1990 }
 0x4b8   : > { %v980_v30 = vmul.f32 %v1991_v29, %v1983_v12  ;;  %v690_v31 = vpop.permute.xlu0 %689 }
 0x4b9   : > { %v694_v32 = vsel %vm2187_vm4, %v690_v31, %v693_v28 }
 0x4ba   : > { %695 = vst [vmem:[#allocation2 + $0x24] sm:$0x7] %v694_v32  ;;  %v984_v33 = vpack.c.bf16 %v980_v30, %v980_v30 }
 0x4bc   : > { %1876 = vmatmul.mubr.msk.bf16.vlgmr.msra.gmra.mrb[16].mxu1 %vm988_vm10, %v984_v33  ;;  %v732_v35 = vpop.permute.xlu0 %731  ;;  %v972_v38 = vpop.xlane.xlu1 %971 }
 0x4bd   : > { %v736_v61 = vsel %vm2187_vm4, %v732_v35, %v735_v34  ;;  %1881 = vmatprep.mubr.msk.bf16.mxu1 %vm2020_vm5, %v2017_v53  ;;  %1994 = vrcp.f32 %v972_v38  ;;  %v1772_v38 = vld [vmem:[%s2444_s8] ss:$0 sm:$0xff] }
 0x4be   : > { %737 = vst [vmem:[#allocation2 + $0x2c] sm:$0x7] %v736_v61 }
 0x4bf   : > { %v1993_v37 = vpop.eup %1992 }
 0x4c0   : > { %v981_v39 = vmul.f32 %v1993_v37, %v1985_v17 }
 0x4c1   : > { %v747_v40 = vld [vmem:[#allocation2 + $0x24] sm:$0x7] }
 0x4c2   : > { %v1043_v41 = vand.u32 %v2237_v36, %v747_v40  ;;  %v985_v43 = vpack.c.bf16 %v981_v39, %v981_v39 }
 0x4c4   : > { %v975_v42 = vpop.xlane.xlu1 %974  ;;  %1880 = vmatpush3.bf16.msra.mxu1 %v1043_v41 }
 0x4c5   : > { %1885 = vmatprep.subr.bf16.mxu1 %v2017_v53  ;;  %1996 = vrcp.f32 %v975_v42  ;;  %v749_v56 = vld [vmem:[#allocation2 + $0x2c] sm:$0x7] }
 0x4c6   : > { %v1135_v59 = vand.u32 %v2237_v36, %v749_v56  ;;  %v1957_v56 = vld [vmem:[%s2445_s9 + $0x10] sm:$0xff]  }
 0x4c7   : > { %1882 = vmatmul.mubr.msk.bf16.vlgmr.msra.gmra.mrb[20].mxu1 %vm988_vm10, %v985_v43  ;;  %v1995_v50 = vpop.eup %1994 }
 0x4c8   : > { %v711_v48 = vpop.permute.xlu1 %710  ;;  %1887 = vmatprep.mubr.msk.bf16.mxu1 %vm2020_vm5, %v2017_v53  ;;  %v982_v51 = vmul.f32 %v1995_v50, %v1987_v22 }
 0x4c9   : > { %v715_v49 = vsel %vm2187_vm4, %v711_v48, %v714_v46  ;;  %v1952_v48 = vld [vmem:[%s2445_s9 + $0x40] sm:$0xff]  }
 0x4ca   : > { %716 = vst [vmem:[#allocation2 + $0x28] sm:$0x7] %v715_v49  ;;  %v986_v57 = vpack.c.bf16 %v982_v51, %v982_v51  ;;  %v1953_v49 = vld [vmem:[%s2445_s9] sm:$0xff]   ;;  %1909 = vmatprep.subr.msk.bf16.mxu0 %vm569_vm1, %v1952_v48  ;;  %v1955_v51 = vld [vmem:[%s2445_s9 + $0x8] sm:$0xff]  }
 0x4cb   : > { %v1468_v50 = vsel %vm569_vm1, %v1953_v49, 0 }
 0x4cc   : > { %1832 = vmatpush3.bf16.xpose.msra.mxu0 %v1468_v50 }
 0x4cf   : > { %v1997_v58 = vpop.eup %1996 }
 0x4d0   : > { %v983_v60 = vmul.f32 %v1997_v58, %v1989_v24  ;;  %v1958_v58 = vld [vmem:[%s2445_s9 + $0x58] sm:$0xff]  }
 0x4d1   : > { %v748_v52 = vld [vmem:[#allocation2 + $0x28] sm:$0x7] }
 0x4d2   : > { %v1089_v55 = vand.u32 %v2237_v36, %v748_v52  ;;  %v987_v62 = vpack.c.bf16 %v983_v60, %v983_v60  ;;  %v1948_v36 = vld [vmem:[%s2443_s7] sm:$0xff]   ;;  %v1471_v52 = vsel %vm569_vm1, %v1955_v51, 0 }
 0x4d3   : > { %v1250_v7 = vsel %vm569_vm1, %v1948_v36, 0 }
 0x4d4   : > { %1886 = vmatpush3.bf16.msra.mxu1 %v1089_v55  ;;  %v1956_v55 = vld [vmem:[%s2445_s9 + $0x50] sm:$0xff]  }
 0x4d5   : > { %1891 = vmatprep.subr.bf16.mxu1 %v2017_v53 }
 0x4d7   : > { %1888 = vmatmul.mubr.msk.bf16.vlgmr.msra.gmra.mrb[24].mxu1 %vm988_vm10, %v986_v57  ;;  %v1474_v57 = vsel %vm569_vm1, %v1957_v56, 0 }
 0x4d8   : > { %1892 = vmatpush3.bf16.msra.mxu1 %v1135_v59  ;;  %1893 = vmatprep.mubr.msk.bf16.mxu1 %vm2020_vm5, %v2017_v53  ;;  %v1959_v59 = vld [vmem:[%s2445_s9 + $0x18] sm:$0xff]  }
 0x4d9   : > { %1897 = vmatprep.subr.bf16.mxu1 %v2017_v53  ;;  %v1477_v60 = vsel %vm569_vm1, %v1959_v59, 0  ;;  %v1802_v59 = vld [vmem:[%s2448_s12] ss:$0 sm:$0xff] }
 0x4df   : > { %1894 = vmatmul.mubr.msk.bf16.vlgmr.msra.gmra.mrb[28].mxu1 %vm988_vm10, %v987_v62  ;;  %v1960_v62 = vld [vmem:[%s2445_s9 + $0x60] sm:$0xff]  }
 0x4e0   : > { %1905 = vmatprep.mubr.msk.bf16.mxu1 %vm2020_vm5, %v2017_v53 }
 0x4e1   : > { %1898 = vmatpush3.bf16.xpose.msra.mxu1 %v1250_v7  ;;  %v1963_v7 = vld [vmem:[%s2445_s9 + $0x28] sm:$0xff]  }
 0x4e2   : > { %1899 = vmatprep.subr.bf16.mxu1 %v2017_v53  ;;  %v1483_v8 = vsel %vm569_vm1, %v1963_v7, 0 }
 0x4e9   : > { %1900 = vmatpush3.bf16.xpose.msra.mxu1 %v1253_v9  ;;  %v1964_v9 = vld [vmem:[%s2445_s9 + $0x70] sm:$0xff]  }
 0x4ea   : > { %1901 = vmatprep.subr.bf16.mxu1 %v2017_v53 }
 0x4f1   : > { %1902 = vmatpush3.bf16.xpose.msra.mxu1 %v1256_v15 }
 0x4f2   : > { %1903 = vmatprep.subr.bf16.mxu1 %v2017_v53 }
 0x4f9   : > { %1904 = vmatpush3.bf16.xpose.msra.mxu1 %v1259_v18  ;;  %v1773_v18 = vld [vmem:[%s2439_s3] ss:$0 sm:$0xff] }
 0x58f   : > { %v1033_v63 = vpop.f32.mrb[16].mxu1 }
 0x590   : > { %v1177_v2 = vpack.c.bf16 %v1033_v63, %v1033_v63  ;;  %v1877_v3 = vpop.f32.mrb[17].mxu1  ;;  %v1961_v63 = vld [vmem:[%s2445_s9 + $0x20] sm:$0xff]  }
 0x591   : > { %v1036_v4 = vpop.f32.mrb[18].mxu1 }
 0x592   : > { %v1179_v5 = vsel %vm2187_vm4, %v1177_v2, %v1178_v0  ;;  %v1878_v6 = vpop.f32.mrb[19].mxu1  ;;  %v1480_v0 = vsel %vm569_vm1, %v1961_v63, 0 }
 0x593   : > { %1180 = vst [vmem:[#allocation3] sm:$0x7] %v1179_v5  ;;  %v1962_v6 = vld [vmem:[%s2445_s9 + $0x68] sm:$0xff]  }
 0x59a   : > { %v1079_v10 = vpop.f32.mrb[20].mxu1  ;;  %v1190_v27 = vld [vmem:[#allocation3] sm:$0x7] }
 0x59b   : > { %v1807_v11 = vpack.c.bf16 %v1079_v10, %v1079_v10  ;;  %v1883_v12 = vpop.f32.mrb[21].mxu1  ;;  %v1965_v10 = vld [vmem:[%s2445_s9 + $0x30] sm:$0xff]  }
 0x59c   : > { %v1082_v13 = vpop.f32.mrb[22].mxu1  ;;  %v1966_v12 = vld [vmem:[%s2445_s9 + $0x78] sm:$0xff]  }
 0x59d   : > { %1185 = vrot.lane.b32.xlu1 %v1807_v11, %s2024_s21  ;;  %v1884_v54 = vpop.f32.mrb[23].mxu1  ;;  %v1486_v11 = vsel %vm569_vm1, %v1965_v10, 0  ;;  %v1967_v13 = vld [vmem:[%s2445_s9 + $0x38] sm:$0xff]   ;;  %s435_s21 = scalar_lea.vmem %s2449_s13, %s1737_s27 }
 0x59e   : > { %v1489_v54 = vsel %vm569_vm1, %v1967_v13, 0 }
 0x5aa   : > { %v1125_v17 = vpop.f32.mrb[24].mxu1 }
 0x5ab   : > { %v1808_v19 = vpack.c.bf16 %v1125_v17, %v1125_v17  ;;  %v1889_v20 = vpop.f32.mrb[25].mxu1 }
 0x5ac   : > { %v1128_v21 = vpop.f32.mrb[26].mxu1  ;;  %v1774_v20 = vld [vmem:[%s2440_s4] ss:$0 sm:$0xff] }
 0x5ad   : > { %1197 = vrot.lane.b32.xlu0 %v1808_v19, %s2022_s19  ;;  %v1890_v22 = vpop.f32.mrb[27].mxu1 }
 0x5b2   : > { %v1171_v23 = vpop.f32.mrb[28].mxu1 }
 0x5b3   : > { %v1809_v24 = vpack.c.bf16 %v1171_v23, %v1171_v23  ;;  %v1895_v25 = vpop.f32.mrb[29].mxu1 }
 0x5b4   : > { %v1174_v26 = vpop.f32.mrb[30].mxu1  ;;  %v1968_v25 = vld [vmem:[%s2447_s11] ss:$8 sps:$4 sm:$0xff]  }
 0x5b5   : > { %1209 = vrot.lane.b32.xlu1 %v1809_v24, %s2021_s18  ;;  %v1896_v53 = vpop.f32.mrb[31].mxu1  ;;  %v1970_v24 = vld [vmem:[%s2447_s11 + $0x4] ss:$8 sps:$4 sm:$0xff]   ;;  %v1973_v26 = vld [vmem:[%s2447_s11 + $0x14] ss:$8 sps:$4 sm:$0xff]  }
 0x5b6   : > { %1624 = vmatprep.subr.bf16.mxu1 %v1970_v24  ;;  %v1971_v53 = vld [vmem:[%s2447_s11 + $0x10] ss:$8 sps:$4 sm:$0xff]  }
 0x60f   : > { %v1186_v28 = vpop.permute.xlu1 %1185 }
 0x610   : > { %v1191_v29 = vsel %vm1189_vm12, %v1186_v28, %v1190_v27  ;;  %v1976_v27 = vld [vmem:[%s2447_s11 + $0x24] ss:$8 sps:$4 sm:$0xff]   ;;  %v1974_v28 = vld [vmem:[%s2447_s11 + $0x20] ss:$8 sps:$4 sm:$0xff]  }
 0x611   : > { %1192 = vst [vmem:[#allocation3] sm:$0x7] %v1191_v29  ;;  %v1979_v29 = vld [vmem:[%s2447_s11 + $0x34] ss:$8 sps:$4 sm:$0xff]  }
 0x618   : > { %v1202_v30 = vld [vmem:[#allocation3] sm:$0x7] }
 0x61f   : > { %v1198_v31 = vpop.permute.xlu0 %1197 }
 0x620   : > { %v1203_v32 = vsel %vm1201_vm14, %v1198_v31, %v1202_v30  ;;  %v1977_v30 = vld [vmem:[%s2447_s11 + $0x30] ss:$8 sps:$4 sm:$0xff]   ;;  %v1372_v31 = vld [vmem:[%s2446_s10] sm:$0x3] }
 0x621   : > { %1204 = vst [vmem:[#allocation3] sm:$0x7] %v1203_v32  ;;  %v1377_v32 = vrot.slane %v1372_v31, %v501_v45 }
 0x627   : > { %v1210_v33 = vpop.permute.xlu1 %1209 }
 0x628   : > { %v1214_v34 = vld [vmem:[#allocation3] sm:$0x7] }
 0x629   : > { %v1215_v35 = vsel %vm1213_vm2, %v1210_v33, %v1214_v34  ;;  %v1381_v33 = vrot.slane %v1372_v31, %v505_v47 }
 0x62a   : > { %1216 = vst [vmem:[#allocation3] sm:$0x7] %v1215_v35 }
 0x631   : > { %v1217_v61 = vld [vmem:[#allocation3] sm:$0x7] }
 0x632   : > { %1906 = vmatmul.mubr.msk.bf16.vlgmr.msra.gmra.mrb[32].mxu1 %vm569_vm1, %v1217_v61 }
 0x633   : > { %1625 = vmatpush1.bf16.xpose.msra.mxu1 %v1968_v25 }
 0x634   : > { %1626 = vmatprep.subr.bf16.mxu1 %v1973_v26 }
 0x63b   : > { %1627 = vmatpush1.bf16.xpose.msra.mxu1 %v1971_v53 }
 0x63c   : > { %1628 = vmatprep.subr.bf16.mxu1 %v1976_v27 }
 0x643   : > { %1629 = vmatpush1.bf16.xpose.msra.mxu1 %v1974_v28 }
 0x644   : > { %1630 = vmatprep.subr.bf16.mxu1 %v1979_v29 }
 0x64b   : > { %1631 = vmatpush1.bf16.xpose.msra.mxu1 %v1977_v30 }
 0x705   : > { %v1295_v37 = vpop.f32.mrb[32].mxu1 }
 0x706   : > { %v1301_v39 = vadd.f32 %v1295_v37, %v2113_v1  ;;  %v1907_v40 = vpop.f32.mrb[33].mxu1  ;;  %v1954_v1 = vld [vmem:[%s2445_s9 + $0x48] sm:$0xff]  }
 0x707   : > { %v1298_v41 = vpop.f32.mrb[34].mxu1  ;;  %1910 = vmatprep.subr.msk.bf16.mxu0 %vm569_vm1, %v1954_v1 }
 0x708   : > { %v2314_v42 = vadd.f32 %v1772_v38, %v1301_v39  ;;  %v1908_v43 = vpop.f32.mrb[35].mxu1  ;;  %1834 = vmatpush3.bf16.xpose.msra.mxu0 %v1471_v52 }
 0x709   : > { %1911 = vmatprep.subr.msk.bf16.mxu0 %vm569_vm1, %v1956_v55 }
 0x70a   : > { %v1312_v46 = vsel %vm443_vm0, %v2314_v42, 0.0 }
 0x70b   : > { %1313 = vadd.xlane.f32.xlu0 %v1312_v46 }
 0x710   : > { %1836 = vmatpush3.bf16.xpose.msra.mxu0 %v1474_v57 }
 0x711   : > { %1912 = vmatprep.subr.msk.bf16.mxu0 %vm569_vm1, %v1958_v58 }
 0x718   : > { %1838 = vmatpush3.bf16.xpose.msra.mxu0 %v1477_v60 }
 0x719   : > { %1913 = vmatprep.subr.msk.bf16.mxu0 %vm569_vm1, %v1960_v62 }
 0x720   : > { %1840 = vmatpush3.bf16.xpose.msra.mxu0 %v1480_v0 }
 0x721   : > { %1914 = vmatprep.subr.msk.bf16.mxu0 %vm569_vm1, %v1962_v6 }
 0x728   : > { %1842 = vmatpush3.bf16.xpose.msra.mxu0 %v1483_v8 }
 0x729   : > { %1915 = vmatprep.subr.msk.bf16.mxu0 %vm569_vm1, %v1964_v9 }
 0x730   : > { %1844 = vmatpush3.bf16.xpose.msra.mxu0 %v1486_v11 }
 0x731   : > { %1916 = vmatprep.subr.msk.bf16.mxu0 %vm569_vm1, %v1966_v12 }
 0x738   : > { %1846 = vmatpush3.bf16.xpose.msra.mxu0 %v1489_v54 }
 0x798   : > { %v1314_v2 = vpop.xlane.xlu0 %1313 }
 0x799   : > { %v1315_v3 = vmul.f32 0.015625, %v1314_v2 }
 0x79b   : > { %v1316_v36 = vsub.f32 %v2314_v42, %v1315_v3  ;;  %v1676_v3 = vld [vmem:[%s435_s21] sm:$0x7] }
 0x79d   : > { %v1317_v4 = vmul.f32 %v1316_v36, %v1316_v36 }
 0x79f   : > { %v1318_v5 = vsel %vm443_vm0, %v1317_v4, 0.0  ;;  %vm1674_vm0 = vcmask 518144  }
 0x7a0   : > { %1319 = vadd.xlane.f32.xlu1 %v1318_v5 }
 0x82d   : > { %v1320_v14 = vpop.xlane.xlu1 %1319 }
 0x82e   : > { %v1321_v15 = vmul.f32 0.015625, %v1320_v14 }
 0x830   : > { %v1322_v16 = vadd.f32 1e-05, %v1321_v15 }
 0x832   : > { %1998 = vrsqrt.f32 %v1322_v16 }
 0x83c   : > { %v1999_v17 = vpop.eup %1998 }
 0x83d   : > { %v1324_v19 = vmul.f32 %v1999_v17, %v1316_v36 }
 0x83f   : > { %v1331_v21 = vmul.f32 %v1773_v18, %v1324_v19 }
 0x841   : > { %v1338_v22 = vadd.f32 %v1774_v20, %v1331_v21 }
 0x843   : > { %v1371_v23 = vpack.c.bf16 %v1338_v22, %v1338_v22 }
 0x845   : > { %1847 = vmatprep.mubr.msk.bf16.mxu0 %vm569_vm1, %v1371_v23 }
 0x846   : > { %1848 = vmatmul.mubr.msk.bf16.vlgmr.msra.gmra.mrb[4].mxu0 %vm569_vm1, %v1371_v23  ;;  %vm1675_vm1 = vmand %vm1674_vm0, %vm653_vm3 }
 0x919   : > { %v1549_v34 = vpop.f32.mrb[4].mxu0 }
 0x91a   : > { %v1550_v35 = vadd.f32 %v1549_v34, %v1377_v32  ;;  %v1551_v61 = vpop.f32.mrb[5].mxu0 }
 0x91b   : > { %v1552_v37 = vadd.f32 %v1551_v61, %v1381_v33  ;;  %v1553_v38 = vpop.f32.mrb[6].mxu0 }
 0x91c   : > { %v1556_v39 = vpack.c.bf16 %v1550_v35, %v1550_v35  ;;  %v1554_v40 = vpop.f32.mrb[7].mxu0 }
 0x91d   : > { %v1557_v41 = vpack.c.bf16 %v1552_v37, %v1552_v37 }
 0x91e   : > { %v1792_v43 = vmul.bf16 3218784218, %v1556_v39 }
 0x91f   : > { %v1793_v46 = vmul.bf16 3218784218, %v1557_v41 }
 0x920   : > { %v1563_v48 = vmul.bf16 1069105081, %v1792_v43 }
 0x921   : > { %v1566_v49 = vmul.bf16 1069105081, %v1793_v46 }
 0x922   : > { %2000 = vpow.bf16 %v1563_v48 }
 0x923   : > { %2002 = vpow.bf16 %v1566_v49 }
 0x92d   : > { %v2001_v1 = vpop.eup %2000 }
 0x92e   : > { %v2003_v45 = vpop.eup %2002  ;;  %v1568_v50 = vadd.bf16 1065369472, %v2001_v1 }
 0x92f   : > { %v1569_v44 = vadd.bf16 1065369472, %v2003_v45 }
 0x930   : > { %2004 = vrcp.bf16 %v1568_v50 }
 0x931   : > { %2006 = vrcp.bf16 %v1569_v44 }
 0x93b   : > { %v2005_v47 = vpop.eup %2004 }
 0x93c   : > { %v2007_v51 = vpop.eup %2006  ;;  %v1571_v52 = vmul.bf16 1065369472, %v2005_v47 }
 0x93d   : > { %v1573_v55 = vmul.bf16 1065369472, %v2007_v51 }
 0x93e   : > { %v1574_v57 = vmul.bf16 %v1571_v52, %v1556_v39 }
 0x93f   : > { %v1575_v56 = vmul.bf16 %v1573_v55, %v1557_v41 }
 0x941   : > { %1656 = vmatprep.mubr.bf16.mxu1 %v1575_v56 }
 0x942   : > { %1657 = vmatmul.mubr.bf16.vlgmr.msra.gmra.mrb[36].mxu1 %v1574_v57 }
 0xa15   : > { %v1658_v58 = vpop.f32.mrb[36].mxu1 }
 0xa16   : > { %v1664_v60 = vadd.f32 %v1658_v58, %v2314_v42  ;;  %v1660_v62 = vpop.f32.mrb[37].mxu1 }
 0xa17   : > { %v1661_v63 = vpop.f32.mrb[38].mxu1 }
 0xa18   : > { %v1672_v0 = vadd.f32 %v1802_v59, %v1664_v60  ;;  %v1662_v2 = vpop.f32.mrb[39].mxu1 }
 0xa1a   : > { %v1673_v36 = vpack.c.bf16 %v1672_v0, %v1672_v0 }
 0xa1c   : > { %v1677_v4 = vsel %vm1675_vm1, %v1673_v36, %v1676_v3 }
 0xa1d   : > { %1678 = vst [vmem:[%s435_s21] sm:$0x7] %v1677_v4 }
 0xa1e PF: > { %s23_s25 = sadd.s32 1, %s2014_s25  }
 0xa1f   : > { %p20_p4 = scmp.ge.s32.totalorder %s23_s25, 4  }
 0xa21   :  { %22 = sbr.rel (!%p20_p4) target bundleno = 1 (0x1), region = 113 }

// kernel: class_incremental_clip_forward.13
= control target key start
LH: loop header
LB: loop body
LE: loop exit
PB: predicated region body
PF: predicated region fallthrough
CT: control target
= control target key end

     0   :  { %s2096_s25 = smov 0   ;;  %s2432_s0 = inlined_call_operand.vmem [shape: f32[2,5,64], index: 0, kind: input, shape index: {}]   ;;  %s2433_s1 = inlined_call_operand.vmem [shape: f32[1,64], index: 1, kind: input, shape index: {}, may-alias: {1,3}]   ;;  %s2434_s2 = inlined_call_operand.vmem [shape: f32[1,64], index: 2, kind: input, shape index: {}, may-alias: {2,4,8,12}]   ;;  %s2435_s3 = inlined_call_operand.vmem [shape: f32[1,64], index: 3, kind: input, shape index: {}, may-alias: {1,3}]   ;;  %s2436_s4 = inlined_call_operand.vmem [shape: f32[1,64], index: 4, kind: input, shape index: {}, may-alias: {2,4,8,12}]   ;;  %s2437_s5 = inlined_call_operand.vmem [shape: bf16[192,64], index: 5, kind: input, shape index: {}]   ;;  %s2438_s6 = inlined_call_operand.vmem [shape: f32[1,192], index: 6, kind: input, shape index: {}]   ;;  %s2439_s7 = inlined_call_operand.vmem [shape: bf16[64,64], index: 7, kind: input, shape index: {}]   ;;  %s2440_s8 = inlined_call_operand.vmem [shape: f32[1,64], index: 8, kind: input, shape index: {}, may-alias: {2,4,8,12}]   ;;  %s2441_s9 = inlined_call_operand.vmem [shape: bf16[256,64], index: 9, kind: input, shape index: {}]   ;;  %s2442_s10 = inlined_call_operand.vmem [shape: f32[1,256], index: 10, kind: input, shape index: {}]   ;;  %s2443_s11 = inlined_call_operand.vmem [shape: bf16[64,256], index: 11, kind: input, shape index: {}]   ;;  %s2444_s12 = inlined_call_operand.vmem [shape: f32[1,64], index: 12, kind: input, shape index: {}, may-alias: {2,4,8,12}]   ;;  %s2445_s13 = inlined_call_operand.vmem [shape: bf16[2,5,64], index: 13, kind: output, shape index: {}]  }
   0x1 LB: > { %s1731_s26 = sadd.s32 4294967295, %s2013_s25   ;;  %p1735_p0 = scmp.ge.s32.totalorder %s2013_s25, 1  ;;  %s2013_s25 = sphi %s2096_s25, %s23_s25  }
   0x2   : > { %p386_p1 = scmp.lt.s32.totalorder %s2013_s25, 3 }
   0x4   : > { %p387_p2 = pnand %p1735_p0, %p386_p1 }
   0x5   : > { %p428_p3 = scmp.lt.s32.totalorder (!%p387_p2), %s1731_s26, 1  ;;  %vm442_vm0 = vcmask (!%p387_p2), 520192   ;;  %v1935_v2 = vld [vmem:[%s2437_s5] sm:$0xff] (!%p387_p2)   ;;  %vm568_vm1 = vcmask (!%p387_p2), 523264   ;;  %v2015_v3 = vmov (!%p387_p2), 0   ;;  %v1936_v5 = vld [vmem:[%s2437_s5 + $0x8] sm:$0xff] (!%p387_p2)   ;;  %v498_v42 = vlaneseq (!%p387_p2) }
   0x6   : > { %390 = sbr.rel (%p387_p2) target bundleno = 2588 (0xa1c), region = 72  ;;  %608 = vmatprep.subr.bf16.mxu0 (!%p387_p2), %v2015_v3  ;;  %640 = vmatprep.mubr.bf16.mxu0 (!%p387_p2), %v2015_v3  ;;  %v573_v4 = vsel (!%p387_p2), %vm568_vm1, %v1935_v2, 0  ;;  %v576_v6 = vsel (!%p387_p2), %vm568_vm1, %v1936_v5, 0  ;;  %v1937_v7 = vld [vmem:[%s2437_s5 + $0x10] sm:$0xff] (!%p387_p2)   ;;  %v1938_v9 = vld [vmem:[%s2437_s5 + $0x18] sm:$0xff] (!%p387_p2)   ;;  %v1939_v11 = vld [vmem:[%s2437_s5 + $0x20] sm:$0xff] (!%p387_p2)  }
   0x7   : > { %609 = vmatpush1.bf16.xpose.msra.mxu0 (!%p387_p2), %v573_v4  ;;  %v579_v8 = vsel (!%p387_p2), %vm568_vm1, %v1937_v7, 0  ;;  %v582_v10 = vsel (!%p387_p2), %vm568_vm1, %v1938_v9, 0  ;;  %v585_v12 = vsel (!%p387_p2), %vm568_vm1, %v1939_v11, 0  ;;  %v1940_v13 = vld [vmem:[%s2437_s5 + $0x28] sm:$0xff] (!%p387_p2)   ;;  %v1941_v15 = vld [vmem:[%s2437_s5 + $0x30] sm:$0xff] (!%p387_p2)   ;;  %v1942_v17 = vld [vmem:[%s2437_s5 + $0x38] sm:$0xff] (!%p387_p2)  }
   0x8   : > { %610 = vmatprep.subr.bf16.mxu0 (!%p387_p2), %v2015_v3  ;;  %v588_v14 = vsel (!%p387_p2), %vm568_vm1, %v1940_v13, 0  ;;  %v591_v16 = vsel (!%p387_p2), %vm568_vm1, %v1941_v15, 0  ;;  %v594_v18 = vsel (!%p387_p2), %vm568_vm1, %v1942_v17, 0  ;;  %v1943_v19 = vld [vmem:[%s2437_s5 + $0x40] sm:$0xff] (!%p387_p2)   ;;  %v1944_v26 = vld [vmem:[%s2437_s5 + $0x48] sm:$0xff] (!%p387_p2)   ;;  %v1945_v28 = vld [vmem:[%s2437_s5 + $0x50] sm:$0xff] (!%p387_p2)  }
   0x9   : > { %v597_v20 = vsel (!%p387_p2), %vm568_vm1, %v1943_v19, 0  ;;  %v600_v27 = vsel (!%p387_p2), %vm568_vm1, %v1944_v26, 0  ;;  %v603_v29 = vsel (!%p387_p2), %vm568_vm1, %v1945_v28, 0  ;;  %v1946_v30 = vld [vmem:[%s2437_s5 + $0x58] sm:$0xff] (!%p387_p2)   ;;  %v1738_v36 = vld [vmem:[%s2433_s1] ss:$0 sm:$0xff] (!%p387_p2) }
   0xa   : > { %v606_v31 = vsel (!%p387_p2), %vm568_vm1, %v1946_v30, 0  ;;  %v1739_v38 = vld [vmem:[%s2434_s2] ss:$0 sm:$0xff] (!%p387_p2)  ;;  %v2171_v43 = vshrl.u32 (!%p387_p2), %v498_v42, 7  ;;  %vm651_vm2 = vcmask (!%p387_p2), 124928   ;;  %v2016_v52 = vmov (!%p387_p2), 0.0  }
   0xb   : > { %v496_v45 = vld [vmem:[%s2438_s6] sm:$0x3] (!%p387_p2)  ;;  %vm652_vm3 = vsmask.f32 (!%p387_p2), 2304  ;;  %1848 = vmatprep.subr.bf16.mxu1 (!%p387_p2), %v2016_v52  ;;  %s2017_s14 = smov (!%p387_p2), 112   ;;  %s2018_s15 = smov (!%p387_p2), 64  }
   0xc   : > { %v500_v44 = vsub.s32 (!%p387_p2), 0, %v2171_v43  ;;  %v504_v46 = vsub.s32 (!%p387_p2), 1, %v2171_v43  ;;  %vm2184_vm4 = vmand (!%p387_p2), %vm651_vm2, %vm652_vm3  ;;  %v654_v54 = vld [vmem:[#allocation2] sm:$0x7] (!%p387_p2)  ;;  %vm2019_vm5 = vmmov (!%p387_p2), 0   ;;  %s2020_s16 = smov (!%p387_p2), 48  }
   0xd   : > { %s2449_s26 = smov (!%p428_p3, %s1731_s26), 1  ;;  %v668_v58 = vld [vmem:[#allocation2 + $0x20] sm:$0x7]  ;;  %1850 = vmatprep.mubr.msk.bf16.mxu1 %vm2019_vm5, %v2016_v52  ;;  %s2021_s17 = smov 32   ;;  %v675_v63 = vld [vmem:[#allocation2 + $0x4] sm:$0x7] }
   0xe   : > { %s1736_s27 = sshll.u32 %s2449_s26, 3  ;;  %v501_v47 = vrot.slane %v496_v45, %v500_v44  ;;  %v505_v48 = vrot.slane %v496_v45, %v504_v46  ;;  %s2022_s18 = smov 96   ;;  %v706_v9 = vld [vmem:[#allocation2 + $0x18] sm:$0x7]  ;;  %vm749_vm6 = vcmask 130048   ;;  %vm991_vm7 = vcmask 1041408  }
   0xf   : > { %s431_s30 = scalar_lea.vmem %s2432_s0, %s1736_s27  ;;  %611 = vmatpush1.bf16.xpose.msra.mxu0 %v576_v6  ;;  %s2023_s19 = smov 16   ;;  %v682_v6 = vld [vmem:[#allocation2 + $0x14] sm:$0x7]  ;;  %v727_v17 = vld [vmem:[#allocation2 + $0x1c] sm:$0x7]  ;;  %vm992_vm8 = vcmask 1042432  }
  0x10   : > { %v2110_v0 = vld [vmem:[%s431_s30] sm:$0x1f]  ;;  %612 = vmatprep.subr.bf16.mxu0 %v2015_v3  ;;  %s2024_s20 = smov 80   ;;  %vm938_vm9 = vcmask 36864   ;;  %vm987_vm10 = vcmask 39936   ;;  %vm1187_vm11 = vcmask 256128  }
  0x11   : > { %v443_v1 = vsel %vm442_vm0, %v2110_v0, 0.0  ;;  %vm1188_vm12 = vmand %vm1187_vm11, %vm652_vm3  ;;  %vm1199_vm13 = vcmask 387328   ;;  %vm1211_vm15 = vcmask 518528   ;;  %s1737_s27 = sshll.u32 %s2449_s26, 2 }
  0x12   : > { %444 = vadd.xlane.f32.xlu0 %v443_v1  ;;  %v664_v1 = vld [vmem:[#allocation2 + $0x10] sm:$0x7]  ;;  %vm1200_vm14 = vmand %vm1199_vm13, %vm652_vm3 }
  0x13   : > { %vm1212_vm2 = vmand %vm1211_vm15, %vm652_vm3 }
  0x17   : > { %613 = vmatpush1.bf16.xpose.msra.mxu0 %v579_v8 }
  0x18   : > { %614 = vmatprep.subr.bf16.mxu0 %v2015_v3 }
  0x1f   : > { %615 = vmatpush1.bf16.xpose.msra.mxu0 %v582_v10 }
  0x20   : > { %616 = vmatprep.subr.bf16.mxu0 %v2015_v3 }
  0x27   : > { %617 = vmatpush1.bf16.xpose.msra.mxu0 %v585_v12 }
  0x28   : > { %618 = vmatprep.subr.bf16.mxu0 %v2015_v3 }
  0x2f   : > { %619 = vmatpush1.bf16.xpose.msra.mxu0 %v588_v14  ;;  %v699_v14 = vld [vmem:[#allocation2 + $0x8] sm:$0x7] }
  0x30   : > { %620 = vmatprep.subr.bf16.mxu0 %v2015_v3 }
  0x37   : > { %621 = vmatpush1.bf16.xpose.msra.mxu0 %v591_v16 }
  0x38   : > { %622 = vmatprep.subr.bf16.mxu0 %v2015_v3 }
  0x3f   : > { %623 = vmatpush1.bf16.xpose.msra.mxu0 %v594_v18 }
  0x40   : > { %624 = vmatprep.subr.bf16.mxu0 %v2015_v3 }
  0x47   : > { %625 = vmatpush1.bf16.xpose.msra.mxu0 %v597_v20 }
  0x48   : > { %626 = vmatprep.subr.bf16.mxu0 %v2015_v3 }
  0x4f   : > { %627 = vmatpush1.bf16.xpose.msra.mxu0 %v600_v27 }
  0x50   : > { %628 = vmatprep.subr.bf16.mxu0 %v2015_v3 }
  0x57   : > { %629 = vmatpush1.bf16.xpose.msra.mxu0 %v603_v29 }
  0x58   : > { %630 = vmatprep.subr.bf16.mxu0 %v2015_v3 }
  0x5f   : > { %631 = vmatpush1.bf16.xpose.msra.mxu0 %v606_v31 }
  0x9f   : > { %v445_v21 = vpop.xlane.xlu0 %444 }
  0xa0   : > { %v447_v22 = vmul.f32 0.015625, %v445_v21 }
  0xa2   : > { %v448_v23 = vsub.f32 %v2110_v0, %v447_v22 }
  0xa4   : > { %v449_v24 = vmul.f32 %v448_v23, %v448_v23 }
  0xa6   : > { %v450_v25 = vsel %vm442_vm0, %v449_v24, 0.0 }
  0xa7   : > { %451 = vadd.xlane.f32.xlu0 %v450_v25 }
 0x134   : > { %v452_v32 = vpop.xlane.xlu0 %451 }
 0x135   : > { %v453_v33 = vmul.f32 0.015625, %v452_v32  ;;  %v2025_v32 = vmov 65535  }
 0x137   : > { %v454_v34 = vadd.f32 1e-05, %v453_v33  ;;  %v993_v33 = vsel %vm991_vm7, 4294967295, %v2025_v32 }
 0x139   : > { %1979 = vrsqrt.f32 %v454_v34 }
 0x143   : > { %v1980_v35 = vpop.eup %1979 }
 0x144   : > { %v456_v37 = vmul.f32 %v1980_v35, %v448_v23  ;;  %v720_v23 = vld [vmem:[#allocation2 + $0xc] sm:$0x7]  ;;  %v2234_v35 = vsel %vm992_vm8, %v993_v33, 0 }
 0x145   : > { %v734_v33 = vld [vmem:[#allocation2 + $0x2c] sm:$0x7] }
 0x146   : > { %v463_v39 = vmul.f32 %v1738_v36, %v456_v37 }
 0x148   : > { %v470_v40 = vadd.f32 %v1739_v38, %v463_v39 }
 0x14a   : > { %v495_v41 = vpack.c.bf16 %v470_v40, %v470_v40 }
 0x14c   : > { %1752 = vmatmul.mubr.msk.bf16.vlgmr.msra.gmra.mrb[0].mxu0 %vm568_vm1, %v495_v41 }
 0x21f   : > { %v642_v49 = vpop.f32.mrb[0].mxu0 }
 0x220   : > { %v643_v50 = vadd.f32 %v642_v49, %v501_v47  ;;  %v644_v51 = vpop.f32.mrb[1].mxu0 }
 0x221   : > { %v645_v55 = vadd.f32 %v644_v51, %v505_v48  ;;  %v646_v56 = vpop.f32.mrb[2].mxu0 }
 0x222   : > { %v649_v57 = vpack.c.bf16 %v643_v50, %v643_v50  ;;  %v647_v59 = vpop.f32.mrb[3].mxu0 }
 0x223   : > { %v2188_v60 = vpack.c.bf16 %v645_v55, %v645_v55 }
 0x224   : > { %v655_v61 = vsel %vm2184_vm4, %v649_v57, %v654_v54  ;;  %671 = vrot.lane.b32.xlu0 %v649_v57, %s2017_s14  ;;  %660 = vrot.lane.b32.xlu1 %v649_v57, %s2018_s15  ;;  %s435_s15 = scalar_lea.vmem %s2445_s13, %s1737_s27 }
 0x225   : > { %656 = vst [vmem:[#allocation2] sm:$0x7] %v655_v61  ;;  %v669_v62 = vsel %vm2184_vm4, %v2188_v60, %v668_v58 }
 0x226   : > { %670 = vst [vmem:[#allocation2 + $0x20] sm:$0x7] %v669_v62 }
 0x228   : > { %678 = vrot.lane.b32.xlu1 %v649_v57, %s2020_s16 }
 0x22c   : > { %702 = vrot.lane.b32.xlu1 %v649_v57, %s2021_s17  ;;  %v737_v21 = vld [vmem:[#allocation2] sm:$0x7] }
 0x22d   : > { %v745_v34 = vld [vmem:[#allocation2 + $0x20] sm:$0x7] }
 0x22e   : > { %v996_v37 = vand.u32 %v2234_v35, %v745_v34 }
 0x230   : > { %695 = vrot.lane.b32.xlu1 %v649_v57, %s2022_s18 }
 0x234   : > { %723 = vrot.lane.b32.xlu1 %v649_v57, %s2023_s19 }
 0x238   : > { %716 = vrot.lane.b32.xlu1 %v649_v57, %s2024_s20 }
 0x296   : > { %v672_v2 = vpop.permute.xlu0 %671  ;;  %v661_v3 = vpop.permute.xlu1 %660 }
 0x297   : > { %v676_v4 = vsel %vm2184_vm4, %v672_v2, %v675_v63  ;;  %v665_v5 = vsel %vm2184_vm4, %v661_v3, %v664_v1 }
 0x298   : > { %677 = vst [vmem:[#allocation2 + $0x4] sm:$0x7] %v676_v4  ;;  %666 = vst [vmem:[#allocation2 + $0x10] sm:$0x7] %v665_v5 }
 0x29a   : > { %v679_v7 = vpop.permute.xlu1 %678 }
 0x29b   : > { %v683_v8 = vsel %vm2184_vm4, %v679_v7, %v682_v6 }
 0x29c   : > { %684 = vst [vmem:[#allocation2 + $0x14] sm:$0x7] %v683_v8 }
 0x29e   : > { %v703_v10 = vpop.permute.xlu1 %702 }
 0x29f   : > { %v707_v11 = vsel %vm2184_vm4, %v703_v10, %v706_v9  ;;  %v741_v12 = vld [vmem:[#allocation2 + $0x10] sm:$0x7]  ;;  %v738_v27 = vld [vmem:[#allocation2 + $0x4] sm:$0x7] }
 0x2a0   : > { %708 = vst [vmem:[#allocation2 + $0x18] sm:$0x7] %v707_v11  ;;  %v754_v13 = vsel %vm749_vm6, %v741_v12, 0 }
 0x2a1   : > { %1849 = vmatpush3.bf16.xpose.msra.mxu1 %v754_v13 }
 0x2a2   : > { %v696_v15 = vpop.permute.xlu1 %695  ;;  %1854 = vmatprep.subr.bf16.mxu1 %v2016_v52 }
 0x2a3   : > { %v700_v16 = vsel %vm2184_vm4, %v696_v15, %v699_v14  ;;  %v742_v18 = vld [vmem:[#allocation2 + $0x14] sm:$0x7] }
 0x2a4   : > { %701 = vst [vmem:[#allocation2 + $0x8] sm:$0x7] %v700_v16  ;;  %v800_v22 = vsel %vm749_vm6, %v742_v18, 0 }
 0x2a6   : > { %v724_v19 = vpop.permute.xlu1 %723 }
 0x2a7   : > { %v728_v20 = vsel %vm2184_vm4, %v724_v19, %v727_v17  ;;  %v743_v26 = vld [vmem:[#allocation2 + $0x18] sm:$0x7] }
 0x2a8   : > { %729 = vst [vmem:[#allocation2 + $0x1c] sm:$0x7] %v728_v20  ;;  %1851 = vmatmul.mubr.msk.bf16.vlgmr.msra.gmra.mrb[0].mxu1 %vm749_vm6, %v737_v21  ;;  %v846_v28 = vsel %vm749_vm6, %v743_v26, 0 }
 0x2a9   : > { %1855 = vmatpush3.bf16.xpose.msra.mxu1 %v800_v22  ;;  %1856 = vmatprep.mubr.msk.bf16.mxu1 %vm2019_vm5, %v2016_v52 }
 0x2aa   : > { %v717_v24 = vpop.permute.xlu1 %716  ;;  %1860 = vmatprep.subr.bf16.mxu1 %v2016_v52 }
 0x2ab   : > { %v721_v25 = vsel %vm2184_vm4, %v717_v24, %v720_v23  ;;  %v739_v30 = vld [vmem:[#allocation2 + $0x8] sm:$0x7] }
 0x2ac   : > { %722 = vst [vmem:[#allocation2 + $0xc] sm:$0x7] %v721_v25 }
 0x2af   : > { %v744_v29 = vld [vmem:[#allocation2 + $0x1c] sm:$0x7] }
 0x2b0   : > { %1857 = vmatmul.mubr.msk.bf16.vlgmr.msra.gmra.mrb[4].mxu1 %vm749_vm6, %v738_v27  ;;  %v892_v31 = vsel %vm749_vm6, %v744_v29, 0  ;;  %v692_v27 = vld [vmem:[#allocation2 + $0x24] sm:$0x7] }
 0x2b1   : > { %1861 = vmatpush3.bf16.xpose.msra.mxu1 %v846_v28  ;;  %1862 = vmatprep.mubr.msk.bf16.mxu1 %vm2019_vm5, %v2016_v52 }
 0x2b2   : > { %1866 = vmatprep.subr.bf16.mxu1 %v2016_v52 }
 0x2b3   : > { %v740_v36 = vld [vmem:[#allocation2 + $0xc] sm:$0x7] }
 0x2b8   : > { %1863 = vmatmul.mubr.msk.bf16.vlgmr.msra.gmra.mrb[8].mxu1 %vm749_vm6, %v739_v30 }
 0x2b9   : > { %1867 = vmatpush3.bf16.xpose.msra.mxu1 %v892_v31  ;;  %1868 = vmatprep.mubr.msk.bf16.mxu1 %vm2019_vm5, %v2016_v52 }
 0x2ba   : > { %1872 = vmatprep.subr.bf16.mxu1 %v2016_v52 }
 0x2c0   : > { %1869 = vmatmul.mubr.msk.bf16.vlgmr.msra.gmra.mrb[12].mxu1 %vm749_vm6, %v740_v36 }
 0x2c1   : > { %1873 = vmatpush3.bf16.msra.mxu1 %v996_v37  ;;  %1874 = vmatprep.mubr.msk.bf16.mxu1 %vm2019_vm5, %v2016_v52 }
 0x2c2   : > { %1878 = vmatprep.subr.bf16.mxu1 %v2016_v52 }
 0x37b   : > { %v790_v38 = vpop.f32.mrb[0].mxu1 }
 0x37c   : > { %v934_v39 = vmul.f32 0.25, %v790_v38  ;;  %v1852_v40 = vpop.f32.mrb[1].mxu1 }
 0x37d   : > { %v793_v41 = vpop.f32.mrb[2].mxu1 }
 0x37e   : > { %v1853_v42 = vpop.f32.mrb[3].mxu1  ;;  %v939_v45 = vsel %vm938_vm9, %v934_v39, -inf }
 0x37f   : > { %940 = vmax.xlane.f32.xlu1 %v939_v45  ;;  %v713_v45 = vld [vmem:[#allocation2 + $0x28] sm:$0x7] }
 0x383   : > { %v836_v47 = vpop.f32.mrb[4].mxu1 }
 0x384   : > { %v935_v48 = vmul.f32 0.25, %v836_v47  ;;  %v1858_v49 = vpop.f32.mrb[5].mxu1 }
 0x385   : > { %v839_v50 = vpop.f32.mrb[6].mxu1 }
 0x386   : > { %v1859_v51 = vpop.f32.mrb[7].mxu1  ;;  %v942_v54 = vsel %vm938_vm9, %v935_v48, -inf }
 0x387   : > { %943 = vmax.xlane.f32.xlu0 %v942_v54 }
 0x38b   : > { %v882_v55 = vpop.f32.mrb[8].mxu1 }
 0x38c   : > { %v936_v56 = vmul.f32 0.25, %v882_v55  ;;  %v1864_v57 = vpop.f32.mrb[9].mxu1 }
 0x38d   : > { %v885_v58 = vpop.f32.mrb[10].mxu1 }
 0x38e   : > { %v1865_v59 = vpop.f32.mrb[11].mxu1  ;;  %v945_v61 = vsel %vm938_vm9, %v936_v56, -inf }
 0x38f   : > { %946 = vmax.xlane.f32.xlu1 %v945_v61 }
 0x393   : > { %v928_v62 = vpop.f32.mrb[12].mxu1 }
 0x394   : > { %v937_v63 = vmul.f32 0.25, %v928_v62  ;;  %v1870_v1 = vpop.f32.mrb[13].mxu1 }
 0x395   : > { %v931_v2 = vpop.f32.mrb[14].mxu1 }
 0x396   : > { %v1871_v3 = vpop.f32.mrb[15].mxu1  ;;  %v948_v4 = vsel %vm938_vm9, %v937_v63, -inf }
 0x397   : > { %949 = vmax.xlane.f32.xlu0 %v948_v4 }
 0x40c   : > { %v941_v5 = vpop.xlane.xlu1 %940 }
 0x40d   : > { %v951_v6 = vsub.f32 %v934_v39, %v941_v5 }
 0x40f   : > { %v955_v7 = vmul.f32 1.442695, %v951_v6 }
 0x411   : > { %1981 = vpow2.f32 %v955_v7  ;;  %v1948_v7 = vld [vmem:[%s2439_s7 + $0x8] sm:$0xff]  }
 0x414   : > { %v944_v8 = vpop.xlane.xlu0 %943 }
 0x415   : > { %v952_v9 = vsub.f32 %v935_v48, %v944_v8  ;;  %v1252_v8 = vsel %vm568_vm1, %v1948_v7, 0 }
 0x417   : > { %v957_v10 = vmul.f32 1.442695, %v952_v9 }
 0x419   : > { %1983 = vpow2.f32 %v957_v10 }
 0x41b   : > { %v1982_v11 = vpop.eup %1981 }
 0x41c   : > { %v947_v12 = vpop.xlane.xlu1 %946  ;;  %v963_v13 = vsel %vm938_vm9, %v1982_v11, 0.0 }
 0x41d   : > { %v953_v14 = vsub.f32 %v936_v56, %v947_v12  ;;  %964 = vadd.xlane.f32.xlu1 %v963_v13  ;;  %v1949_v13 = vld [vmem:[%s2439_s7 + $0x10] sm:$0xff]  }
 0x41f   : > { %v959_v15 = vmul.f32 1.442695, %v953_v14  ;;  %v1255_v14 = vsel %vm568_vm1, %v1949_v13, 0 }
 0x421   : > { %1985 = vpow2.f32 %v959_v15  ;;  %v1950_v15 = vld [vmem:[%s2439_s7 + $0x18] sm:$0xff]  }
 0x423   : > { %v1984_v16 = vpop.eup %1983 }
 0x424   : > { %v950_v17 = vpop.xlane.xlu0 %949  ;;  %v966_v18 = vsel %vm938_vm9, %v1984_v16, 0.0 }
 0x425   : > { %v954_v19 = vsub.f32 %v937_v63, %v950_v17  ;;  %967 = vadd.xlane.f32.xlu0 %v966_v18  ;;  %v1177_v63 = vld [vmem:[#allocation3] sm:$0x7]  ;;  %v1258_v17 = vsel %vm568_vm1, %v1950_v15, 0 }
 0x427   : > { %v961_v20 = vmul.f32 1.442695, %v954_v19 }
 0x429   : > { %1987 = vpow2.f32 %v961_v20 }
 0x42b   : > { %v1986_v21 = vpop.eup %1985 }
 0x42c   : > { %v969_v22 = vsel %vm938_vm9, %v1986_v21, 0.0 }
 0x42d   : > { %970 = vadd.xlane.f32.xlu1 %v969_v22 }
 0x433   : > { %v1988_v23 = vpop.eup %1987 }
 0x434   : > { %v972_v24 = vsel %vm938_vm9, %v1988_v23, 0.0 }
 0x435   : > { %973 = vadd.xlane.f32.xlu1 %v972_v24 }
 0x43b   : > { %688 = vrot.lane.b32.xlu0 %v2188_v60, %s2017_s14 }
 0x43f   : > { %730 = vrot.lane.b32.xlu0 %v2188_v60, %s2024_s20 }
 0x446   : > { %709 = vrot.lane.b32.xlu1 %v2188_v60, %s2022_s18 }
 0x4aa   : > { %v965_v25 = vpop.xlane.xlu1 %964 }
 0x4ab   : > { %1989 = vrcp.f32 %v965_v25 }
 0x4b2   : > { %v968_v26 = vpop.xlane.xlu0 %967 }
 0x4b3   : > { %1991 = vrcp.f32 %v968_v26 }
 0x4b5   : > { %v1990_v28 = vpop.eup %1989 }
 0x4b6   : > { %v979_v29 = vmul.f32 %v1990_v28, %v1982_v11  ;;  %v689_v30 = vpop.permute.xlu0 %688 }
 0x4b7   : > { %v693_v31 = vsel %vm2184_vm4, %v689_v30, %v692_v27 }
 0x4b8   : > { %694 = vst [vmem:[#allocation2 + $0x24] sm:$0x7] %v693_v31  ;;  %v983_v32 = vpack.c.bf16 %v979_v29, %v979_v29 }
 0x4ba   : > { %1875 = vmatmul.mubr.msk.bf16.vlgmr.msra.gmra.mrb[16].mxu1 %vm987_vm10, %v983_v32  ;;  %v731_v34 = vpop.permute.xlu0 %730  ;;  %v971_v37 = vpop.xlane.xlu1 %970 }
 0x4bb   : > { %v735_v60 = vsel %vm2184_vm4, %v731_v34, %v734_v33  ;;  %1880 = vmatprep.mubr.msk.bf16.mxu1 %vm2019_vm5, %v2016_v52  ;;  %1993 = vrcp.f32 %v971_v37  ;;  %v1771_v37 = vld [vmem:[%s2440_s8] ss:$0 sm:$0xff] }
 0x4bc   : > { %736 = vst [vmem:[#allocation2 + $0x2c] sm:$0x7] %v735_v60 }
 0x4bd   : > { %v1992_v36 = vpop.eup %1991 }
 0x4be   : > { %v980_v38 = vmul.f32 %v1992_v36, %v1984_v16 }
 0x4bf   : > { %v746_v39 = vld [vmem:[#allocation2 + $0x24] sm:$0x7] }
 0x4c0   : > { %v1042_v40 = vand.u32 %v2234_v35, %v746_v39  ;;  %v984_v42 = vpack.c.bf16 %v980_v38, %v980_v38 }
 0x4c2   : > { %v974_v41 = vpop.xlane.xlu1 %973  ;;  %1879 = vmatpush3.bf16.msra.mxu1 %v1042_v40 }
 0x4c3   : > { %1884 = vmatprep.subr.bf16.mxu1 %v2016_v52  ;;  %1995 = vrcp.f32 %v974_v41  ;;  %v748_v55 = vld [vmem:[#allocation2 + $0x2c] sm:$0x7] }
 0x4c4   : > { %v1134_v58 = vand.u32 %v2234_v35, %v748_v55  ;;  %v1956_v55 = vld [vmem:[%s2441_s9 + $0x10] sm:$0xff]  }
 0x4c5   : > { %1881 = vmatmul.mubr.msk.bf16.vlgmr.msra.gmra.mrb[20].mxu1 %vm987_vm10, %v984_v42  ;;  %v1994_v49 = vpop.eup %1993 }
 0x4c6   : > { %v710_v47 = vpop.permute.xlu1 %709  ;;  %1886 = vmatprep.mubr.msk.bf16.mxu1 %vm2019_vm5, %v2016_v52  ;;  %v981_v50 = vmul.f32 %v1994_v49, %v1986_v21 }
 0x4c7   : > { %v714_v48 = vsel %vm2184_vm4, %v710_v47, %v713_v45  ;;  %v1951_v47 = vld [vmem:[%s2441_s9 + $0x40] sm:$0xff]  }
 0x4c8   : > { %715 = vst [vmem:[#allocation2 + $0x28] sm:$0x7] %v714_v48  ;;  %v985_v56 = vpack.c.bf16 %v981_v50, %v981_v50  ;;  %v1952_v48 = vld [vmem:[%s2441_s9] sm:$0xff]   ;;  %1908 = vmatprep.subr.msk.bf16.mxu0 %vm568_vm1, %v1951_v47  ;;  %v1954_v50 = vld [vmem:[%s2441_s9 + $0x8] sm:$0xff]  }
 0x4c9   : > { %v1467_v49 = vsel %vm568_vm1, %v1952_v48, 0 }
 0x4ca   : > { %1831 = vmatpush3.bf16.xpose.msra.mxu0 %v1467_v49 }
 0x4cd   : > { %v1996_v57 = vpop.eup %1995 }
 0x4ce   : > { %v982_v59 = vmul.f32 %v1996_v57, %v1988_v23  ;;  %v1957_v57 = vld [vmem:[%s2441_s9 + $0x58] sm:$0xff]  }
 0x4cf   : > { %v747_v51 = vld [vmem:[#allocation2 + $0x28] sm:$0x7] }
 0x4d0   : > { %v1088_v54 = vand.u32 %v2234_v35, %v747_v51  ;;  %v986_v61 = vpack.c.bf16 %v982_v59, %v982_v59  ;;  %v1947_v35 = vld [vmem:[%s2439_s7] sm:$0xff]   ;;  %v1470_v51 = vsel %vm568_vm1, %v1954_v50, 0 }
 0x4d1   : > { %v1249_v6 = vsel %vm568_vm1, %v1947_v35, 0 }
 0x4d2   : > { %1885 = vmatpush3.bf16.msra.mxu1 %v1088_v54  ;;  %v1955_v54 = vld [vmem:[%s2441_s9 + $0x50] sm:$0xff]  }
 0x4d3   : > { %1890 = vmatprep.subr.bf16.mxu1 %v2016_v52 }
 0x4d5   : > { %1887 = vmatmul.mubr.msk.bf16.vlgmr.msra.gmra.mrb[24].mxu1 %vm987_vm10, %v985_v56  ;;  %v1473_v56 = vsel %vm568_vm1, %v1956_v55, 0 }
 0x4d6   : > { %1891 = vmatpush3.bf16.msra.mxu1 %v1134_v58  ;;  %1892 = vmatprep.mubr.msk.bf16.mxu1 %vm2019_vm5, %v2016_v52  ;;  %v1958_v58 = vld [vmem:[%s2441_s9 + $0x18] sm:$0xff]  }
 0x4d7   : > { %1896 = vmatprep.subr.bf16.mxu1 %v2016_v52  ;;  %v1476_v59 = vsel %vm568_vm1, %v1958_v58, 0  ;;  %v1801_v58 = vld [vmem:[%s2444_s12] ss:$0 sm:$0xff] }
 0x4dd   : > { %1893 = vmatmul.mubr.msk.bf16.vlgmr.msra.gmra.mrb[28].mxu1 %vm987_vm10, %v986_v61  ;;  %v1959_v61 = vld [vmem:[%s2441_s9 + $0x60] sm:$0xff]  }
 0x4de   : > { %1904 = vmatprep.mubr.msk.bf16.mxu1 %vm2019_vm5, %v2016_v52 }
 0x4df   : > { %1897 = vmatpush3.bf16.xpose.msra.mxu1 %v1249_v6  ;;  %v1962_v6 = vld [vmem:[%s2441_s9 + $0x28] sm:$0xff]  }
 0x4e0   : > { %1898 = vmatprep.subr.bf16.mxu1 %v2016_v52  ;;  %v1482_v7 = vsel %vm568_vm1, %v1962_v6, 0 }
 0x4e7   : > { %1899 = vmatpush3.bf16.xpose.msra.mxu1 %v1252_v8  ;;  %v1963_v8 = vld [vmem:[%s2441_s9 + $0x70] sm:$0xff]  }
 0x4e8   : > { %1900 = vmatprep.subr.bf16.mxu1 %v2016_v52 }
 0x4ef   : > { %1901 = vmatpush3.bf16.xpose.msra.mxu1 %v1255_v14 }
 0x4f0   : > { %1902 = vmatprep.subr.bf16.mxu1 %v2016_v52 }
 0x4f7   : > { %1903 = vmatpush3.bf16.xpose.msra.mxu1 %v1258_v17  ;;  %v1772_v17 = vld [vmem:[%s2435_s3] ss:$0 sm:$0xff] }
 0x58d   : > { %v1032_v62 = vpop.f32.mrb[16].mxu1 }
 0x58e   : > { %v1176_v1 = vpack.c.bf16 %v1032_v62, %v1032_v62  ;;  %v1876_v2 = vpop.f32.mrb[17].mxu1  ;;  %v1960_v62 = vld [vmem:[%s2441_s9 + $0x20] sm:$0xff]  }
 0x58f   : > { %v1035_v3 = vpop.f32.mrb[18].mxu1 }
 0x590   : > { %v1178_v4 = vsel %vm2184_vm4, %v1176_v1, %v1177_v63  ;;  %v1877_v5 = vpop.f32.mrb[19].mxu1  ;;  %v1479_v63 = vsel %vm568_vm1, %v1960_v62, 0 }
 0x591   : > { %1179 = vst [vmem:[#allocation3] sm:$0x7] %v1178_v4  ;;  %v1961_v5 = vld [vmem:[%s2441_s9 + $0x68] sm:$0xff]  }
 0x598   : > { %v1078_v9 = vpop.f32.mrb[20].mxu1  ;;  %v1189_v26 = vld [vmem:[#allocation3] sm:$0x7] }
 0x599   : > { %v1806_v10 = vpack.c.bf16 %v1078_v9, %v1078_v9  ;;  %v1882_v11 = vpop.f32.mrb[21].mxu1  ;;  %v1964_v9 = vld [vmem:[%s2441_s9 + $0x30] sm:$0xff]  }
 0x59a   : > { %v1081_v12 = vpop.f32.mrb[22].mxu1  ;;  %v1965_v11 = vld [vmem:[%s2441_s9 + $0x78] sm:$0xff]  }
 0x59b   : > { %1184 = vrot.lane.b32.xlu1 %v1806_v10, %s2023_s19  ;;  %v1883_v53 = vpop.f32.mrb[23].mxu1  ;;  %v1485_v10 = vsel %vm568_vm1, %v1964_v9, 0  ;;  %v1966_v12 = vld [vmem:[%s2441_s9 + $0x38] sm:$0xff]  }
 0x59c   : > { %v1488_v53 = vsel %vm568_vm1, %v1966_v12, 0 }
 0x5a8   : > { %v1124_v16 = vpop.f32.mrb[24].mxu1 }
 0x5a9   : > { %v1807_v18 = vpack.c.bf16 %v1124_v16, %v1124_v16  ;;  %v1888_v19 = vpop.f32.mrb[25].mxu1 }
 0x5aa   : > { %v1127_v20 = vpop.f32.mrb[26].mxu1  ;;  %v1773_v19 = vld [vmem:[%s2436_s4] ss:$0 sm:$0xff] }
 0x5ab   : > { %1196 = vrot.lane.b32.xlu0 %v1807_v18, %s2021_s17  ;;  %v1889_v21 = vpop.f32.mrb[27].mxu1 }
 0x5b0   : > { %v1170_v22 = vpop.f32.mrb[28].mxu1 }
 0x5b1   : > { %v1808_v23 = vpack.c.bf16 %v1170_v22, %v1170_v22  ;;  %v1894_v24 = vpop.f32.mrb[29].mxu1 }
 0x5b2   : > { %v1173_v25 = vpop.f32.mrb[30].mxu1  ;;  %v1967_v24 = vld [vmem:[%s2443_s11] ss:$8 sps:$4 sm:$0xff]  }
 0x5b3   : > { %1208 = vrot.lane.b32.xlu1 %v1808_v23, %s2020_s16  ;;  %v1895_v52 = vpop.f32.mrb[31].mxu1  ;;  %v1969_v23 = vld [vmem:[%s2443_s11 + $0x4] ss:$8 sps:$4 sm:$0xff]   ;;  %v1972_v25 = vld [vmem:[%s2443_s11 + $0x14] ss:$8 sps:$4 sm:$0xff]  }
 0x5b4   : > { %1623 = vmatprep.subr.bf16.mxu1 %v1969_v23  ;;  %v1970_v52 = vld [vmem:[%s2443_s11 + $0x10] ss:$8 sps:$4 sm:$0xff]  }
 0x60d   : > { %v1185_v27 = vpop.permute.xlu1 %1184 }
 0x60e   : > { %v1190_v28 = vsel %vm1188_vm12, %v1185_v27, %v1189_v26  ;;  %v1975_v26 = vld [vmem:[%s2443_s11 + $0x24] ss:$8 sps:$4 sm:$0xff]   ;;  %v1973_v27 = vld [vmem:[%s2443_s11 + $0x20] ss:$8 sps:$4 sm:$0xff]  }
 0x60f   : > { %1191 = vst [vmem:[#allocation3] sm:$0x7] %v1190_v28  ;;  %v1978_v28 = vld [vmem:[%s2443_s11 + $0x34] ss:$8 sps:$4 sm:$0xff]  }
 0x616   : > { %v1201_v29 = vld [vmem:[#allocation3] sm:$0x7] }
 0x61d   : > { %v1197_v30 = vpop.permute.xlu0 %1196 }
 0x61e   : > { %v1202_v31 = vsel %vm1200_vm14, %v1197_v30, %v1201_v29  ;;  %v1976_v29 = vld [vmem:[%s2443_s11 + $0x30] ss:$8 sps:$4 sm:$0xff]   ;;  %v1371_v30 = vld [vmem:[%s2442_s10] sm:$0x3] }
 0x61f   : > { %1203 = vst [vmem:[#allocation3] sm:$0x7] %v1202_v31  ;;  %v1376_v31 = vrot.slane %v1371_v30, %v500_v44 }
 0x625   : > { %v1209_v32 = vpop.permute.xlu1 %1208 }
 0x626   : > { %v1213_v33 = vld [vmem:[#allocation3] sm:$0x7] }
 0x627   : > { %v1214_v34 = vsel %vm1212_vm2, %v1209_v32, %v1213_v33  ;;  %v1380_v32 = vrot.slane %v1371_v30, %v504_v46 }
 0x628   : > { %1215 = vst [vmem:[#allocation3] sm:$0x7] %v1214_v34 }
 0x62f   : > { %v1216_v60 = vld [vmem:[#allocation3] sm:$0x7] }
 0x630   : > { %1905 = vmatmul.mubr.msk.bf16.vlgmr.msra.gmra.mrb[32].mxu1 %vm568_vm1, %v1216_v60 }
 0x631   : > { %1624 = vmatpush1.bf16.xpose.msra.mxu1 %v1967_v24 }
 0x632   : > { %1625 = vmatprep.subr.bf16.mxu1 %v1972_v25 }
 0x639   : > { %1626 = vmatpush1.bf16.xpose.msra.mxu1 %v1970_v52 }
 0x63a   : > { %1627 = vmatprep.subr.bf16.mxu1 %v1975_v26 }
 0x641   : > { %1628 = vmatpush1.bf16.xpose.msra.mxu1 %v1973_v27 }
 0x642   : > { %1629 = vmatprep.subr.bf16.mxu1 %v1978_v28 }
 0x649   : > { %1630 = vmatpush1.bf16.xpose.msra.mxu1 %v1976_v29 }
 0x703   : > { %v1294_v36 = vpop.f32.mrb[32].mxu1 }
 0x704   : > { %v1300_v38 = vadd.f32 %v1294_v36, %v2110_v0  ;;  %v1906_v39 = vpop.f32.mrb[33].mxu1  ;;  %v1953_v0 = vld [vmem:[%s2441_s9 + $0x48] sm:$0xff]  }
 0x705   : > { %v1297_v40 = vpop.f32.mrb[34].mxu1  ;;  %1909 = vmatprep.subr.msk.bf16.mxu0 %vm568_vm1, %v1953_v0 }
 0x706   : > { %v2311_v41 = vadd.f32 %v1771_v37, %v1300_v38  ;;  %v1907_v42 = vpop.f32.mrb[35].mxu1  ;;  %1833 = vmatpush3.bf16.xpose.msra.mxu0 %v1470_v51 }
 0x707   : > { %1910 = vmatprep.subr.msk.bf16.mxu0 %vm568_vm1, %v1955_v54 }
 0x708   : > { %v1311_v45 = vsel %vm442_vm0, %v2311_v41, 0.0 }
 0x709   : > { %1312 = vadd.xlane.f32.xlu0 %v1311_v45 }
 0x70e   : > { %1835 = vmatpush3.bf16.xpose.msra.mxu0 %v1473_v56 }
 0x70f   : > { %1911 = vmatprep.subr.msk.bf16.mxu0 %vm568_vm1, %v1957_v57 }
 0x716   : > { %1837 = vmatpush3.bf16.xpose.msra.mxu0 %v1476_v59 }
 0x717   : > { %1912 = vmatprep.subr.msk.bf16.mxu0 %vm568_vm1, %v1959_v61 }
 0x71e   : > { %1839 = vmatpush3.bf16.xpose.msra.mxu0 %v1479_v63 }
 0x71f   : > { %1913 = vmatprep.subr.msk.bf16.mxu0 %vm568_vm1, %v1961_v5 }
 0x726   : > { %1841 = vmatpush3.bf16.xpose.msra.mxu0 %v1482_v7 }
 0x727   : > { %1914 = vmatprep.subr.msk.bf16.mxu0 %vm568_vm1, %v1963_v8 }
 0x72e   : > { %1843 = vmatpush3.bf16.xpose.msra.mxu0 %v1485_v10 }
 0x72f   : > { %1915 = vmatprep.subr.msk.bf16.mxu0 %vm568_vm1, %v1965_v11 }
 0x736   : > { %1845 = vmatpush3.bf16.xpose.msra.mxu0 %v1488_v53 }
 0x796   : > { %v1313_v1 = vpop.xlane.xlu0 %1312 }
 0x797   : > { %v1314_v2 = vmul.f32 0.015625, %v1313_v1 }
 0x799   : > { %v1315_v35 = vsub.f32 %v2311_v41, %v1314_v2  ;;  %v1675_v2 = vld [vmem:[%s435_s15] sm:$0x7] }
 0x79b   : > { %v1316_v3 = vmul.f32 %v1315_v35, %v1315_v35 }
 0x79d   : > { %v1317_v4 = vsel %vm442_vm0, %v1316_v3, 0.0  ;;  %vm1673_vm0 = vcmask 518144  }
 0x79e   : > { %1318 = vadd.xlane.f32.xlu1 %v1317_v4 }
 0x82b   : > { %v1319_v13 = vpop.xlane.xlu1 %1318 }
 0x82c   : > { %v1320_v14 = vmul.f32 0.015625, %v1319_v13 }
 0x82e   : > { %v1321_v15 = vadd.f32 1e-05, %v1320_v14 }
 0x830   : > { %1997 = vrsqrt.f32 %v1321_v15 }
 0x83a   : > { %v1998_v16 = vpop.eup %1997 }
 0x83b   : > { %v1323_v18 = vmul.f32 %v1998_v16, %v1315_v35 }
 0x83d   : > { %v1330_v20 = vmul.f32 %v1772_v17, %v1323_v18 }
 0x83f   : > { %v1337_v21 = vadd.f32 %v1773_v19, %v1330_v20 }
 0x841   : > { %v1370_v22 = vpack.c.bf16 %v1337_v21, %v1337_v21 }
 0x843   : > { %1846 = vmatprep.mubr.msk.bf16.mxu0 %vm568_vm1, %v1370_v22 }
 0x844   : > { %1847 = vmatmul.mubr.msk.bf16.vlgmr.msra.gmra.mrb[4].mxu0 %vm568_vm1, %v1370_v22  ;;  %vm1674_vm1 = vmand %vm1673_vm0, %vm652_vm3 }
 0x917   : > { %v1548_v33 = vpop.f32.mrb[4].mxu0 }
 0x918   : > { %v1549_v34 = vadd.f32 %v1548_v33, %v1376_v31  ;;  %v1550_v60 = vpop.f32.mrb[5].mxu0 }
 0x919   : > { %v1551_v36 = vadd.f32 %v1550_v60, %v1380_v32  ;;  %v1552_v37 = vpop.f32.mrb[6].mxu0 }
 0x91a   : > { %v1555_v38 = vpack.c.bf16 %v1549_v34, %v1549_v34  ;;  %v1553_v39 = vpop.f32.mrb[7].mxu0 }
 0x91b   : > { %v1556_v40 = vpack.c.bf16 %v1551_v36, %v1551_v36 }
 0x91c   : > { %v1791_v42 = vmul.bf16 3218784218, %v1555_v38 }
 0x91d   : > { %v1792_v45 = vmul.bf16 3218784218, %v1556_v40 }
 0x91e   : > { %v1562_v47 = vmul.bf16 1069105081, %v1791_v42 }
 0x91f   : > { %v1565_v48 = vmul.bf16 1069105081, %v1792_v45 }
 0x920   : > { %1999 = vpow.bf16 %v1562_v47 }
 0x921   : > { %2001 = vpow.bf16 %v1565_v48 }
 0x92b   : > { %v2000_v0 = vpop.eup %1999 }
 0x92c   : > { %v2002_v44 = vpop.eup %2001  ;;  %v1567_v49 = vadd.bf16 1065369472, %v2000_v0 }
 0x92d   : > { %v1568_v43 = vadd.bf16 1065369472, %v2002_v44 }
 0x92e   : > { %2003 = vrcp.bf16 %v1567_v49 }
 0x92f   : > { %2005 = vrcp.bf16 %v1568_v43 }
 0x939   : > { %v2004_v46 = vpop.eup %2003 }
 0x93a   : > { %v2006_v50 = vpop.eup %2005  ;;  %v1570_v51 = vmul.bf16 1065369472, %v2004_v46 }
 0x93b   : > { %v1572_v54 = vmul.bf16 1065369472, %v2006_v50 }
 0x93c   : > { %v1573_v56 = vmul.bf16 %v1570_v51, %v1555_v38 }
 0x93d   : > { %v1574_v55 = vmul.bf16 %v1572_v54, %v1556_v40 }
 0x93f   : > { %1655 = vmatprep.mubr.bf16.mxu1 %v1574_v55 }
 0x940   : > { %1656 = vmatmul.mubr.bf16.vlgmr.msra.gmra.mrb[36].mxu1 %v1573_v56 }
 0xa13   : > { %v1657_v57 = vpop.f32.mrb[36].mxu1 }
 0xa14   : > { %v1663_v59 = vadd.f32 %v1657_v57, %v2311_v41  ;;  %v1659_v61 = vpop.f32.mrb[37].mxu1 }
 0xa15   : > { %v1660_v62 = vpop.f32.mrb[38].mxu1 }
 0xa16   : > { %v1671_v63 = vadd.f32 %v1801_v58, %v1663_v59  ;;  %v1661_v1 = vpop.f32.mrb[39].mxu1 }
 0xa18   : > { %v1672_v35 = vpack.c.bf16 %v1671_v63, %v1671_v63 }
 0xa1a   : > { %v1676_v3 = vsel %vm1674_vm1, %v1672_v35, %v1675_v2 }
 0xa1b   : > { %1677 = vst [vmem:[%s435_s15] sm:$0x7] %v1676_v3 }
 0xa1c PF: > { %s23_s25 = sadd.s32 1, %s2013_s25  }
 0xa1d   : > { %p20_p4 = scmp.ge.s32.totalorder %s23_s25, 4  }
 0xa1f   :  { %22 = sbr.rel (!%p20_p4) target bundleno = 1 (0x1), region = 113 }

// kernel: class_incremental_clip_forward.17
= control target key start
LH: loop header
LB: loop body
LE: loop exit
PB: predicated region body
PF: predicated region fallthrough
CT: control target
= control target key end

     0   :  { %s2230_s3 = inlined_call_operand.vmem [shape: bf16[512,512], index: 3, kind: input, shape index: {}]   ;;  %s2231_s1 = inlined_call_operand.vmem [shape: f32[8,512], index: 1, kind: input, shape index: {}]   ;;  %s2232_s2 = inlined_call_operand.vmem [shape: bf16[128,512], index: 2, kind: input, shape index: {}]   ;;  %s2233_s5 = inlined_call_operand.vmem [shape: f32[8,512], index: 5, kind: output, shape index: {1}]   ;;  %s2234_s0 = inlined_call_operand.<no memory space> [shape: f32[1,1], index: 0, kind: input, shape index: {}]   ;;  %s2235_s4 = inlined_call_operand.vmem [shape: f32[8,128], index: 4, kind: output, shape index: {0}]  }
   0x1   :  { %v1448_v0 = vld [vmem:[%s2230_s3 + $0x4] ss:$16 sps:$4 sm:$0xff]   ;;  %v1452_v2 = vld [vmem:[%s2230_s3] ss:$16 sps:$4 sm:$0xff]   ;;  %v26_v26 = vld [vmem:[%s2231_s1 + $0x8] sm:$0xff] }
   0x2   :  { %v1450_v1 = vld [vmem:[%s2230_s3 + $0x204] ss:$16 sps:$4 sm:$0xff]   ;;  %801 = vmatprep.subr.bf16.mxu0 %v1448_v0  ;;  %v1453_v3 = vld [vmem:[%s2230_s3 + $0x200] ss:$16 sps:$4 sm:$0xff]   ;;  %v30_v27 = vpack.c.bf16 %v26_v26, %v26_v26  ;;  %v1576_v26 = vld [vmem:[%s2230_s3 + $0xac] ss:$16 sps:$4 sm:$0xff]  }
   0x3   :  { %883 = vmatprep.subr.bf16.mxu1 %v1450_v1  ;;  %v1454_v4 = vld [vmem:[%s2230_s3 + $0x24] ss:$16 sps:$4 sm:$0xff]   ;;  %802 = vmatpush1.bf16.xpose.msra.mxu0 %v1452_v2  ;;  %v1458_v6 = vld [vmem:[%s2230_s3 + $0x20] ss:$16 sps:$4 sm:$0xff]   ;;  %v1546_v2 = vld [vmem:[%s2230_s3 + $0xc] ss:$16 sps:$4 sm:$0xff]  }
   0x4   :  { %884 = vmatpush1.bf16.xpose.msra.mxu1 %v1453_v3  ;;  %v1456_v5 = vld [vmem:[%s2230_s3 + $0x224] ss:$16 sps:$4 sm:$0xff]   ;;  %803 = vmatprep.subr.bf16.mxu0 %v1454_v4  ;;  %v1459_v7 = vld [vmem:[%s2230_s3 + $0x220] ss:$16 sps:$4 sm:$0xff]   ;;  %v1549_v3 = vld [vmem:[%s2230_s3 + $0x20c] ss:$16 sps:$4 sm:$0xff]  }
   0x5   :  { %885 = vmatprep.subr.bf16.mxu1 %v1456_v5  ;;  %v1460_v8 = vld [vmem:[%s2230_s3 + $0x44] ss:$16 sps:$4 sm:$0xff]   ;;  %v1464_v10 = vld [vmem:[%s2230_s3 + $0x40] ss:$16 sps:$4 sm:$0xff]   ;;  %833 = vmatprep.mubr.bf16.mxu0 %v30_v27 }
   0x6   :  { %v1462_v9 = vld [vmem:[%s2230_s3 + $0x244] ss:$16 sps:$4 sm:$0xff]   ;;  %v1465_v11 = vld [vmem:[%s2230_s3 + $0x240] ss:$16 sps:$4 sm:$0xff]   ;;  %915 = vmatprep.mubr.bf16.mxu1 %v30_v27  ;;  %v1579_v27 = vld [vmem:[%s2230_s3 + $0x2ac] ss:$16 sps:$4 sm:$0xff]  }
   0x7   :  { %v1466_v12 = vld [vmem:[%s2230_s3 + $0x64] ss:$16 sps:$4 sm:$0xff]   ;;  %v1470_v14 = vld [vmem:[%s2230_s3 + $0x60] ss:$16 sps:$4 sm:$0xff]  }
   0x8   :  { %v1468_v13 = vld [vmem:[%s2230_s3 + $0x264] ss:$16 sps:$4 sm:$0xff]   ;;  %v1471_v15 = vld [vmem:[%s2230_s3 + $0x260] ss:$16 sps:$4 sm:$0xff]  }
   0x9   :  { %v1472_v16 = vld [vmem:[%s2230_s3 + $0x84] ss:$16 sps:$4 sm:$0xff]   ;;  %v1476_v18 = vld [vmem:[%s2230_s3 + $0x80] ss:$16 sps:$4 sm:$0xff]  }
   0xa   :  { %v1474_v17 = vld [vmem:[%s2230_s3 + $0x284] ss:$16 sps:$4 sm:$0xff]   ;;  %v1477_v19 = vld [vmem:[%s2230_s3 + $0x280] ss:$16 sps:$4 sm:$0xff]  }
   0xb   :  { %804 = vmatpush1.bf16.xpose.msra.mxu0 %v1458_v6  ;;  %v1478_v20 = vld [vmem:[%s2230_s3 + $0xa4] ss:$16 sps:$4 sm:$0xff]   ;;  %v1482_v22 = vld [vmem:[%s2230_s3 + $0xa0] ss:$16 sps:$4 sm:$0xff]   ;;  %v28_v6 = vld [vmem:[%s2231_s1 + $0x18] sm:$0xff] }
   0xc   :  { %886 = vmatpush1.bf16.xpose.msra.mxu1 %v1459_v7  ;;  %805 = vmatprep.subr.bf16.mxu0 %v1460_v8  ;;  %v1480_v21 = vld [vmem:[%s2230_s3 + $0x2a4] ss:$16 sps:$4 sm:$0xff]   ;;  %v1483_v23 = vld [vmem:[%s2230_s3 + $0x2a0] ss:$16 sps:$4 sm:$0xff]   ;;  %v1544_v7 = vld [vmem:[%s2230_s3 + $0x8] ss:$16 sps:$4 sm:$0xff]  }
   0xd   :  { %887 = vmatprep.subr.bf16.mxu1 %v1462_v9  ;;  %v1484_v24 = vld [vmem:[%s2230_s3 + $0xc4] ss:$16 sps:$4 sm:$0xff]   ;;  %v1488_v28 = vld [vmem:[%s2230_s3 + $0xc0] ss:$16 sps:$4 sm:$0xff]   ;;  %v1547_v8 = vld [vmem:[%s2230_s3 + $0x208] ss:$16 sps:$4 sm:$0xff]  }
   0xe   :  { %v1486_v25 = vld [vmem:[%s2230_s3 + $0x2c4] ss:$16 sps:$4 sm:$0xff]   ;;  %v1489_v29 = vld [vmem:[%s2230_s3 + $0x2c0] ss:$16 sps:$4 sm:$0xff]   ;;  %v1552_v9 = vld [vmem:[%s2230_s3 + $0x2c] ss:$16 sps:$4 sm:$0xff]  }
   0xf   :  { %v1490_v30 = vld [vmem:[%s2230_s3 + $0xe4] ss:$16 sps:$4 sm:$0xff]   ;;  %v1494_v32 = vld [vmem:[%s2230_s3 + $0xe0] ss:$16 sps:$4 sm:$0xff]  }
  0x10   :  { %v1492_v31 = vld [vmem:[%s2230_s3 + $0x2e4] ss:$16 sps:$4 sm:$0xff]   ;;  %v1495_v33 = vld [vmem:[%s2230_s3 + $0x2e0] ss:$16 sps:$4 sm:$0xff]  }
  0x11   :  { %v1496_v34 = vld [vmem:[%s2230_s3 + $0x104] ss:$16 sps:$4 sm:$0xff]   ;;  %v1500_v36 = vld [vmem:[%s2230_s3 + $0x100] ss:$16 sps:$4 sm:$0xff]  }
  0x12   :  { %v1498_v35 = vld [vmem:[%s2230_s3 + $0x304] ss:$16 sps:$4 sm:$0xff]   ;;  %v1501_v37 = vld [vmem:[%s2230_s3 + $0x300] ss:$16 sps:$4 sm:$0xff]  }
  0x13   :  { %806 = vmatpush1.bf16.xpose.msra.mxu0 %v1464_v10  ;;  %v1502_v38 = vld [vmem:[%s2230_s3 + $0x124] ss:$16 sps:$4 sm:$0xff]   ;;  %v1506_v40 = vld [vmem:[%s2230_s3 + $0x120] ss:$16 sps:$4 sm:$0xff]   ;;  %v1555_v10 = vld [vmem:[%s2230_s3 + $0x22c] ss:$16 sps:$4 sm:$0xff]  }
  0x14   :  { %888 = vmatpush1.bf16.xpose.msra.mxu1 %v1465_v11  ;;  %807 = vmatprep.subr.bf16.mxu0 %v1466_v12  ;;  %v1504_v39 = vld [vmem:[%s2230_s3 + $0x324] ss:$16 sps:$4 sm:$0xff]   ;;  %v1507_v41 = vld [vmem:[%s2230_s3 + $0x320] ss:$16 sps:$4 sm:$0xff]   ;;  %v32_v11 = vpack.c.bf16 %v28_v6, %v28_v6  ;;  %v1550_v12 = vld [vmem:[%s2230_s3 + $0x28] ss:$16 sps:$4 sm:$0xff]  }
  0x15   :  { %889 = vmatprep.subr.bf16.mxu1 %v1468_v13  ;;  %v1508_v42 = vld [vmem:[%s2230_s3 + $0x144] ss:$16 sps:$4 sm:$0xff]   ;;  %v1512_v44 = vld [vmem:[%s2230_s3 + $0x140] ss:$16 sps:$4 sm:$0xff]   ;;  %v1553_v13 = vld [vmem:[%s2230_s3 + $0x228] ss:$16 sps:$4 sm:$0xff]  }
  0x16   :  { %v1510_v43 = vld [vmem:[%s2230_s3 + $0x344] ss:$16 sps:$4 sm:$0xff]   ;;  %v1513_v45 = vld [vmem:[%s2230_s3 + $0x340] ss:$16 sps:$4 sm:$0xff]  }
  0x17   :  { %v1514_v46 = vld [vmem:[%s2230_s3 + $0x164] ss:$16 sps:$4 sm:$0xff]   ;;  %v1518_v48 = vld [vmem:[%s2230_s3 + $0x160] ss:$16 sps:$4 sm:$0xff]  }
  0x18   :  { %v1516_v47 = vld [vmem:[%s2230_s3 + $0x364] ss:$16 sps:$4 sm:$0xff]   ;;  %v1519_v49 = vld [vmem:[%s2230_s3 + $0x360] ss:$16 sps:$4 sm:$0xff]  }
  0x19   :  { %v1520_v50 = vld [vmem:[%s2230_s3 + $0x184] ss:$16 sps:$4 sm:$0xff]   ;;  %v1524_v52 = vld [vmem:[%s2230_s3 + $0x180] ss:$16 sps:$4 sm:$0xff]  }
  0x1a   :  { %v1522_v51 = vld [vmem:[%s2230_s3 + $0x384] ss:$16 sps:$4 sm:$0xff]   ;;  %v1525_v53 = vld [vmem:[%s2230_s3 + $0x380] ss:$16 sps:$4 sm:$0xff]  }
  0x1b   :  { %808 = vmatpush1.bf16.xpose.msra.mxu0 %v1470_v14  ;;  %v1526_v54 = vld [vmem:[%s2230_s3 + $0x1a4] ss:$16 sps:$4 sm:$0xff]   ;;  %v1530_v56 = vld [vmem:[%s2230_s3 + $0x1a0] ss:$16 sps:$4 sm:$0xff]   ;;  %v1558_v14 = vld [vmem:[%s2230_s3 + $0x4c] ss:$16 sps:$4 sm:$0xff]  }
  0x1c   :  { %890 = vmatpush1.bf16.xpose.msra.mxu1 %v1471_v15  ;;  %809 = vmatprep.subr.bf16.mxu0 %v1472_v16  ;;  %v1528_v55 = vld [vmem:[%s2230_s3 + $0x3a4] ss:$16 sps:$4 sm:$0xff]   ;;  %v1531_v57 = vld [vmem:[%s2230_s3 + $0x3a0] ss:$16 sps:$4 sm:$0xff]   ;;  %v1561_v15 = vld [vmem:[%s2230_s3 + $0x24c] ss:$16 sps:$4 sm:$0xff]  }
  0x1d   :  { %891 = vmatprep.subr.bf16.mxu1 %v1474_v17  ;;  %v1532_v58 = vld [vmem:[%s2230_s3 + $0x1c4] ss:$16 sps:$4 sm:$0xff]   ;;  %v1536_v60 = vld [vmem:[%s2230_s3 + $0x1c0] ss:$16 sps:$4 sm:$0xff]   ;;  %v1556_v16 = vld [vmem:[%s2230_s3 + $0x48] ss:$16 sps:$4 sm:$0xff]  }
  0x1e   :  { %v1534_v59 = vld [vmem:[%s2230_s3 + $0x3c4] ss:$16 sps:$4 sm:$0xff]   ;;  %v1537_v61 = vld [vmem:[%s2230_s3 + $0x3c0] ss:$16 sps:$4 sm:$0xff]   ;;  %v1559_v17 = vld [vmem:[%s2230_s3 + $0x248] ss:$16 sps:$4 sm:$0xff]  }
  0x1f   :  { %v1538_v62 = vld [vmem:[%s2230_s3 + $0x1e4] ss:$16 sps:$4 sm:$0xff]   ;;  %v1542_v0 = vld [vmem:[%s2230_s3 + $0x1e0] ss:$16 sps:$4 sm:$0xff]  }
  0x20   :  { %v1540_v63 = vld [vmem:[%s2230_s3 + $0x3e4] ss:$16 sps:$4 sm:$0xff]   ;;  %v1543_v1 = vld [vmem:[%s2230_s3 + $0x3e0] ss:$16 sps:$4 sm:$0xff]  }
  0x21   :  { %v25_v4 = vld [vmem:[%s2231_s1] sm:$0xff]  ;;  %v27_v6 = vld [vmem:[%s2231_s1 + $0x10] sm:$0xff] }
  0x22   :  { %v29_v5 = vpack.c.bf16 %v25_v4, %v25_v4  ;;  %v1634_v4 = vld [vmem:[%s2230_s3 + $0x1e8] ss:$16 sps:$4 sm:$0xff]  }
  0x23   :  { %810 = vmatpush1.bf16.xpose.msra.mxu0 %v1476_v18  ;;  %v1564_v18 = vld [vmem:[%s2230_s3 + $0x6c] ss:$16 sps:$4 sm:$0xff]  }
  0x24   :  { %892 = vmatpush1.bf16.xpose.msra.mxu1 %v1477_v19  ;;  %811 = vmatprep.subr.bf16.mxu0 %v1478_v20  ;;  %v1567_v19 = vld [vmem:[%s2230_s3 + $0x26c] ss:$16 sps:$4 sm:$0xff]   ;;  %v1562_v20 = vld [vmem:[%s2230_s3 + $0x68] ss:$16 sps:$4 sm:$0xff]  }
  0x25   :  { %893 = vmatprep.subr.bf16.mxu1 %v1480_v21  ;;  %v1565_v21 = vld [vmem:[%s2230_s3 + $0x268] ss:$16 sps:$4 sm:$0xff]  }
  0x2b   :  { %812 = vmatpush1.bf16.xpose.msra.mxu0 %v1482_v22  ;;  %v1570_v22 = vld [vmem:[%s2230_s3 + $0x8c] ss:$16 sps:$4 sm:$0xff]  }
  0x2c   :  { %894 = vmatpush1.bf16.xpose.msra.mxu1 %v1483_v23  ;;  %813 = vmatprep.subr.bf16.mxu0 %v1484_v24  ;;  %v1573_v23 = vld [vmem:[%s2230_s3 + $0x28c] ss:$16 sps:$4 sm:$0xff]   ;;  %v1568_v24 = vld [vmem:[%s2230_s3 + $0x88] ss:$16 sps:$4 sm:$0xff]  }
  0x2d   :  { %895 = vmatprep.subr.bf16.mxu1 %v1486_v25  ;;  %v1571_v25 = vld [vmem:[%s2230_s3 + $0x288] ss:$16 sps:$4 sm:$0xff]  }
  0x33   :  { %814 = vmatpush1.bf16.xpose.msra.mxu0 %v1488_v28  ;;  %v1574_v28 = vld [vmem:[%s2230_s3 + $0xa8] ss:$16 sps:$4 sm:$0xff]  }
  0x34   :  { %896 = vmatpush1.bf16.xpose.msra.mxu1 %v1489_v29  ;;  %815 = vmatprep.subr.bf16.mxu0 %v1490_v30  ;;  %v1577_v29 = vld [vmem:[%s2230_s3 + $0x2a8] ss:$16 sps:$4 sm:$0xff]   ;;  %v1582_v30 = vld [vmem:[%s2230_s3 + $0xcc] ss:$16 sps:$4 sm:$0xff]  }
  0x35   :  { %897 = vmatprep.subr.bf16.mxu1 %v1492_v31  ;;  %v1585_v31 = vld [vmem:[%s2230_s3 + $0x2cc] ss:$16 sps:$4 sm:$0xff]  }
  0x3b   :  { %816 = vmatpush1.bf16.xpose.msra.mxu0 %v1494_v32  ;;  %v1580_v32 = vld [vmem:[%s2230_s3 + $0xc8] ss:$16 sps:$4 sm:$0xff]  }
  0x3c   :  { %898 = vmatpush1.bf16.xpose.msra.mxu1 %v1495_v33  ;;  %817 = vmatprep.subr.bf16.mxu0 %v1496_v34  ;;  %v1583_v33 = vld [vmem:[%s2230_s3 + $0x2c8] ss:$16 sps:$4 sm:$0xff]   ;;  %v1588_v34 = vld [vmem:[%s2230_s3 + $0xec] ss:$16 sps:$4 sm:$0xff]  }
  0x3d   :  { %899 = vmatprep.subr.bf16.mxu1 %v1498_v35  ;;  %v1591_v35 = vld [vmem:[%s2230_s3 + $0x2ec] ss:$16 sps:$4 sm:$0xff]  }
  0x43   :  { %818 = vmatpush1.bf16.xpose.msra.mxu0 %v1500_v36  ;;  %v1586_v36 = vld [vmem:[%s2230_s3 + $0xe8] ss:$16 sps:$4 sm:$0xff]  }
  0x44   :  { %900 = vmatpush1.bf16.xpose.msra.mxu1 %v1501_v37  ;;  %819 = vmatprep.subr.bf16.mxu0 %v1502_v38  ;;  %v1589_v37 = vld [vmem:[%s2230_s3 + $0x2e8] ss:$16 sps:$4 sm:$0xff]   ;;  %v1594_v38 = vld [vmem:[%s2230_s3 + $0x10c] ss:$16 sps:$4 sm:$0xff]  }
  0x45   :  { %901 = vmatprep.subr.bf16.mxu1 %v1504_v39  ;;  %v1597_v39 = vld [vmem:[%s2230_s3 + $0x30c] ss:$16 sps:$4 sm:$0xff]  }
  0x4b   :  { %820 = vmatpush1.bf16.xpose.msra.mxu0 %v1506_v40  ;;  %v1592_v40 = vld [vmem:[%s2230_s3 + $0x108] ss:$16 sps:$4 sm:$0xff]  }
  0x4c   :  { %902 = vmatpush1.bf16.xpose.msra.mxu1 %v1507_v41  ;;  %821 = vmatprep.subr.bf16.mxu0 %v1508_v42  ;;  %v1595_v41 = vld [vmem:[%s2230_s3 + $0x308] ss:$16 sps:$4 sm:$0xff]   ;;  %v1600_v42 = vld [vmem:[%s2230_s3 + $0x12c] ss:$16 sps:$4 sm:$0xff]  }
  0x4d   :  { %903 = vmatprep.subr.bf16.mxu1 %v1510_v43  ;;  %v1603_v43 = vld [vmem:[%s2230_s3 + $0x32c] ss:$16 sps:$4 sm:$0xff]  }
  0x53   :  { %822 = vmatpush1.bf16.xpose.msra.mxu0 %v1512_v44  ;;  %v1598_v44 = vld [vmem:[%s2230_s3 + $0x128] ss:$16 sps:$4 sm:$0xff]  }
  0x54   :  { %904 = vmatpush1.bf16.xpose.msra.mxu1 %v1513_v45  ;;  %823 = vmatprep.subr.bf16.mxu0 %v1514_v46  ;;  %v1601_v45 = vld [vmem:[%s2230_s3 + $0x328] ss:$16 sps:$4 sm:$0xff]   ;;  %v1606_v46 = vld [vmem:[%s2230_s3 + $0x14c] ss:$16 sps:$4 sm:$0xff]  }
  0x55   :  { %905 = vmatprep.subr.bf16.mxu1 %v1516_v47  ;;  %v1609_v47 = vld [vmem:[%s2230_s3 + $0x34c] ss:$16 sps:$4 sm:$0xff]  }
  0x5b   :  { %824 = vmatpush1.bf16.xpose.msra.mxu0 %v1518_v48  ;;  %v1604_v48 = vld [vmem:[%s2230_s3 + $0x148] ss:$16 sps:$4 sm:$0xff]  }
  0x5c   :  { %906 = vmatpush1.bf16.xpose.msra.mxu1 %v1519_v49  ;;  %825 = vmatprep.subr.bf16.mxu0 %v1520_v50  ;;  %v1607_v49 = vld [vmem:[%s2230_s3 + $0x348] ss:$16 sps:$4 sm:$0xff]   ;;  %v1612_v50 = vld [vmem:[%s2230_s3 + $0x16c] ss:$16 sps:$4 sm:$0xff]  }
  0x5d   :  { %907 = vmatprep.subr.bf16.mxu1 %v1522_v51  ;;  %v1615_v51 = vld [vmem:[%s2230_s3 + $0x36c] ss:$16 sps:$4 sm:$0xff]  }
  0x63   :  { %826 = vmatpush1.bf16.xpose.msra.mxu0 %v1524_v52  ;;  %v1610_v52 = vld [vmem:[%s2230_s3 + $0x168] ss:$16 sps:$4 sm:$0xff]  }
  0x64   :  { %908 = vmatpush1.bf16.xpose.msra.mxu1 %v1525_v53  ;;  %827 = vmatprep.subr.bf16.mxu0 %v1526_v54  ;;  %v1613_v53 = vld [vmem:[%s2230_s3 + $0x368] ss:$16 sps:$4 sm:$0xff]   ;;  %v1618_v54 = vld [vmem:[%s2230_s3 + $0x18c] ss:$16 sps:$4 sm:$0xff]  }
  0x65   :  { %909 = vmatprep.subr.bf16.mxu1 %v1528_v55  ;;  %v1621_v55 = vld [vmem:[%s2230_s3 + $0x38c] ss:$16 sps:$4 sm:$0xff]  }
  0x6b   :  { %828 = vmatpush1.bf16.xpose.msra.mxu0 %v1530_v56  ;;  %v1616_v56 = vld [vmem:[%s2230_s3 + $0x188] ss:$16 sps:$4 sm:$0xff]  }
  0x6c   :  { %910 = vmatpush1.bf16.xpose.msra.mxu1 %v1531_v57  ;;  %829 = vmatprep.subr.bf16.mxu0 %v1532_v58  ;;  %v1619_v57 = vld [vmem:[%s2230_s3 + $0x388] ss:$16 sps:$4 sm:$0xff]   ;;  %v1624_v58 = vld [vmem:[%s2230_s3 + $0x1ac] ss:$16 sps:$4 sm:$0xff]  }
  0x6d   :  { %911 = vmatprep.subr.bf16.mxu1 %v1534_v59  ;;  %v1627_v59 = vld [vmem:[%s2230_s3 + $0x3ac] ss:$16 sps:$4 sm:$0xff]  }
  0x73   :  { %830 = vmatpush1.bf16.xpose.msra.mxu0 %v1536_v60  ;;  %v1622_v60 = vld [vmem:[%s2230_s3 + $0x1a8] ss:$16 sps:$4 sm:$0xff]  }
  0x74   :  { %912 = vmatpush1.bf16.xpose.msra.mxu1 %v1537_v61  ;;  %831 = vmatprep.subr.bf16.mxu0 %v1538_v62  ;;  %v1625_v61 = vld [vmem:[%s2230_s3 + $0x3a8] ss:$16 sps:$4 sm:$0xff]   ;;  %v1630_v62 = vld [vmem:[%s2230_s3 + $0x1cc] ss:$16 sps:$4 sm:$0xff]  }
  0x75   :  { %913 = vmatprep.subr.bf16.mxu1 %v1540_v63  ;;  %v1633_v63 = vld [vmem:[%s2230_s3 + $0x3cc] ss:$16 sps:$4 sm:$0xff]  }
  0x7b   :  { %832 = vmatpush1.bf16.xpose.msra.mxu0 %v1542_v0  ;;  %v1628_v0 = vld [vmem:[%s2230_s3 + $0x1c8] ss:$16 sps:$4 sm:$0xff]  }
  0x7c   :  { %914 = vmatpush1.bf16.xpose.msra.mxu1 %v1543_v1  ;;  %842 = vmatprep.subr.bf16.mxu0 %v1546_v2  ;;  %v1631_v1 = vld [vmem:[%s2230_s3 + $0x3c8] ss:$16 sps:$4 sm:$0xff]   ;;  %v1636_v2 = vld [vmem:[%s2230_s3 + $0x1ec] ss:$16 sps:$4 sm:$0xff]  }
  0x7d   :  { %924 = vmatprep.subr.bf16.mxu1 %v1549_v3  ;;  %v1639_v3 = vld [vmem:[%s2230_s3 + $0x3ec] ss:$16 sps:$4 sm:$0xff]  }
  0x82   :  { %834 = vmatmul.mubr.bf16.vlgmr.msra.gmra.mrb[0].mxu0 %v29_v5 }
  0x83   :  { %916 = vmatmul.mubr.bf16.vlgmr.msra.gmra.mrb[0].mxu1 %v29_v5  ;;  %843 = vmatpush1.bf16.xpose.msra.mxu0 %v1544_v7  ;;  %v1637_v5 = vld [vmem:[%s2230_s3 + $0x3e8] ss:$16 sps:$4 sm:$0xff]   ;;  %v31_v7 = vpack.c.bf16 %v27_v6, %v27_v6 }
  0x84   :  { %925 = vmatpush1.bf16.xpose.msra.mxu1 %v1547_v8  ;;  %844 = vmatprep.subr.bf16.mxu0 %v1552_v9  ;;  %v1640_v8 = vld [vmem:[%s2232_s2] ss:$16 sps:$4 sm:$0xff]   ;;  %v1642_v9 = vld [vmem:[%s2232_s2 + $0x4] ss:$16 sps:$4 sm:$0xff]  }
  0x85   :  { %926 = vmatprep.subr.bf16.mxu1 %v1555_v10  ;;  %874 = vmatprep.mubr.bf16.mxu0 %v32_v11  ;;  %v1643_v10 = vld [vmem:[%s2232_s2 + $0x8] ss:$16 sps:$4 sm:$0xff]  }
  0x86   :  { %956 = vmatprep.mubr.bf16.mxu1 %v32_v11  ;;  %v1645_v11 = vld [vmem:[%s2232_s2 + $0xc] ss:$16 sps:$4 sm:$0xff]  }
  0x8b   :  { %845 = vmatpush1.bf16.xpose.msra.mxu0 %v1550_v12  ;;  %v1648_v12 = vld [vmem:[%s2232_s2 + $0x24] ss:$16 sps:$4 sm:$0xff]  }
  0x8c   :  { %927 = vmatpush1.bf16.xpose.msra.mxu1 %v1553_v13  ;;  %846 = vmatprep.subr.bf16.mxu0 %v1558_v14  ;;  %v1651_v13 = vld [vmem:[%s2232_s2 + $0x2c] ss:$16 sps:$4 sm:$0xff]   ;;  %v1646_v14 = vld [vmem:[%s2232_s2 + $0x20] ss:$16 sps:$4 sm:$0xff]  }
  0x8d   :  { %928 = vmatprep.subr.bf16.mxu1 %v1561_v15  ;;  %v1649_v15 = vld [vmem:[%s2232_s2 + $0x28] ss:$16 sps:$4 sm:$0xff]  }
  0x93   :  { %847 = vmatpush1.bf16.xpose.msra.mxu0 %v1556_v16  ;;  %v1654_v16 = vld [vmem:[%s2232_s2 + $0x44] ss:$16 sps:$4 sm:$0xff]  }
  0x94   :  { %929 = vmatpush1.bf16.xpose.msra.mxu1 %v1559_v17  ;;  %848 = vmatprep.subr.bf16.mxu0 %v1564_v18  ;;  %v1657_v17 = vld [vmem:[%s2232_s2 + $0x4c] ss:$16 sps:$4 sm:$0xff]   ;;  %v1652_v18 = vld [vmem:[%s2232_s2 + $0x40] ss:$16 sps:$4 sm:$0xff]  }
  0x95   :  { %930 = vmatprep.subr.bf16.mxu1 %v1567_v19  ;;  %v1655_v19 = vld [vmem:[%s2232_s2 + $0x48] ss:$16 sps:$4 sm:$0xff]  }
  0x9b   :  { %849 = vmatpush1.bf16.xpose.msra.mxu0 %v1562_v20  ;;  %v1660_v20 = vld [vmem:[%s2232_s2 + $0x64] ss:$16 sps:$4 sm:$0xff]  }
  0x9c   :  { %931 = vmatpush1.bf16.xpose.msra.mxu1 %v1565_v21  ;;  %850 = vmatprep.subr.bf16.mxu0 %v1570_v22  ;;  %v1663_v21 = vld [vmem:[%s2232_s2 + $0x6c] ss:$16 sps:$4 sm:$0xff]   ;;  %v1658_v22 = vld [vmem:[%s2232_s2 + $0x60] ss:$16 sps:$4 sm:$0xff]  }
  0x9d   :  { %932 = vmatprep.subr.bf16.mxu1 %v1573_v23  ;;  %v1661_v23 = vld [vmem:[%s2232_s2 + $0x68] ss:$16 sps:$4 sm:$0xff]  }
  0xa3   :  { %851 = vmatpush1.bf16.xpose.msra.mxu0 %v1568_v24  ;;  %v1666_v24 = vld [vmem:[%s2232_s2 + $0x84] ss:$16 sps:$4 sm:$0xff]  }
  0xa4   :  { %933 = vmatpush1.bf16.xpose.msra.mxu1 %v1571_v25  ;;  %852 = vmatprep.subr.bf16.mxu0 %v1576_v26  ;;  %v1669_v25 = vld [vmem:[%s2232_s2 + $0x8c] ss:$16 sps:$4 sm:$0xff]   ;;  %v1664_v26 = vld [vmem:[%s2232_s2 + $0x80] ss:$16 sps:$4 sm:$0xff]  }
  0xa5   :  { %934 = vmatprep.subr.bf16.mxu1 %v1579_v27  ;;  %v1667_v27 = vld [vmem:[%s2232_s2 + $0x88] ss:$16 sps:$4 sm:$0xff]  }
  0xab   :  { %853 = vmatpush1.bf16.xpose.msra.mxu0 %v1574_v28  ;;  %v1672_v28 = vld [vmem:[%s2232_s2 + $0xa4] ss:$16 sps:$4 sm:$0xff]  }
  0xac   :  { %935 = vmatpush1.bf16.xpose.msra.mxu1 %v1577_v29  ;;  %854 = vmatprep.subr.bf16.mxu0 %v1582_v30  ;;  %v1675_v29 = vld [vmem:[%s2232_s2 + $0xac] ss:$16 sps:$4 sm:$0xff]   ;;  %v1670_v30 = vld [vmem:[%s2232_s2 + $0xa0] ss:$16 sps:$4 sm:$0xff]  }
  0xad   :  { %936 = vmatprep.subr.bf16.mxu1 %v1585_v31  ;;  %v1673_v31 = vld [vmem:[%s2232_s2 + $0xa8] ss:$16 sps:$4 sm:$0xff]  }
  0xb3   :  { %855 = vmatpush1.bf16.xpose.msra.mxu0 %v1580_v32 }
  0xb4   :  { %937 = vmatpush1.bf16.xpose.msra.mxu1 %v1583_v33  ;;  %856 = vmatprep.subr.bf16.mxu0 %v1588_v34 }
  0xb5   :  { %938 = vmatprep.subr.bf16.mxu1 %v1591_v35 }
  0xbb   :  { %857 = vmatpush1.bf16.xpose.msra.mxu0 %v1586_v36 }
  0xbc   :  { %939 = vmatpush1.bf16.xpose.msra.mxu1 %v1589_v37  ;;  %858 = vmatprep.subr.bf16.mxu0 %v1594_v38 }
  0xbd   :  { %940 = vmatprep.subr.bf16.mxu1 %v1597_v39 }
  0xc3   :  { %859 = vmatpush1.bf16.xpose.msra.mxu0 %v1592_v40 }
  0xc4   :  { %941 = vmatpush1.bf16.xpose.msra.mxu1 %v1595_v41  ;;  %860 = vmatprep.subr.bf16.mxu0 %v1600_v42 }
  0xc5   :  { %942 = vmatprep.subr.bf16.mxu1 %v1603_v43 }
  0xcb   :  { %861 = vmatpush1.bf16.xpose.msra.mxu0 %v1598_v44 }
  0xcc   :  { %943 = vmatpush1.bf16.xpose.msra.mxu1 %v1601_v45  ;;  %862 = vmatprep.subr.bf16.mxu0 %v1606_v46 }
  0xcd   :  { %944 = vmatprep.subr.bf16.mxu1 %v1609_v47  ;;  %v1678_v47 = vld [vmem:[%s2232_s2 + $0xc4] ss:$16 sps:$4 sm:$0xff]  }
  0xd3   :  { %863 = vmatpush1.bf16.xpose.msra.mxu0 %v1604_v48  ;;  %v1681_v48 = vld [vmem:[%s2232_s2 + $0xcc] ss:$16 sps:$4 sm:$0xff]  }
  0xd4   :  { %945 = vmatpush1.bf16.xpose.msra.mxu1 %v1607_v49  ;;  %864 = vmatprep.subr.bf16.mxu0 %v1612_v50  ;;  %v1676_v49 = vld [vmem:[%s2232_s2 + $0xc0] ss:$16 sps:$4 sm:$0xff]   ;;  %v1679_v50 = vld [vmem:[%s2232_s2 + $0xc8] ss:$16 sps:$4 sm:$0xff]  }
  0xd5   :  { %946 = vmatprep.subr.bf16.mxu1 %v1615_v51  ;;  %v1684_v51 = vld [vmem:[%s2232_s2 + $0xe4] ss:$16 sps:$4 sm:$0xff]  }
  0xdb   :  { %865 = vmatpush1.bf16.xpose.msra.mxu0 %v1610_v52  ;;  %v1687_v52 = vld [vmem:[%s2232_s2 + $0xec] ss:$16 sps:$4 sm:$0xff]  }
  0xdc   :  { %947 = vmatpush1.bf16.xpose.msra.mxu1 %v1613_v53  ;;  %866 = vmatprep.subr.bf16.mxu0 %v1618_v54  ;;  %v1682_v53 = vld [vmem:[%s2232_s2 + $0xe0] ss:$16 sps:$4 sm:$0xff]   ;;  %v1685_v54 = vld [vmem:[%s2232_s2 + $0xe8] ss:$16 sps:$4 sm:$0xff]  }
  0xdd   :  { %948 = vmatprep.subr.bf16.mxu1 %v1621_v55 }
  0xe3   :  { %867 = vmatpush1.bf16.xpose.msra.mxu0 %v1616_v56 }
  0xe4   :  { %949 = vmatpush1.bf16.xpose.msra.mxu1 %v1619_v57  ;;  %868 = vmatprep.subr.bf16.mxu0 %v1624_v58 }
  0xe5   :  { %950 = vmatprep.subr.bf16.mxu1 %v1627_v59 }
  0xeb   :  { %869 = vmatpush1.bf16.xpose.msra.mxu0 %v1622_v60 }
  0xec   :  { %951 = vmatpush1.bf16.xpose.msra.mxu1 %v1625_v61  ;;  %870 = vmatprep.subr.bf16.mxu0 %v1630_v62 }
  0xed   :  { %952 = vmatprep.subr.bf16.mxu1 %v1633_v63 }
  0xf3   :  { %871 = vmatpush1.bf16.xpose.msra.mxu0 %v1628_v0 }
  0xf4   :  { %953 = vmatpush1.bf16.xpose.msra.mxu1 %v1631_v1  ;;  %872 = vmatprep.subr.bf16.mxu0 %v1636_v2 }
  0xf5   :  { %954 = vmatprep.subr.bf16.mxu1 %v1639_v3  ;;  %v1268_v3 = vstv %s2234_s0 }
  0xfb   :  { %873 = vmatpush1.bf16.xpose.msra.mxu0 %v1634_v4 }
  0xfc   :  { %955 = vmatpush1.bf16.xpose.msra.mxu1 %v1637_v5  ;;  %1227 = vmatprep.subr.bf16.mxu0 %v1645_v11 }
  0xfd   :  { %1187 = vmatprep.subr.bf16.mxu1 %v1642_v9 }
 0x102   :  { %875 = vmatmul.mubr.bf16.vlgmr.msra.gmra.mrb[0].mxu0 %v31_v7 }
 0x103   :  { %957 = vmatmul.mubr.bf16.vlgmr.msra.gmra.mrb[0].mxu1 %v31_v7  ;;  %1228 = vmatpush1.bf16.xpose.msra.mxu0 %v1643_v10 }
 0x104   :  { %1188 = vmatpush1.bf16.xpose.msra.mxu1 %v1640_v8  ;;  %1229 = vmatprep.subr.bf16.mxu0 %v1651_v13 }
 0x105   :  { %1189 = vmatprep.subr.bf16.mxu1 %v1648_v12 }
 0x10b   :  { %1230 = vmatpush1.bf16.xpose.msra.mxu0 %v1649_v15 }
 0x10c   :  { %1190 = vmatpush1.bf16.xpose.msra.mxu1 %v1646_v14  ;;  %1231 = vmatprep.subr.bf16.mxu0 %v1657_v17 }
 0x10d   :  { %1191 = vmatprep.subr.bf16.mxu1 %v1654_v16 }
 0x113   :  { %1232 = vmatpush1.bf16.xpose.msra.mxu0 %v1655_v19 }
 0x114   :  { %1192 = vmatpush1.bf16.xpose.msra.mxu1 %v1652_v18  ;;  %1233 = vmatprep.subr.bf16.mxu0 %v1663_v21 }
 0x115   :  { %1193 = vmatprep.subr.bf16.mxu1 %v1660_v20 }
 0x11b   :  { %1234 = vmatpush1.bf16.xpose.msra.mxu0 %v1661_v23 }
 0x11c   :  { %1194 = vmatpush1.bf16.xpose.msra.mxu1 %v1658_v22  ;;  %1235 = vmatprep.subr.bf16.mxu0 %v1669_v25 }
 0x11d   :  { %1195 = vmatprep.subr.bf16.mxu1 %v1666_v24 }
 0x123   :  { %1236 = vmatpush1.bf16.xpose.msra.mxu0 %v1667_v27 }
 0x124   :  { %1196 = vmatpush1.bf16.xpose.msra.mxu1 %v1664_v26  ;;  %1237 = vmatprep.subr.bf16.mxu0 %v1675_v29 }
 0x125   :  { %1197 = vmatprep.subr.bf16.mxu1 %v1672_v28 }
 0x12b   :  { %1238 = vmatpush1.bf16.xpose.msra.mxu0 %v1673_v31 }
 0x12c   :  { %1198 = vmatpush1.bf16.xpose.msra.mxu1 %v1670_v30  ;;  %1239 = vmatprep.subr.bf16.mxu0 %v1681_v48 }
 0x12d   :  { %1199 = vmatprep.subr.bf16.mxu1 %v1678_v47 }
 0x133   :  { %1240 = vmatpush1.bf16.xpose.msra.mxu0 %v1679_v50 }
 0x134   :  { %1200 = vmatpush1.bf16.xpose.msra.mxu1 %v1676_v49  ;;  %1241 = vmatprep.subr.bf16.mxu0 %v1687_v52 }
 0x135   :  { %1201 = vmatprep.subr.bf16.mxu1 %v1684_v51 }
 0x13b   :  { %1242 = vmatpush1.bf16.xpose.msra.mxu0 %v1685_v54 }
 0x13c   :  { %1202 = vmatpush1.bf16.xpose.msra.mxu1 %v1682_v53 }
 0x1d5   :  { %v876_v32 = vpop.f32.mrb[0].mxu0 }
 0x1d6   :  { %v958_v33 = vpop.f32.mrb[0].mxu1  ;;  %v965_v34 = vmul.f32 %v876_v32, %v876_v32  ;;  %v878_v35 = vpop.f32.mrb[1].mxu0 }
 0x1d7   :  { %v960_v36 = vpop.f32.mrb[1].mxu1  ;;  %v966_v37 = vmul.f32 %v878_v35, %v878_v35  ;;  %v880_v38 = vpop.f32.mrb[2].mxu0  ;;  %v967_v42 = vmul.f32 %v958_v33, %v958_v33 }
 0x1d8   :  { %v962_v39 = vpop.f32.mrb[2].mxu1  ;;  %v881_v40 = vpop.f32.mrb[3].mxu0  ;;  %v968_v44 = vmul.f32 %v960_v36, %v960_v36 }
 0x1d9   :  { %v963_v41 = vpop.f32.mrb[3].mxu1  ;;  %v969_v43 = vadd.f32 %v966_v37, %v965_v34 }
 0x1db   :  { %v970_v45 = vadd.f32 %v969_v43, %v967_v42 }
 0x1dd   :  { %v971_v46 = vadd.f32 %v970_v45, %v968_v44 }
 0x1df   :  { %972 = vadd.xlane.f32.xlu0 %v971_v46 }
 0x26c   :  { %v973_v55 = vpop.xlane.xlu0 %972 }
 0x26d   :  { %1688 = vrsqrt.f32 %v973_v55 }
 0x277   :  { %v1689_v56 = vpop.eup %1688 }
 0x278   :  { %v976_v57 = vmul.f32 %v1689_v56, %v878_v35  ;;  %v978_v58 = vmul.f32 %v1689_v56, %v960_v36  ;;  %v975_v59 = vmul.f32 %v1689_v56, %v876_v32  ;;  %v977_v60 = vmul.f32 %v1689_v56, %v958_v33 }
 0x27a   :  { %984 = vst [vmem:[%s2233_s5 + $0x8] sm:$0xff] %v976_v57  ;;  %v992_v61 = vpack.c.bf16 %v976_v57, %v976_v57  ;;  %986 = vst [vmem:[%s2233_s5 + $0x18] sm:$0xff] %v978_v58  ;;  %v994_v62 = vpack.c.bf16 %v978_v58, %v978_v58  ;;  %v991_v63 = vpack.c.bf16 %v975_v59, %v975_v59 }
 0x27b   :  { %983 = vst [vmem:[%s2233_s5] sm:$0xff] %v975_v59  ;;  %985 = vst [vmem:[%s2233_s5 + $0x10] sm:$0xff] %v977_v60  ;;  %v993_v0 = vpack.c.bf16 %v977_v60, %v977_v60 }
 0x27c   :  { %1219 = vmatprep.mubr.bf16.mxu1 %v992_v61  ;;  %1259 = vmatprep.mubr.bf16.mxu0 %v994_v62 }
 0x27d   :  { %1220 = vmatmul.mubr.bf16.vlgmr.msra.gmra.mrb[4].mxu1 %v991_v63  ;;  %1260 = vmatmul.mubr.bf16.vlgmr.msra.gmra.mrb[4].mxu0 %v993_v0 }
 0x350   :  { %v1221_v1 = vpop.f32.mrb[4].mxu1  ;;  %v1261_v2 = vpop.f32.mrb[4].mxu0 }
 0x351   :  { %v1262_v4 = vadd.f32 %v1261_v2, %v1221_v1  ;;  %v1223_v5 = vpop.f32.mrb[5].mxu1  ;;  %v1263_v6 = vpop.f32.mrb[5].mxu0 }
 0x352   :  { %v1224_v7 = vpop.f32.mrb[6].mxu1  ;;  %v1264_v8 = vpop.f32.mrb[6].mxu0 }
 0x353   :  { %v1269_v9 = vmul.f32 %v1268_v3, %v1262_v4  ;;  %v1225_v10 = vpop.f32.mrb[7].mxu1  ;;  %v1265_v11 = vpop.f32.mrb[7].mxu0 }
 0x355   :  { %1270 = vst [vmem:[%s2235_s4] sm:$0xff] %v1269_v9 }

</bundles_post_ra>
